<compile_context>
chip_gen: v7x
topology: tpu7x:2x2x1
jax: 0.10.0
libtpu: 0.0.40
codegen_flags: <defaults>
</compile_context>

<pallas_src>
import functools
import math

import jax
import jax.numpy as jnp
import numpy as np
from jax.experimental import pallas as pl
from jax.experimental.pallas import tpu as pltpu


def _round_up(x, m):
    return (x + m - 1) // m * m


# Safe on v5e (128 MiB phys / 16 MiB default scoped), v6e (128/32) and
# v7x (64/32).  Worst-case resident block set here is ~8 MiB (bf16 conv4).
_VMEM_LIMIT = 32 * 1024 * 1024


# ---------------------------------------------------------------------------
# Fused Conv2d (+ InstanceNorm2d) + LeakyReLU(0.2) block
#   single K step GEMM -> epilogue entirely in VMEM, one grid step per image
# ---------------------------------------------------------------------------
def _conv_block_kernel(x_ref, w_ref, b_ref, o_ref, *, normalize, eps, slope):
    # x_ref: (1, OHW, Kp) bf16  -- im2col rows of ONE batch element
    # w_ref: (Kp, N)      bf16  -- pre-reshaped / pre-padded weight
    # b_ref: (1, N)       f32
    # o_ref: (1, OHW, N)  bf16
    y = jnp.dot(x_ref[0], w_ref[...], preferred_element_type=jnp.float32)
    y = y + b_ref[...]
    if normalize:
        # InstanceNorm2d (affine=False, biased variance, eps=1e-5): reduce over
        # the H*W rows of this single batch element; channels live on lanes.
        m = jnp.mean(y, axis=0, keepdims=True)
        c = y - m
        v = jnp.mean(c * c, axis=0, keepdims=True)
        y = c * jax.lax.rsqrt(v + eps)
    y = jnp.where(y >= 0.0, y, slope * y)               # LeakyReLU(0.2)
    o_ref[0] = y.astype(o_ref.dtype)


def conv_block(x_nhwc, w_mat, b_row, *, normalize, ksize=4, stride=2,
               pad=((1, 1), (1, 1))):
    """Fused Conv2d(ksize, stride, pad) [+ InstanceNorm2d] + LeakyReLU(0.2).

    x_nhwc: (B, H, W, C) bf16, w_mat: (Kp, N) bf16, b_row: (1, N) f32.
    Returns (B, OH, OW, N) bf16.
    """
    B = x_nhwc.shape[0]
    Kp, N = w_mat.shape

    # im2col as a single XLA op.  Output feature order is (cin, kh, kw),
    # matching the (cin, kh, kw)-ordered rows of w_mat (see prepare_params).
    patches = jax.lax.conv_general_dilated_patches(
        x_nhwc, (ksize, ksize), (stride, stride), list(pad),
        dimension_numbers=("NHWC", "HWIO", "NHWC"))
    _, OH, OW, K = patches.shape
    OHW = OH * OW
    x3 = patches.reshape(B, OHW, K)
    if K != Kp:                                          # only conv1: 96 -> 128
        x3 = jnp.pad(x3, ((0, 0), (0, 0), (0, Kp - K)))

    out = pl.pallas_call(
        functools.partial(_conv_block_kernel, normalize=normalize,
                          eps=1e-5, slope=0.2),
        out_shape=jax.ShapeDtypeStruct((B, OHW, N), jnp.bfloat16),
        grid=(B,),
        in_specs=[
            pl.BlockSpec((1, OHW, Kp), lambda b: (b, 0, 0)),
            pl.BlockSpec((Kp, N), lambda b: (0, 0)),     # revisited: one DMA
            pl.BlockSpec((1, N), lambda b: (0, 0)),
        ],
        out_specs=pl.BlockSpec((1, OHW, N), lambda b: (b, 0, 0)),
        compiler_params=pltpu.CompilerParams(
            dimension_semantics=("parallel",),           # 2 TCs on v7x
            vmem_limit_bytes=_VMEM_LIMIT),
    )(x3, w_mat, b_row)
    return out.reshape(B, OH, OW, N)


# ---------------------------------------------------------------------------
# Final Conv2d(512, 1, 4, stride=1, bias=False) + Sigmoid
#   N=1 output: VPU multiply + lane reduction (no 128-lane weight padding)
# ---------------------------------------------------------------------------
def _final_conv_kernel(x_ref, w_ref, o_ref):
    # x_ref: (M, K) bf16, w_ref: (1, K) bf16, o_ref: (M, 1) f32
    x = x_ref[...].astype(jnp.float32)
    w = w_ref[...].astype(jnp.float32)
    y = jnp.sum(x * w, axis=1, keepdims=True)            # VPU mul + XLU reduce
    o_ref[...] = jax.nn.sigmoid(y)


def final_conv_sigmoid(x_nhwc, w_row):
    """ZeroPad2d((1,0,1,0)) + Conv2d(512,1,4,pad=1,bias=False) + Sigmoid.

    The asymmetric ZeroPad2d is folded into the patch padding:
    (top, bottom) = (1+1, 0+1), (left, right) = (1+1, 0+1).
    """
    B = x_nhwc.shape[0]
    patches = jax.lax.conv_general_dilated_patches(
        x_nhwc, (4, 4), (1, 1), [(2, 1), (2, 1)],
        dimension_numbers=("NHWC", "HWIO", "NHWC"))
    _, OH, OW, K = patches.shape
    M = B * OH * OW
    x2 = patches.reshape(M, K)

    out = pl.pallas_call(
        _final_conv_kernel,
        out_shape=jax.ShapeDtypeStruct((M, 1), jnp.float32),
        grid=(1,),
        in_specs=[pl.BlockSpec((M, K), lambda i: (0, 0)),
                  pl.BlockSpec((1, K), lambda i: (0, 0))],
        out_specs=pl.BlockSpec((M, 1), lambda i: (0, 0)),
        compiler_params=pltpu.CompilerParams(
            dimension_semantics=("arbitrary",),
            vmem_limit_bytes=_VMEM_LIMIT),
    )(x2, w_row)
    return out.reshape(B, OH, OW, 1)


# ---------------------------------------------------------------------------
# One-time parameter preparation (outside the jitted forward)
# ---------------------------------------------------------------------------
def prepare_params(raw):
    """Reshape / pad / cast conv weights once.

    Weight matrices are stored as (Kp, Cout) bf16 with rows ordered
    (cin, kh, kw) to match conv_general_dilated_patches, and K padded to a
    multiple of 128 (only conv1: 96 -> 128).  Biases are (1, Cout) f32.
    The final conv weight is a (1, K) bf16 row (no lane padding).
    """
    def prep_w(w_hwio):
        KH, KW, Cin, Cout = w_hwio.shape
        w = jnp.transpose(w_hwio, (2, 0, 1, 3)).reshape(Cin * KH * KW, Cout)
        Kp = _round_up(w.shape[0], 128)
        if Kp != w.shape[0]:
            w = jnp.pad(w, ((0, Kp - w.shape[0]), (0, 0)))
        return w.astype(jnp.bfloat16)

    p = {}
    for i in (1, 2, 3, 4):
        p[f"w{i}"] = prep_w(raw[f"w{i}"])
        p[f"b{i}"] = raw[f"b{i}"].reshape(1, -1).astype(jnp.float32)
    p["w5"] = (jnp.transpose(raw["w5"], (2, 0, 1, 3))
               .reshape(1, -1).astype(jnp.bfloat16))
    return p


# ---------------------------------------------------------------------------
# Discriminator forward (matches the PyTorch module)
# ---------------------------------------------------------------------------
@jax.jit
def discriminator_forward(params, img_A, img_B):
    # NCHW inputs (PyTorch convention) -> NHWC bf16 internally.
    x = jnp.concatenate([img_A, img_B], axis=1)
    x = jnp.transpose(x, (0, 2, 3, 1)).astype(jnp.bfloat16)

    x = conv_block(x, params["w1"], params["b1"], normalize=False)  # (B,16,16, 64)
    x = conv_block(x, params["w2"], params["b2"], normalize=True)   # (B, 8, 8,128)
    x = conv_block(x, params["w3"], params["b3"], normalize=True)   # (B, 4, 4,256)
    x = conv_block(x, params["w4"], params["b4"], normalize=True)   # (B, 2, 2,512)
    y = final_conv_sigmoid(x, params["w5"])                          # (B, 2, 2, 1)
    return jnp.transpose(y, (0, 3, 1, 2))                            # back to NCHW


# ---------------------------------------------------------------------------
# Pure-JAX f32 reference (correctness check only)
# ---------------------------------------------------------------------------
def reference_forward(raw, img_A, img_B):
    x = jnp.concatenate([img_A, img_B], axis=1)
    x = jnp.transpose(x, (0, 2, 3, 1))

    def conv(x, w, b, stride, pad):
        y = jax.lax.conv_general_dilated(
            x, w, (stride, stride), [(pad, pad), (pad, pad)],
            dimension_numbers=("NHWC", "HWIO", "NHWC"))
        return y + b

    def inorm(x):
        m = jnp.mean(x, axis=(1, 2), keepdims=True)
        v = jnp.mean((x - m) ** 2, axis=(1, 2), keepdims=True)
        return (x - m) * jax.lax.rsqrt(v + 1e-5)

    def lrelu(x):
        return jnp.where(x >= 0, x, 0.2 * x)

    x = lrelu(conv(x, raw["w1"], raw["b1"], 2, 1))
    x = lrelu(inorm(conv(x, raw["w2"], raw["b2"], 2, 1)))
    x = lrelu(inorm(conv(x, raw["w3"], raw["b3"], 2, 1)))
    x = lrelu(inorm(conv(x, raw["w4"], raw["b4"], 2, 1)))
    x = jnp.pad(x, ((0, 0), (1, 0), (1, 0), (0, 0)))     # ZeroPad2d((1,0,1,0))
    x = jax.nn.sigmoid(conv(x, raw["w5"], 0.0, 1, 1))
    return jnp.transpose(x, (0, 3, 1, 2))


# ---------------------------------------------------------------------------
if __name__ == "__main__":
    key = jax.random.PRNGKey(0)
    B, Cin, H, W = 2, 3, 32, 32                          # img_A/img_B: (2, 3, 32, 32)

    def init_conv(k, cin, cout):
        kw, kb = jax.random.split(k)
        scale = 1.0 / math.sqrt(cin * 4 * 4)
        w = jax.random.uniform(kw, (4, 4, cin, cout), jnp.float32, -scale, scale)
        b = jax.random.uniform(kb, (cout,), jnp.float32, -scale, scale)
        return w, b

    keys = jax.random.split(key, 8)
    raw = {}
    raw["w1"], raw["b1"] = init_conv(keys[0], 2 * Cin, 64)
    raw["w2"], raw["b2"] = init_conv(keys[1], 64, 128)
    raw["w3"], raw["b3"] = init_conv(keys[2], 128, 256)
    raw["w4"], raw["b4"] = init_conv(keys[3], 256, 512)
    raw["w5"], _ = init_conv(keys[4], 512, 1)            # final conv has no bias

    params = prepare_params(raw)                         # one-time, outside jit

    img_A = jax.random.normal(keys[5], (B, Cin, H, W), jnp.float32)
    img_B = jax.random.normal(keys[6], (B, Cin, H, W), jnp.float32)

    out = discriminator_forward(params, img_A, img_B)
    out = jax.block_until_ready(out)

    ref = reference_forward(raw, img_A, img_B)
    # bf16 GEMM inputs vs f32 reference -> looser (but still meaningful) tolerance
    np.testing.assert_allclose(np.asarray(out), np.asarray(ref),
                               rtol=2e-2, atol=2e-2)
    assert out.shape == (B, 1, 2, 2), out.shape

    print("KERNEL_OK")
</pallas_src>

<mosaic_0001>
module attributes {stable_mosaic.version = 11 : i64} {
  func.func @_conv_block_kernel(%arg0: i32, %arg1: memref<1x256x128xbf16, #tpu.memory_space<vmem>>, %arg2: memref<128x64xbf16, #tpu.memory_space<vmem>>, %arg3: memref<1x64xf32, #tpu.memory_space<vmem>>, %arg4: memref<1x256x64xbf16, #tpu.memory_space<vmem>>) attributes {dimension_semantics = [#tpu.dimension_semantics<parallel>], iteration_bounds = array<i64: 2>, scalar_prefetch = 0 : i64, scratch_operands = 0 : i64, tpu.core_type = #tpu.core_type<tc>, window_params = [{transform_indices = @transform_0, window_bounds = array<i64: 1, 256, 128>}, {pipeline_mode = #tpu.pipeline_mode<synchronous>, transform_indices = @transform_1, window_bounds = array<i64: 128, 64>}, {pipeline_mode = #tpu.pipeline_mode<synchronous>, transform_indices = @transform_2, window_bounds = array<i64: 1, 64>}, {transform_indices = @transform_3, window_bounds = array<i64: 1, 256, 64>}]} {
    %c0 = arith.constant 0 : index
    %c0_0 = arith.constant 0 : index
    %c0_1 = arith.constant 0 : index
    %0 = vector.load %arg1[%c0, %c0_0, %c0_1] : memref<1x256x128xbf16, #tpu.memory_space<vmem>>, vector<1x256x128xbf16>
    %1 = vector.shape_cast %0 : vector<1x256x128xbf16> to vector<256x128xbf16>
    %c0_2 = arith.constant 0 : index
    %c0_3 = arith.constant 0 : index
    %2 = vector.load %arg2[%c0_2, %c0_3] : memref<128x64xbf16, #tpu.memory_space<vmem>>, vector<128x64xbf16>
    %cst = arith.constant dense<0.000000e+00> : vector<256x64xf32>
    %3 = tpu.matmul %1, %2, %cst {dimension_numbers = #tpu.dot_dimension_numbers<[1], [0], [0], [1], [0, 0, 1, 1], [], []>} : vector<256x128xbf16>, vector<128x64xbf16>, vector<256x64xf32> -> vector<256x64xf32>
    %c0_4 = arith.constant 0 : index
    %c0_5 = arith.constant 0 : index
    %4 = vector.load %arg3[%c0_4, %c0_5] : memref<1x64xf32, #tpu.memory_space<vmem>>, vector<1x64xf32>
    %5 = vector.broadcast %4 : vector<1x64xf32> to vector<256x64xf32>
    %6 = arith.addf %3, %5 : vector<256x64xf32>
    %cst_6 = arith.constant 0.000000e+00 : f32
    %7 = vector.broadcast %cst_6 : f32 to vector<256x64xf32>
    %8 = arith.cmpf oge, %6, %7 : vector<256x64xf32>
    %cst_7 = arith.constant 2.000000e-01 : f32
    %9 = vector.broadcast %cst_7 : f32 to vector<256x64xf32>
    %10 = arith.mulf %9, %6 : vector<256x64xf32>
    %11 = arith.select %8, %6, %10 : vector<256x64xi1>, vector<256x64xf32>
    %12 = arith.truncf %11 : vector<256x64xf32> to vector<256x64xbf16>
    %c0_8 = arith.constant 0 : index
    %c0_9 = arith.constant 0 : index
    %c0_10 = arith.constant 0 : index
    %13 = vector.load %arg4[%c0_8, %c0_9, %c0_10] : memref<1x256x64xbf16, #tpu.memory_space<vmem>>, vector<1x256x64xbf16>
    %14 = vector.shape_cast %13 : vector<1x256x64xbf16> to vector<256x64xbf16>
    %15 = vector.shape_cast %12 : vector<256x64xbf16> to vector<1x256x64xbf16>
    tpu.vector_store %arg4[%c0_8, %c0_9, %c0_10], %15 {strides = array<i32>} : memref<1x256x64xbf16, #tpu.memory_space<vmem>>, vector<1x256x64xbf16>,
    return
  }
  func.func @transform_0(%arg0: i32) -> (i32, i32, i32) {
    %c0_i32 = arith.constant 0 : i32
    %c0_i32_0 = arith.constant 0 : i32
    %c0_i32_1 = arith.constant 0 : i32
    return %arg0, %c0_i32, %c0_i32_0 : i32, i32, i32
  }
  func.func @transform_1(%arg0: i32) -> (i32, i32) {
    %c0_i32 = arith.constant 0 : i32
    %c0_i32_0 = arith.constant 0 : i32
    %c0_i32_1 = arith.constant 0 : i32
    return %c0_i32, %c0_i32_0 : i32, i32
  }
  func.func @transform_2(%arg0: i32) -> (i32, i32) {
    %c0_i32 = arith.constant 0 : i32
    %c0_i32_0 = arith.constant 0 : i32
    %c0_i32_1 = arith.constant 0 : i32
    return %c0_i32, %c0_i32_0 : i32, i32
  }
  func.func @transform_3(%arg0: i32) -> (i32, i32, i32) {
    %c0_i32 = arith.constant 0 : i32
    %c0_i32_0 = arith.constant 0 : i32
    %c0_i32_1 = arith.constant 0 : i32
    return %arg0, %c0_i32, %c0_i32_0 : i32, i32, i32
  }
}

module attributes {stable_mosaic.version = 11 : i64} {
  func.func @_conv_block_kernel(%arg0: i32, %arg1: memref<1x64x1024xbf16, #tpu.memory_space<vmem>>, %arg2: memref<1024x128xbf16, #tpu.memory_space<vmem>>, %arg3: memref<1x128xf32, #tpu.memory_space<vmem>>, %arg4: memref<1x64x128xbf16, #tpu.memory_space<vmem>>) attributes {dimension_semantics = [#tpu.dimension_semantics<parallel>], iteration_bounds = array<i64: 2>, scalar_prefetch = 0 : i64, scratch_operands = 0 : i64, tpu.core_type = #tpu.core_type<tc>, window_params = [{transform_indices = @transform_0, window_bounds = array<i64: 1, 64, 1024>}, {pipeline_mode = #tpu.pipeline_mode<synchronous>, transform_indices = @transform_1, window_bounds = array<i64: 1024, 128>}, {pipeline_mode = #tpu.pipeline_mode<synchronous>, transform_indices = @transform_2, window_bounds = array<i64: 1, 128>}, {transform_indices = @transform_3, window_bounds = array<i64: 1, 64, 128>}]} {
    %c0 = arith.constant 0 : index
    %c0_0 = arith.constant 0 : index
    %c0_1 = arith.constant 0 : index
    %0 = vector.load %arg1[%c0, %c0_0, %c0_1] : memref<1x64x1024xbf16, #tpu.memory_space<vmem>>, vector<1x64x1024xbf16>
    %1 = vector.shape_cast %0 : vector<1x64x1024xbf16> to vector<64x1024xbf16>
    %c0_2 = arith.constant 0 : index
    %c0_3 = arith.constant 0 : index
    %2 = vector.load %arg2[%c0_2, %c0_3] : memref<1024x128xbf16, #tpu.memory_space<vmem>>, vector<1024x128xbf16>
    %cst = arith.constant dense<0.000000e+00> : vector<64x128xf32>
    %3 = tpu.matmul %1, %2, %cst {dimension_numbers = #tpu.dot_dimension_numbers<[1], [0], [0], [1], [0, 0, 1, 1], [], []>} : vector<64x1024xbf16>, vector<1024x128xbf16>, vector<64x128xf32> -> vector<64x128xf32>
    %c0_4 = arith.constant 0 : index
    %c0_5 = arith.constant 0 : index
    %4 = vector.load %arg3[%c0_4, %c0_5] : memref<1x128xf32, #tpu.memory_space<vmem>>, vector<1x128xf32>
    %5 = vector.broadcast %4 : vector<1x128xf32> to vector<64x128xf32>
    %6 = arith.addf %3, %5 : vector<64x128xf32>
    %cst_6 = arith.constant dense<0.000000e+00> : vector<128xf32>
    %7 = vector.multi_reduction <add>, %6, %cst_6 [0] : vector<64x128xf32> to vector<128xf32>
    %8 = vector.shape_cast %7 : vector<128xf32> to vector<1x128xf32>
    %cst_7 = arith.constant 6.400000e+01 : f32
    %9 = vector.broadcast %cst_7 : f32 to vector<1x128xf32>
    %10 = arith.divf %8, %9 : vector<1x128xf32>
    %11 = vector.broadcast %10 : vector<1x128xf32> to vector<64x128xf32>
    %12 = arith.subf %6, %11 : vector<64x128xf32>
    %13 = arith.mulf %12, %12 : vector<64x128xf32>
    %cst_8 = arith.constant dense<0.000000e+00> : vector<128xf32>
    %14 = vector.multi_reduction <add>, %13, %cst_8 [0] : vector<64x128xf32> to vector<128xf32>
    %15 = vector.shape_cast %14 : vector<128xf32> to vector<1x128xf32>
    %cst_9 = arith.constant 6.400000e+01 : f32
    %16 = vector.broadcast %cst_9 : f32 to vector<1x128xf32>
    %17 = arith.divf %15, %16 : vector<1x128xf32>
    %cst_10 = arith.constant 9.99999974E-6 : f32
    %18 = vector.broadcast %cst_10 : f32 to vector<1x128xf32>
    %19 = arith.addf %17, %18 : vector<1x128xf32>
    %20 = math.rsqrt %19 : vector<1x128xf32>
    %21 = vector.broadcast %20 : vector<1x128xf32> to vector<64x128xf32>
    %22 = arith.mulf %12, %21 : vector<64x128xf32>
    %cst_11 = arith.constant 0.000000e+00 : f32
    %23 = vector.broadcast %cst_11 : f32 to vector<64x128xf32>
    %24 = arith.cmpf oge, %22, %23 : vector<64x128xf32>
    %cst_12 = arith.constant 2.000000e-01 : f32
    %25 = vector.broadcast %cst_12 : f32 to vector<64x128xf32>
    %26 = arith.mulf %25, %22 : vector<64x128xf32>
    %27 = arith.select %24, %22, %26 : vector<64x128xi1>, vector<64x128xf32>
    %28 = arith.truncf %27 : vector<64x128xf32> to vector<64x128xbf16>
    %c0_13 = arith.constant 0 : index
    %c0_14 = arith.constant 0 : index
    %c0_15 = arith.constant 0 : index
    %29 = vector.load %arg4[%c0_13, %c0_14, %c0_15] : memref<1x64x128xbf16, #tpu.memory_space<vmem>>, vector<1x64x128xbf16>
    %30 = vector.shape_cast %29 : vector<1x64x128xbf16> to vector<64x128xbf16>
    %31 = vector.shape_cast %28 : vector<64x128xbf16> to vector<1x64x128xbf16>
    tpu.vector_store %arg4[%c0_13, %c0_14, %c0_15], %31 {strides = array<i32>} : memref<1x64x128xbf16, #tpu.memory_space<vmem>>, vector<1x64x128xbf16>,
    return
  }
  func.func @transform_0(%arg0: i32) -> (i32, i32, i32) {
    %c0_i32 = arith.constant 0 : i32
    %c0_i32_0 = arith.constant 0 : i32
    %c0_i32_1 = arith.constant 0 : i32
    return %arg0, %c0_i32, %c0_i32_0 : i32, i32, i32
  }
  func.func @transform_1(%arg0: i32) -> (i32, i32) {
    %c0_i32 = arith.constant 0 : i32
    %c0_i32_0 = arith.constant 0 : i32
    %c0_i32_1 = arith.constant 0 : i32
    return %c0_i32, %c0_i32_0 : i32, i32
  }
  func.func @transform_2(%arg0: i32) -> (i32, i32) {
    %c0_i32 = arith.constant 0 : i32
    %c0_i32_0 = arith.constant 0 : i32
    %c0_i32_1 = arith.constant 0 : i32
    return %c0_i32, %c0_i32_0 : i32, i32
  }
  func.func @transform_3(%arg0: i32) -> (i32, i32, i32) {
    %c0_i32 = arith.constant 0 : i32
    %c0_i32_0 = arith.constant 0 : i32
    %c0_i32_1 = arith.constant 0 : i32
    return %arg0, %c0_i32, %c0_i32_0 : i32, i32, i32
  }
}

module attributes {stable_mosaic.version = 11 : i64} {
  func.func @_conv_block_kernel(%arg0: i32, %arg1: memref<1x16x2048xbf16, #tpu.memory_space<vmem>>, %arg2: memref<2048x256xbf16, #tpu.memory_space<vmem>>, %arg3: memref<1x256xf32, #tpu.memory_space<vmem>>, %arg4: memref<1x16x256xbf16, #tpu.memory_space<vmem>>) attributes {dimension_semantics = [#tpu.dimension_semantics<parallel>], iteration_bounds = array<i64: 2>, scalar_prefetch = 0 : i64, scratch_operands = 0 : i64, tpu.core_type = #tpu.core_type<tc>, window_params = [{transform_indices = @transform_0, window_bounds = array<i64: 1, 16, 2048>}, {pipeline_mode = #tpu.pipeline_mode<synchronous>, transform_indices = @transform_1, window_bounds = array<i64: 2048, 256>}, {pipeline_mode = #tpu.pipeline_mode<synchronous>, transform_indices = @transform_2, window_bounds = array<i64: 1, 256>}, {transform_indices = @transform_3, window_bounds = array<i64: 1, 16, 256>}]} {
    %c0 = arith.constant 0 : index
    %c0_0 = arith.constant 0 : index
    %c0_1 = arith.constant 0 : index
    %0 = vector.load %arg1[%c0, %c0_0, %c0_1] : memref<1x16x2048xbf16, #tpu.memory_space<vmem>>, vector<1x16x2048xbf16>
    %1 = vector.shape_cast %0 : vector<1x16x2048xbf16> to vector<16x2048xbf16>
    %c0_2 = arith.constant 0 : index
    %c0_3 = arith.constant 0 : index
    %2 = vector.load %arg2[%c0_2, %c0_3] : memref<2048x256xbf16, #tpu.memory_space<vmem>>, vector<2048x256xbf16>
    %cst = arith.constant dense<0.000000e+00> : vector<16x256xf32>
    %3 = tpu.matmul %1, %2, %cst {dimension_numbers = #tpu.dot_dimension_numbers<[1], [0], [0], [1], [0, 0, 1, 1], [], []>} : vector<16x2048xbf16>, vector<2048x256xbf16>, vector<16x256xf32> -> vector<16x256xf32>
    %c0_4 = arith.constant 0 : index
    %c0_5 = arith.constant 0 : index
    %4 = vector.load %arg3[%c0_4, %c0_5] : memref<1x256xf32, #tpu.memory_space<vmem>>, vector<1x256xf32>
    %5 = vector.broadcast %4 : vector<1x256xf32> to vector<16x256xf32>
    %6 = arith.addf %3, %5 : vector<16x256xf32>
    %cst_6 = arith.constant dense<0.000000e+00> : vector<256xf32>
    %7 = vector.multi_reduction <add>, %6, %cst_6 [0] : vector<16x256xf32> to vector<256xf32>
    %8 = vector.shape_cast %7 : vector<256xf32> to vector<1x256xf32>
    %cst_7 = arith.constant 1.600000e+01 : f32
    %9 = vector.broadcast %cst_7 : f32 to vector<1x256xf32>
    %10 = arith.divf %8, %9 : vector<1x256xf32>
    %11 = vector.broadcast %10 : vector<1x256xf32> to vector<16x256xf32>
    %12 = arith.subf %6, %11 : vector<16x256xf32>
    %13 = arith.mulf %12, %12 : vector<16x256xf32>
    %cst_8 = arith.constant dense<0.000000e+00> : vector<256xf32>
    %14 = vector.multi_reduction <add>, %13, %cst_8 [0] : vector<16x256xf32> to vector<256xf32>
    %15 = vector.shape_cast %14 : vector<256xf32> to vector<1x256xf32>
    %cst_9 = arith.constant 1.600000e+01 : f32
    %16 = vector.broadcast %cst_9 : f32 to vector<1x256xf32>
    %17 = arith.divf %15, %16 : vector<1x256xf32>
    %cst_10 = arith.constant 9.99999974E-6 : f32
    %18 = vector.broadcast %cst_10 : f32 to vector<1x256xf32>
    %19 = arith.addf %17, %18 : vector<1x256xf32>
    %20 = math.rsqrt %19 : vector<1x256xf32>
    %21 = vector.broadcast %20 : vector<1x256xf32> to vector<16x256xf32>
    %22 = arith.mulf %12, %21 : vector<16x256xf32>
    %cst_11 = arith.constant 0.000000e+00 : f32
    %23 = vector.broadcast %cst_11 : f32 to vector<16x256xf32>
    %24 = arith.cmpf oge, %22, %23 : vector<16x256xf32>
    %cst_12 = arith.constant 2.000000e-01 : f32
    %25 = vector.broadcast %cst_12 : f32 to vector<16x256xf32>
    %26 = arith.mulf %25, %22 : vector<16x256xf32>
    %27 = arith.select %24, %22, %26 : vector<16x256xi1>, vector<16x256xf32>
    %28 = arith.truncf %27 : vector<16x256xf32> to vector<16x256xbf16>
    %c0_13 = arith.constant 0 : index
    %c0_14 = arith.constant 0 : index
    %c0_15 = arith.constant 0 : index
    %29 = vector.load %arg4[%c0_13, %c0_14, %c0_15] : memref<1x16x256xbf16, #tpu.memory_space<vmem>>, vector<1x16x256xbf16>
    %30 = vector.shape_cast %29 : vector<1x16x256xbf16> to vector<16x256xbf16>
    %31 = vector.shape_cast %28 : vector<16x256xbf16> to vector<1x16x256xbf16>
    tpu.vector_store %arg4[%c0_13, %c0_14, %c0_15], %31 {strides = array<i32>} : memref<1x16x256xbf16, #tpu.memory_space<vmem>>, vector<1x16x256xbf16>,
    return
  }
  func.func @transform_0(%arg0: i32) -> (i32, i32, i32) {
    %c0_i32 = arith.constant 0 : i32
    %c0_i32_0 = arith.constant 0 : i32
    %c0_i32_1 = arith.constant 0 : i32
    return %arg0, %c0_i32, %c0_i32_0 : i32, i32, i32
  }
  func.func @transform_1(%arg0: i32) -> (i32, i32) {
    %c0_i32 = arith.constant 0 : i32
    %c0_i32_0 = arith.constant 0 : i32
    %c0_i32_1 = arith.constant 0 : i32
    return %c0_i32, %c0_i32_0 : i32, i32
  }
  func.func @transform_2(%arg0: i32) -> (i32, i32) {
    %c0_i32 = arith.constant 0 : i32
    %c0_i32_0 = arith.constant 0 : i32
    %c0_i32_1 = arith.constant 0 : i32
    return %c0_i32, %c0_i32_0 : i32, i32
  }
  func.func @transform_3(%arg0: i32) -> (i32, i32, i32) {
    %c0_i32 = arith.constant 0 : i32
    %c0_i32_0 = arith.constant 0 : i32
    %c0_i32_1 = arith.constant 0 : i32
    return %arg0, %c0_i32, %c0_i32_0 : i32, i32, i32
  }
}

module attributes {stable_mosaic.version = 11 : i64} {
  func.func @_conv_block_kernel(%arg0: i32, %arg1: memref<1x4x4096xbf16, #tpu.memory_space<vmem>>, %arg2: memref<4096x512xbf16, #tpu.memory_space<vmem>>, %arg3: memref<1x512xf32, #tpu.memory_space<vmem>>, %arg4: memref<1x4x512xbf16, #tpu.memory_space<vmem>>) attributes {dimension_semantics = [#tpu.dimension_semantics<parallel>], iteration_bounds = array<i64: 2>, scalar_prefetch = 0 : i64, scratch_operands = 0 : i64, tpu.core_type = #tpu.core_type<tc>, window_params = [{transform_indices = @transform_0, window_bounds = array<i64: 1, 4, 4096>}, {pipeline_mode = #tpu.pipeline_mode<synchronous>, transform_indices = @transform_1, window_bounds = array<i64: 4096, 512>}, {pipeline_mode = #tpu.pipeline_mode<synchronous>, transform_indices = @transform_2, window_bounds = array<i64: 1, 512>}, {transform_indices = @transform_3, window_bounds = array<i64: 1, 4, 512>}]} {
    %c0 = arith.constant 0 : index
    %c0_0 = arith.constant 0 : index
    %c0_1 = arith.constant 0 : index
    %0 = vector.load %arg1[%c0, %c0_0, %c0_1] : memref<1x4x4096xbf16, #tpu.memory_space<vmem>>, vector<1x4x4096xbf16>
    %1 = vector.shape_cast %0 : vector<1x4x4096xbf16> to vector<4x4096xbf16>
    %c0_2 = arith.constant 0 : index
    %c0_3 = arith.constant 0 : index
    %2 = vector.load %arg2[%c0_2, %c0_3] : memref<4096x512xbf16, #tpu.memory_space<vmem>>, vector<4096x512xbf16>
    %cst = arith.constant dense<0.000000e+00> : vector<4x512xf32>
    %3 = tpu.matmul %1, %2, %cst {dimension_numbers = #tpu.dot_dimension_numbers<[1], [0], [0], [1], [0, 0, 1, 1], [], []>} : vector<4x4096xbf16>, vector<4096x512xbf16>, vector<4x512xf32> -> vector<4x512xf32>
    %c0_4 = arith.constant 0 : index
    %c0_5 = arith.constant 0 : index
    %4 = vector.load %arg3[%c0_4, %c0_5] : memref<1x512xf32, #tpu.memory_space<vmem>>, vector<1x512xf32>
    %5 = vector.broadcast %4 : vector<1x512xf32> to vector<4x512xf32>
    %6 = arith.addf %3, %5 : vector<4x512xf32>
    %cst_6 = arith.constant dense<0.000000e+00> : vector<512xf32>
    %7 = vector.multi_reduction <add>, %6, %cst_6 [0] : vector<4x512xf32> to vector<512xf32>
    %8 = vector.shape_cast %7 : vector<512xf32> to vector<1x512xf32>
    %cst_7 = arith.constant 4.000000e+00 : f32
    %9 = vector.broadcast %cst_7 : f32 to vector<1x512xf32>
    %10 = arith.divf %8, %9 : vector<1x512xf32>
    %11 = vector.broadcast %10 : vector<1x512xf32> to vector<4x512xf32>
    %12 = arith.subf %6, %11 : vector<4x512xf32>
    %13 = arith.mulf %12, %12 : vector<4x512xf32>
    %cst_8 = arith.constant dense<0.000000e+00> : vector<512xf32>
    %14 = vector.multi_reduction <add>, %13, %cst_8 [0] : vector<4x512xf32> to vector<512xf32>
    %15 = vector.shape_cast %14 : vector<512xf32> to vector<1x512xf32>
    %cst_9 = arith.constant 4.000000e+00 : f32
    %16 = vector.broadcast %cst_9 : f32 to vector<1x512xf32>
    %17 = arith.divf %15, %16 : vector<1x512xf32>
    %cst_10 = arith.constant 9.99999974E-6 : f32
    %18 = vector.broadcast %cst_10 : f32 to vector<1x512xf32>
    %19 = arith.addf %17, %18 : vector<1x512xf32>
    %20 = math.rsqrt %19 : vector<1x512xf32>
    %21 = vector.broadcast %20 : vector<1x512xf32> to vector<4x512xf32>
    %22 = arith.mulf %12, %21 : vector<4x512xf32>
    %cst_11 = arith.constant 0.000000e+00 : f32
    %23 = vector.broadcast %cst_11 : f32 to vector<4x512xf32>
    %24 = arith.cmpf oge, %22, %23 : vector<4x512xf32>
    %cst_12 = arith.constant 2.000000e-01 : f32
    %25 = vector.broadcast %cst_12 : f32 to vector<4x512xf32>
    %26 = arith.mulf %25, %22 : vector<4x512xf32>
    %27 = arith.select %24, %22, %26 : vector<4x512xi1>, vector<4x512xf32>
    %28 = arith.truncf %27 : vector<4x512xf32> to vector<4x512xbf16>
    %c0_13 = arith.constant 0 : index
    %c0_14 = arith.constant 0 : index
    %c0_15 = arith.constant 0 : index
    %29 = vector.load %arg4[%c0_13, %c0_14, %c0_15] : memref<1x4x512xbf16, #tpu.memory_space<vmem>>, vector<1x4x512xbf16>
    %30 = vector.shape_cast %29 : vector<1x4x512xbf16> to vector<4x512xbf16>
    %31 = vector.shape_cast %28 : vector<4x512xbf16> to vector<1x4x512xbf16>
    tpu.vector_store %arg4[%c0_13, %c0_14, %c0_15], %31 {strides = array<i32>} : memref<1x4x512xbf16, #tpu.memory_space<vmem>>, vector<1x4x512xbf16>,
    return
  }
  func.func @transform_0(%arg0: i32) -> (i32, i32, i32) {
    %c0_i32 = arith.constant 0 : i32
    %c0_i32_0 = arith.constant 0 : i32
    %c0_i32_1 = arith.constant 0 : i32
    return %arg0, %c0_i32, %c0_i32_0 : i32, i32, i32
  }
  func.func @transform_1(%arg0: i32) -> (i32, i32) {
    %c0_i32 = arith.constant 0 : i32
    %c0_i32_0 = arith.constant 0 : i32
    %c0_i32_1 = arith.constant 0 : i32
    return %c0_i32, %c0_i32_0 : i32, i32
  }
  func.func @transform_2(%arg0: i32) -> (i32, i32) {
    %c0_i32 = arith.constant 0 : i32
    %c0_i32_0 = arith.constant 0 : i32
    %c0_i32_1 = arith.constant 0 : i32
    return %c0_i32, %c0_i32_0 : i32, i32
  }
  func.func @transform_3(%arg0: i32) -> (i32, i32, i32) {
    %c0_i32 = arith.constant 0 : i32
    %c0_i32_0 = arith.constant 0 : i32
    %c0_i32_1 = arith.constant 0 : i32
    return %arg0, %c0_i32, %c0_i32_0 : i32, i32, i32
  }
}

module attributes {stable_mosaic.version = 11 : i64} {
  func.func @_final_conv_kernel(%arg0: i32, %arg1: memref<8x8192xbf16, #tpu.memory_space<vmem>>, %arg2: memref<1x8192xbf16, #tpu.memory_space<vmem>>, %arg3: memref<8x1xf32, #tpu.memory_space<vmem>>) attributes {dimension_semantics = [#tpu.dimension_semantics<arbitrary>], iteration_bounds = array<i64: 1>, scalar_prefetch = 0 : i64, scratch_operands = 0 : i64, tpu.core_type = #tpu.core_type<tc>, window_params = [{pipeline_mode = #tpu.pipeline_mode<synchronous>, transform_indices = @transform_0, window_bounds = array<i64: 8, 8192>}, {pipeline_mode = #tpu.pipeline_mode<synchronous>, transform_indices = @transform_1, window_bounds = array<i64: 1, 8192>}, {pipeline_mode = #tpu.pipeline_mode<synchronous>, transform_indices = @transform_2, window_bounds = array<i64: 8, 1>}]} {
    %c0 = arith.constant 0 : index
    %c0_0 = arith.constant 0 : index
    %0 = vector.load %arg1[%c0, %c0_0] : memref<8x8192xbf16, #tpu.memory_space<vmem>>, vector<8x8192xbf16>
    %1 = arith.extf %0 : vector<8x8192xbf16> to vector<8x8192xf32>
    %c0_1 = arith.constant 0 : index
    %c0_2 = arith.constant 0 : index
    %2 = vector.load %arg2[%c0_1, %c0_2] : memref<1x8192xbf16, #tpu.memory_space<vmem>>, vector<1x8192xbf16>
    %3 = arith.extf %2 : vector<1x8192xbf16> to vector<1x8192xf32>
    %4 = vector.broadcast %3 : vector<1x8192xf32> to vector<8x8192xf32>
    %5 = arith.mulf %1, %4 : vector<8x8192xf32>
    %cst = arith.constant dense<0.000000e+00> : vector<8xf32>
    %6 = vector.multi_reduction <add>, %5, %cst [1] : vector<8x8192xf32> to vector<8xf32>
    %7 = vector.shape_cast %6 : vector<8xf32> to vector<8x1xf32>
    %8 = arith.negf %7 : vector<8x1xf32>
    %9 = math.exp %8 : vector<8x1xf32>
    %cst_3 = arith.constant 1.000000e+00 : f32
    %10 = vector.broadcast %cst_3 : f32 to vector<8x1xf32>
    %11 = arith.addf %10, %9 : vector<8x1xf32>
    %12 = arith.divf %10, %11 : vector<8x1xf32>
    %c0_4 = arith.constant 0 : index
    %c0_5 = arith.constant 0 : index
    %13 = vector.load %arg3[%c0_4, %c0_5] : memref<8x1xf32, #tpu.memory_space<vmem>>, vector<8x1xf32>
    tpu.vector_store %arg3[%c0_4, %c0_5], %12 {strides = array<i32>} : memref<8x1xf32, #tpu.memory_space<vmem>>, vector<8x1xf32>,
    return
  }
  func.func @transform_0(%arg0: i32) -> (i32, i32) {
    %c0_i32 = arith.constant 0 : i32
    %c0_i32_0 = arith.constant 0 : i32
    %c0_i32_1 = arith.constant 0 : i32
    return %c0_i32, %c0_i32_0 : i32, i32
  }
  func.func @transform_1(%arg0: i32) -> (i32, i32) {
    %c0_i32 = arith.constant 0 : i32
    %c0_i32_0 = arith.constant 0 : i32
    %c0_i32_1 = arith.constant 0 : i32
    return %c0_i32, %c0_i32_0 : i32, i32
  }
  func.func @transform_2(%arg0: i32) -> (i32, i32) {
    %c0_i32 = arith.constant 0 : i32
    %c0_i32_0 = arith.constant 0 : i32
    %c0_i32_1 = arith.constant 0 : i32
    return %c0_i32, %c0_i32_0 : i32, i32
  }
}

</mosaic_0001>

<bundles_post_ra>
// kernel: discriminator_forward.5
= control target key start
LH: loop header
LB: loop body
LE: loop exit
PB: predicated region body
PF: predicated region fallthrough
CT: control target
= control target key end

     0   :  { %s1094_s12 = smov 0   ;;  %s1264_s0 = inlined_call_operand.vmem [shape: bf16[2,256,128], index: 0, kind: input, shape index: {}]   ;;  %s1265_s1 = inlined_call_operand.vmem [shape: bf16[128,64], index: 1, kind: input, shape index: {}]   ;;  %s1266_s2 = inlined_call_operand.vmem [shape: f32[1,64], index: 2, kind: input, shape index: {}]   ;;  %s1267_s3 = inlined_call_operand.vmem [shape: bf16[2,256,64], index: 3, kind: output, shape index: {}]  }
   0x1 LB: > { %s844_s13 = sadd.s32 4294967295, %s1072_s12   ;;  %p848_p0 = scmp.ge.s32.totalorder %s1072_s12, 1  ;;  %s1072_s12 = sphi %s1094_s12, %s13_s12  }
   0x2   : > { %p137_p1 = scmp.lt.s32.totalorder %s1072_s12, 3 }
   0x4   : > { %p138_p2 = pnand %p848_p0, %p137_p1 }
   0x5   : > { %v1042_v0 = vld [vmem:[%s1265_s1] sm:$0xff] (!%p138_p2)   ;;  %p161_p3 = scmp.lt.s32.totalorder (!%p138_p2), %s844_s13, 1  ;;  %v1043_v1 = vld [vmem:[%s1265_s1 + $0x8] sm:$0xff] (!%p138_p2)   ;;  %v1044_v2 = vld [vmem:[%s1265_s1 + $0x10] sm:$0xff] (!%p138_p2)   ;;  %vm756_vm0 = vcmask (!%p138_p2), 519168  }
   0x6   : > { %141 = sbr.rel (%p138_p2) target bundleno = 296 (0x128), region = 32  ;;  %970 = vmatprep.subr.bf16.mxu0 (!%p138_p2), %v1042_v0  ;;  %1018 = vmatprep.subr.bf16.mxu1 (!%p138_p2), %v1042_v0  ;;  %v1045_v3 = vld [vmem:[%s1265_s1 + $0x18] sm:$0xff] (!%p138_p2)   ;;  %v1046_v6 = vld [vmem:[%s1265_s1 + $0x20] sm:$0xff] (!%p138_p2)   ;;  %v1047_v7 = vld [vmem:[%s1265_s1 + $0x28] sm:$0xff] (!%p138_p2)  }
   0x7   : > { %971 = vmatpush3.bf16.msra.mxu0 (!%p138_p2), %v1042_v0  ;;  %1026 = vmatpush3.bf16.msra.mxu1 (!%p138_p2), %v1042_v0  ;;  %v1048_v8 = vld [vmem:[%s1265_s1 + $0x30] sm:$0xff] (!%p138_p2)   ;;  %v1049_v9 = vld [vmem:[%s1265_s1 + $0x38] sm:$0xff] (!%p138_p2)   ;;  %v1155_v24 = vld [vmem:[%s1266_s2] ss:$0 sm:$0xff] (!%p138_p2) }
   0x8   : > { %972 = vmatprep.subr.bf16.mxu0 (!%p138_p2), %v1043_v1  ;;  %1019 = vmatprep.subr.bf16.mxu1 (!%p138_p2), %v1043_v1 }
   0xb   : > { %973 = vmatpush3.bf16.msra.mxu0 (!%p138_p2), %v1043_v1  ;;  %1027 = vmatpush3.bf16.msra.mxu1 (!%p138_p2), %v1043_v1 }
   0xc   : > { %974 = vmatprep.subr.bf16.mxu0 (!%p138_p2), %v1044_v2  ;;  %1020 = vmatprep.subr.bf16.mxu1 (!%p138_p2), %v1044_v2 }
   0xd   : > { %s1269_s13 = smov (!%p161_p3, %s844_s13), 1 }
   0xe   : > { %s912_s20 = sshll.u32 %s1269_s13, 7 }
   0xf   : > { %s1119_s23 = scalar_lea.vmem %s1264_s0, %s912_s20  ;;  %975 = vmatpush3.bf16.msra.mxu0 %v1044_v2  ;;  %1028 = vmatpush3.bf16.msra.mxu1 %v1044_v2  ;;  %s1166_s11 = scalar_lea.vmem %s1267_s3, %s912_s20 }
  0x10   : > { %v1050_v4 = vld [vmem:[%s1119_s23] sm:$0xff]   ;;  %976 = vmatprep.subr.bf16.mxu0 %v1045_v3  ;;  %1021 = vmatprep.subr.bf16.mxu1 %v1045_v3  ;;  %v1052_v10 = vld [vmem:[%s1119_s23 + $0x8] sm:$0xff]   ;;  %v1054_v12 = vld [vmem:[%s1119_s23 + $0x10] sm:$0xff]  }
  0x11   : > { %v1051_v5 = vld [vmem:[%s1119_s23 + $0x40] sm:$0xff]   ;;  %986 = vmatprep.mubr.bf16.mxu0 %v1050_v4  ;;  %v1053_v11 = vld [vmem:[%s1119_s23 + $0x48] sm:$0xff]   ;;  %v1055_v13 = vld [vmem:[%s1119_s23 + $0x50] sm:$0xff]  }
  0x12   : > { %1002 = vmatprep.mubr.bf16.mxu1 %v1051_v5  ;;  %v1056_v14 = vld [vmem:[%s1119_s23 + $0x18] sm:$0xff]   ;;  %v1058_v16 = vld [vmem:[%s1119_s23 + $0x20] sm:$0xff]   ;;  %v1060_v18 = vld [vmem:[%s1119_s23 + $0x28] sm:$0xff]  }
  0x13   : > { %977 = vmatpush3.bf16.msra.mxu0 %v1045_v3  ;;  %1029 = vmatpush3.bf16.msra.mxu1 %v1045_v3  ;;  %v1057_v15 = vld [vmem:[%s1119_s23 + $0x58] sm:$0xff]   ;;  %v1059_v17 = vld [vmem:[%s1119_s23 + $0x60] sm:$0xff]   ;;  %v1061_v19 = vld [vmem:[%s1119_s23 + $0x68] sm:$0xff]  }
  0x14   : > { %978 = vmatprep.subr.bf16.mxu0 %v1046_v6  ;;  %1022 = vmatprep.subr.bf16.mxu1 %v1046_v6  ;;  %v1062_v20 = vld [vmem:[%s1119_s23 + $0x30] sm:$0xff]   ;;  %v1064_v22 = vld [vmem:[%s1119_s23 + $0x38] sm:$0xff]  }
  0x15   : > { %v1063_v21 = vld [vmem:[%s1119_s23 + $0x70] sm:$0xff]   ;;  %v1065_v23 = vld [vmem:[%s1119_s23 + $0x78] sm:$0xff]  }
  0x17   : > { %979 = vmatpush3.bf16.msra.mxu0 %v1046_v6  ;;  %1030 = vmatpush3.bf16.msra.mxu1 %v1046_v6 }
  0x18   : > { %980 = vmatprep.subr.bf16.mxu0 %v1047_v7  ;;  %1023 = vmatprep.subr.bf16.mxu1 %v1047_v7 }
  0x1b   : > { %981 = vmatpush3.bf16.msra.mxu0 %v1047_v7  ;;  %1031 = vmatpush3.bf16.msra.mxu1 %v1047_v7 }
  0x1c   : > { %982 = vmatprep.subr.bf16.mxu0 %v1048_v8  ;;  %1024 = vmatprep.subr.bf16.mxu1 %v1048_v8 }
  0x1f   : > { %983 = vmatpush3.bf16.msra.mxu0 %v1048_v8  ;;  %1032 = vmatpush3.bf16.msra.mxu1 %v1048_v8 }
  0x20   : > { %984 = vmatprep.subr.bf16.mxu0 %v1049_v9  ;;  %1025 = vmatprep.subr.bf16.mxu1 %v1049_v9 }
  0x23   : > { %985 = vmatpush3.bf16.msra.mxu0 %v1049_v9  ;;  %1033 = vmatpush3.bf16.msra.mxu1 %v1049_v9 }
  0x26   : > { %987 = vmatmul.mubr.bf16.vlgmr.msra.gmra.mrb[0].mxu0 %v1052_v10  ;;  %1003 = vmatmul.mubr.bf16.vlgmr.msra.gmra.mrb[0].mxu1 %v1053_v11 }
  0x27   : > { %990 = vmatprep.mubr.bf16.mxu0 %v1054_v12  ;;  %1006 = vmatprep.mubr.bf16.mxu1 %v1055_v13 }
  0x2e   : > { %991 = vmatmul.mubr.bf16.gmra.mrb[4].mxu0 %v1056_v14  ;;  %1007 = vmatmul.mubr.bf16.gmra.mrb[4].mxu1 %v1057_v15 }
  0x2f   : > { %994 = vmatprep.mubr.bf16.mxu0 %v1058_v16  ;;  %1010 = vmatprep.mubr.bf16.mxu1 %v1059_v17 }
  0x36   : > { %995 = vmatmul.mubr.bf16.gmra.mrb[8].mxu0 %v1060_v18  ;;  %1011 = vmatmul.mubr.bf16.gmra.mrb[8].mxu1 %v1061_v19 }
  0x37   : > { %998 = vmatprep.mubr.bf16.mxu0 %v1062_v20  ;;  %1014 = vmatprep.mubr.bf16.mxu1 %v1063_v21 }
  0x3e   : > { %999 = vmatmul.mubr.bf16.gmra.mrb[12].mxu0 %v1064_v22  ;;  %1015 = vmatmul.mubr.bf16.gmra.mrb[12].mxu1 %v1065_v23 }
  0xf9   : > { %v988_v25 = vpop.f32.mrb[0].mxu0  ;;  %v1004_v26 = vpop.f32.mrb[0].mxu1 }
  0xfa   : > { %v414_v27 = vadd.f32 %v988_v25, %v1155_v24  ;;  %v478_v28 = vadd.f32 %v1004_v26, %v1155_v24  ;;  %v405_v29 = vpop.f32.mrb[1].mxu0  ;;  %v469_v30 = vpop.f32.mrb[1].mxu1 }
  0xfb   : > { %v406_v31 = vadd.f32 %v1155_v24, %v405_v29  ;;  %v470_v32 = vadd.f32 %v1155_v24, %v469_v30  ;;  %v989_v33 = vpop.f32.mrb[2].mxu0  ;;  %v1005_v34 = vpop.f32.mrb[2].mxu1 }
  0xfc   : > { %vm534_vm1 = vcmp.ge.f32.partialorder %v414_v27, 0.0  ;;  %v566_v35 = vmul.f32 0.2, %v414_v27  ;;  %vm550_vm2 = vcmp.ge.f32.partialorder %v478_v28, 0.0  ;;  %v582_v36 = vmul.f32 0.2, %v478_v28 }
  0xfd   : > { %vm532_vm3 = vcmp.ge.f32.partialorder %v406_v31, 0.0  ;;  %v564_v37 = vmul.f32 0.2, %v406_v31  ;;  %vm548_vm4 = vcmp.ge.f32.partialorder %v470_v32, 0.0  ;;  %v580_v38 = vmul.f32 0.2, %v470_v32 }
  0xfe   : > { %v598_v39 = vsel %vm534_vm1, %v414_v27, %v566_v35  ;;  %v614_v40 = vsel %vm550_vm2, %v478_v28, %v582_v36  ;;  %v417_v41 = vadd.f32 %v989_v33, %v1155_v24  ;;  %v481_v42 = vadd.f32 %v1005_v34, %v1155_v24  ;;  %v408_v43 = vpop.f32.mrb[3].mxu0  ;;  %v472_v44 = vpop.f32.mrb[3].mxu1 }
  0xff   : > { %v916_v45 = vpack.c.bf16 %v598_v39, %v598_v39  ;;  %v932_v46 = vpack.c.bf16 %v614_v40, %v614_v40  ;;  %v596_v47 = vsel %vm532_vm3, %v406_v31, %v564_v37  ;;  %v612_v48 = vsel %vm548_vm4, %v470_v32, %v580_v38 }
 0x100   : > { %v914_v49 = vpack.c.bf16 %v596_v47, %v596_v47  ;;  %v930_v50 = vpack.c.bf16 %v612_v48, %v612_v48  ;;  %vm535_vm5 = vcmp.ge.f32.partialorder %v417_v41, 0.0  ;;  %v567_v51 = vmul.f32 0.2, %v417_v41 }
 0x101   : > { %759 = vst.msk [vmem:[%s1166_s11 + $0x8] sm:$0xf] %vm756_vm0, %v916_v45  ;;  %775 = vst.msk [vmem:[%s1166_s11 + $0x48] sm:$0xf] %vm756_vm0, %v932_v46  ;;  %vm551_vm6 = vcmp.ge.f32.partialorder %v481_v42, 0.0  ;;  %v409_v53 = vadd.f32 %v1155_v24, %v408_v43  ;;  %v473_v54 = vadd.f32 %v1155_v24, %v472_v44  ;;  %v992_v55 = vpop.f32.mrb[4].mxu0 }
 0x102   : > { %v583_v52 = vmul.f32 0.2, %v481_v42  ;;  %v1008_v56 = vpop.f32.mrb[4].mxu1  ;;  %757 = vst.msk [vmem:[%s1166_s11] sm:$0xf] %vm756_vm0, %v914_v49  ;;  %v599_v57 = vsel %vm535_vm5, %v417_v41, %v567_v51  ;;  %v430_v58 = vadd.f32 %v992_v55, %v1155_v24  ;;  %v421_v60 = vpop.f32.mrb[5].mxu0 }
 0x103   : > { %773 = vst.msk [vmem:[%s1166_s11 + $0x40] sm:$0xf] %vm756_vm0, %v930_v50  ;;  %v494_v59 = vadd.f32 %v1008_v56, %v1155_v24  ;;  %v485_v61 = vpop.f32.mrb[5].mxu1  ;;  %v917_v62 = vpack.c.bf16 %v599_v57, %v599_v57  ;;  %vm533_vm7 = vcmp.ge.f32.partialorder %v409_v53, 0.0  ;;  %v565_v0 = vmul.f32 0.2, %v409_v53 }
 0x104   : > { %v615_v63 = vsel %vm551_vm6, %v481_v42, %v583_v52  ;;  %v993_v1 = vpop.f32.mrb[6].mxu0  ;;  %v1009_v2 = vpop.f32.mrb[6].mxu1  ;;  %vm549_vm8 = vcmp.ge.f32.partialorder %v473_v54, 0.0  ;;  %v581_v4 = vmul.f32 0.2, %v473_v54  ;;  %vm538_vm9 = vcmp.ge.f32.partialorder %v430_v58, 0.0 }
 0x105   : > { %v933_v3 = vpack.c.bf16 %v615_v63, %v615_v63  ;;  %v424_v5 = vpop.f32.mrb[7].mxu0  ;;  %v488_v6 = vpop.f32.mrb[7].mxu1  ;;  %760 = vst.msk [vmem:[%s1166_s11 + $0xc] sm:$0xf] %vm756_vm0, %v917_v62  ;;  %v597_v7 = vsel %vm533_vm7, %v409_v53, %v565_v0  ;;  %v570_v8 = vmul.f32 0.2, %v430_v58  ;;  %v422_v12 = vadd.f32 %v1155_v24, %v421_v60 }
 0x106   : > { %vm554_vm10 = vcmp.ge.f32.partialorder %v494_v59, 0.0  ;;  %v586_v9 = vmul.f32 0.2, %v494_v59  ;;  %v915_v10 = vpack.c.bf16 %v597_v7, %v597_v7  ;;  %v613_v11 = vsel %vm549_vm8, %v473_v54, %v581_v4 }
 0x107   : > { %776 = vst.msk [vmem:[%s1166_s11 + $0x4c] sm:$0xf] %vm756_vm0, %v933_v3  ;;  %v486_v13 = vadd.f32 %v1155_v24, %v485_v61  ;;  %v931_v14 = vpack.c.bf16 %v613_v11, %v613_v11  ;;  %v602_v15 = vsel %vm538_vm9, %v430_v58, %v570_v8  ;;  %v433_v17 = vadd.f32 %v993_v1, %v1155_v24 }
 0x108   : > { %v618_v16 = vsel %vm554_vm10, %v494_v59, %v586_v9  ;;  %758 = vst.msk [vmem:[%s1166_s11 + $0x4] sm:$0xf] %vm756_vm0, %v915_v10  ;;  %v920_v18 = vpack.c.bf16 %v602_v15, %v602_v15  ;;  %vm536_vm11 = vcmp.ge.f32.partialorder %v422_v12, 0.0  ;;  %v568_v20 = vmul.f32 0.2, %v422_v12 }
 0x109   : > { %v936_v19 = vpack.c.bf16 %v618_v16, %v618_v16  ;;  %774 = vst.msk [vmem:[%s1166_s11 + $0x44] sm:$0xf] %vm756_vm0, %v931_v14  ;;  %vm552_vm12 = vcmp.ge.f32.partialorder %v486_v13, 0.0  ;;  %v584_v21 = vmul.f32 0.2, %v486_v13  ;;  %vm539_vm13 = vcmp.ge.f32.partialorder %v433_v17, 0.0 }
 0x10a   : > { %v571_v22 = vmul.f32 0.2, %v433_v17  ;;  %763 = vst.msk [vmem:[%s1166_s11 + $0x18] sm:$0xf] %vm756_vm0, %v920_v18  ;;  %v600_v23 = vsel %vm536_vm11, %v422_v12, %v568_v20  ;;  %v497_v25 = vadd.f32 %v1009_v2, %v1155_v24  ;;  %v425_v26 = vadd.f32 %v1155_v24, %v424_v5  ;;  %v996_v28 = vpop.f32.mrb[8].mxu0  ;;  %v1012_v29 = vpop.f32.mrb[8].mxu1 }
 0x10b   : > { %779 = vst.msk [vmem:[%s1166_s11 + $0x58] sm:$0xf] %vm756_vm0, %v936_v19  ;;  %v489_v27 = vadd.f32 %v1155_v24, %v488_v6  ;;  %v918_v30 = vpack.c.bf16 %v600_v23, %v600_v23  ;;  %v616_v31 = vsel %vm552_vm12, %v486_v13, %v584_v21  ;;  %v446_v33 = vadd.f32 %v996_v28, %v1155_v24  ;;  %v437_v34 = vpop.f32.mrb[9].mxu0  ;;  %v501_v35 = vpop.f32.mrb[9].mxu1 }
 0x10c   : > { %v603_v32 = vsel %vm539_vm13, %v433_v17, %v571_v22  ;;  %v934_v36 = vpack.c.bf16 %v616_v31, %v616_v31  ;;  %vm555_vm14 = vcmp.ge.f32.partialorder %v497_v25, 0.0  ;;  %v587_v38 = vmul.f32 0.2, %v497_v25  ;;  %v997_v39 = vpop.f32.mrb[10].mxu0  ;;  %v1013_v40 = vpop.f32.mrb[10].mxu1 }
 0x10d   : > { %v921_v37 = vpack.c.bf16 %v603_v32, %v603_v32  ;;  %761 = vst.msk [vmem:[%s1166_s11 + $0x10] sm:$0xf] %vm756_vm0, %v918_v30  ;;  %vm537_vm15 = vcmp.ge.f32.partialorder %v425_v26, 0.0  ;;  %v569_v41 = vmul.f32 0.2, %v425_v26  ;;  %vm553_vm1 = vcmp.ge.f32.partialorder %v489_v27, 0.0 }
 0x10e   : > { %v585_v42 = vmul.f32 0.2, %v489_v27  ;;  %777 = vst.msk [vmem:[%s1166_s11 + $0x50] sm:$0xf] %vm756_vm0, %v934_v36  ;;  %v619_v43 = vsel %vm555_vm14, %v497_v25, %v587_v38  ;;  %vm542_vm2 = vcmp.ge.f32.partialorder %v446_v33, 0.0  ;;  %v510_v45 = vadd.f32 %v1012_v29, %v1155_v24  ;;  %v440_v46 = vpop.f32.mrb[11].mxu0 }
 0x10f   : > { %764 = vst.msk [vmem:[%s1166_s11 + $0x1c] sm:$0xf] %vm756_vm0, %v921_v37  ;;  %v574_v44 = vmul.f32 0.2, %v446_v33  ;;  %v504_v47 = vpop.f32.mrb[11].mxu1  ;;  %v937_v48 = vpack.c.bf16 %v619_v43, %v619_v43  ;;  %v601_v49 = vsel %vm537_vm15, %v425_v26, %v569_v41  ;;  %v438_v51 = vadd.f32 %v1155_v24, %v437_v34 }
 0x110   : > { %v617_v50 = vsel %vm553_vm1, %v489_v27, %v585_v42  ;;  %v919_v52 = vpack.c.bf16 %v601_v49, %v601_v49  ;;  %vm558_vm3 = vcmp.ge.f32.partialorder %v510_v45, 0.0  ;;  %v590_v56 = vmul.f32 0.2, %v510_v45 }
 0x111   : > { %v935_v53 = vpack.c.bf16 %v617_v50, %v617_v50  ;;  %v606_v54 = vsel %vm542_vm2, %v446_v33, %v574_v44  ;;  %780 = vst.msk [vmem:[%s1166_s11 + $0x5c] sm:$0xf] %vm756_vm0, %v937_v48  ;;  %vm540_vm4 = vcmp.ge.f32.partialorder %v438_v51, 0.0  ;;  %v572_v57 = vmul.f32 0.2, %v438_v51  ;;  %v1000_v58 = vpop.f32.mrb[12].mxu0 }
 0x112   : > { %v924_v55 = vpack.c.bf16 %v606_v54, %v606_v54  ;;  %762 = vst.msk [vmem:[%s1166_s11 + $0x14] sm:$0xf] %vm756_vm0, %v919_v52  ;;  %v502_v59 = vadd.f32 %v1155_v24, %v501_v35  ;;  %v449_v60 = vadd.f32 %v997_v39, %v1155_v24  ;;  %v513_v61 = vadd.f32 %v1013_v40, %v1155_v24  ;;  %v1016_v63 = vpop.f32.mrb[12].mxu1  ;;  %v453_v0 = vpop.f32.mrb[13].mxu0 }
 0x113   : > { %778 = vst.msk [vmem:[%s1166_s11 + $0x54] sm:$0xf] %vm756_vm0, %v935_v53  ;;  %v441_v62 = vadd.f32 %v1155_v24, %v440_v46  ;;  %v622_v1 = vsel %vm558_vm3, %v510_v45, %v590_v56  ;;  %v604_v2 = vsel %vm540_vm4, %v438_v51, %v572_v57  ;;  %v505_v3 = vadd.f32 %v1155_v24, %v504_v47  ;;  %v517_v5 = vpop.f32.mrb[13].mxu1  ;;  %v1001_v6 = vpop.f32.mrb[14].mxu0 }
 0x114   : > { %767 = vst.msk [vmem:[%s1166_s11 + $0x28] sm:$0xf] %vm756_vm0, %v924_v55  ;;  %v462_v4 = vadd.f32 %v1000_v58, %v1155_v24  ;;  %v940_v7 = vpack.c.bf16 %v622_v1, %v622_v1  ;;  %v922_v8 = vpack.c.bf16 %v604_v2, %v604_v2  ;;  %vm556_vm5 = vcmp.ge.f32.partialorder %v502_v59, 0.0  ;;  %v1017_v10 = vpop.f32.mrb[14].mxu1  ;;  %v456_v11 = vpop.f32.mrb[15].mxu0 }
 0x115   : > { %v588_v9 = vmul.f32 0.2, %v502_v59  ;;  %vm543_vm6 = vcmp.ge.f32.partialorder %v449_v60, 0.0  ;;  %v575_v12 = vmul.f32 0.2, %v449_v60  ;;  %vm559_vm7 = vcmp.ge.f32.partialorder %v513_v61, 0.0 }
 0x116   : > { %v591_v13 = vmul.f32 0.2, %v513_v61  ;;  %783 = vst.msk [vmem:[%s1166_s11 + $0x68] sm:$0xf] %vm756_vm0, %v940_v7  ;;  %765 = vst.msk [vmem:[%s1166_s11 + $0x20] sm:$0xf] %vm756_vm0, %v922_v8  ;;  %v526_v28 = vadd.f32 %v1016_v63, %v1155_v24  ;;  %v454_v30 = vadd.f32 %v1155_v24, %v453_v0  ;;  %v518_v31 = vadd.f32 %v1155_v24, %v517_v5 }
 0x117   : > { %v620_v14 = vsel %vm556_vm5, %v502_v59, %v588_v9  ;;  %vm541_vm8 = vcmp.ge.f32.partialorder %v441_v62, 0.0  ;;  %v573_v15 = vmul.f32 0.2, %v441_v62  ;;  %vm557_vm9 = vcmp.ge.f32.partialorder %v505_v3, 0.0  ;;  %v520_v16 = vpop.f32.mrb[15].mxu1 }
 0x118   : > { %v938_v17 = vpack.c.bf16 %v620_v14, %v620_v14  ;;  %v607_v18 = vsel %vm543_vm6, %v449_v60, %v575_v12  ;;  %v623_v19 = vsel %vm559_vm7, %v513_v61, %v591_v13  ;;  %v589_v20 = vmul.f32 0.2, %v505_v3 }
 0x119   : > { %v925_v21 = vpack.c.bf16 %v607_v18, %v607_v18  ;;  %v941_v22 = vpack.c.bf16 %v623_v19, %v623_v19  ;;  %v605_v23 = vsel %vm541_vm8, %v441_v62, %v573_v15  ;;  %vm546_vm10 = vcmp.ge.f32.partialorder %v462_v4, 0.0 }
 0x11a   : > { %781 = vst.msk [vmem:[%s1166_s11 + $0x60] sm:$0xf] %vm756_vm0, %v938_v17  ;;  %v923_v25 = vpack.c.bf16 %v605_v23, %v605_v23  ;;  %v621_v26 = vsel %vm557_vm9, %v505_v3, %v589_v20  ;;  %v578_v27 = vmul.f32 0.2, %v462_v4  ;;  %v465_v32 = vadd.f32 %v1001_v6, %v1155_v24 }
 0x11b   : > { %768 = vst.msk [vmem:[%s1166_s11 + $0x2c] sm:$0xf] %vm756_vm0, %v925_v21  ;;  %784 = vst.msk [vmem:[%s1166_s11 + $0x6c] sm:$0xf] %vm756_vm0, %v941_v22  ;;  %v939_v29 = vpack.c.bf16 %v621_v26, %v621_v26  ;;  %vm562_vm11 = vcmp.ge.f32.partialorder %v526_v28, 0.0  ;;  %v529_v35 = vadd.f32 %v1017_v10, %v1155_v24  ;;  %vm544_vm12 = vcmp.ge.f32.partialorder %v454_v30, 0.0 }
 0x11c   : > { %766 = vst.msk [vmem:[%s1166_s11 + $0x24] sm:$0xf] %vm756_vm0, %v923_v25  ;;  %v610_v33 = vsel %vm546_vm10, %v462_v4, %v578_v27  ;;  %v594_v34 = vmul.f32 0.2, %v526_v28  ;;  %v576_v37 = vmul.f32 0.2, %v454_v30  ;;  %v457_v47 = vadd.f32 %v1155_v24, %v456_v11 }
 0x11d   : > { %782 = vst.msk [vmem:[%s1166_s11 + $0x64] sm:$0xf] %vm756_vm0, %v939_v29  ;;  %v928_v36 = vpack.c.bf16 %v610_v33, %v610_v33  ;;  %vm560_vm13 = vcmp.ge.f32.partialorder %v518_v31, 0.0  ;;  %v592_v39 = vmul.f32 0.2, %v518_v31  ;;  %vm547_vm14 = vcmp.ge.f32.partialorder %v465_v32, 0.0 }
 0x11e   : > { %v626_v38 = vsel %vm562_vm11, %v526_v28, %v594_v34  ;;  %v579_v40 = vmul.f32 0.2, %v465_v32  ;;  %v608_v42 = vsel %vm544_vm12, %v454_v30, %v576_v37  ;;  %vm563_vm15 = vcmp.ge.f32.partialorder %v529_v35, 0.0 }
 0x11f   : > { %771 = vst.msk [vmem:[%s1166_s11 + $0x38] sm:$0xf] %vm756_vm0, %v928_v36  ;;  %v944_v41 = vpack.c.bf16 %v626_v38, %v626_v38  ;;  %v595_v43 = vmul.f32 0.2, %v529_v35  ;;  %v926_v44 = vpack.c.bf16 %v608_v42, %v608_v42  ;;  %v624_v45 = vsel %vm560_vm13, %v518_v31, %v592_v39 }
 0x120   : > { %v611_v46 = vsel %vm547_vm14, %v465_v32, %v579_v40  ;;  %v942_v48 = vpack.c.bf16 %v624_v45, %v624_v45  ;;  %v521_v51 = vadd.f32 %v1155_v24, %v520_v16  ;;  %vm545_vm1 = vcmp.ge.f32.partialorder %v457_v47, 0.0 }
 0x121   : > { %787 = vst.msk [vmem:[%s1166_s11 + $0x78] sm:$0xf] %vm756_vm0, %v944_v41  ;;  %v929_v49 = vpack.c.bf16 %v611_v46, %v611_v46  ;;  %v627_v50 = vsel %vm563_vm15, %v529_v35, %v595_v43  ;;  %769 = vst.msk [vmem:[%s1166_s11 + $0x30] sm:$0xf] %vm756_vm0, %v926_v44  ;;  %v577_v53 = vmul.f32 0.2, %v457_v47 }
 0x122   : > { %v945_v52 = vpack.c.bf16 %v627_v50, %v627_v50  ;;  %785 = vst.msk [vmem:[%s1166_s11 + $0x70] sm:$0xf] %vm756_vm0, %v942_v48  ;;  %vm561_vm2 = vcmp.ge.f32.partialorder %v521_v51, 0.0  ;;  %v593_v54 = vmul.f32 0.2, %v521_v51 }
 0x123   : > { %772 = vst.msk [vmem:[%s1166_s11 + $0x3c] sm:$0xf] %vm756_vm0, %v929_v49  ;;  %v609_v55 = vsel %vm545_vm1, %v457_v47, %v577_v53 }
 0x124   : > { %788 = vst.msk [vmem:[%s1166_s11 + $0x7c] sm:$0xf] %vm756_vm0, %v945_v52  ;;  %v927_v56 = vpack.c.bf16 %v609_v55, %v609_v55  ;;  %v625_v57 = vsel %vm561_vm2, %v521_v51, %v593_v54 }
 0x125   : > { %v943_v58 = vpack.c.bf16 %v625_v57, %v625_v57 }
 0x126   : > { %770 = vst.msk [vmem:[%s1166_s11 + $0x34] sm:$0xf] %vm756_vm0, %v927_v56 }
 0x127   : > { %786 = vst.msk [vmem:[%s1166_s11 + $0x74] sm:$0xf] %vm756_vm0, %v943_v58 }
 0x128 PF: > { %s13_s12 = sadd.s32 1, %s1072_s12  }
 0x129   : > { %p10_p4 = scmp.ge.s32.totalorder %s13_s12, 4  }
 0x12b   :  { %12 = sbr.rel (!%p10_p4) target bundleno = 1 (0x1), region = 62 }

// kernel: discriminator_forward.6
= control target key start
LH: loop header
LB: loop body
LE: loop exit
PB: predicated region body
PF: predicated region fallthrough
CT: control target
= control target key end

     0   :  { %s1728_s12 = smov 0   ;;  %s2016_s0 = inlined_call_operand.vmem [shape: bf16[2,64,1024], index: 0, kind: input, shape index: {}]   ;;  %s2017_s1 = inlined_call_operand.vmem [shape: bf16[1024,128], index: 1, kind: input, shape index: {}]   ;;  %s2018_s2 = inlined_call_operand.vmem [shape: f32[1,128], index: 2, kind: input, shape index: {}]   ;;  %s2019_s3 = inlined_call_operand.vmem [shape: bf16[2,64,128], index: 3, kind: output, shape index: {}]  }
   0x1 LB: > { %s1317_s13 = sadd.s32 4294967295, %s1706_s12   ;;  %p1321_p0 = scmp.ge.s32.totalorder %s1706_s12, 1  ;;  %s1706_s12 = sphi %s1728_s12, %s13_s12  }
   0x2   : > { %p137_p1 = scmp.lt.s32.totalorder %s1706_s12, 3 }
   0x4   : > { %p138_p2 = pnand %p1321_p0, %p137_p1 }
   0x5   : > { %v1634_v0 = vld [vmem:[%s2017_s1 + $0x40] sm:$0xff] (!%p138_p2)   ;;  %v1638_v4 = vld [vmem:[%s2017_s1 + $0x48] sm:$0xff] (!%p138_p2)   ;;  %v1642_v8 = vld [vmem:[%s2017_s1 + $0x50] sm:$0xff] (!%p138_p2)   ;;  %p161_p3 = scmp.lt.s32.totalorder (!%p138_p2), %s1317_s13, 1 }
   0x6   : > { %141 = sbr.rel (%p138_p2) target bundleno = 389 (0x185), region = 32  ;;  %v1635_v1 = vld [vmem:[%s2017_s1 + $0xc0] sm:$0xff] (!%p138_p2)   ;;  %1466 = vmatprep.subr.bf16.mxu0 (!%p138_p2), %v1634_v0  ;;  %v1639_v5 = vld [vmem:[%s2017_s1 + $0xc8] sm:$0xff] (!%p138_p2)   ;;  %v1643_v9 = vld [vmem:[%s2017_s1 + $0xd0] sm:$0xff] (!%p138_p2)  }
   0x7   : > { %v1636_v2 = vld [vmem:[%s2017_s1] sm:$0xff] (!%p138_p2)   ;;  %1506 = vmatprep.subr.bf16.mxu1 (!%p138_p2), %v1635_v1  ;;  %v1640_v6 = vld [vmem:[%s2017_s1 + $0x8] sm:$0xff] (!%p138_p2)   ;;  %v1644_v10 = vld [vmem:[%s2017_s1 + $0x10] sm:$0xff] (!%p138_p2)  }
   0x8   : > { %v1637_v3 = vld [vmem:[%s2017_s1 + $0x80] sm:$0xff] (!%p138_p2)   ;;  %1467 = vmatpush3.bf16.msra.mxu0 (!%p138_p2), %v1636_v2  ;;  %v1641_v7 = vld [vmem:[%s2017_s1 + $0x88] sm:$0xff] (!%p138_p2)   ;;  %v1645_v11 = vld [vmem:[%s2017_s1 + $0x90] sm:$0xff] (!%p138_p2)  }
   0x9   : > { %1507 = vmatpush3.bf16.msra.mxu1 (!%p138_p2), %v1637_v3  ;;  %1468 = vmatprep.subr.bf16.mxu0 (!%p138_p2), %v1638_v4  ;;  %v1646_v12 = vld [vmem:[%s2017_s1 + $0x58] sm:$0xff] (!%p138_p2)   ;;  %v1650_v16 = vld [vmem:[%s2017_s1 + $0x60] sm:$0xff] (!%p138_p2)   ;;  %v1654_v20 = vld [vmem:[%s2017_s1 + $0x68] sm:$0xff] (!%p138_p2)  }
   0xa   : > { %1508 = vmatprep.subr.bf16.mxu1 (!%p138_p2), %v1639_v5  ;;  %v1647_v13 = vld [vmem:[%s2017_s1 + $0xd8] sm:$0xff] (!%p138_p2)   ;;  %v1651_v17 = vld [vmem:[%s2017_s1 + $0xe0] sm:$0xff] (!%p138_p2)   ;;  %v1655_v21 = vld [vmem:[%s2017_s1 + $0xe8] sm:$0xff] (!%p138_p2)  }
   0xb   : > { %v1648_v14 = vld [vmem:[%s2017_s1 + $0x18] sm:$0xff] (!%p138_p2)   ;;  %v1652_v18 = vld [vmem:[%s2017_s1 + $0x20] sm:$0xff] (!%p138_p2)   ;;  %v1656_v22 = vld [vmem:[%s2017_s1 + $0x28] sm:$0xff] (!%p138_p2)  }
   0xc   : > { %1469 = vmatpush3.bf16.msra.mxu0 (!%p138_p2), %v1640_v6  ;;  %v1649_v15 = vld [vmem:[%s2017_s1 + $0x98] sm:$0xff] (!%p138_p2)   ;;  %v1653_v19 = vld [vmem:[%s2017_s1 + $0xa0] sm:$0xff] (!%p138_p2)   ;;  %v1657_v23 = vld [vmem:[%s2017_s1 + $0xa8] sm:$0xff] (!%p138_p2)  }
   0xd   : > { %1509 = vmatpush3.bf16.msra.mxu1 %v1641_v7  ;;  %1470 = vmatprep.subr.bf16.mxu0 %v1642_v8  ;;  %s2021_s13 = smov (!%p161_p3, %s1317_s13), 1  ;;  %v1658_v24 = vld [vmem:[%s2017_s1 + $0x70] sm:$0xff]   ;;  %v1662_v28 = vld [vmem:[%s2017_s1 + $0x78] sm:$0xff]   ;;  %v1666_v40 = vld [vmem:[%s2017_s1 + $0x140] sm:$0xff]  }
   0xe   : > { %1510 = vmatprep.subr.bf16.mxu1 %v1643_v9  ;;  %v1659_v25 = vld [vmem:[%s2017_s1 + $0xf0] sm:$0xff]   ;;  %s1433_s18 = sshll.u32 %s2021_s13, 8  ;;  %v1663_v29 = vld [vmem:[%s2017_s1 + $0xf8] sm:$0xff]   ;;  %v1667_v41 = vld [vmem:[%s2017_s1 + $0x1c0] sm:$0xff]  }
   0xf   : > { %v1660_v26 = vld [vmem:[%s2017_s1 + $0x30] sm:$0xff]   ;;  %s1836_s27 = scalar_lea.vmem %s2016_s0, %s1433_s18  ;;  %v1664_v30 = vld [vmem:[%s2017_s1 + $0x38] sm:$0xff]   ;;  %v1668_v42 = vld [vmem:[%s2017_s1 + $0x100] sm:$0xff]  }
  0x10   : > { %1471 = vmatpush3.bf16.msra.mxu0 %v1644_v10  ;;  %v1661_v27 = vld [vmem:[%s2017_s1 + $0xb0] sm:$0xff]   ;;  %v1665_v31 = vld [vmem:[%s2017_s1 + $0xb8] sm:$0xff]   ;;  %v172_v32 = vld [vmem:[%s1836_s27] sm:$0xff] }
  0x11   : > { %1511 = vmatpush3.bf16.msra.mxu1 %v1645_v11  ;;  %1472 = vmatprep.subr.bf16.mxu0 %v1646_v12  ;;  %v176_v33 = vld [vmem:[%s1836_s27 + $0x20] sm:$0xff]  ;;  %v173_v34 = vld [vmem:[%s1836_s27 + $0x8] sm:$0xff]  ;;  %v1674_v56 = vld [vmem:[%s2017_s1 + $0x150] sm:$0xff]  }
  0x12   : > { %1512 = vmatprep.subr.bf16.mxu1 %v1647_v13  ;;  %v1327_v35 = vcombine.low %v172_v32, %v176_v33  ;;  %v1328_v36 = vcombine.high %v172_v32, %v176_v33  ;;  %v177_v37 = vld [vmem:[%s1836_s27 + $0x28] sm:$0xff]  ;;  %v1669_v43 = vld [vmem:[%s2017_s1 + $0x180] sm:$0xff]   ;;  %v1675_v57 = vld [vmem:[%s2017_s1 + $0x1d0] sm:$0xff]  }
  0x13   : > { %v1329_v38 = vcombine.low %v173_v34, %v177_v37  ;;  %v1330_v39 = vcombine.high %v173_v34, %v177_v37  ;;  %v1670_v44 = vld [vmem:[%s2017_s1 + $0x148] sm:$0xff]   ;;  %v180_v48 = vld [vmem:[%s1836_s27 + $0x40] sm:$0xff]  ;;  %v1676_v58 = vld [vmem:[%s2017_s1 + $0x110] sm:$0xff]  }
  0x14   : > { %1473 = vmatpush3.bf16.msra.mxu0 %v1648_v14  ;;  %915 = vmatprep.mubr.bf16.mxu0 %v1328_v36  ;;  %v1671_v45 = vld [vmem:[%s2017_s1 + $0x1c8] sm:$0xff]   ;;  %v184_v49 = vld [vmem:[%s1836_s27 + $0x60] sm:$0xff]  ;;  %v1677_v59 = vld [vmem:[%s2017_s1 + $0x190] sm:$0xff]  }
  0x15   : > { %1513 = vmatpush3.bf16.msra.mxu1 %v1649_v15  ;;  %1474 = vmatprep.subr.bf16.mxu0 %v1650_v16  ;;  %v1672_v46 = vld [vmem:[%s2017_s1 + $0x108] sm:$0xff]   ;;  %v1336_v50 = vcombine.high %v180_v48, %v184_v49  ;;  %v1335_v53 = vcombine.low %v180_v48, %v184_v49  ;;  %v1678_v60 = vld [vmem:[%s2017_s1 + $0x158] sm:$0xff]   ;;  %v188_v0 = vld [vmem:[%s1836_s27 + $0x80] sm:$0xff] }
  0x16   : > { %1514 = vmatprep.subr.bf16.mxu1 %v1651_v17  ;;  %980 = vmatprep.mubr.bf16.mxu1 %v1330_v39  ;;  %v1673_v47 = vld [vmem:[%s2017_s1 + $0x188] sm:$0xff]   ;;  %v1679_v61 = vld [vmem:[%s2017_s1 + $0x1d8] sm:$0xff]   ;;  %v192_v1 = vld [vmem:[%s1836_s27 + $0xa0] sm:$0xff] }
  0x17   : > { %v181_v51 = vld [vmem:[%s1836_s27 + $0x48] sm:$0xff]  ;;  %v1680_v62 = vld [vmem:[%s2017_s1 + $0x118] sm:$0xff]   ;;  %v1344_v4 = vcombine.high %v188_v0, %v192_v1  ;;  %v1343_v6 = vcombine.low %v188_v0, %v192_v1  ;;  %v1682_v8 = vld [vmem:[%s2017_s1 + $0x160] sm:$0xff]  }
  0x18   : > { %1475 = vmatpush3.bf16.msra.mxu0 %v1652_v18  ;;  %v185_v52 = vld [vmem:[%s1836_s27 + $0x68] sm:$0xff]  ;;  %v1681_v63 = vld [vmem:[%s2017_s1 + $0x198] sm:$0xff]   ;;  %v1683_v9 = vld [vmem:[%s2017_s1 + $0x1e0] sm:$0xff]  }
  0x19   : > { %1515 = vmatpush3.bf16.msra.mxu1 %v1653_v19  ;;  %1476 = vmatprep.subr.bf16.mxu0 %v1654_v20  ;;  %v1338_v54 = vcombine.high %v181_v51, %v185_v52  ;;  %v1337_v55 = vcombine.low %v181_v51, %v185_v52  ;;  %v189_v2 = vld [vmem:[%s1836_s27 + $0x88] sm:$0xff]  ;;  %v1684_v10 = vld [vmem:[%s2017_s1 + $0x120] sm:$0xff]   ;;  %v174_v32 = vld [vmem:[%s1836_s27 + $0x10] sm:$0xff] }
  0x1a   : > { %1516 = vmatprep.subr.bf16.mxu1 %v1655_v21  ;;  %v193_v3 = vld [vmem:[%s1836_s27 + $0xa8] sm:$0xff]  ;;  %v1685_v11 = vld [vmem:[%s2017_s1 + $0x1a0] sm:$0xff]   ;;  %v178_v33 = vld [vmem:[%s1836_s27 + $0x30] sm:$0xff] }
  0x1b   : > { %v1346_v5 = vcombine.high %v189_v2, %v193_v3  ;;  %v1345_v7 = vcombine.low %v189_v2, %v193_v3  ;;  %v1686_v12 = vld [vmem:[%s2017_s1 + $0x168] sm:$0xff]   ;;  %v196_v16 = vld [vmem:[%s1836_s27 + $0xc0] sm:$0xff]  ;;  %v1331_v34 = vcombine.low %v174_v32, %v178_v33  ;;  %v175_v36 = vld [vmem:[%s1836_s27 + $0x18] sm:$0xff] }
  0x1c   : > { %1477 = vmatpush3.bf16.msra.mxu0 %v1656_v22  ;;  %v1687_v13 = vld [vmem:[%s2017_s1 + $0x1e8] sm:$0xff]   ;;  %v200_v17 = vld [vmem:[%s1836_s27 + $0xe0] sm:$0xff]  ;;  %v179_v37 = vld [vmem:[%s1836_s27 + $0x38] sm:$0xff] }
  0x1d   : > { %1517 = vmatpush3.bf16.msra.mxu1 %v1657_v23  ;;  %1478 = vmatprep.subr.bf16.mxu0 %v1658_v24  ;;  %v1688_v14 = vld [vmem:[%s2017_s1 + $0x128] sm:$0xff]   ;;  %v1352_v19 = vcombine.high %v196_v16, %v200_v17  ;;  %v1351_v21 = vcombine.low %v196_v16, %v200_v17  ;;  %v1690_v24 = vld [vmem:[%s2017_s1 + $0x170] sm:$0xff]   ;;  %v1333_v39 = vcombine.low %v175_v36, %v179_v37  ;;  %v191_v48 = vld [vmem:[%s1836_s27 + $0x98] sm:$0xff] }
  0x1e   : > { %1518 = vmatprep.subr.bf16.mxu1 %v1659_v25  ;;  %v1689_v15 = vld [vmem:[%s2017_s1 + $0x1a8] sm:$0xff]   ;;  %v1691_v25 = vld [vmem:[%s2017_s1 + $0x1f0] sm:$0xff]   ;;  %v195_v49 = vld [vmem:[%s1836_s27 + $0xb8] sm:$0xff] }
  0x1f   : > { %v197_v18 = vld [vmem:[%s1836_s27 + $0xc8] sm:$0xff]  ;;  %v1326_v2 = vld [vmem:[%s2018_s2] ss:$0 sm:$0xff] }
  0x20   : > { %1479 = vmatpush3.bf16.msra.mxu0 %v1660_v26  ;;  %v201_v20 = vld [vmem:[%s1836_s27 + $0xe8] sm:$0xff]  ;;  %v1692_v26 = vld [vmem:[%s2017_s1 + $0x130] sm:$0xff]  }
  0x21   : > { %1519 = vmatpush3.bf16.msra.mxu1 %v1661_v27  ;;  %1480 = vmatprep.subr.bf16.mxu0 %v1662_v28  ;;  %v1354_v22 = vcombine.high %v197_v18, %v201_v20  ;;  %v1353_v23 = vcombine.low %v197_v18, %v201_v20  ;;  %v1693_v27 = vld [vmem:[%s2017_s1 + $0x1b0] sm:$0xff]   ;;  %v1694_v28 = vld [vmem:[%s2017_s1 + $0x178] sm:$0xff]  }
  0x22   : > { %1520 = vmatprep.subr.bf16.mxu1 %v1663_v29  ;;  %v1695_v29 = vld [vmem:[%s2017_s1 + $0x1f8] sm:$0xff]  }
  0x24   : > { %1481 = vmatpush3.bf16.msra.mxu0 %v1664_v30  ;;  %v1696_v30 = vld [vmem:[%s2017_s1 + $0x138] sm:$0xff]  }
  0x25   : > { %1521 = vmatpush3.bf16.msra.mxu1 %v1665_v31  ;;  %1546 = vmatprep.subr.bf16.mxu0 %v1666_v40  ;;  %v1697_v31 = vld [vmem:[%s2017_s1 + $0x1b8] sm:$0xff]   ;;  %v1334_v40 = vcombine.high %v175_v36, %v179_v37 }
  0x26   : > { %1586 = vmatprep.subr.bf16.mxu1 %v1667_v41  ;;  %v186_v41 = vld [vmem:[%s1836_s27 + $0x70] sm:$0xff] }
  0x27   : > { %916 = vmatmul.mubr.bf16.vlgmr.msra.gmra.mrb[0].mxu0 %v1327_v35  ;;  %v1332_v35 = vcombine.high %v174_v32, %v178_v33 }
  0x28   : > { %981 = vmatmul.mubr.bf16.vlgmr.msra.gmra.mrb[0].mxu1 %v1329_v38  ;;  %1547 = vmatpush3.bf16.msra.mxu0 %v1668_v42  ;;  %v182_v38 = vld [vmem:[%s1836_s27 + $0x50] sm:$0xff]  ;;  %v183_v42 = vld [vmem:[%s1836_s27 + $0x58] sm:$0xff] }
  0x29   : > { %1587 = vmatpush3.bf16.msra.mxu1 %v1669_v43  ;;  %1548 = vmatprep.subr.bf16.mxu0 %v1670_v44  ;;  %v187_v43 = vld [vmem:[%s1836_s27 + $0x78] sm:$0xff]  ;;  %v1340_v44 = vcombine.high %v182_v38, %v186_v41 }
  0x2a   : > { %1588 = vmatprep.subr.bf16.mxu1 %v1671_v45  ;;  %923 = vmatprep.mubr.bf16.mxu0 %v1336_v50  ;;  %v1342_v45 = vcombine.high %v183_v42, %v187_v43  ;;  %v1339_v50 = vcombine.low %v182_v38, %v186_v41  ;;  %v1341_v51 = vcombine.low %v183_v42, %v187_v43 }
  0x2b   : > { %988 = vmatprep.mubr.bf16.mxu1 %v1338_v54  ;;  %v198_v54 = vld [vmem:[%s1836_s27 + $0xd0] sm:$0xff] }
  0x2c   : > { %1549 = vmatpush3.bf16.msra.mxu0 %v1672_v46  ;;  %v190_v46 = vld [vmem:[%s1836_s27 + $0x90] sm:$0xff] }
  0x2d   : > { %1589 = vmatpush3.bf16.msra.mxu1 %v1673_v47  ;;  %1550 = vmatprep.subr.bf16.mxu0 %v1674_v56  ;;  %v194_v47 = vld [vmem:[%s1836_s27 + $0xb0] sm:$0xff]  ;;  %v199_v56 = vld [vmem:[%s1836_s27 + $0xd8] sm:$0xff] }
  0x2e   : > { %1590 = vmatprep.subr.bf16.mxu1 %v1675_v57  ;;  %v1348_v52 = vcombine.high %v190_v46, %v194_v47  ;;  %v203_v57 = vld [vmem:[%s1836_s27 + $0xf8] sm:$0xff] }
  0x2f   : > { %924 = vmatmul.mubr.bf16.gmra.mrb[4].mxu0 %v1335_v53  ;;  %v1350_v53 = vcombine.high %v191_v48, %v195_v49 }
  0x30   : > { %989 = vmatmul.mubr.bf16.gmra.mrb[4].mxu1 %v1337_v55  ;;  %1551 = vmatpush3.bf16.msra.mxu0 %v1676_v58  ;;  %v202_v55 = vld [vmem:[%s1836_s27 + $0xf0] sm:$0xff]  ;;  %v1347_v58 = vcombine.low %v190_v46, %v194_v47  ;;  %s1434_s27 = sshll.u32 %s2021_s13, 5 }
  0x31   : > { %1591 = vmatpush3.bf16.msra.mxu1 %v1677_v59  ;;  %1552 = vmatprep.subr.bf16.mxu0 %v1678_v60  ;;  %v1349_v59 = vcombine.low %v191_v48, %v195_v49  ;;  %v1356_v60 = vcombine.high %v198_v54, %v202_v55  ;;  %s170_s13 = scalar_lea.vmem %s2019_s3, %s1434_s27 }
  0x32   : > { %1592 = vmatprep.subr.bf16.mxu1 %v1679_v61  ;;  %931 = vmatprep.mubr.bf16.mxu0 %v1344_v4  ;;  %v1358_v61 = vcombine.high %v199_v56, %v203_v57 }
  0x33   : > { %996 = vmatprep.mubr.bf16.mxu1 %v1346_v5 }
  0x34   : > { %1553 = vmatpush3.bf16.msra.mxu0 %v1680_v62  ;;  %v1355_v62 = vcombine.low %v198_v54, %v202_v55 }
  0x35   : > { %1593 = vmatpush3.bf16.msra.mxu1 %v1681_v63  ;;  %1554 = vmatprep.subr.bf16.mxu0 %v1682_v8  ;;  %v1357_v63 = vcombine.low %v199_v56, %v203_v57 }
  0x36   : > { %1594 = vmatprep.subr.bf16.mxu1 %v1683_v9 }
  0x37   : > { %932 = vmatmul.mubr.bf16.gmra.mrb[8].mxu0 %v1343_v6 }
  0x38   : > { %997 = vmatmul.mubr.bf16.gmra.mrb[8].mxu1 %v1345_v7  ;;  %1555 = vmatpush3.bf16.msra.mxu0 %v1684_v10 }
  0x39   : > { %1595 = vmatpush3.bf16.msra.mxu1 %v1685_v11  ;;  %1556 = vmatprep.subr.bf16.mxu0 %v1686_v12 }
  0x3a   : > { %1596 = vmatprep.subr.bf16.mxu1 %v1687_v13  ;;  %939 = vmatprep.mubr.bf16.mxu0 %v1352_v19 }
  0x3b   : > { %1004 = vmatprep.mubr.bf16.mxu1 %v1354_v22 }
  0x3c   : > { %1557 = vmatpush3.bf16.msra.mxu0 %v1688_v14 }
  0x3d   : > { %1597 = vmatpush3.bf16.msra.mxu1 %v1689_v15  ;;  %1558 = vmatprep.subr.bf16.mxu0 %v1690_v24 }
  0x3e   : > { %1598 = vmatprep.subr.bf16.mxu1 %v1691_v25 }
  0x3f   : > { %940 = vmatmul.mubr.bf16.gmra.mrb[12].mxu0 %v1351_v21 }
  0x40   : > { %1005 = vmatmul.mubr.bf16.gmra.mrb[12].mxu1 %v1353_v23  ;;  %1559 = vmatpush3.bf16.msra.mxu0 %v1692_v26 }
  0x41   : > { %1599 = vmatpush3.bf16.msra.mxu1 %v1693_v27  ;;  %1560 = vmatprep.subr.bf16.mxu0 %v1694_v28 }
  0x42   : > { %1600 = vmatprep.subr.bf16.mxu1 %v1695_v29  ;;  %1045 = vmatprep.mubr.bf16.mxu0 %v1332_v35 }
  0x43   : > { %1110 = vmatprep.mubr.bf16.mxu1 %v1334_v40 }
  0x44   : > { %1561 = vmatpush3.bf16.msra.mxu0 %v1696_v30 }
  0x45   : > { %1601 = vmatpush3.bf16.msra.mxu1 %v1697_v31 }
  0x47   : > { %1046 = vmatmul.mubr.bf16.vlgmr.msra.gmra.mrb[16].mxu0 %v1331_v34 }
  0x48   : > { %1111 = vmatmul.mubr.bf16.vlgmr.msra.gmra.mrb[16].mxu1 %v1333_v39  ;;  %1053 = vmatprep.mubr.bf16.mxu0 %v1340_v44 }
  0x49   : > { %1118 = vmatprep.mubr.bf16.mxu1 %v1342_v45 }
  0x4f   : > { %1054 = vmatmul.mubr.bf16.gmra.mrb[20].mxu0 %v1339_v50 }
  0x50   : > { %1119 = vmatmul.mubr.bf16.gmra.mrb[20].mxu1 %v1341_v51  ;;  %1061 = vmatprep.mubr.bf16.mxu0 %v1348_v52 }
  0x51   : > { %1126 = vmatprep.mubr.bf16.mxu1 %v1350_v53 }
  0x57   : > { %1062 = vmatmul.mubr.bf16.gmra.mrb[24].mxu0 %v1347_v58 }
  0x58   : > { %1127 = vmatmul.mubr.bf16.gmra.mrb[24].mxu1 %v1349_v59  ;;  %1069 = vmatprep.mubr.bf16.mxu0 %v1356_v60 }
  0x59   : > { %1134 = vmatprep.mubr.bf16.mxu1 %v1358_v61 }
  0x5f   : > { %1070 = vmatmul.mubr.bf16.gmra.mrb[28].mxu0 %v1355_v62 }
  0x60   : > { %1135 = vmatmul.mubr.bf16.gmra.mrb[28].mxu1 %v1357_v63 }
  0xfa   : > { %v1482_v0 = vpop.f32.mrb[0].mxu0 }
  0xfb   : > { %v1522_v1 = vpop.f32.mrb[0].mxu1  ;;  %v1483_v3 = vpop.f32.mrb[1].mxu0 }
  0xfc   : > { %v1484_v4 = vadd.f32 %v1483_v3, %v1482_v0  ;;  %v1523_v5 = vpop.f32.mrb[1].mxu1  ;;  %v1485_v6 = vpop.f32.mrb[2].mxu0 }
  0xfd   : > { %v1524_v7 = vadd.f32 %v1523_v5, %v1522_v1  ;;  %v1525_v8 = vpop.f32.mrb[2].mxu1  ;;  %v1486_v9 = vpop.f32.mrb[3].mxu0 }
  0xfe   : > { %v918_v10 = vadd.f32 %v1484_v4, %v1326_v2  ;;  %v1487_v11 = vadd.f32 %v1486_v9, %v1485_v6  ;;  %v1526_v12 = vpop.f32.mrb[3].mxu1 }
  0xff   : > { %v1527_v13 = vadd.f32 %v1526_v12, %v1525_v8 }
 0x100   : > { %v983_v14 = vadd.f32 %v1524_v7, %v918_v10  ;;  %v921_v15 = vadd.f32 %v1487_v11, %v1326_v2 }
 0x102   : > { %v1975_v16 = vadd.f32 %v1527_v13, %v921_v15  ;;  %v1488_v17 = vpop.f32.mrb[4].mxu0 }
 0x103   : > { %v1528_v18 = vpop.f32.mrb[4].mxu1  ;;  %v1489_v19 = vpop.f32.mrb[5].mxu0 }
 0x104   : > { %v1490_v20 = vadd.f32 %v1489_v19, %v1488_v17  ;;  %v1529_v21 = vpop.f32.mrb[5].mxu1  ;;  %v1491_v22 = vpop.f32.mrb[6].mxu0 }
 0x105   : > { %v1530_v23 = vadd.f32 %v1529_v21, %v1528_v18  ;;  %v1531_v24 = vpop.f32.mrb[6].mxu1  ;;  %v1492_v25 = vpop.f32.mrb[7].mxu0 }
 0x106   : > { %v926_v26 = vadd.f32 %v1490_v20, %v1326_v2  ;;  %v1493_v27 = vadd.f32 %v1492_v25, %v1491_v22  ;;  %v1532_v28 = vpop.f32.mrb[7].mxu1 }
 0x107   : > { %v1533_v29 = vadd.f32 %v1532_v28, %v1531_v24 }
 0x108   : > { %v991_v30 = vadd.f32 %v1530_v23, %v926_v26  ;;  %v929_v31 = vadd.f32 %v1493_v27, %v1326_v2 }
 0x10a   : > { %v1977_v32 = vadd.f32 %v1533_v29, %v929_v31  ;;  %v1494_v33 = vpop.f32.mrb[8].mxu0 }
 0x10b   : > { %v1534_v34 = vpop.f32.mrb[8].mxu1  ;;  %v1495_v35 = vpop.f32.mrb[9].mxu0 }
 0x10c   : > { %v1535_v36 = vpop.f32.mrb[9].mxu1  ;;  %v1496_v37 = vadd.f32 %v1495_v35, %v1494_v33  ;;  %v1497_v39 = vpop.f32.mrb[10].mxu0 }
 0x10d   : > { %v1536_v38 = vadd.f32 %v1535_v36, %v1534_v34  ;;  %v1537_v40 = vpop.f32.mrb[10].mxu1  ;;  %v1498_v41 = vpop.f32.mrb[11].mxu0 }
 0x10e   : > { %v1538_v42 = vpop.f32.mrb[11].mxu1  ;;  %v934_v43 = vadd.f32 %v1496_v37, %v1326_v2  ;;  %v1499_v44 = vadd.f32 %v1498_v41, %v1497_v39 }
 0x10f   : > { %v1539_v45 = vadd.f32 %v1538_v42, %v1537_v40 }
 0x110   : > { %v1979_v46 = vadd.f32 %v1536_v38, %v934_v43  ;;  %v937_v47 = vadd.f32 %v1499_v44, %v1326_v2 }
 0x112   : > { %v1981_v48 = vadd.f32 %v1539_v45, %v937_v47  ;;  %v1500_v49 = vpop.f32.mrb[12].mxu0 }
 0x113   : > { %v1540_v50 = vpop.f32.mrb[12].mxu1  ;;  %v1501_v51 = vpop.f32.mrb[13].mxu0 }
 0x114   : > { %v1502_v52 = vadd.f32 %v1501_v51, %v1500_v49  ;;  %v1541_v53 = vpop.f32.mrb[13].mxu1  ;;  %v1503_v54 = vpop.f32.mrb[14].mxu0 }
 0x115   : > { %v1542_v55 = vadd.f32 %v1541_v53, %v1540_v50  ;;  %v1543_v56 = vpop.f32.mrb[14].mxu1  ;;  %v1504_v57 = vpop.f32.mrb[15].mxu0 }
 0x116   : > { %v942_v58 = vadd.f32 %v1502_v52, %v1326_v2  ;;  %v1505_v59 = vadd.f32 %v1504_v57, %v1503_v54  ;;  %v1544_v60 = vpop.f32.mrb[15].mxu1 }
 0x117   : > { %v1545_v61 = vadd.f32 %v1544_v60, %v1543_v56 }
 0x118   : > { %v1983_v62 = vadd.f32 %v1542_v55, %v942_v58  ;;  %v945_v63 = vadd.f32 %v1505_v59, %v1326_v2 }
 0x11a   : > { %v1985_v0 = vadd.f32 %v1545_v61, %v945_v63  ;;  %v1562_v1 = vpop.f32.mrb[16].mxu0 }
 0x11b   : > { %v1602_v3 = vpop.f32.mrb[16].mxu1  ;;  %v1563_v4 = vpop.f32.mrb[17].mxu0 }
 0x11c   : > { %v1564_v5 = vadd.f32 %v1563_v4, %v1562_v1  ;;  %v1603_v6 = vpop.f32.mrb[17].mxu1  ;;  %v1565_v7 = vpop.f32.mrb[18].mxu0 }
 0x11d   : > { %v1604_v8 = vadd.f32 %v1603_v6, %v1602_v3  ;;  %v1605_v9 = vpop.f32.mrb[18].mxu1  ;;  %v1566_v10 = vpop.f32.mrb[19].mxu0 }
 0x11e   : > { %v1048_v11 = vadd.f32 %v1564_v5, %v983_v14  ;;  %v1567_v12 = vadd.f32 %v1566_v10, %v1565_v7  ;;  %v1606_v13 = vpop.f32.mrb[19].mxu1 }
 0x11f   : > { %v1607_v15 = vadd.f32 %v1606_v13, %v1605_v9 }
 0x120   : > { %v1987_v17 = vadd.f32 %v1604_v8, %v1048_v11  ;;  %v1051_v18 = vadd.f32 %v1567_v12, %v1975_v16 }
 0x122   : > { %v1990_v2 = vadd.f32 %v1607_v15, %v1051_v18  ;;  %v1568_v19 = vpop.f32.mrb[20].mxu0 }
 0x123   : > { %v1608_v20 = vpop.f32.mrb[20].mxu1  ;;  %v1569_v21 = vpop.f32.mrb[21].mxu0 }
 0x124   : > { %v1143_v22 = vadd.f32 %v1990_v2, %v1987_v17  ;;  %v1570_v23 = vadd.f32 %v1569_v21, %v1568_v19  ;;  %v1609_v24 = vpop.f32.mrb[21].mxu1  ;;  %v1571_v25 = vpop.f32.mrb[22].mxu0 }
 0x125   : > { %v1610_v26 = vadd.f32 %v1609_v24, %v1608_v20  ;;  %v1611_v14 = vpop.f32.mrb[22].mxu1  ;;  %v1572_v27 = vpop.f32.mrb[23].mxu0 }
 0x126   : > { %v1056_v28 = vadd.f32 %v1570_v23, %v991_v30  ;;  %v1573_v29 = vadd.f32 %v1572_v27, %v1571_v25  ;;  %v1612_v31 = vpop.f32.mrb[23].mxu1 }
 0x127   : > { %v1613_v33 = vadd.f32 %v1612_v31, %v1611_v14 }
 0x128   : > { %v1121_v34 = vadd.f32 %v1610_v26, %v1056_v28  ;;  %v1059_v16 = vadd.f32 %v1573_v29, %v1977_v32 }
 0x12a   : > { %v1144_v35 = vadd.f32 %v1143_v22, %v1121_v34  ;;  %v1124_v36 = vadd.f32 %v1613_v33, %v1059_v16  ;;  %v1574_v37 = vpop.f32.mrb[24].mxu0 }
 0x12b   : > { %v1614_v38 = vpop.f32.mrb[24].mxu1  ;;  %v1575_v39 = vpop.f32.mrb[25].mxu0 }
 0x12c   : > { %v1145_v40 = vadd.f32 %v1144_v35, %v1124_v36  ;;  %v1576_v41 = vadd.f32 %v1575_v39, %v1574_v37  ;;  %v1615_v42 = vpop.f32.mrb[25].mxu1  ;;  %v1577_v43 = vpop.f32.mrb[26].mxu0 }
 0x12d   : > { %v1616_v44 = vadd.f32 %v1615_v42, %v1614_v38  ;;  %v1617_v45 = vpop.f32.mrb[26].mxu1  ;;  %v1578_v47 = vpop.f32.mrb[27].mxu0 }
 0x12e   : > { %v1064_v30 = vadd.f32 %v1576_v41, %v1979_v46  ;;  %v1579_v49 = vadd.f32 %v1578_v47, %v1577_v43  ;;  %v1618_v50 = vpop.f32.mrb[27].mxu1 }
 0x12f   : > { %v1619_v51 = vadd.f32 %v1618_v50, %v1617_v45 }
 0x130   : > { %v1129_v52 = vadd.f32 %v1616_v44, %v1064_v30  ;;  %v1067_v32 = vadd.f32 %v1579_v49, %v1981_v48 }
 0x132   : > { %v1146_v53 = vadd.f32 %v1145_v40, %v1129_v52  ;;  %v1132_v54 = vadd.f32 %v1619_v51, %v1067_v32  ;;  %v1580_v55 = vpop.f32.mrb[28].mxu0 }
 0x133   : > { %v1620_v56 = vpop.f32.mrb[28].mxu1  ;;  %v1581_v57 = vpop.f32.mrb[29].mxu0 }
 0x134   : > { %v1147_v58 = vadd.f32 %v1146_v53, %v1132_v54  ;;  %v1582_v59 = vadd.f32 %v1581_v57, %v1580_v55  ;;  %v1621_v60 = vpop.f32.mrb[29].mxu1  ;;  %v1583_v61 = vpop.f32.mrb[30].mxu0 }
 0x135   : > { %v1622_v63 = vadd.f32 %v1621_v60, %v1620_v56  ;;  %v1623_v1 = vpop.f32.mrb[30].mxu1  ;;  %v1584_v3 = vpop.f32.mrb[31].mxu0 }
 0x136   : > { %v1072_v46 = vadd.f32 %v1582_v59, %v1983_v62  ;;  %v1585_v4 = vadd.f32 %v1584_v3, %v1583_v61  ;;  %v1624_v5 = vpop.f32.mrb[31].mxu1 }
 0x137   : > { %v1625_v6 = vadd.f32 %v1624_v5, %v1623_v1 }
 0x138   : > { %v1137_v7 = vadd.f32 %v1622_v63, %v1072_v46  ;;  %v1075_v48 = vadd.f32 %v1585_v4, %v1985_v0 }
 0x13a   : > { %v1148_v8 = vadd.f32 %v1147_v58, %v1137_v7  ;;  %v1140_v9 = vadd.f32 %v1625_v6, %v1075_v48 }
 0x13c   : > { %v1149_v10 = vadd.f32 %v1148_v8, %v1140_v9 }
 0x13e   : > { %v1150_v11 = vrot.slane %v1149_v10, 4 }
 0x140   : > { %v1151_v12 = vadd.f32 %v1150_v11, %v1149_v10 }
 0x142   : > { %v1152_v13 = vrot.slane %v1151_v12, 2 }
 0x144   : > { %v1153_v15 = vadd.f32 %v1152_v13, %v1151_v12 }
 0x146   : > { %v1154_v18 = vrot.slane %v1153_v15, 1 }
 0x148   : > { %v1155_v19 = vadd.f32 %v1154_v18, %v1153_v15 }
 0x14a   : > { %v1157_v20 = vmul.f32 0.015625, %v1155_v19 }
 0x14c   : > { %v1158_v21 = vsub.f32 %v1987_v17, %v1157_v20  ;;  %v1159_v62 = vsub.f32 %v1990_v2, %v1157_v20  ;;  %v1160_v22 = vsub.f32 %v1121_v34, %v1157_v20  ;;  %v1161_v23 = vsub.f32 %v1124_v36, %v1157_v20 }
 0x14d   : > { %v1162_v24 = vsub.f32 %v1129_v52, %v1157_v20  ;;  %v1163_v25 = vsub.f32 %v1132_v54, %v1157_v20  ;;  %v1164_v26 = vsub.f32 %v1137_v7, %v1157_v20  ;;  %v1165_v0 = vsub.f32 %v1140_v9, %v1157_v20 }
 0x14e   : > { %v1166_v14 = vmul.f32 %v1158_v21, %v1158_v21  ;;  %v1167_v27 = vmul.f32 %v1159_v62, %v1159_v62  ;;  %v1168_v28 = vmul.f32 %v1160_v22, %v1160_v22  ;;  %v1169_v31 = vmul.f32 %v1161_v23, %v1161_v23 }
 0x14f   : > { %v1170_v16 = vmul.f32 %v1162_v24, %v1162_v24  ;;  %v1171_v37 = vmul.f32 %v1163_v25, %v1163_v25  ;;  %v1172_v39 = vmul.f32 %v1164_v26, %v1164_v26  ;;  %v1173_v40 = vmul.f32 %v1165_v0, %v1165_v0 }
 0x150   : > { %v1174_v29 = vadd.f32 %v1167_v27, %v1166_v14 }
 0x152   : > { %v1175_v33 = vadd.f32 %v1174_v29, %v1168_v28 }
 0x154   : > { %v1176_v35 = vadd.f32 %v1175_v33, %v1169_v31 }
 0x156   : > { %v1177_v38 = vadd.f32 %v1176_v35, %v1170_v16 }
 0x158   : > { %v1178_v17 = vadd.f32 %v1177_v38, %v1171_v37 }
 0x15a   : > { %v1179_v2 = vadd.f32 %v1178_v17, %v1172_v39 }
 0x15c   : > { %v1180_v34 = vadd.f32 %v1179_v2, %v1173_v40 }
 0x15e   : > { %v1181_v36 = vrot.slane %v1180_v34, 4 }
 0x160   : > { %v1182_v41 = vadd.f32 %v1181_v36, %v1180_v34 }
 0x162   : > { %v1183_v42 = vrot.slane %v1182_v41, 2 }
 0x164   : > { %v1184_v43 = vadd.f32 %v1183_v42, %v1182_v41 }
 0x166   : > { %v1185_v44 = vrot.slane %v1184_v43, 1 }
 0x168   : > { %v1186_v45 = vadd.f32 %v1185_v44, %v1184_v43 }
 0x16a   : > { %v1187_v47 = vmul.f32 0.015625, %v1186_v45 }
 0x16c   : > { %v1188_v30 = vadd.f32 1e-05, %v1187_v47 }
 0x16e   : > { %1698 = vrsqrt.f32 %v1188_v30 }
 0x178   : > { %v1699_v49 = vpop.eup %1698 }
 0x179   : > { %v1190_v50 = vmul.f32 %v1699_v49, %v1158_v21  ;;  %v1191_v51 = vmul.f32 %v1699_v49, %v1159_v62  ;;  %v1192_v52 = vmul.f32 %v1699_v49, %v1160_v22  ;;  %v1193_v32 = vmul.f32 %v1699_v49, %v1161_v23 }
 0x17a   : > { %v1194_v53 = vmul.f32 %v1699_v49, %v1162_v24  ;;  %v1195_v54 = vmul.f32 %v1699_v49, %v1163_v25  ;;  %v1196_v55 = vmul.f32 %v1699_v49, %v1164_v26  ;;  %v1197_v56 = vmul.f32 %v1699_v49, %v1165_v0 }
 0x17b   : > { %vm1198_vm0 = vcmp.ge.f32.partialorder %v1190_v50, 0.0  ;;  %vm1199_vm1 = vcmp.ge.f32.partialorder %v1191_v51, 0.0  ;;  %vm1200_vm2 = vcmp.ge.f32.partialorder %v1192_v52, 0.0  ;;  %vm1201_vm3 = vcmp.ge.f32.partialorder %v1193_v32, 0.0 }
 0x17c   : > { %vm1202_vm4 = vcmp.ge.f32.partialorder %v1194_v53, 0.0  ;;  %vm1203_vm5 = vcmp.ge.f32.partialorder %v1195_v54, 0.0  ;;  %vm1204_vm6 = vcmp.ge.f32.partialorder %v1196_v55, 0.0  ;;  %vm1205_vm7 = vcmp.ge.f32.partialorder %v1197_v56, 0.0 }
 0x17d   : > { %v1206_v57 = vmul.f32 0.2, %v1190_v50  ;;  %v1207_v58 = vmul.f32 0.2, %v1191_v51  ;;  %v1208_v59 = vmul.f32 0.2, %v1192_v52 }
 0x17e   : > { %v1209_v60 = vmul.f32 0.2, %v1193_v32  ;;  %v1210_v61 = vmul.f32 0.2, %v1194_v53  ;;  %v1211_v63 = vmul.f32 0.2, %v1195_v54 }
 0x17f   : > { %v1212_v1 = vmul.f32 0.2, %v1196_v55  ;;  %v1213_v3 = vmul.f32 0.2, %v1197_v56  ;;  %v1214_v46 = vsel %vm1198_vm0, %v1190_v50, %v1206_v57  ;;  %v1215_v4 = vsel %vm1199_vm1, %v1191_v51, %v1207_v58 }
 0x180   : > { %v1216_v5 = vsel %vm1200_vm2, %v1192_v52, %v1208_v59  ;;  %v1217_v6 = vsel %vm1201_vm3, %v1193_v32, %v1209_v60  ;;  %v1218_v7 = vsel %vm1202_vm4, %v1194_v53, %v1210_v61  ;;  %v1219_v48 = vsel %vm1203_vm5, %v1195_v54, %v1211_v63 }
 0x181   : > { %v1220_v8 = vsel %vm1204_vm6, %v1196_v55, %v1212_v1  ;;  %v1221_v9 = vsel %vm1205_vm7, %v1197_v56, %v1213_v3  ;;  %v1446_v10 = vpack.c.bf16 %v1215_v4, %v1214_v46  ;;  %v1451_v11 = vpack.c.bf16 %v1217_v6, %v1216_v5 }
 0x182   : > { %v1456_v12 = vpack.c.bf16 %v1219_v48, %v1218_v7  ;;  %v1461_v13 = vpack.c.bf16 %v1221_v9, %v1220_v8 }
 0x183   : > { %1447 = vst [vmem:[%s170_s13] sm:$0xff] %v1446_v10   ;;  %1463 = vst [vmem:[%s170_s13 + $0x8] sm:$0xff] %v1451_v11  }
 0x184   : > { %1464 = vst [vmem:[%s170_s13 + $0x10] sm:$0xff] %v1456_v12   ;;  %1465 = vst [vmem:[%s170_s13 + $0x18] sm:$0xff] %v1461_v13  }
 0x185 PF: > { %s13_s12 = sadd.s32 1, %s1706_s12  }
 0x186   : > { %p10_p4 = scmp.ge.s32.totalorder %s13_s12, 4  }
 0x188   :  { %12 = sbr.rel (!%p10_p4) target bundleno = 1 (0x1), region = 62 }

// kernel: discriminator_forward.7
= control target key start
LH: loop header
LB: loop body
LE: loop exit
PB: predicated region body
PF: predicated region fallthrough
CT: control target
= control target key end

     0   :  { %s3034_s12 = smov 0   ;;  %s3896_s0 = inlined_call_operand.vmem [shape: bf16[2,16,2048], index: 0, kind: input, shape index: {}]   ;;  %s3897_s1 = inlined_call_operand.vmem [shape: bf16[2048,256], index: 1, kind: input, shape index: {}]   ;;  %s3898_s2 = inlined_call_operand.vmem [shape: f32[1,256], index: 2, kind: input, shape index: {}]   ;;  %s3899_s3 = inlined_call_operand.vmem [shape: bf16[2,16,256], index: 3, kind: output, shape index: {}]  }
   0x1 LB: > { %s2289_s13 = sadd.s32 4294967295, %s3012_s12   ;;  %p2293_p0 = scmp.ge.s32.totalorder %s3012_s12, 1  ;;  %s3012_s12 = sphi %s3034_s12, %s13_s12  }
   0x2   : > { %p137_p1 = scmp.lt.s32.totalorder %s3012_s12, 3 }
   0x4   : > { %p138_p2 = pnand %p2293_p0, %p137_p1 }
   0x5   : > { %v2618_v0 = vld [vmem:[%s3897_s1 + $0x4] ss:$8 sps:$4 sm:$0xff] (!%p138_p2)   ;;  %v2622_v2 = vld [vmem:[%s3897_s1] ss:$8 sps:$4 sm:$0xff] (!%p138_p2)   ;;  %v2624_v4 = vld [vmem:[%s3897_s1 + $0x14] ss:$8 sps:$4 sm:$0xff] (!%p138_p2)  }
   0x6   : > { %141 = sbr.rel (%p138_p2) target bundleno = 538 (0x21a), region = 32  ;;  %v2620_v1 = vld [vmem:[%s3897_s1 + $0x404] ss:$8 sps:$4 sm:$0xff] (!%p138_p2)   ;;  %1815 = vmatprep.subr.bf16.mxu1 (!%p138_p2), %v2618_v0  ;;  %v2623_v3 = vld [vmem:[%s3897_s1 + $0x400] ss:$8 sps:$4 sm:$0xff] (!%p138_p2)   ;;  %p161_p3 = scmp.lt.s32.totalorder (!%p138_p2), %s2289_s13, 1 }
   0x7   : > { %1987 = vmatprep.subr.bf16.mxu0 (!%p138_p2), %v2620_v1  ;;  %1816 = vmatpush1.bf16.msra.mxu1 (!%p138_p2), %v2622_v2  ;;  %v2626_v5 = vld [vmem:[%s3897_s1 + $0x414] ss:$8 sps:$4 sm:$0xff] (!%p138_p2)   ;;  %v2628_v6 = vld [vmem:[%s3897_s1 + $0x10] ss:$8 sps:$4 sm:$0xff] (!%p138_p2)   ;;  %v2630_v8 = vld [vmem:[%s3897_s1 + $0x24] ss:$8 sps:$4 sm:$0xff] (!%p138_p2)  }
   0x8   : > { %1988 = vmatpush1.bf16.msra.mxu0 (!%p138_p2), %v2623_v3  ;;  %1817 = vmatprep.subr.bf16.mxu1 (!%p138_p2), %v2624_v4  ;;  %v2629_v7 = vld [vmem:[%s3897_s1 + $0x410] ss:$8 sps:$4 sm:$0xff] (!%p138_p2)   ;;  %v2632_v9 = vld [vmem:[%s3897_s1 + $0x424] ss:$8 sps:$4 sm:$0xff] (!%p138_p2)   ;;  %v2634_v10 = vld [vmem:[%s3897_s1 + $0x20] ss:$8 sps:$4 sm:$0xff] (!%p138_p2)  }
   0x9   : > { %1989 = vmatprep.subr.bf16.mxu0 (!%p138_p2), %v2626_v5  ;;  %v2635_v11 = vld [vmem:[%s3897_s1 + $0x420] ss:$8 sps:$4 sm:$0xff] (!%p138_p2)   ;;  %v2636_v12 = vld [vmem:[%s3897_s1 + $0x34] ss:$8 sps:$4 sm:$0xff] (!%p138_p2)   ;;  %v2640_v14 = vld [vmem:[%s3897_s1 + $0x30] ss:$8 sps:$4 sm:$0xff] (!%p138_p2)  }
   0xa   : > { %v2638_v13 = vld [vmem:[%s3897_s1 + $0x434] ss:$8 sps:$4 sm:$0xff] (!%p138_p2)   ;;  %v2641_v15 = vld [vmem:[%s3897_s1 + $0x430] ss:$8 sps:$4 sm:$0xff] (!%p138_p2)   ;;  %v2642_v16 = vld [vmem:[%s3897_s1 + $0x44] ss:$8 sps:$4 sm:$0xff] (!%p138_p2)  }
   0xb   : > { %1818 = vmatpush1.bf16.msra.mxu1 (!%p138_p2), %v2628_v6  ;;  %v2644_v17 = vld [vmem:[%s3897_s1 + $0x444] ss:$8 sps:$4 sm:$0xff] (!%p138_p2)   ;;  %v2646_v18 = vld [vmem:[%s3897_s1 + $0x40] ss:$8 sps:$4 sm:$0xff] (!%p138_p2)   ;;  %v2648_v20 = vld [vmem:[%s3897_s1 + $0x54] ss:$8 sps:$4 sm:$0xff] (!%p138_p2)  }
   0xc   : > { %1990 = vmatpush1.bf16.msra.mxu0 (!%p138_p2), %v2629_v7  ;;  %1819 = vmatprep.subr.bf16.mxu1 (!%p138_p2), %v2630_v8  ;;  %v2647_v19 = vld [vmem:[%s3897_s1 + $0x440] ss:$8 sps:$4 sm:$0xff] (!%p138_p2)   ;;  %v2650_v21 = vld [vmem:[%s3897_s1 + $0x454] ss:$8 sps:$4 sm:$0xff] (!%p138_p2)   ;;  %v2652_v22 = vld [vmem:[%s3897_s1 + $0x50] ss:$8 sps:$4 sm:$0xff] (!%p138_p2)  }
   0xd   : > { %1991 = vmatprep.subr.bf16.mxu0 %v2632_v9  ;;  %v2653_v23 = vld [vmem:[%s3897_s1 + $0x450] ss:$8 sps:$4 sm:$0xff]   ;;  %v2654_v24 = vld [vmem:[%s3897_s1 + $0x64] ss:$8 sps:$4 sm:$0xff]   ;;  %v2658_v26 = vld [vmem:[%s3897_s1 + $0x60] ss:$8 sps:$4 sm:$0xff]  }
   0xe   : > { %v2656_v25 = vld [vmem:[%s3897_s1 + $0x464] ss:$8 sps:$4 sm:$0xff]   ;;  %v2659_v27 = vld [vmem:[%s3897_s1 + $0x460] ss:$8 sps:$4 sm:$0xff]   ;;  %v2660_v28 = vld [vmem:[%s3897_s1 + $0x74] ss:$8 sps:$4 sm:$0xff]  }
   0xf   : > { %1820 = vmatpush1.bf16.msra.mxu1 %v2634_v10  ;;  %v2662_v29 = vld [vmem:[%s3897_s1 + $0x474] ss:$8 sps:$4 sm:$0xff]   ;;  %v2664_v30 = vld [vmem:[%s3897_s1 + $0x70] ss:$8 sps:$4 sm:$0xff]   ;;  %v2666_v32 = vld [vmem:[%s3897_s1 + $0x84] ss:$8 sps:$4 sm:$0xff]  }
  0x10   : > { %1992 = vmatpush1.bf16.msra.mxu0 %v2635_v11  ;;  %1821 = vmatprep.subr.bf16.mxu1 %v2636_v12  ;;  %v2665_v31 = vld [vmem:[%s3897_s1 + $0x470] ss:$8 sps:$4 sm:$0xff]   ;;  %v2668_v33 = vld [vmem:[%s3897_s1 + $0x484] ss:$8 sps:$4 sm:$0xff]   ;;  %v2670_v34 = vld [vmem:[%s3897_s1 + $0x80] ss:$8 sps:$4 sm:$0xff]  }
  0x11   : > { %1993 = vmatprep.subr.bf16.mxu0 %v2638_v13  ;;  %v2671_v35 = vld [vmem:[%s3897_s1 + $0x480] ss:$8 sps:$4 sm:$0xff]   ;;  %v2672_v36 = vld [vmem:[%s3897_s1 + $0x94] ss:$8 sps:$4 sm:$0xff]   ;;  %s3901_s13 = smov (!%p161_p3, %s2289_s13), 1 }
  0x12   : > { %v2674_v37 = vld [vmem:[%s3897_s1 + $0x494] ss:$8 sps:$4 sm:$0xff]   ;;  %v2676_v38 = vld [vmem:[%s3897_s1 + $0x90] ss:$8 sps:$4 sm:$0xff]   ;;  %v2678_v40 = vld [vmem:[%s3897_s1 + $0xa4] ss:$8 sps:$4 sm:$0xff]  }
  0x13   : > { %1822 = vmatpush1.bf16.msra.mxu1 %v2640_v14  ;;  %v2677_v39 = vld [vmem:[%s3897_s1 + $0x490] ss:$8 sps:$4 sm:$0xff]   ;;  %s2574_s21 = sshll.u32 %s3901_s13, 7  ;;  %v2680_v41 = vld [vmem:[%s3897_s1 + $0x4a4] ss:$8 sps:$4 sm:$0xff]   ;;  %s2575_s19 = sshll.u32 %s3901_s13, 4 }
  0x14   : > { %1994 = vmatpush1.bf16.msra.mxu0 %v2641_v15  ;;  %1823 = vmatprep.subr.bf16.mxu1 %v2642_v16  ;;  %v2682_v42 = vld [vmem:[%s3897_s1 + $0xa0] ss:$8 sps:$4 sm:$0xff]   ;;  %s3184_s30 = scalar_lea.vmem %s3896_s0, %s2574_s21  ;;  %v2684_v44 = vld [vmem:[%s3897_s1 + $0xb4] ss:$8 sps:$4 sm:$0xff]   ;;  %v2688_v46 = vld [vmem:[%s3897_s1 + $0xb0] ss:$8 sps:$4 sm:$0xff]   ;;  %s170_s22 = scalar_lea.vmem %s3899_s3, %s2575_s19 }
  0x15   : > { %1995 = vmatprep.subr.bf16.mxu0 %v2644_v17  ;;  %v2683_v43 = vld [vmem:[%s3897_s1 + $0x4a0] ss:$8 sps:$4 sm:$0xff]   ;;  %v2686_v45 = vld [vmem:[%s3897_s1 + $0x4b4] ss:$8 sps:$4 sm:$0xff]   ;;  %v2689_v47 = vld [vmem:[%s3897_s1 + $0x4b0] ss:$8 sps:$4 sm:$0xff]  }
  0x16   : > { %v171_v48 = vld [vmem:[%s3184_s30] sm:$0xff]  ;;  %v2696_v58 = vld [vmem:[%s3897_s1 + $0xd4] ss:$8 sps:$4 sm:$0xff]   ;;  %v2700_v60 = vld [vmem:[%s3897_s1 + $0xd0] ss:$8 sps:$4 sm:$0xff]  }
  0x17   : > { %1824 = vmatpush1.bf16.msra.mxu1 %v2646_v18  ;;  %v179_v49 = vld [vmem:[%s3184_s30 + $0x40] sm:$0xff]  ;;  %v2698_v59 = vld [vmem:[%s3897_s1 + $0x4d4] ss:$8 sps:$4 sm:$0xff]   ;;  %v2701_v61 = vld [vmem:[%s3897_s1 + $0x4d0] ss:$8 sps:$4 sm:$0xff]  }
  0x18   : > { %1996 = vmatpush1.bf16.msra.mxu0 %v2647_v19  ;;  %1825 = vmatprep.subr.bf16.mxu1 %v2648_v20  ;;  %v2690_v50 = vld [vmem:[%s3897_s1 + $0xc4] ss:$8 sps:$4 sm:$0xff]   ;;  %v2299_v52 = vcombine.high %v171_v48, %v179_v49  ;;  %v2694_v56 = vld [vmem:[%s3897_s1 + $0xc0] ss:$8 sps:$4 sm:$0xff]   ;;  %v2708_v2 = vld [vmem:[%s3897_s1 + $0xf4] ss:$8 sps:$4 sm:$0xff]   ;;  %v2298_v8 = vcombine.low %v171_v48, %v179_v49 }
  0x19   : > { %1997 = vmatprep.subr.bf16.mxu0 %v2650_v21  ;;  %v2692_v51 = vld [vmem:[%s3897_s1 + $0x4c4] ss:$8 sps:$4 sm:$0xff]   ;;  %v2695_v57 = vld [vmem:[%s3897_s1 + $0x4c0] ss:$8 sps:$4 sm:$0xff]   ;;  %v2710_v3 = vld [vmem:[%s3897_s1 + $0x4f4] ss:$8 sps:$4 sm:$0xff]  }
  0x1a   : > { %v175_v53 = vld [vmem:[%s3184_s30 + $0x20] sm:$0xff]  ;;  %1847 = vmatprep.mubr.bf16.mxu1 %v2299_v52  ;;  %v2712_v4 = vld [vmem:[%s3897_s1 + $0xf0] ss:$8 sps:$4 sm:$0xff]   ;;  %v2722_v12 = vld [vmem:[%s3897_s1 + $0x114] ss:$8 sps:$4 sm:$0xff]  }
  0x1b   : > { %1826 = vmatpush1.bf16.msra.mxu1 %v2652_v22  ;;  %v183_v54 = vld [vmem:[%s3184_s30 + $0x60] sm:$0xff]  ;;  %v2713_v5 = vld [vmem:[%s3897_s1 + $0x4f0] ss:$8 sps:$4 sm:$0xff]   ;;  %v2725_v13 = vld [vmem:[%s3897_s1 + $0x514] ss:$8 sps:$4 sm:$0xff]  }
  0x1c   : > { %1998 = vmatpush1.bf16.msra.mxu0 %v2653_v23  ;;  %1827 = vmatprep.subr.bf16.mxu1 %v2654_v24  ;;  %v2307_v55 = vcombine.high %v175_v53, %v183_v54  ;;  %v2702_v62 = vld [vmem:[%s3897_s1 + $0xe4] ss:$8 sps:$4 sm:$0xff]   ;;  %v2706_v0 = vld [vmem:[%s3897_s1 + $0xe0] ss:$8 sps:$4 sm:$0xff]   ;;  %v2306_v10 = vcombine.low %v175_v53, %v183_v54  ;;  %v2720_v14 = vld [vmem:[%s3897_s1 + $0x110] ss:$8 sps:$4 sm:$0xff]  }
  0x1d   : > { %1999 = vmatprep.subr.bf16.mxu0 %v2656_v25  ;;  %v2704_v63 = vld [vmem:[%s3897_s1 + $0x4e4] ss:$8 sps:$4 sm:$0xff]   ;;  %v2707_v1 = vld [vmem:[%s3897_s1 + $0x4e0] ss:$8 sps:$4 sm:$0xff]   ;;  %v2723_v15 = vld [vmem:[%s3897_s1 + $0x510] ss:$8 sps:$4 sm:$0xff]  }
  0x1e   : > { %2019 = vmatprep.mubr.bf16.mxu0 %v2307_v55  ;;  %v2716_v6 = vld [vmem:[%s3897_s1 + $0x104] ss:$8 sps:$4 sm:$0xff]   ;;  %v2714_v9 = vld [vmem:[%s3897_s1 + $0x100] ss:$8 sps:$4 sm:$0xff]   ;;  %v2734_v20 = vld [vmem:[%s3897_s1 + $0x134] ss:$8 sps:$4 sm:$0xff]  }
  0x1f   : > { %1828 = vmatpush1.bf16.msra.mxu1 %v2658_v26  ;;  %v2719_v7 = vld [vmem:[%s3897_s1 + $0x504] ss:$8 sps:$4 sm:$0xff]   ;;  %v2717_v11 = vld [vmem:[%s3897_s1 + $0x500] ss:$8 sps:$4 sm:$0xff]   ;;  %v2737_v21 = vld [vmem:[%s3897_s1 + $0x534] ss:$8 sps:$4 sm:$0xff]  }
  0x20   : > { %2000 = vmatpush1.bf16.msra.mxu0 %v2659_v27  ;;  %1829 = vmatprep.subr.bf16.mxu1 %v2660_v28  ;;  %v2728_v16 = vld [vmem:[%s3897_s1 + $0x124] ss:$8 sps:$4 sm:$0xff]   ;;  %v2726_v18 = vld [vmem:[%s3897_s1 + $0x120] ss:$8 sps:$4 sm:$0xff]   ;;  %v2732_v22 = vld [vmem:[%s3897_s1 + $0x130] ss:$8 sps:$4 sm:$0xff]  }
  0x21   : > { %2001 = vmatprep.subr.bf16.mxu0 %v2662_v29  ;;  %v2731_v17 = vld [vmem:[%s3897_s1 + $0x524] ss:$8 sps:$4 sm:$0xff]   ;;  %v2729_v19 = vld [vmem:[%s3897_s1 + $0x520] ss:$8 sps:$4 sm:$0xff]   ;;  %v2735_v23 = vld [vmem:[%s3897_s1 + $0x530] ss:$8 sps:$4 sm:$0xff]  }
  0x22   : > { %v2740_v24 = vld [vmem:[%s3897_s1 + $0x144] ss:$8 sps:$4 sm:$0xff]   ;;  %v2738_v26 = vld [vmem:[%s3897_s1 + $0x140] ss:$8 sps:$4 sm:$0xff]   ;;  %v2746_v28 = vld [vmem:[%s3897_s1 + $0x154] ss:$8 sps:$4 sm:$0xff]  }
  0x23   : > { %1830 = vmatpush1.bf16.msra.mxu1 %v2664_v30  ;;  %v2743_v25 = vld [vmem:[%s3897_s1 + $0x544] ss:$8 sps:$4 sm:$0xff]   ;;  %v2741_v27 = vld [vmem:[%s3897_s1 + $0x540] ss:$8 sps:$4 sm:$0xff]   ;;  %v2749_v29 = vld [vmem:[%s3897_s1 + $0x554] ss:$8 sps:$4 sm:$0xff]  }
  0x24   : > { %2002 = vmatpush1.bf16.msra.mxu0 %v2665_v31  ;;  %1831 = vmatprep.subr.bf16.mxu1 %v2666_v32  ;;  %v2744_v30 = vld [vmem:[%s3897_s1 + $0x150] ss:$8 sps:$4 sm:$0xff]   ;;  %v2752_v32 = vld [vmem:[%s3897_s1 + $0x164] ss:$8 sps:$4 sm:$0xff]   ;;  %v2762_v48 = vld [vmem:[%s3897_s1 + $0x180] ss:$8 sps:$4 sm:$0xff]  }
  0x25   : > { %2003 = vmatprep.subr.bf16.mxu0 %v2668_v33  ;;  %v2747_v31 = vld [vmem:[%s3897_s1 + $0x550] ss:$8 sps:$4 sm:$0xff]   ;;  %v2755_v33 = vld [vmem:[%s3897_s1 + $0x564] ss:$8 sps:$4 sm:$0xff]   ;;  %v2765_v49 = vld [vmem:[%s3897_s1 + $0x580] ss:$8 sps:$4 sm:$0xff]  }
  0x26   : > { %v2768_v52 = vld [vmem:[%s3897_s1 + $0x190] ss:$8 sps:$4 sm:$0xff]   ;;  %v2776_v54 = vld [vmem:[%s3897_s1 + $0x1a4] ss:$8 sps:$4 sm:$0xff]  }
  0x27   : > { %1832 = vmatpush1.bf16.msra.mxu1 %v2670_v34  ;;  %v2750_v34 = vld [vmem:[%s3897_s1 + $0x160] ss:$8 sps:$4 sm:$0xff]   ;;  %v2771_v53 = vld [vmem:[%s3897_s1 + $0x590] ss:$8 sps:$4 sm:$0xff]   ;;  %v2779_v55 = vld [vmem:[%s3897_s1 + $0x5a4] ss:$8 sps:$4 sm:$0xff]  }
  0x28   : > { %2004 = vmatpush1.bf16.msra.mxu0 %v2671_v35  ;;  %1833 = vmatprep.subr.bf16.mxu1 %v2672_v36  ;;  %v2753_v35 = vld [vmem:[%s3897_s1 + $0x560] ss:$8 sps:$4 sm:$0xff]  }
  0x29   : > { %2005 = vmatprep.subr.bf16.mxu0 %v2674_v37  ;;  %v3335_v36 = vld [vmem:[%s3184_s30 + $0x8] sm:$0xff] }
  0x2a   : > { %v3338_v37 = vld [vmem:[%s3184_s30 + $0x48] sm:$0xff] }
  0x2b   : > { %1834 = vmatpush1.bf16.msra.mxu1 %v2676_v38  ;;  %v2758_v38 = vld [vmem:[%s3897_s1 + $0x174] ss:$8 sps:$4 sm:$0xff]  }
  0x2c   : > { %2006 = vmatpush1.bf16.msra.mxu0 %v2677_v39  ;;  %1835 = vmatprep.subr.bf16.mxu1 %v2678_v40  ;;  %v2761_v39 = vld [vmem:[%s3897_s1 + $0x574] ss:$8 sps:$4 sm:$0xff]   ;;  %v2301_v40 = vcombine.high %v3335_v36, %v3338_v37 }
  0x2d   : > { %2007 = vmatprep.subr.bf16.mxu0 %v2680_v41  ;;  %v3349_v41 = vld [vmem:[%s3184_s30 + $0x28] sm:$0xff] }
  0x2f   : > { %1836 = vmatpush1.bf16.msra.mxu1 %v2682_v42  ;;  %v3352_v42 = vld [vmem:[%s3184_s30 + $0x68] sm:$0xff] }
  0x30   : > { %2008 = vmatpush1.bf16.msra.mxu0 %v2683_v43  ;;  %1837 = vmatprep.subr.bf16.mxu1 %v2684_v44  ;;  %v2309_v43 = vcombine.high %v3349_v41, %v3352_v42  ;;  %v2756_v44 = vld [vmem:[%s3897_s1 + $0x170] ss:$8 sps:$4 sm:$0xff]  }
  0x31   : > { %2009 = vmatprep.subr.bf16.mxu0 %v2686_v45  ;;  %v2759_v45 = vld [vmem:[%s3897_s1 + $0x570] ss:$8 sps:$4 sm:$0xff]  }
  0x33   : > { %1838 = vmatpush1.bf16.msra.mxu1 %v2688_v46  ;;  %v2764_v46 = vld [vmem:[%s3897_s1 + $0x184] ss:$8 sps:$4 sm:$0xff]  }
  0x34   : > { %2010 = vmatpush1.bf16.msra.mxu0 %v2689_v47  ;;  %1839 = vmatprep.subr.bf16.mxu1 %v2690_v50  ;;  %v2767_v47 = vld [vmem:[%s3897_s1 + $0x584] ss:$8 sps:$4 sm:$0xff]   ;;  %v2770_v50 = vld [vmem:[%s3897_s1 + $0x194] ss:$8 sps:$4 sm:$0xff]  }
  0x35   : > { %2011 = vmatprep.subr.bf16.mxu0 %v2692_v51  ;;  %v2773_v51 = vld [vmem:[%s3897_s1 + $0x594] ss:$8 sps:$4 sm:$0xff]  }
  0x37   : > { %1840 = vmatpush1.bf16.msra.mxu1 %v2694_v56  ;;  %v2774_v56 = vld [vmem:[%s3897_s1 + $0x1a0] ss:$8 sps:$4 sm:$0xff]  }
  0x38   : > { %2012 = vmatpush1.bf16.msra.mxu0 %v2695_v57  ;;  %1841 = vmatprep.subr.bf16.mxu1 %v2696_v58  ;;  %v2777_v57 = vld [vmem:[%s3897_s1 + $0x5a0] ss:$8 sps:$4 sm:$0xff]   ;;  %v2782_v58 = vld [vmem:[%s3897_s1 + $0x1b4] ss:$8 sps:$4 sm:$0xff]  }
  0x39   : > { %2013 = vmatprep.subr.bf16.mxu0 %v2698_v59  ;;  %v2785_v59 = vld [vmem:[%s3897_s1 + $0x5b4] ss:$8 sps:$4 sm:$0xff]  }
  0x3b   : > { %1842 = vmatpush1.bf16.msra.mxu1 %v2700_v60  ;;  %v2780_v60 = vld [vmem:[%s3897_s1 + $0x1b0] ss:$8 sps:$4 sm:$0xff]  }
  0x3c   : > { %2014 = vmatpush1.bf16.msra.mxu0 %v2701_v61  ;;  %1843 = vmatprep.subr.bf16.mxu1 %v2702_v62  ;;  %v2783_v61 = vld [vmem:[%s3897_s1 + $0x5b0] ss:$8 sps:$4 sm:$0xff]   ;;  %v2788_v62 = vld [vmem:[%s3897_s1 + $0x1c4] ss:$8 sps:$4 sm:$0xff]  }
  0x3d   : > { %2015 = vmatprep.subr.bf16.mxu0 %v2704_v63  ;;  %v2791_v63 = vld [vmem:[%s3897_s1 + $0x5c4] ss:$8 sps:$4 sm:$0xff]  }
  0x3f   : > { %1844 = vmatpush1.bf16.msra.mxu1 %v2706_v0  ;;  %v2786_v0 = vld [vmem:[%s3897_s1 + $0x1c0] ss:$8 sps:$4 sm:$0xff]  }
  0x40   : > { %2016 = vmatpush1.bf16.msra.mxu0 %v2707_v1  ;;  %1845 = vmatprep.subr.bf16.mxu1 %v2708_v2  ;;  %v2789_v1 = vld [vmem:[%s3897_s1 + $0x5c0] ss:$8 sps:$4 sm:$0xff]   ;;  %v2794_v2 = vld [vmem:[%s3897_s1 + $0x1d4] ss:$8 sps:$4 sm:$0xff]  }
  0x41   : > { %2017 = vmatprep.subr.bf16.mxu0 %v2710_v3  ;;  %v2797_v3 = vld [vmem:[%s3897_s1 + $0x5d4] ss:$8 sps:$4 sm:$0xff]  }
  0x43   : > { %1846 = vmatpush1.bf16.msra.mxu1 %v2712_v4  ;;  %v2792_v4 = vld [vmem:[%s3897_s1 + $0x1d0] ss:$8 sps:$4 sm:$0xff]  }
  0x44   : > { %2018 = vmatpush1.bf16.msra.mxu0 %v2713_v5  ;;  %1858 = vmatprep.subr.bf16.mxu1 %v2716_v6  ;;  %v2795_v5 = vld [vmem:[%s3897_s1 + $0x5d0] ss:$8 sps:$4 sm:$0xff]   ;;  %v2800_v6 = vld [vmem:[%s3897_s1 + $0x1e4] ss:$8 sps:$4 sm:$0xff]  }
  0x45   : > { %2030 = vmatprep.subr.bf16.mxu0 %v2719_v7  ;;  %v2803_v7 = vld [vmem:[%s3897_s1 + $0x5e4] ss:$8 sps:$4 sm:$0xff]  }
  0x46   : > { %1848 = vmatmul.mubr.bf16.vlgmr.msra.gmra.mrb[0].mxu1 %v2298_v8  ;;  %v2798_v8 = vld [vmem:[%s3897_s1 + $0x1e0] ss:$8 sps:$4 sm:$0xff]  }
  0x47   : > { %2020 = vmatmul.mubr.bf16.vlgmr.msra.gmra.mrb[0].mxu0 %v2306_v10  ;;  %1859 = vmatpush1.bf16.msra.mxu1 %v2714_v9  ;;  %v2801_v9 = vld [vmem:[%s3897_s1 + $0x5e0] ss:$8 sps:$4 sm:$0xff]   ;;  %v2806_v10 = vld [vmem:[%s3897_s1 + $0x1f4] ss:$8 sps:$4 sm:$0xff]  }
  0x48   : > { %2031 = vmatpush1.bf16.msra.mxu0 %v2717_v11  ;;  %1860 = vmatprep.subr.bf16.mxu1 %v2722_v12  ;;  %v2809_v11 = vld [vmem:[%s3897_s1 + $0x5f4] ss:$8 sps:$4 sm:$0xff]   ;;  %v2804_v12 = vld [vmem:[%s3897_s1 + $0x1f0] ss:$8 sps:$4 sm:$0xff]  }
  0x49   : > { %2032 = vmatprep.subr.bf16.mxu0 %v2725_v13  ;;  %1890 = vmatprep.mubr.bf16.mxu1 %v2301_v40  ;;  %v2807_v13 = vld [vmem:[%s3897_s1 + $0x5f0] ss:$8 sps:$4 sm:$0xff]   ;;  %v2834_v40 = vld [vmem:[%s3897_s1 + $0x240] ss:$8 sps:$4 sm:$0xff]  }
  0x4a   : > { %2062 = vmatprep.mubr.bf16.mxu0 %v2309_v43  ;;  %v2845_v43 = vld [vmem:[%s3897_s1 + $0x654] ss:$8 sps:$4 sm:$0xff]  }
  0x4b   : > { %1861 = vmatpush1.bf16.msra.mxu1 %v2720_v14  ;;  %v2812_v14 = vld [vmem:[%s3897_s1 + $0x204] ss:$8 sps:$4 sm:$0xff]  }
  0x4c   : > { %2033 = vmatpush1.bf16.msra.mxu0 %v2723_v15  ;;  %1862 = vmatprep.subr.bf16.mxu1 %v2728_v16  ;;  %v2815_v15 = vld [vmem:[%s3897_s1 + $0x604] ss:$8 sps:$4 sm:$0xff]   ;;  %v2300_v16 = vcombine.low %v3335_v36, %v3338_v37  ;;  %v2828_v36 = vld [vmem:[%s3897_s1 + $0x230] ss:$8 sps:$4 sm:$0xff]  }
  0x4d   : > { %2034 = vmatprep.subr.bf16.mxu0 %v2731_v17  ;;  %v2810_v17 = vld [vmem:[%s3897_s1 + $0x200] ss:$8 sps:$4 sm:$0xff]   ;;  %v2831_v37 = vld [vmem:[%s3897_s1 + $0x630] ss:$8 sps:$4 sm:$0xff]  }
  0x4f   : > { %1863 = vmatpush1.bf16.msra.mxu1 %v2726_v18  ;;  %v2308_v18 = vcombine.low %v3349_v41, %v3352_v42  ;;  %v2837_v41 = vld [vmem:[%s3897_s1 + $0x640] ss:$8 sps:$4 sm:$0xff]   ;;  %v2842_v42 = vld [vmem:[%s3897_s1 + $0x254] ss:$8 sps:$4 sm:$0xff]  }
  0x50   : > { %2035 = vmatpush1.bf16.msra.mxu0 %v2729_v19  ;;  %1864 = vmatprep.subr.bf16.mxu1 %v2734_v20  ;;  %v2813_v19 = vld [vmem:[%s3897_s1 + $0x600] ss:$8 sps:$4 sm:$0xff]   ;;  %v2818_v20 = vld [vmem:[%s3897_s1 + $0x214] ss:$8 sps:$4 sm:$0xff]  }
  0x51   : > { %2036 = vmatprep.subr.bf16.mxu0 %v2737_v21  ;;  %v2821_v21 = vld [vmem:[%s3897_s1 + $0x614] ss:$8 sps:$4 sm:$0xff]  }
  0x53   : > { %1865 = vmatpush1.bf16.msra.mxu1 %v2732_v22  ;;  %v2816_v22 = vld [vmem:[%s3897_s1 + $0x210] ss:$8 sps:$4 sm:$0xff]  }
  0x54   : > { %2037 = vmatpush1.bf16.msra.mxu0 %v2735_v23  ;;  %1866 = vmatprep.subr.bf16.mxu1 %v2740_v24  ;;  %v2819_v23 = vld [vmem:[%s3897_s1 + $0x610] ss:$8 sps:$4 sm:$0xff]  }
  0x55   : > { %2038 = vmatprep.subr.bf16.mxu0 %v2743_v25  ;;  %v3487_v24 = vld [vmem:[%s3184_s30 + $0x10] sm:$0xff] }
  0x56   : > { %v3490_v25 = vld [vmem:[%s3184_s30 + $0x50] sm:$0xff] }
  0x57   : > { %1867 = vmatpush1.bf16.msra.mxu1 %v2738_v26  ;;  %v2824_v26 = vld [vmem:[%s3897_s1 + $0x224] ss:$8 sps:$4 sm:$0xff]  }
  0x58   : > { %2039 = vmatpush1.bf16.msra.mxu0 %v2741_v27  ;;  %1868 = vmatprep.subr.bf16.mxu1 %v2746_v28  ;;  %v2827_v27 = vld [vmem:[%s3897_s1 + $0x624] ss:$8 sps:$4 sm:$0xff]   ;;  %v2303_v28 = vcombine.high %v3487_v24, %v3490_v25 }
  0x59   : > { %2040 = vmatprep.subr.bf16.mxu0 %v2749_v29  ;;  %v3501_v29 = vld [vmem:[%s3184_s30 + $0x30] sm:$0xff] }
  0x5b   : > { %1869 = vmatpush1.bf16.msra.mxu1 %v2744_v30  ;;  %v3504_v30 = vld [vmem:[%s3184_s30 + $0x70] sm:$0xff] }
  0x5c   : > { %2041 = vmatpush1.bf16.msra.mxu0 %v2747_v31  ;;  %1870 = vmatprep.subr.bf16.mxu1 %v2752_v32  ;;  %v2311_v31 = vcombine.high %v3501_v29, %v3504_v30  ;;  %v2822_v32 = vld [vmem:[%s3897_s1 + $0x220] ss:$8 sps:$4 sm:$0xff]  }
  0x5d   : > { %2042 = vmatprep.subr.bf16.mxu0 %v2755_v33  ;;  %v2825_v33 = vld [vmem:[%s3897_s1 + $0x620] ss:$8 sps:$4 sm:$0xff]  }
  0x5f   : > { %1871 = vmatpush1.bf16.msra.mxu1 %v2750_v34  ;;  %v2830_v34 = vld [vmem:[%s3897_s1 + $0x234] ss:$8 sps:$4 sm:$0xff]  }
  0x60   : > { %2043 = vmatpush1.bf16.msra.mxu0 %v2753_v35  ;;  %1872 = vmatprep.subr.bf16.mxu1 %v2758_v38  ;;  %v2833_v35 = vld [vmem:[%s3897_s1 + $0x634] ss:$8 sps:$4 sm:$0xff]   ;;  %v2836_v38 = vld [vmem:[%s3897_s1 + $0x244] ss:$8 sps:$4 sm:$0xff]  }
  0x61   : > { %2044 = vmatprep.subr.bf16.mxu0 %v2761_v39  ;;  %v2839_v39 = vld [vmem:[%s3897_s1 + $0x644] ss:$8 sps:$4 sm:$0xff]  }
  0x63   : > { %1873 = vmatpush1.bf16.msra.mxu1 %v2756_v44  ;;  %v2840_v44 = vld [vmem:[%s3897_s1 + $0x250] ss:$8 sps:$4 sm:$0xff]  }
  0x64   : > { %2045 = vmatpush1.bf16.msra.mxu0 %v2759_v45  ;;  %1874 = vmatprep.subr.bf16.mxu1 %v2764_v46  ;;  %v2843_v45 = vld [vmem:[%s3897_s1 + $0x650] ss:$8 sps:$4 sm:$0xff]   ;;  %v2848_v46 = vld [vmem:[%s3897_s1 + $0x264] ss:$8 sps:$4 sm:$0xff]  }
  0x65   : > { %2046 = vmatprep.subr.bf16.mxu0 %v2767_v47  ;;  %v2851_v47 = vld [vmem:[%s3897_s1 + $0x664] ss:$8 sps:$4 sm:$0xff]  }
  0x67   : > { %1875 = vmatpush1.bf16.msra.mxu1 %v2762_v48  ;;  %v2846_v48 = vld [vmem:[%s3897_s1 + $0x260] ss:$8 sps:$4 sm:$0xff]  }
  0x68   : > { %2047 = vmatpush1.bf16.msra.mxu0 %v2765_v49  ;;  %1876 = vmatprep.subr.bf16.mxu1 %v2770_v50  ;;  %v2849_v49 = vld [vmem:[%s3897_s1 + $0x660] ss:$8 sps:$4 sm:$0xff]   ;;  %v2854_v50 = vld [vmem:[%s3897_s1 + $0x274] ss:$8 sps:$4 sm:$0xff]  }
  0x69   : > { %2048 = vmatprep.subr.bf16.mxu0 %v2773_v51  ;;  %v2857_v51 = vld [vmem:[%s3897_s1 + $0x674] ss:$8 sps:$4 sm:$0xff]  }
  0x6b   : > { %1877 = vmatpush1.bf16.msra.mxu1 %v2768_v52  ;;  %v2852_v52 = vld [vmem:[%s3897_s1 + $0x270] ss:$8 sps:$4 sm:$0xff]  }
  0x6c   : > { %2049 = vmatpush1.bf16.msra.mxu0 %v2771_v53  ;;  %1878 = vmatprep.subr.bf16.mxu1 %v2776_v54  ;;  %v2855_v53 = vld [vmem:[%s3897_s1 + $0x670] ss:$8 sps:$4 sm:$0xff]   ;;  %v2860_v54 = vld [vmem:[%s3897_s1 + $0x284] ss:$8 sps:$4 sm:$0xff]  }
  0x6d   : > { %2050 = vmatprep.subr.bf16.mxu0 %v2779_v55  ;;  %v2863_v55 = vld [vmem:[%s3897_s1 + $0x684] ss:$8 sps:$4 sm:$0xff]  }
  0x6f   : > { %1879 = vmatpush1.bf16.msra.mxu1 %v2774_v56  ;;  %v2858_v56 = vld [vmem:[%s3897_s1 + $0x280] ss:$8 sps:$4 sm:$0xff]  }
  0x70   : > { %2051 = vmatpush1.bf16.msra.mxu0 %v2777_v57  ;;  %1880 = vmatprep.subr.bf16.mxu1 %v2782_v58  ;;  %v2861_v57 = vld [vmem:[%s3897_s1 + $0x680] ss:$8 sps:$4 sm:$0xff]   ;;  %v2866_v58 = vld [vmem:[%s3897_s1 + $0x294] ss:$8 sps:$4 sm:$0xff]  }
  0x71   : > { %2052 = vmatprep.subr.bf16.mxu0 %v2785_v59  ;;  %v2869_v59 = vld [vmem:[%s3897_s1 + $0x694] ss:$8 sps:$4 sm:$0xff]  }
  0x73   : > { %1881 = vmatpush1.bf16.msra.mxu1 %v2780_v60  ;;  %v2864_v60 = vld [vmem:[%s3897_s1 + $0x290] ss:$8 sps:$4 sm:$0xff]  }
  0x74   : > { %2053 = vmatpush1.bf16.msra.mxu0 %v2783_v61  ;;  %1882 = vmatprep.subr.bf16.mxu1 %v2788_v62  ;;  %v2867_v61 = vld [vmem:[%s3897_s1 + $0x690] ss:$8 sps:$4 sm:$0xff]   ;;  %v2872_v62 = vld [vmem:[%s3897_s1 + $0x2a4] ss:$8 sps:$4 sm:$0xff]  }
  0x75   : > { %2054 = vmatprep.subr.bf16.mxu0 %v2791_v63  ;;  %v2875_v63 = vld [vmem:[%s3897_s1 + $0x6a4] ss:$8 sps:$4 sm:$0xff]  }
  0x77   : > { %1883 = vmatpush1.bf16.msra.mxu1 %v2786_v0  ;;  %v2870_v0 = vld [vmem:[%s3897_s1 + $0x2a0] ss:$8 sps:$4 sm:$0xff]  }
  0x78   : > { %2055 = vmatpush1.bf16.msra.mxu0 %v2789_v1  ;;  %1884 = vmatprep.subr.bf16.mxu1 %v2794_v2  ;;  %v2873_v1 = vld [vmem:[%s3897_s1 + $0x6a0] ss:$8 sps:$4 sm:$0xff]   ;;  %v2878_v2 = vld [vmem:[%s3897_s1 + $0x2b4] ss:$8 sps:$4 sm:$0xff]  }
  0x79   : > { %2056 = vmatprep.subr.bf16.mxu0 %v2797_v3  ;;  %v2881_v3 = vld [vmem:[%s3897_s1 + $0x6b4] ss:$8 sps:$4 sm:$0xff]  }
  0x7b   : > { %1885 = vmatpush1.bf16.msra.mxu1 %v2792_v4  ;;  %v2876_v4 = vld [vmem:[%s3897_s1 + $0x2b0] ss:$8 sps:$4 sm:$0xff]  }
  0x7c   : > { %2057 = vmatpush1.bf16.msra.mxu0 %v2795_v5  ;;  %1886 = vmatprep.subr.bf16.mxu1 %v2800_v6  ;;  %v2879_v5 = vld [vmem:[%s3897_s1 + $0x6b0] ss:$8 sps:$4 sm:$0xff]   ;;  %v2884_v6 = vld [vmem:[%s3897_s1 + $0x2c4] ss:$8 sps:$4 sm:$0xff]  }
  0x7d   : > { %2058 = vmatprep.subr.bf16.mxu0 %v2803_v7  ;;  %v2887_v7 = vld [vmem:[%s3897_s1 + $0x6c4] ss:$8 sps:$4 sm:$0xff]  }
  0x7f   : > { %1887 = vmatpush1.bf16.msra.mxu1 %v2798_v8  ;;  %v2882_v8 = vld [vmem:[%s3897_s1 + $0x2c0] ss:$8 sps:$4 sm:$0xff]  }
  0x80   : > { %2059 = vmatpush1.bf16.msra.mxu0 %v2801_v9  ;;  %1888 = vmatprep.subr.bf16.mxu1 %v2806_v10  ;;  %v2885_v9 = vld [vmem:[%s3897_s1 + $0x6c0] ss:$8 sps:$4 sm:$0xff]   ;;  %v2890_v10 = vld [vmem:[%s3897_s1 + $0x2d4] ss:$8 sps:$4 sm:$0xff]  }
  0x81   : > { %2060 = vmatprep.subr.bf16.mxu0 %v2809_v11  ;;  %v2893_v11 = vld [vmem:[%s3897_s1 + $0x6d4] ss:$8 sps:$4 sm:$0xff]  }
  0x83   : > { %1889 = vmatpush1.bf16.msra.mxu1 %v2804_v12  ;;  %v2888_v12 = vld [vmem:[%s3897_s1 + $0x2d0] ss:$8 sps:$4 sm:$0xff]  }
  0x84   : > { %2061 = vmatpush1.bf16.msra.mxu0 %v2807_v13  ;;  %1901 = vmatprep.subr.bf16.mxu1 %v2812_v14  ;;  %v2891_v13 = vld [vmem:[%s3897_s1 + $0x6d0] ss:$8 sps:$4 sm:$0xff]   ;;  %v2896_v14 = vld [vmem:[%s3897_s1 + $0x2e4] ss:$8 sps:$4 sm:$0xff]  }
  0x85   : > { %2073 = vmatprep.subr.bf16.mxu0 %v2815_v15  ;;  %v2899_v15 = vld [vmem:[%s3897_s1 + $0x6e4] ss:$8 sps:$4 sm:$0xff]  }
  0x86   : > { %1891 = vmatmul.mubr.bf16.vlgmr.msra.gmra.mrb[0].mxu1 %v2300_v16  ;;  %v2894_v16 = vld [vmem:[%s3897_s1 + $0x2e0] ss:$8 sps:$4 sm:$0xff]  }
  0x87   : > { %2063 = vmatmul.mubr.bf16.vlgmr.msra.gmra.mrb[0].mxu0 %v2308_v18  ;;  %1902 = vmatpush1.bf16.msra.mxu1 %v2810_v17  ;;  %v2897_v17 = vld [vmem:[%s3897_s1 + $0x6e0] ss:$8 sps:$4 sm:$0xff]   ;;  %v2902_v18 = vld [vmem:[%s3897_s1 + $0x2f4] ss:$8 sps:$4 sm:$0xff]  }
  0x88   : > { %2074 = vmatpush1.bf16.msra.mxu0 %v2813_v19  ;;  %1903 = vmatprep.subr.bf16.mxu1 %v2818_v20  ;;  %v2905_v19 = vld [vmem:[%s3897_s1 + $0x6f4] ss:$8 sps:$4 sm:$0xff]   ;;  %v2900_v20 = vld [vmem:[%s3897_s1 + $0x2f0] ss:$8 sps:$4 sm:$0xff]  }
  0x89   : > { %2075 = vmatprep.subr.bf16.mxu0 %v2821_v21  ;;  %1933 = vmatprep.mubr.bf16.mxu1 %v2303_v28  ;;  %v2903_v21 = vld [vmem:[%s3897_s1 + $0x6f0] ss:$8 sps:$4 sm:$0xff]   ;;  %v2310_v28 = vcombine.low %v3501_v29, %v3504_v30 }
  0x8a   : > { %2105 = vmatprep.mubr.bf16.mxu0 %v2311_v31  ;;  %v3684_v31 = vld [vmem:[%s3184_s30 + $0x58] sm:$0xff] }
  0x8b   : > { %1904 = vmatpush1.bf16.msra.mxu1 %v2816_v22  ;;  %v2908_v22 = vld [vmem:[%s3897_s1 + $0x304] ss:$8 sps:$4 sm:$0xff]  }
  0x8c   : > { %2076 = vmatpush1.bf16.msra.mxu0 %v2819_v23  ;;  %1905 = vmatprep.subr.bf16.mxu1 %v2824_v26  ;;  %v2911_v23 = vld [vmem:[%s3897_s1 + $0x704] ss:$8 sps:$4 sm:$0xff]   ;;  %v3677_v26 = vld [vmem:[%s3184_s30 + $0x18] sm:$0xff] }
  0x8d   : > { %2077 = vmatprep.subr.bf16.mxu0 %v2827_v27  ;;  %v2302_v27 = vcombine.low %v3487_v24, %v3490_v25  ;;  %v2914_v24 = vld [vmem:[%s3897_s1 + $0x314] ss:$8 sps:$4 sm:$0xff]   ;;  %v2305_v29 = vcombine.high %v3677_v26, %v3684_v31 }
  0x8e   : > { %v2917_v25 = vld [vmem:[%s3897_s1 + $0x714] ss:$8 sps:$4 sm:$0xff]  }
  0x8f   : > { %1906 = vmatpush1.bf16.msra.mxu1 %v2822_v32  ;;  %v3687_v32 = vld [vmem:[%s3184_s30 + $0x38] sm:$0xff] }
  0x90   : > { %2078 = vmatpush1.bf16.msra.mxu0 %v2825_v33  ;;  %1907 = vmatprep.subr.bf16.mxu1 %v2830_v34  ;;  %v3690_v33 = vld [vmem:[%s3184_s30 + $0x78] sm:$0xff]  ;;  %v2906_v34 = vld [vmem:[%s3897_s1 + $0x300] ss:$8 sps:$4 sm:$0xff]  }
  0x91   : > { %2079 = vmatprep.subr.bf16.mxu0 %v2833_v35  ;;  %v2909_v35 = vld [vmem:[%s3897_s1 + $0x700] ss:$8 sps:$4 sm:$0xff]   ;;  %v2313_v30 = vcombine.high %v3687_v32, %v3690_v33 }
  0x93   : > { %1908 = vmatpush1.bf16.msra.mxu1 %v2828_v36  ;;  %v2912_v36 = vld [vmem:[%s3897_s1 + $0x310] ss:$8 sps:$4 sm:$0xff]  }
  0x94   : > { %2080 = vmatpush1.bf16.msra.mxu0 %v2831_v37  ;;  %1909 = vmatprep.subr.bf16.mxu1 %v2836_v38  ;;  %v2915_v37 = vld [vmem:[%s3897_s1 + $0x710] ss:$8 sps:$4 sm:$0xff]   ;;  %v2920_v38 = vld [vmem:[%s3897_s1 + $0x324] ss:$8 sps:$4 sm:$0xff]  }
  0x95   : > { %2081 = vmatprep.subr.bf16.mxu0 %v2839_v39  ;;  %v2923_v39 = vld [vmem:[%s3897_s1 + $0x724] ss:$8 sps:$4 sm:$0xff]  }
  0x97   : > { %1910 = vmatpush1.bf16.msra.mxu1 %v2834_v40  ;;  %v2918_v40 = vld [vmem:[%s3897_s1 + $0x320] ss:$8 sps:$4 sm:$0xff]  }
  0x98   : > { %2082 = vmatpush1.bf16.msra.mxu0 %v2837_v41  ;;  %1911 = vmatprep.subr.bf16.mxu1 %v2842_v42  ;;  %v2921_v41 = vld [vmem:[%s3897_s1 + $0x720] ss:$8 sps:$4 sm:$0xff]   ;;  %v2926_v42 = vld [vmem:[%s3897_s1 + $0x334] ss:$8 sps:$4 sm:$0xff]  }
  0x99   : > { %2083 = vmatprep.subr.bf16.mxu0 %v2845_v43  ;;  %v2929_v43 = vld [vmem:[%s3897_s1 + $0x734] ss:$8 sps:$4 sm:$0xff]  }
  0x9b   : > { %1912 = vmatpush1.bf16.msra.mxu1 %v2840_v44  ;;  %v2924_v44 = vld [vmem:[%s3897_s1 + $0x330] ss:$8 sps:$4 sm:$0xff]  }
  0x9c   : > { %2084 = vmatpush1.bf16.msra.mxu0 %v2843_v45  ;;  %1913 = vmatprep.subr.bf16.mxu1 %v2848_v46  ;;  %v2927_v45 = vld [vmem:[%s3897_s1 + $0x730] ss:$8 sps:$4 sm:$0xff]   ;;  %v2932_v46 = vld [vmem:[%s3897_s1 + $0x344] ss:$8 sps:$4 sm:$0xff]  }
  0x9d   : > { %2085 = vmatprep.subr.bf16.mxu0 %v2851_v47  ;;  %v2935_v47 = vld [vmem:[%s3897_s1 + $0x744] ss:$8 sps:$4 sm:$0xff]  }
  0x9f   : > { %1914 = vmatpush1.bf16.msra.mxu1 %v2846_v48  ;;  %v2930_v48 = vld [vmem:[%s3897_s1 + $0x340] ss:$8 sps:$4 sm:$0xff]  }
  0xa0   : > { %2086 = vmatpush1.bf16.msra.mxu0 %v2849_v49  ;;  %1915 = vmatprep.subr.bf16.mxu1 %v2854_v50  ;;  %v2933_v49 = vld [vmem:[%s3897_s1 + $0x740] ss:$8 sps:$4 sm:$0xff]   ;;  %v2938_v50 = vld [vmem:[%s3897_s1 + $0x354] ss:$8 sps:$4 sm:$0xff]  }
  0xa1   : > { %2087 = vmatprep.subr.bf16.mxu0 %v2857_v51  ;;  %v2941_v51 = vld [vmem:[%s3897_s1 + $0x754] ss:$8 sps:$4 sm:$0xff]  }
  0xa3   : > { %1916 = vmatpush1.bf16.msra.mxu1 %v2852_v52  ;;  %v2936_v52 = vld [vmem:[%s3897_s1 + $0x350] ss:$8 sps:$4 sm:$0xff]  }
  0xa4   : > { %2088 = vmatpush1.bf16.msra.mxu0 %v2855_v53  ;;  %1917 = vmatprep.subr.bf16.mxu1 %v2860_v54  ;;  %v2939_v53 = vld [vmem:[%s3897_s1 + $0x750] ss:$8 sps:$4 sm:$0xff]   ;;  %v2944_v54 = vld [vmem:[%s3897_s1 + $0x364] ss:$8 sps:$4 sm:$0xff]  }
  0xa5   : > { %2089 = vmatprep.subr.bf16.mxu0 %v2863_v55  ;;  %v2947_v55 = vld [vmem:[%s3897_s1 + $0x764] ss:$8 sps:$4 sm:$0xff]  }
  0xa7   : > { %1918 = vmatpush1.bf16.msra.mxu1 %v2858_v56  ;;  %v2942_v56 = vld [vmem:[%s3897_s1 + $0x360] ss:$8 sps:$4 sm:$0xff]  }
  0xa8   : > { %2090 = vmatpush1.bf16.msra.mxu0 %v2861_v57  ;;  %1919 = vmatprep.subr.bf16.mxu1 %v2866_v58  ;;  %v2945_v57 = vld [vmem:[%s3897_s1 + $0x760] ss:$8 sps:$4 sm:$0xff]   ;;  %v2950_v58 = vld [vmem:[%s3897_s1 + $0x374] ss:$8 sps:$4 sm:$0xff]  }
  0xa9   : > { %2091 = vmatprep.subr.bf16.mxu0 %v2869_v59  ;;  %v2953_v59 = vld [vmem:[%s3897_s1 + $0x774] ss:$8 sps:$4 sm:$0xff]  }
  0xab   : > { %1920 = vmatpush1.bf16.msra.mxu1 %v2864_v60  ;;  %v2948_v60 = vld [vmem:[%s3897_s1 + $0x370] ss:$8 sps:$4 sm:$0xff]  }
  0xac   : > { %2092 = vmatpush1.bf16.msra.mxu0 %v2867_v61  ;;  %1921 = vmatprep.subr.bf16.mxu1 %v2872_v62  ;;  %v2951_v61 = vld [vmem:[%s3897_s1 + $0x770] ss:$8 sps:$4 sm:$0xff]   ;;  %v2956_v62 = vld [vmem:[%s3897_s1 + $0x384] ss:$8 sps:$4 sm:$0xff]  }
  0xad   : > { %2093 = vmatprep.subr.bf16.mxu0 %v2875_v63  ;;  %v2959_v63 = vld [vmem:[%s3897_s1 + $0x784] ss:$8 sps:$4 sm:$0xff]  }
  0xaf   : > { %1922 = vmatpush1.bf16.msra.mxu1 %v2870_v0  ;;  %v2954_v0 = vld [vmem:[%s3897_s1 + $0x380] ss:$8 sps:$4 sm:$0xff]  }
  0xb0   : > { %2094 = vmatpush1.bf16.msra.mxu0 %v2873_v1  ;;  %1923 = vmatprep.subr.bf16.mxu1 %v2878_v2  ;;  %v2957_v1 = vld [vmem:[%s3897_s1 + $0x780] ss:$8 sps:$4 sm:$0xff]   ;;  %v2962_v2 = vld [vmem:[%s3897_s1 + $0x394] ss:$8 sps:$4 sm:$0xff]  }
  0xb1   : > { %2095 = vmatprep.subr.bf16.mxu0 %v2881_v3  ;;  %v2965_v3 = vld [vmem:[%s3897_s1 + $0x794] ss:$8 sps:$4 sm:$0xff]  }
  0xb3   : > { %1924 = vmatpush1.bf16.msra.mxu1 %v2876_v4  ;;  %v2960_v4 = vld [vmem:[%s3897_s1 + $0x390] ss:$8 sps:$4 sm:$0xff]  }
  0xb4   : > { %2096 = vmatpush1.bf16.msra.mxu0 %v2879_v5  ;;  %1925 = vmatprep.subr.bf16.mxu1 %v2884_v6  ;;  %v2963_v5 = vld [vmem:[%s3897_s1 + $0x790] ss:$8 sps:$4 sm:$0xff]   ;;  %v2968_v6 = vld [vmem:[%s3897_s1 + $0x3a4] ss:$8 sps:$4 sm:$0xff]  }
  0xb5   : > { %2097 = vmatprep.subr.bf16.mxu0 %v2887_v7  ;;  %v2971_v7 = vld [vmem:[%s3897_s1 + $0x7a4] ss:$8 sps:$4 sm:$0xff]  }
  0xb7   : > { %1926 = vmatpush1.bf16.msra.mxu1 %v2882_v8  ;;  %v2966_v8 = vld [vmem:[%s3897_s1 + $0x3a0] ss:$8 sps:$4 sm:$0xff]  }
  0xb8   : > { %2098 = vmatpush1.bf16.msra.mxu0 %v2885_v9  ;;  %1927 = vmatprep.subr.bf16.mxu1 %v2890_v10  ;;  %v2969_v9 = vld [vmem:[%s3897_s1 + $0x7a0] ss:$8 sps:$4 sm:$0xff]   ;;  %v2974_v10 = vld [vmem:[%s3897_s1 + $0x3b4] ss:$8 sps:$4 sm:$0xff]  }
  0xb9   : > { %2099 = vmatprep.subr.bf16.mxu0 %v2893_v11  ;;  %v2977_v11 = vld [vmem:[%s3897_s1 + $0x7b4] ss:$8 sps:$4 sm:$0xff]  }
  0xbb   : > { %1928 = vmatpush1.bf16.msra.mxu1 %v2888_v12  ;;  %v2972_v12 = vld [vmem:[%s3897_s1 + $0x3b0] ss:$8 sps:$4 sm:$0xff]  }
  0xbc   : > { %2100 = vmatpush1.bf16.msra.mxu0 %v2891_v13  ;;  %1929 = vmatprep.subr.bf16.mxu1 %v2896_v14  ;;  %v2975_v13 = vld [vmem:[%s3897_s1 + $0x7b0] ss:$8 sps:$4 sm:$0xff]   ;;  %v2980_v14 = vld [vmem:[%s3897_s1 + $0x3c4] ss:$8 sps:$4 sm:$0xff]  }
  0xbd   : > { %2101 = vmatprep.subr.bf16.mxu0 %v2899_v15  ;;  %v2983_v15 = vld [vmem:[%s3897_s1 + $0x7c4] ss:$8 sps:$4 sm:$0xff]  }
  0xbf   : > { %1930 = vmatpush1.bf16.msra.mxu1 %v2894_v16  ;;  %v2978_v16 = vld [vmem:[%s3897_s1 + $0x3c0] ss:$8 sps:$4 sm:$0xff]  }
  0xc0   : > { %2102 = vmatpush1.bf16.msra.mxu0 %v2897_v17  ;;  %1931 = vmatprep.subr.bf16.mxu1 %v2902_v18  ;;  %v2981_v17 = vld [vmem:[%s3897_s1 + $0x7c0] ss:$8 sps:$4 sm:$0xff]   ;;  %v2986_v18 = vld [vmem:[%s3897_s1 + $0x3d4] ss:$8 sps:$4 sm:$0xff]  }
  0xc1   : > { %2103 = vmatprep.subr.bf16.mxu0 %v2905_v19  ;;  %v2989_v19 = vld [vmem:[%s3897_s1 + $0x7d4] ss:$8 sps:$4 sm:$0xff]  }
  0xc3   : > { %1932 = vmatpush1.bf16.msra.mxu1 %v2900_v20  ;;  %v2984_v20 = vld [vmem:[%s3897_s1 + $0x3d0] ss:$8 sps:$4 sm:$0xff]  }
  0xc4   : > { %2104 = vmatpush1.bf16.msra.mxu0 %v2903_v21  ;;  %1944 = vmatprep.subr.bf16.mxu1 %v2908_v22  ;;  %v2987_v21 = vld [vmem:[%s3897_s1 + $0x7d0] ss:$8 sps:$4 sm:$0xff]   ;;  %v2992_v22 = vld [vmem:[%s3897_s1 + $0x3e4] ss:$8 sps:$4 sm:$0xff]  }
  0xc5   : > { %2116 = vmatprep.subr.bf16.mxu0 %v2911_v23  ;;  %v2995_v23 = vld [vmem:[%s3897_s1 + $0x7e4] ss:$8 sps:$4 sm:$0xff]  }
  0xc6   : > { %1934 = vmatmul.mubr.bf16.vlgmr.msra.gmra.mrb[0].mxu1 %v2302_v27  ;;  %v2990_v27 = vld [vmem:[%s3897_s1 + $0x3e0] ss:$8 sps:$4 sm:$0xff]  }
  0xc7   : > { %2106 = vmatmul.mubr.bf16.vlgmr.msra.gmra.mrb[0].mxu0 %v2310_v28  ;;  %1945 = vmatpush1.bf16.msra.mxu1 %v2906_v34  ;;  %v2993_v28 = vld [vmem:[%s3897_s1 + $0x7e0] ss:$8 sps:$4 sm:$0xff]   ;;  %v2998_v34 = vld [vmem:[%s3897_s1 + $0x3f4] ss:$8 sps:$4 sm:$0xff]  }
  0xc8   : > { %2117 = vmatpush1.bf16.msra.mxu0 %v2909_v35  ;;  %1946 = vmatprep.subr.bf16.mxu1 %v2914_v24  ;;  %v3001_v35 = vld [vmem:[%s3897_s1 + $0x7f4] ss:$8 sps:$4 sm:$0xff]   ;;  %v2996_v24 = vld [vmem:[%s3897_s1 + $0x3f0] ss:$8 sps:$4 sm:$0xff]  }
  0xc9   : > { %2118 = vmatprep.subr.bf16.mxu0 %v2917_v25  ;;  %1976 = vmatprep.mubr.bf16.mxu1 %v2305_v29  ;;  %v2999_v25 = vld [vmem:[%s3897_s1 + $0x7f0] ss:$8 sps:$4 sm:$0xff]   ;;  %v2304_v29 = vcombine.low %v3677_v26, %v3684_v31 }
  0xca   : > { %2148 = vmatprep.mubr.bf16.mxu0 %v2313_v30  ;;  %v2312_v30 = vcombine.low %v3687_v32, %v3690_v33 }
  0xcb   : > { %1947 = vmatpush1.bf16.msra.mxu1 %v2912_v36  ;;  %v445_v36 = vlaneseq }
  0xcc   : > { %2119 = vmatpush1.bf16.msra.mxu0 %v2915_v37  ;;  %1948 = vmatprep.subr.bf16.mxu1 %v2920_v38 }
  0xcd   : > { %2120 = vmatprep.subr.bf16.mxu0 %v2923_v39  ;;  %v446_v37 = vshrl.u32 %v445_v36, 7  ;;  %v443_v39 = vld [vmem:[%s3898_s2] sm:$0x3] }
  0xcf   : > { %1949 = vmatpush1.bf16.msra.mxu1 %v2918_v40  ;;  %v447_v38 = vsub.s32 0, %v446_v37  ;;  %v451_v40 = vsub.s32 1, %v446_v37 }
  0xd0   : > { %2121 = vmatpush1.bf16.msra.mxu0 %v2921_v41  ;;  %1950 = vmatprep.subr.bf16.mxu1 %v2926_v42 }
  0xd1   : > { %2122 = vmatprep.subr.bf16.mxu0 %v2929_v43  ;;  %v448_v41 = vrot.slane %v443_v39, %v447_v38  ;;  %v452_v42 = vrot.slane %v443_v39, %v451_v40 }
  0xd3   : > { %1951 = vmatpush1.bf16.msra.mxu1 %v2924_v44 }
  0xd4   : > { %2123 = vmatpush1.bf16.msra.mxu0 %v2927_v45  ;;  %1952 = vmatprep.subr.bf16.mxu1 %v2932_v46 }
  0xd5   : > { %2124 = vmatprep.subr.bf16.mxu0 %v2935_v47 }
  0xd7   : > { %1953 = vmatpush1.bf16.msra.mxu1 %v2930_v48 }
  0xd8   : > { %2125 = vmatpush1.bf16.msra.mxu0 %v2933_v49  ;;  %1954 = vmatprep.subr.bf16.mxu1 %v2938_v50 }
  0xd9   : > { %2126 = vmatprep.subr.bf16.mxu0 %v2941_v51 }
  0xdb   : > { %1955 = vmatpush1.bf16.msra.mxu1 %v2936_v52 }
  0xdc   : > { %2127 = vmatpush1.bf16.msra.mxu0 %v2939_v53  ;;  %1956 = vmatprep.subr.bf16.mxu1 %v2944_v54 }
  0xdd   : > { %2128 = vmatprep.subr.bf16.mxu0 %v2947_v55 }
  0xdf   : > { %1957 = vmatpush1.bf16.msra.mxu1 %v2942_v56 }
  0xe0   : > { %2129 = vmatpush1.bf16.msra.mxu0 %v2945_v57  ;;  %1958 = vmatprep.subr.bf16.mxu1 %v2950_v58 }
  0xe1   : > { %2130 = vmatprep.subr.bf16.mxu0 %v2953_v59 }
  0xe3   : > { %1959 = vmatpush1.bf16.msra.mxu1 %v2948_v60 }
  0xe4   : > { %2131 = vmatpush1.bf16.msra.mxu0 %v2951_v61  ;;  %1960 = vmatprep.subr.bf16.mxu1 %v2956_v62 }
  0xe5   : > { %2132 = vmatprep.subr.bf16.mxu0 %v2959_v63 }
  0xe7   : > { %1961 = vmatpush1.bf16.msra.mxu1 %v2954_v0 }
  0xe8   : > { %2133 = vmatpush1.bf16.msra.mxu0 %v2957_v1  ;;  %1962 = vmatprep.subr.bf16.mxu1 %v2962_v2 }
  0xe9   : > { %2134 = vmatprep.subr.bf16.mxu0 %v2965_v3 }
  0xeb   : > { %1963 = vmatpush1.bf16.msra.mxu1 %v2960_v4 }
  0xec   : > { %2135 = vmatpush1.bf16.msra.mxu0 %v2963_v5  ;;  %1964 = vmatprep.subr.bf16.mxu1 %v2968_v6 }
  0xed   : > { %2136 = vmatprep.subr.bf16.mxu0 %v2971_v7 }
  0xef   : > { %1965 = vmatpush1.bf16.msra.mxu1 %v2966_v8 }
  0xf0   : > { %2137 = vmatpush1.bf16.msra.mxu0 %v2969_v9  ;;  %1966 = vmatprep.subr.bf16.mxu1 %v2974_v10 }
  0xf1   : > { %2138 = vmatprep.subr.bf16.mxu0 %v2977_v11 }
  0xf3   : > { %1967 = vmatpush1.bf16.msra.mxu1 %v2972_v12 }
  0xf4   : > { %2139 = vmatpush1.bf16.msra.mxu0 %v2975_v13  ;;  %1968 = vmatprep.subr.bf16.mxu1 %v2980_v14 }
  0xf5   : > { %2140 = vmatprep.subr.bf16.mxu0 %v2983_v15 }
  0xf7   : > { %1969 = vmatpush1.bf16.msra.mxu1 %v2978_v16 }
  0xf8   : > { %2141 = vmatpush1.bf16.msra.mxu0 %v2981_v17  ;;  %1970 = vmatprep.subr.bf16.mxu1 %v2986_v18 }
  0xf9   : > { %2142 = vmatprep.subr.bf16.mxu0 %v2989_v19 }
  0xfb   : > { %1971 = vmatpush1.bf16.msra.mxu1 %v2984_v20 }
  0xfc   : > { %2143 = vmatpush1.bf16.msra.mxu0 %v2987_v21  ;;  %1972 = vmatprep.subr.bf16.mxu1 %v2992_v22 }
  0xfd   : > { %2144 = vmatprep.subr.bf16.mxu0 %v2995_v23 }
  0xff   : > { %1973 = vmatpush1.bf16.msra.mxu1 %v2990_v27 }
 0x100   : > { %2145 = vmatpush1.bf16.msra.mxu0 %v2993_v28  ;;  %1974 = vmatprep.subr.bf16.mxu1 %v2998_v34 }
 0x101   : > { %2146 = vmatprep.subr.bf16.mxu0 %v3001_v35 }
 0x103   : > { %1975 = vmatpush1.bf16.msra.mxu1 %v2996_v24 }
 0x104   : > { %2147 = vmatpush1.bf16.msra.mxu0 %v2999_v25 }
 0x106   : > { %1977 = vmatmul.mubr.bf16.vlgmr.msra.gmra.mrb[0].mxu1 %v2304_v29 }
 0x107   : > { %2149 = vmatmul.mubr.bf16.vlgmr.msra.gmra.mrb[0].mxu0 %v2312_v30 }
 0x1d9   : > { %v1978_v43 = vpop.f32.mrb[0].mxu1 }
 0x1da   : > { %v2150_v44 = vpop.f32.mrb[0].mxu0  ;;  %v2578_v26 = vadd.f32 %v1978_v43, %v448_v41  ;;  %v1980_v31 = vpop.f32.mrb[1].mxu1 }
 0x1db   : > { %v2152_v45 = vpop.f32.mrb[1].mxu0  ;;  %v2580_v32 = vadd.f32 %v1980_v31, %v452_v42  ;;  %v1982_v33 = vpop.f32.mrb[2].mxu1 }
 0x1dc   : > { %v2154_v46 = vpop.f32.mrb[2].mxu0  ;;  %v2579_v47 = vadd.f32 %v2578_v26, %v2150_v44  ;;  %v2582_v48 = vadd.f32 %v1982_v33, %v448_v41  ;;  %v1984_v49 = vpop.f32.mrb[3].mxu1 }
 0x1dd   : > { %v2156_v50 = vpop.f32.mrb[3].mxu0  ;;  %v2581_v51 = vadd.f32 %v2580_v32, %v2152_v45  ;;  %v2584_v52 = vadd.f32 %v1984_v49, %v452_v42 }
 0x1de   : > { %v2583_v53 = vadd.f32 %v2582_v48, %v2154_v46 }
 0x1df   : > { %v2585_v54 = vadd.f32 %v2584_v52, %v2156_v50 }
 0x1e0   : > { %v2159_v55 = vadd.f32 %v2583_v53, %v2579_v47 }
 0x1e1   : > { %v2166_v56 = vadd.f32 %v2585_v54, %v2581_v51 }
 0x1e2   : > { %v2160_v57 = vrot.slane %v2159_v55, 4 }
 0x1e3   : > { %v2167_v58 = vrot.slane %v2166_v56, 4 }
 0x1e4   : > { %v2161_v59 = vadd.f32 %v2160_v57, %v2159_v55 }
 0x1e5   : > { %v2168_v60 = vadd.f32 %v2167_v58, %v2166_v56 }
 0x1e6   : > { %v2162_v61 = vrot.slane %v2161_v59, 2 }
 0x1e7   : > { %v2169_v62 = vrot.slane %v2168_v60, 2 }
 0x1e8   : > { %v2163_v63 = vadd.f32 %v2162_v61, %v2161_v59 }
 0x1e9   : > { %v2170_v0 = vadd.f32 %v2169_v62, %v2168_v60 }
 0x1ea   : > { %v2164_v1 = vrot.slane %v2163_v63, 1 }
 0x1eb   : > { %v2171_v2 = vrot.slane %v2170_v0, 1 }
 0x1ec   : > { %v2165_v3 = vadd.f32 %v2164_v1, %v2163_v63 }
 0x1ed   : > { %v2172_v4 = vadd.f32 %v2171_v2, %v2170_v0 }
 0x1ee   : > { %v2174_v5 = vmul.f32 0.0625, %v2165_v3 }
 0x1ef   : > { %v2175_v6 = vmul.f32 0.0625, %v2172_v4 }
 0x1f0   : > { %v2176_v7 = vsub.f32 %v2579_v47, %v2174_v5  ;;  %v2178_v8 = vsub.f32 %v2583_v53, %v2174_v5 }
 0x1f1   : > { %v2177_v9 = vsub.f32 %v2581_v51, %v2175_v6  ;;  %v2179_v10 = vsub.f32 %v2585_v54, %v2175_v6 }
 0x1f2   : > { %v2180_v11 = vmul.f32 %v2176_v7, %v2176_v7  ;;  %v2182_v12 = vmul.f32 %v2178_v8, %v2178_v8 }
 0x1f3   : > { %v2181_v13 = vmul.f32 %v2177_v9, %v2177_v9  ;;  %v2183_v14 = vmul.f32 %v2179_v10, %v2179_v10 }
 0x1f4   : > { %v2184_v15 = vadd.f32 %v2182_v12, %v2180_v11 }
 0x1f5   : > { %v2191_v16 = vadd.f32 %v2183_v14, %v2181_v13 }
 0x1f6   : > { %v2185_v17 = vrot.slane %v2184_v15, 4 }
 0x1f7   : > { %v2192_v18 = vrot.slane %v2191_v16, 4 }
 0x1f8   : > { %v2186_v19 = vadd.f32 %v2185_v17, %v2184_v15 }
 0x1f9   : > { %v2193_v20 = vadd.f32 %v2192_v18, %v2191_v16 }
 0x1fa   : > { %v2187_v21 = vrot.slane %v2186_v19, 2 }
 0x1fb   : > { %v2194_v22 = vrot.slane %v2193_v20, 2 }
 0x1fc   : > { %v2188_v23 = vadd.f32 %v2187_v21, %v2186_v19 }
 0x1fd   : > { %v2195_v27 = vadd.f32 %v2194_v22, %v2193_v20 }
 0x1fe   : > { %v2189_v28 = vrot.slane %v2188_v23, 1 }
 0x1ff   : > { %v2196_v34 = vrot.slane %v2195_v27, 1 }
 0x200   : > { %v2190_v35 = vadd.f32 %v2189_v28, %v2188_v23 }
 0x201   : > { %v2197_v24 = vadd.f32 %v2196_v34, %v2195_v27 }
 0x202   : > { %v2198_v25 = vmul.f32 0.0625, %v2190_v35 }
 0x203   : > { %v2199_v29 = vmul.f32 0.0625, %v2197_v24 }
 0x204   : > { %v2200_v30 = vadd.f32 1e-05, %v2198_v25 }
 0x205   : > { %v2201_v36 = vadd.f32 1e-05, %v2199_v29 }
 0x206   : > { %3002 = vrsqrt.f32 %v2200_v30 }
 0x207   : > { %3004 = vrsqrt.f32 %v2201_v36 }
 0x210   : > { %v3003_v37 = vpop.eup %3002 }
 0x211   : > { %v3005_v38 = vpop.eup %3004  ;;  %v2204_v39 = vmul.f32 %v3003_v37, %v2176_v7  ;;  %v2206_v40 = vmul.f32 %v3003_v37, %v2178_v8 }
 0x212   : > { %v2205_v41 = vmul.f32 %v3005_v38, %v2177_v9  ;;  %v2207_v42 = vmul.f32 %v3005_v38, %v2179_v10 }
 0x213   : > { %vm2208_vm0 = vcmp.ge.f32.partialorder %v2204_v39, 0.0  ;;  %vm2210_vm1 = vcmp.ge.f32.partialorder %v2206_v40, 0.0  ;;  %v2212_v43 = vmul.f32 0.2, %v2204_v39  ;;  %v2214_v44 = vmul.f32 0.2, %v2206_v40 }
 0x214   : > { %vm2209_vm2 = vcmp.ge.f32.partialorder %v2205_v41, 0.0  ;;  %vm2211_vm3 = vcmp.ge.f32.partialorder %v2207_v42, 0.0  ;;  %v2213_v26 = vmul.f32 0.2, %v2205_v41  ;;  %v2215_v31 = vmul.f32 0.2, %v2207_v42 }
 0x215   : > { %v2216_v45 = vsel %vm2208_vm0, %v2204_v39, %v2212_v43  ;;  %v2218_v32 = vsel %vm2210_vm1, %v2206_v40, %v2214_v44 }
 0x216   : > { %v2217_v33 = vsel %vm2209_vm2, %v2205_v41, %v2213_v26  ;;  %v2219_v46 = vsel %vm2211_vm3, %v2207_v42, %v2215_v31 }
 0x217   : > { %v2576_v47 = vpack.c.bf16 %v2217_v33, %v2216_v45  ;;  %v2577_v48 = vpack.c.bf16 %v2219_v46, %v2218_v32 }
 0x219   : > { %2232 = vst [vmem:[%s170_s22] sm:$0xff] %v2576_v47  ;;  %2233 = vst [vmem:[%s170_s22 + $0x8] sm:$0xff] %v2577_v48 }
 0x21a PF: > { %s13_s12 = sadd.s32 1, %s3012_s12  }
 0x21b   : > { %p10_p4 = scmp.ge.s32.totalorder %s13_s12, 4  }
 0x21d   :  { %12 = sbr.rel (!%p10_p4) target bundleno = 1 (0x1), region = 62 }

// kernel: discriminator_forward.8
= control target key start
LH: loop header
LB: loop body
LE: loop exit
PB: predicated region body
PF: predicated region fallthrough
CT: control target
= control target key end

     0   :  { %s10766_s12 = smov 0   ;;  %s14036_s0 = inlined_call_operand.vmem [shape: bf16[2,4,4096], index: 0, kind: input, shape index: {}]   ;;  %s14037_s1 = inlined_call_operand.vmem [shape: bf16[4096,512], index: 1, kind: input, shape index: {}]   ;;  %s14038_s2 = inlined_call_operand.vmem [shape: f32[1,512], index: 2, kind: input, shape index: {}]   ;;  %s14039_s3 = inlined_call_operand.vmem [shape: bf16[2,4,512], index: 3, kind: output, shape index: {}]  }
   0x1 LB: > { %s8013_s13 = sadd.s32 4294967295, %s10743_s12   ;;  %p8017_p0 = scmp.ge.s32.totalorder %s10743_s12, 1  ;;  %s10743_s12 = sphi %s10766_s12, %s13_s12  }
   0x2   : > { %p137_p1 = scmp.lt.s32.totalorder %s10743_s12, 3 }
   0x4   : > { %p138_p2 = pnand %p8017_p0, %p137_p1 }
   0x5   : > { %v9185_v0 = vld [vmem:[%s14037_s1 + $0x4] ss:$16 sps:$4 sm:$0xff] (!%p138_p2)   ;;  %v9187_v1 = vld [vmem:[%s14037_s1 + $0xc] ss:$16 sps:$4 sm:$0xff] (!%p138_p2)   ;;  %v9189_v2 = vld [vmem:[%s14037_s1] ss:$16 sps:$4 sm:$0xff] (!%p138_p2)   ;;  %v1205_v36 = vlaneseq (!%p138_p2) }
   0x6   : > { %141 = sbr.rel (%p138_p2) target bundleno = 1306 (0x51a), region = 32  ;;  %6521 = vmatprep.subr.bf16.mxu0 (!%p138_p2), %v9185_v0  ;;  %v9190_v3 = vld [vmem:[%s14037_s1 + $0x8] ss:$16 sps:$4 sm:$0xff] (!%p138_p2)   ;;  %7177 = vmatprep.subr.bf16.mxu1 (!%p138_p2), %v9187_v1  ;;  %v9191_v4 = vld [vmem:[%s14037_s1 + $0x24] ss:$16 sps:$4 sm:$0xff] (!%p138_p2)   ;;  %p161_p3 = scmp.lt.s32.totalorder (!%p138_p2), %s8013_s13, 1 }
   0x7   : > { %6522 = vmatpush1.bf16.msra.mxu0 (!%p138_p2), %v9189_v2  ;;  %7178 = vmatpush1.bf16.msra.mxu1 (!%p138_p2), %v9190_v3  ;;  %v9193_v5 = vld [vmem:[%s14037_s1 + $0x2c] ss:$16 sps:$4 sm:$0xff] (!%p138_p2)   ;;  %v9195_v6 = vld [vmem:[%s14037_s1 + $0x20] ss:$16 sps:$4 sm:$0xff] (!%p138_p2)   ;;  %v9196_v7 = vld [vmem:[%s14037_s1 + $0x28] ss:$16 sps:$4 sm:$0xff] (!%p138_p2)  }
   0x8   : > { %6523 = vmatprep.subr.bf16.mxu0 (!%p138_p2), %v9191_v4  ;;  %7179 = vmatprep.subr.bf16.mxu1 (!%p138_p2), %v9193_v5  ;;  %v9197_v8 = vld [vmem:[%s14037_s1 + $0x44] ss:$16 sps:$4 sm:$0xff] (!%p138_p2)   ;;  %v9199_v9 = vld [vmem:[%s14037_s1 + $0x4c] ss:$16 sps:$4 sm:$0xff] (!%p138_p2)   ;;  %v9201_v10 = vld [vmem:[%s14037_s1 + $0x40] ss:$16 sps:$4 sm:$0xff] (!%p138_p2)  }
   0x9   : > { %v9202_v11 = vld [vmem:[%s14037_s1 + $0x48] ss:$16 sps:$4 sm:$0xff] (!%p138_p2)   ;;  %v9203_v12 = vld [vmem:[%s14037_s1 + $0x64] ss:$16 sps:$4 sm:$0xff] (!%p138_p2)   ;;  %v9205_v13 = vld [vmem:[%s14037_s1 + $0x6c] ss:$16 sps:$4 sm:$0xff] (!%p138_p2)  }
   0xa   : > { %v9207_v14 = vld [vmem:[%s14037_s1 + $0x60] ss:$16 sps:$4 sm:$0xff] (!%p138_p2)   ;;  %v9208_v15 = vld [vmem:[%s14037_s1 + $0x68] ss:$16 sps:$4 sm:$0xff] (!%p138_p2)   ;;  %v9209_v16 = vld [vmem:[%s14037_s1 + $0x84] ss:$16 sps:$4 sm:$0xff] (!%p138_p2)  }
   0xb   : > { %6524 = vmatpush1.bf16.msra.mxu0 (!%p138_p2), %v9195_v6  ;;  %7180 = vmatpush1.bf16.msra.mxu1 (!%p138_p2), %v9196_v7  ;;  %v9211_v17 = vld [vmem:[%s14037_s1 + $0x8c] ss:$16 sps:$4 sm:$0xff] (!%p138_p2)   ;;  %v9213_v18 = vld [vmem:[%s14037_s1 + $0x80] ss:$16 sps:$4 sm:$0xff] (!%p138_p2)   ;;  %v9214_v19 = vld [vmem:[%s14037_s1 + $0x88] ss:$16 sps:$4 sm:$0xff] (!%p138_p2)  }
   0xc   : > { %6525 = vmatprep.subr.bf16.mxu0 (!%p138_p2), %v9197_v8  ;;  %7181 = vmatprep.subr.bf16.mxu1 (!%p138_p2), %v9199_v9  ;;  %v9215_v20 = vld [vmem:[%s14037_s1 + $0xa4] ss:$16 sps:$4 sm:$0xff] (!%p138_p2)   ;;  %v9217_v21 = vld [vmem:[%s14037_s1 + $0xac] ss:$16 sps:$4 sm:$0xff] (!%p138_p2)   ;;  %v9219_v22 = vld [vmem:[%s14037_s1 + $0xa0] ss:$16 sps:$4 sm:$0xff] (!%p138_p2)  }
   0xd   : > { %v9220_v23 = vld [vmem:[%s14037_s1 + $0xa8] ss:$16 sps:$4 sm:$0xff]   ;;  %v9221_v24 = vld [vmem:[%s14037_s1 + $0xc4] ss:$16 sps:$4 sm:$0xff]   ;;  %v9223_v25 = vld [vmem:[%s14037_s1 + $0xcc] ss:$16 sps:$4 sm:$0xff]  }
   0xe   : > { %v9225_v26 = vld [vmem:[%s14037_s1 + $0xc0] ss:$16 sps:$4 sm:$0xff]   ;;  %v9226_v27 = vld [vmem:[%s14037_s1 + $0xc8] ss:$16 sps:$4 sm:$0xff]   ;;  %v9227_v28 = vld [vmem:[%s14037_s1 + $0xe4] ss:$16 sps:$4 sm:$0xff]  }
   0xf   : > { %6526 = vmatpush1.bf16.msra.mxu0 %v9201_v10  ;;  %7182 = vmatpush1.bf16.msra.mxu1 %v9202_v11  ;;  %v9229_v29 = vld [vmem:[%s14037_s1 + $0xec] ss:$16 sps:$4 sm:$0xff]   ;;  %v9231_v30 = vld [vmem:[%s14037_s1 + $0xe0] ss:$16 sps:$4 sm:$0xff]   ;;  %v9232_v31 = vld [vmem:[%s14037_s1 + $0xe8] ss:$16 sps:$4 sm:$0xff]  }
  0x10   : > { %6527 = vmatprep.subr.bf16.mxu0 %v9203_v12  ;;  %7183 = vmatprep.subr.bf16.mxu1 %v9205_v13  ;;  %v9233_v32 = vld [vmem:[%s14037_s1 + $0x104] ss:$16 sps:$4 sm:$0xff]   ;;  %v9235_v33 = vld [vmem:[%s14037_s1 + $0x10c] ss:$16 sps:$4 sm:$0xff]   ;;  %v9237_v34 = vld [vmem:[%s14037_s1 + $0x100] ss:$16 sps:$4 sm:$0xff]  }
  0x11   : > { %v9238_v35 = vld [vmem:[%s14037_s1 + $0x108] ss:$16 sps:$4 sm:$0xff]   ;;  %v10745_v37 = vmov 1983009808   ;;  %v9239_v39 = vld [vmem:[%s14037_s1 + $0x124] ss:$16 sps:$4 sm:$0xff]  }
  0x12   : > { %v1235_v38 = vunpack.c.l.s4 %v10745_v37  ;;  %s14041_s13 = smov (!%p161_p3, %s8013_s13), 1  ;;  %v9241_v40 = vld [vmem:[%s14037_s1 + $0x12c] ss:$16 sps:$4 sm:$0xff]   ;;  %v9243_v41 = vld [vmem:[%s14037_s1 + $0x120] ss:$16 sps:$4 sm:$0xff]   ;;  %v10897_v42 = vshrl.u32 %v1205_v36, 7 }
  0x13   : > { %6528 = vmatpush1.bf16.msra.mxu0 %v9207_v14  ;;  %7184 = vmatpush1.bf16.msra.mxu1 %v9208_v15  ;;  %v9244_v44 = vld [vmem:[%s14037_s1 + $0x128] ss:$16 sps:$4 sm:$0xff]   ;;  %v9245_v45 = vld [vmem:[%s14037_s1 + $0x144] ss:$16 sps:$4 sm:$0xff]   ;;  %s9050_s21 = sshll.u32 %s14041_s13, 6  ;;  %vm7833_vm0 = vcmask 1043456  }
  0x14   : > { %6529 = vmatprep.subr.bf16.mxu0 %v9209_v16  ;;  %7185 = vmatprep.subr.bf16.mxu1 %v9211_v17  ;;  %v1236_v43 = vunpack.c.0.s8 %v1235_v38  ;;  %v9247_v46 = vld [vmem:[%s14037_s1 + $0x14c] ss:$16 sps:$4 sm:$0xff]   ;;  %v9249_v47 = vld [vmem:[%s14037_s1 + $0x140] ss:$16 sps:$4 sm:$0xff]   ;;  %v9250_v48 = vld [vmem:[%s14037_s1 + $0x148] ss:$16 sps:$4 sm:$0xff]   ;;  %s10918_s30 = scalar_lea.vmem %s14036_s0, %s9050_s21 }
  0x15   : > { %v9251_v50 = vld [vmem:[%s14037_s1 + $0x164] ss:$16 sps:$4 sm:$0xff]   ;;  %v9253_v51 = vld [vmem:[%s14037_s1 + $0x16c] ss:$16 sps:$4 sm:$0xff]   ;;  %v9255_v53 = vld [vmem:[%s14037_s1 + $0x160] ss:$16 sps:$4 sm:$0xff]  }
  0x16   : > { %v10921_v49 = vsub.s32 %v1236_v43, %v10897_v42  ;;  %v171_v52 = vld [vmem:[%s10918_s30] sm:$0xff]  ;;  %v9256_v55 = vld [vmem:[%s14037_s1 + $0x168] ss:$16 sps:$4 sm:$0xff]   ;;  %v9259_v57 = vld [vmem:[%s14037_s1 + $0x18c] ss:$16 sps:$4 sm:$0xff]   ;;  %s9051_s11 = sshll.u32 %s14041_s13, 3 }
  0x17   : > { %6530 = vmatpush1.bf16.msra.mxu0 %v9213_v18  ;;  %7186 = vmatpush1.bf16.msra.mxu1 %v9214_v19  ;;  %v9257_v56 = vld [vmem:[%s14037_s1 + $0x184] ss:$16 sps:$4 sm:$0xff]   ;;  %v9261_v59 = vld [vmem:[%s14037_s1 + $0x180] ss:$16 sps:$4 sm:$0xff]   ;;  %v9262_v60 = vld [vmem:[%s14037_s1 + $0x188] ss:$16 sps:$4 sm:$0xff]   ;;  %v1233_v7 = vcombine.high %v171_v52, %v171_v52  ;;  %s170_s16 = scalar_lea.vmem %s14039_s3, %s9051_s11 }
  0x18   : > { %6531 = vmatprep.subr.bf16.mxu0 %v9215_v20  ;;  %7187 = vmatprep.subr.bf16.mxu1 %v9217_v21  ;;  %v1240_v54 = vrot.slane %v171_v52, %v10921_v49  ;;  %v9263_v61 = vld [vmem:[%s14037_s1 + $0x1a4] ss:$16 sps:$4 sm:$0xff]   ;;  %v9265_v62 = vld [vmem:[%s14037_s1 + $0x1ac] ss:$16 sps:$4 sm:$0xff]   ;;  %v9267_v63 = vld [vmem:[%s14037_s1 + $0x1a0] ss:$16 sps:$4 sm:$0xff]  }
  0x19   : > { %v9268_v0 = vld [vmem:[%s14037_s1 + $0x1a8] ss:$16 sps:$4 sm:$0xff]   ;;  %v9269_v1 = vld [vmem:[%s14037_s1 + $0x1c4] ss:$16 sps:$4 sm:$0xff]   ;;  %v9271_v2 = vld [vmem:[%s14037_s1 + $0x1cc] ss:$16 sps:$4 sm:$0xff]   ;;  %v10992_v12 = vrot.slane %v1233_v7, %v10921_v49 }
  0x1a   : > { %v1248_v58 = vcombine.high %v1240_v54, %v1240_v54  ;;  %v9273_v3 = vld [vmem:[%s14037_s1 + $0x1c0] ss:$16 sps:$4 sm:$0xff]   ;;  %v9274_v4 = vld [vmem:[%s14037_s1 + $0x1c8] ss:$16 sps:$4 sm:$0xff]   ;;  %v9275_v5 = vld [vmem:[%s14037_s1 + $0x1e4] ss:$16 sps:$4 sm:$0xff]  }
  0x1b   : > { %6532 = vmatpush1.bf16.msra.mxu0 %v9219_v22  ;;  %7188 = vmatpush1.bf16.msra.mxu1 %v9220_v23  ;;  %v9277_v6 = vld [vmem:[%s14037_s1 + $0x1ec] ss:$16 sps:$4 sm:$0xff]   ;;  %v9279_v8 = vld [vmem:[%s14037_s1 + $0x1e0] ss:$16 sps:$4 sm:$0xff]   ;;  %v9280_v9 = vld [vmem:[%s14037_s1 + $0x1e8] ss:$16 sps:$4 sm:$0xff]   ;;  %v1249_v17 = vcombine.high %v10992_v12, %v10992_v12 }
  0x1c   : > { %6533 = vmatprep.subr.bf16.mxu0 %v9221_v24  ;;  %7189 = vmatprep.subr.bf16.mxu1 %v9223_v25  ;;  %v9284_v10 = vld [vmem:[%s14037_s1 + $0x204] ss:$16 sps:$4 sm:$0xff]   ;;  %v9287_v11 = vld [vmem:[%s14037_s1 + $0x20c] ss:$16 sps:$4 sm:$0xff]   ;;  %v9282_v13 = vld [vmem:[%s14037_s1 + $0x200] ss:$16 sps:$4 sm:$0xff]  }
  0x1d   : > { %6553 = vmatprep.mubr.bf16.mxu0 %v1248_v58  ;;  %7209 = vmatprep.mubr.bf16.mxu1 %v1248_v58  ;;  %v9285_v14 = vld [vmem:[%s14037_s1 + $0x208] ss:$16 sps:$4 sm:$0xff]   ;;  %v9290_v15 = vld [vmem:[%s14037_s1 + $0x224] ss:$16 sps:$4 sm:$0xff]   ;;  %v9293_v16 = vld [vmem:[%s14037_s1 + $0x22c] ss:$16 sps:$4 sm:$0xff]  }
  0x1e   : > { %v9288_v18 = vld [vmem:[%s14037_s1 + $0x220] ss:$16 sps:$4 sm:$0xff]   ;;  %v9291_v19 = vld [vmem:[%s14037_s1 + $0x228] ss:$16 sps:$4 sm:$0xff]   ;;  %v9296_v20 = vld [vmem:[%s14037_s1 + $0x244] ss:$16 sps:$4 sm:$0xff]  }
  0x1f   : > { %6534 = vmatpush1.bf16.msra.mxu0 %v9225_v26  ;;  %7190 = vmatpush1.bf16.msra.mxu1 %v9226_v27  ;;  %v9299_v21 = vld [vmem:[%s14037_s1 + $0x24c] ss:$16 sps:$4 sm:$0xff]   ;;  %v9294_v22 = vld [vmem:[%s14037_s1 + $0x240] ss:$16 sps:$4 sm:$0xff]   ;;  %v9297_v23 = vld [vmem:[%s14037_s1 + $0x248] ss:$16 sps:$4 sm:$0xff]  }
  0x20   : > { %6535 = vmatprep.subr.bf16.mxu0 %v9227_v28  ;;  %7191 = vmatprep.subr.bf16.mxu1 %v9229_v29  ;;  %v9302_v24 = vld [vmem:[%s14037_s1 + $0x264] ss:$16 sps:$4 sm:$0xff]   ;;  %v9305_v25 = vld [vmem:[%s14037_s1 + $0x26c] ss:$16 sps:$4 sm:$0xff]   ;;  %v9300_v26 = vld [vmem:[%s14037_s1 + $0x260] ss:$16 sps:$4 sm:$0xff]  }
  0x21   : > { %v9303_v27 = vld [vmem:[%s14037_s1 + $0x268] ss:$16 sps:$4 sm:$0xff]   ;;  %v9308_v28 = vld [vmem:[%s14037_s1 + $0x284] ss:$16 sps:$4 sm:$0xff]   ;;  %v9311_v29 = vld [vmem:[%s14037_s1 + $0x28c] ss:$16 sps:$4 sm:$0xff]  }
  0x22   : > { %v9320_v36 = vld [vmem:[%s14037_s1 + $0x2c4] ss:$16 sps:$4 sm:$0xff]   ;;  %v9323_v37 = vld [vmem:[%s14037_s1 + $0x2cc] ss:$16 sps:$4 sm:$0xff]   ;;  %v9318_v38 = vld [vmem:[%s14037_s1 + $0x2c0] ss:$16 sps:$4 sm:$0xff]  }
  0x23   : > { %6536 = vmatpush1.bf16.msra.mxu0 %v9231_v30  ;;  %7192 = vmatpush1.bf16.msra.mxu1 %v9232_v31  ;;  %v9306_v30 = vld [vmem:[%s14037_s1 + $0x280] ss:$16 sps:$4 sm:$0xff]   ;;  %v9309_v31 = vld [vmem:[%s14037_s1 + $0x288] ss:$16 sps:$4 sm:$0xff]   ;;  %v9350_v58 = vld [vmem:[%s14037_s1 + $0x364] ss:$16 sps:$4 sm:$0xff]  }
  0x24   : > { %6537 = vmatprep.subr.bf16.mxu0 %v9233_v32  ;;  %7193 = vmatprep.subr.bf16.mxu1 %v9235_v33  ;;  %v9314_v32 = vld [vmem:[%s14037_s1 + $0x2a4] ss:$16 sps:$4 sm:$0xff]   ;;  %v9317_v33 = vld [vmem:[%s14037_s1 + $0x2ac] ss:$16 sps:$4 sm:$0xff]   ;;  %v9324_v43 = vld [vmem:[%s14037_s1 + $0x2e0] ss:$16 sps:$4 sm:$0xff]  }
  0x25   : > { %v9336_v52 = vld [vmem:[%s14037_s1 + $0x320] ss:$16 sps:$4 sm:$0xff]   ;;  %v9371_v7 = vld [vmem:[%s14037_s1 + $0x3cc] ss:$16 sps:$4 sm:$0xff]  }
  0x27   : > { %6538 = vmatpush1.bf16.msra.mxu0 %v9237_v34  ;;  %7194 = vmatpush1.bf16.msra.mxu1 %v9238_v35  ;;  %v9312_v34 = vld [vmem:[%s14037_s1 + $0x2a0] ss:$16 sps:$4 sm:$0xff]   ;;  %v9315_v35 = vld [vmem:[%s14037_s1 + $0x2a8] ss:$16 sps:$4 sm:$0xff]  }
  0x28   : > { %6539 = vmatprep.subr.bf16.mxu0 %v9239_v39  ;;  %7195 = vmatprep.subr.bf16.mxu1 %v9241_v40  ;;  %v9321_v39 = vld [vmem:[%s14037_s1 + $0x2c8] ss:$16 sps:$4 sm:$0xff]   ;;  %v9326_v40 = vld [vmem:[%s14037_s1 + $0x2e4] ss:$16 sps:$4 sm:$0xff]  }
  0x2b   : > { %6540 = vmatpush1.bf16.msra.mxu0 %v9243_v41  ;;  %7196 = vmatpush1.bf16.msra.mxu1 %v9244_v44  ;;  %v9329_v41 = vld [vmem:[%s14037_s1 + $0x2ec] ss:$16 sps:$4 sm:$0xff]   ;;  %v9327_v44 = vld [vmem:[%s14037_s1 + $0x2e8] ss:$16 sps:$4 sm:$0xff]  }
  0x2c   : > { %6541 = vmatprep.subr.bf16.mxu0 %v9245_v45  ;;  %7197 = vmatprep.subr.bf16.mxu1 %v9247_v46  ;;  %v9332_v45 = vld [vmem:[%s14037_s1 + $0x304] ss:$16 sps:$4 sm:$0xff]   ;;  %v9335_v46 = vld [vmem:[%s14037_s1 + $0x30c] ss:$16 sps:$4 sm:$0xff]  }
  0x2f   : > { %6542 = vmatpush1.bf16.msra.mxu0 %v9249_v47  ;;  %7198 = vmatpush1.bf16.msra.mxu1 %v9250_v48  ;;  %v9330_v47 = vld [vmem:[%s14037_s1 + $0x300] ss:$16 sps:$4 sm:$0xff]   ;;  %v9333_v48 = vld [vmem:[%s14037_s1 + $0x308] ss:$16 sps:$4 sm:$0xff]  }
  0x30   : > { %6543 = vmatprep.subr.bf16.mxu0 %v9251_v50  ;;  %7199 = vmatprep.subr.bf16.mxu1 %v9253_v51  ;;  %v9338_v50 = vld [vmem:[%s14037_s1 + $0x324] ss:$16 sps:$4 sm:$0xff]   ;;  %v9341_v51 = vld [vmem:[%s14037_s1 + $0x32c] ss:$16 sps:$4 sm:$0xff]  }
  0x33   : > { %6544 = vmatpush1.bf16.msra.mxu0 %v9255_v53  ;;  %7200 = vmatpush1.bf16.msra.mxu1 %v9256_v55  ;;  %v9339_v53 = vld [vmem:[%s14037_s1 + $0x328] ss:$16 sps:$4 sm:$0xff]   ;;  %v9347_v55 = vld [vmem:[%s14037_s1 + $0x34c] ss:$16 sps:$4 sm:$0xff]  }
  0x34   : > { %6545 = vmatprep.subr.bf16.mxu0 %v9257_v56  ;;  %7201 = vmatprep.subr.bf16.mxu1 %v9259_v57  ;;  %v9342_v56 = vld [vmem:[%s14037_s1 + $0x340] ss:$16 sps:$4 sm:$0xff]   ;;  %v9345_v57 = vld [vmem:[%s14037_s1 + $0x348] ss:$16 sps:$4 sm:$0xff]  }
  0x37   : > { %6546 = vmatpush1.bf16.msra.mxu0 %v9261_v59  ;;  %7202 = vmatpush1.bf16.msra.mxu1 %v9262_v60  ;;  %v9353_v59 = vld [vmem:[%s14037_s1 + $0x36c] ss:$16 sps:$4 sm:$0xff]   ;;  %v9348_v60 = vld [vmem:[%s14037_s1 + $0x360] ss:$16 sps:$4 sm:$0xff]  }
  0x38   : > { %6547 = vmatprep.subr.bf16.mxu0 %v9263_v61  ;;  %7203 = vmatprep.subr.bf16.mxu1 %v9265_v62  ;;  %v9351_v61 = vld [vmem:[%s14037_s1 + $0x368] ss:$16 sps:$4 sm:$0xff]   ;;  %v9356_v62 = vld [vmem:[%s14037_s1 + $0x384] ss:$16 sps:$4 sm:$0xff]  }
  0x3b   : > { %6548 = vmatpush1.bf16.msra.mxu0 %v9267_v63  ;;  %7204 = vmatpush1.bf16.msra.mxu1 %v9268_v0  ;;  %v9359_v63 = vld [vmem:[%s14037_s1 + $0x38c] ss:$16 sps:$4 sm:$0xff]   ;;  %v9354_v0 = vld [vmem:[%s14037_s1 + $0x380] ss:$16 sps:$4 sm:$0xff]  }
  0x3c   : > { %6549 = vmatprep.subr.bf16.mxu0 %v9269_v1  ;;  %7205 = vmatprep.subr.bf16.mxu1 %v9271_v2  ;;  %v9357_v1 = vld [vmem:[%s14037_s1 + $0x388] ss:$16 sps:$4 sm:$0xff]   ;;  %v9362_v2 = vld [vmem:[%s14037_s1 + $0x3a4] ss:$16 sps:$4 sm:$0xff]  }
  0x3f   : > { %6550 = vmatpush1.bf16.msra.mxu0 %v9273_v3  ;;  %7206 = vmatpush1.bf16.msra.mxu1 %v9274_v4  ;;  %v9365_v3 = vld [vmem:[%s14037_s1 + $0x3ac] ss:$16 sps:$4 sm:$0xff]   ;;  %v9360_v4 = vld [vmem:[%s14037_s1 + $0x3a0] ss:$16 sps:$4 sm:$0xff]  }
  0x40   : > { %6551 = vmatprep.subr.bf16.mxu0 %v9275_v5  ;;  %7207 = vmatprep.subr.bf16.mxu1 %v9277_v6  ;;  %v9363_v5 = vld [vmem:[%s14037_s1 + $0x3a8] ss:$16 sps:$4 sm:$0xff]   ;;  %v9368_v6 = vld [vmem:[%s14037_s1 + $0x3c4] ss:$16 sps:$4 sm:$0xff]  }
  0x43   : > { %6552 = vmatpush1.bf16.msra.mxu0 %v9279_v8  ;;  %7208 = vmatpush1.bf16.msra.mxu1 %v9280_v9  ;;  %v9366_v8 = vld [vmem:[%s14037_s1 + $0x3c0] ss:$16 sps:$4 sm:$0xff]   ;;  %v9369_v9 = vld [vmem:[%s14037_s1 + $0x3c8] ss:$16 sps:$4 sm:$0xff]  }
  0x44   : > { %6562 = vmatprep.subr.bf16.mxu0 %v9284_v10  ;;  %7218 = vmatprep.subr.bf16.mxu1 %v9287_v11  ;;  %v9374_v10 = vld [vmem:[%s14037_s1 + $0x3e4] ss:$16 sps:$4 sm:$0xff]   ;;  %v9377_v11 = vld [vmem:[%s14037_s1 + $0x3ec] ss:$16 sps:$4 sm:$0xff]  }
  0x46   : > { %6554 = vmatmul.mubr.bf16.vlgmr.msra.gmra.mrb[0].mxu0 %v1240_v54  ;;  %7210 = vmatmul.mubr.bf16.vlgmr.msra.gmra.mrb[0].mxu1 %v1240_v54  ;;  %v9344_v54 = vld [vmem:[%s14037_s1 + $0x344] ss:$16 sps:$4 sm:$0xff]  }
  0x47   : > { %6563 = vmatpush1.bf16.msra.mxu0 %v9282_v13  ;;  %7219 = vmatpush1.bf16.msra.mxu1 %v9285_v14  ;;  %v9372_v13 = vld [vmem:[%s14037_s1 + $0x3e0] ss:$16 sps:$4 sm:$0xff]   ;;  %v9375_v14 = vld [vmem:[%s14037_s1 + $0x3e8] ss:$16 sps:$4 sm:$0xff]  }
  0x48   : > { %6564 = vmatprep.subr.bf16.mxu0 %v9290_v15  ;;  %7220 = vmatprep.subr.bf16.mxu1 %v9293_v16  ;;  %v9380_v15 = vld [vmem:[%s14037_s1 + $0x404] ss:$16 sps:$4 sm:$0xff]   ;;  %v9383_v16 = vld [vmem:[%s14037_s1 + $0x40c] ss:$16 sps:$4 sm:$0xff]  }
  0x49   : > { %6594 = vmatprep.mubr.bf16.mxu0 %v1249_v17  ;;  %7250 = vmatprep.mubr.bf16.mxu1 %v1249_v17  ;;  %v9378_v17 = vld [vmem:[%s14037_s1 + $0x400] ss:$16 sps:$4 sm:$0xff]  }
  0x4b   : > { %6565 = vmatpush1.bf16.msra.mxu0 %v9288_v18  ;;  %7221 = vmatpush1.bf16.msra.mxu1 %v9291_v19  ;;  %v9381_v18 = vld [vmem:[%s14037_s1 + $0x408] ss:$16 sps:$4 sm:$0xff]  }
  0x4c   : > { %6566 = vmatprep.subr.bf16.mxu0 %v9296_v20  ;;  %7222 = vmatprep.subr.bf16.mxu1 %v9299_v21  ;;  %v11195_v19 = vld [vmem:[%s10918_s30 + $0x8] sm:$0xff]  ;;  %v9386_v20 = vld [vmem:[%s14037_s1 + $0x424] ss:$16 sps:$4 sm:$0xff]  }
  0x4d   : > { %v9389_v21 = vld [vmem:[%s14037_s1 + $0x42c] ss:$16 sps:$4 sm:$0xff]  }
  0x4f   : > { %6567 = vmatpush1.bf16.msra.mxu0 %v9294_v22  ;;  %7223 = vmatpush1.bf16.msra.mxu1 %v9297_v23  ;;  %v11205_v22 = vrot.slane %v11195_v19, %v10921_v49 }
  0x50   : > { %6568 = vmatprep.subr.bf16.mxu0 %v9302_v24  ;;  %7224 = vmatprep.subr.bf16.mxu1 %v9305_v25  ;;  %v9384_v24 = vld [vmem:[%s14037_s1 + $0x420] ss:$16 sps:$4 sm:$0xff]   ;;  %v9387_v25 = vld [vmem:[%s14037_s1 + $0x428] ss:$16 sps:$4 sm:$0xff]  }
  0x51   : > { %v1265_v23 = vcombine.high %v11205_v22, %v11205_v22 }
  0x53   : > { %6569 = vmatpush1.bf16.msra.mxu0 %v9300_v26  ;;  %7225 = vmatpush1.bf16.msra.mxu1 %v9303_v27  ;;  %v9392_v26 = vld [vmem:[%s14037_s1 + $0x444] ss:$16 sps:$4 sm:$0xff]   ;;  %v9390_v27 = vld [vmem:[%s14037_s1 + $0x440] ss:$16 sps:$4 sm:$0xff]  }
  0x54   : > { %6570 = vmatprep.subr.bf16.mxu0 %v9308_v28  ;;  %7226 = vmatprep.subr.bf16.mxu1 %v9311_v29  ;;  %v9393_v28 = vld [vmem:[%s14037_s1 + $0x448] ss:$16 sps:$4 sm:$0xff]   ;;  %v9398_v29 = vld [vmem:[%s14037_s1 + $0x464] ss:$16 sps:$4 sm:$0xff]  }
  0x57   : > { %6571 = vmatpush1.bf16.msra.mxu0 %v9306_v30  ;;  %7227 = vmatpush1.bf16.msra.mxu1 %v9309_v31  ;;  %v9401_v30 = vld [vmem:[%s14037_s1 + $0x46c] ss:$16 sps:$4 sm:$0xff]   ;;  %v9396_v31 = vld [vmem:[%s14037_s1 + $0x460] ss:$16 sps:$4 sm:$0xff]  }
  0x58   : > { %6572 = vmatprep.subr.bf16.mxu0 %v9314_v32  ;;  %7228 = vmatprep.subr.bf16.mxu1 %v9317_v33  ;;  %v9399_v32 = vld [vmem:[%s14037_s1 + $0x468] ss:$16 sps:$4 sm:$0xff]   ;;  %v9404_v33 = vld [vmem:[%s14037_s1 + $0x484] ss:$16 sps:$4 sm:$0xff]  }
  0x5b   : > { %6573 = vmatpush1.bf16.msra.mxu0 %v9312_v34  ;;  %7229 = vmatpush1.bf16.msra.mxu1 %v9315_v35  ;;  %v9407_v34 = vld [vmem:[%s14037_s1 + $0x48c] ss:$16 sps:$4 sm:$0xff]   ;;  %v9402_v35 = vld [vmem:[%s14037_s1 + $0x480] ss:$16 sps:$4 sm:$0xff]  }
  0x5c   : > { %6574 = vmatprep.subr.bf16.mxu0 %v9320_v36  ;;  %7230 = vmatprep.subr.bf16.mxu1 %v9323_v37  ;;  %v9405_v36 = vld [vmem:[%s14037_s1 + $0x488] ss:$16 sps:$4 sm:$0xff]   ;;  %v9410_v37 = vld [vmem:[%s14037_s1 + $0x4a4] ss:$16 sps:$4 sm:$0xff]  }
  0x5f   : > { %6575 = vmatpush1.bf16.msra.mxu0 %v9318_v38  ;;  %7231 = vmatpush1.bf16.msra.mxu1 %v9321_v39  ;;  %v9413_v38 = vld [vmem:[%s14037_s1 + $0x4ac] ss:$16 sps:$4 sm:$0xff]   ;;  %v9408_v39 = vld [vmem:[%s14037_s1 + $0x4a0] ss:$16 sps:$4 sm:$0xff]  }
  0x60   : > { %6576 = vmatprep.subr.bf16.mxu0 %v9326_v40  ;;  %7232 = vmatprep.subr.bf16.mxu1 %v9329_v41  ;;  %v9411_v40 = vld [vmem:[%s14037_s1 + $0x4a8] ss:$16 sps:$4 sm:$0xff]   ;;  %v9416_v41 = vld [vmem:[%s14037_s1 + $0x4c4] ss:$16 sps:$4 sm:$0xff]  }
  0x63   : > { %6577 = vmatpush1.bf16.msra.mxu0 %v9324_v43  ;;  %7233 = vmatpush1.bf16.msra.mxu1 %v9327_v44  ;;  %v9419_v43 = vld [vmem:[%s14037_s1 + $0x4cc] ss:$16 sps:$4 sm:$0xff]   ;;  %v9414_v44 = vld [vmem:[%s14037_s1 + $0x4c0] ss:$16 sps:$4 sm:$0xff]  }
  0x64   : > { %6578 = vmatprep.subr.bf16.mxu0 %v9332_v45  ;;  %7234 = vmatprep.subr.bf16.mxu1 %v9335_v46  ;;  %v9417_v45 = vld [vmem:[%s14037_s1 + $0x4c8] ss:$16 sps:$4 sm:$0xff]   ;;  %v9422_v46 = vld [vmem:[%s14037_s1 + $0x4e4] ss:$16 sps:$4 sm:$0xff]  }
  0x67   : > { %6579 = vmatpush1.bf16.msra.mxu0 %v9330_v47  ;;  %7235 = vmatpush1.bf16.msra.mxu1 %v9333_v48  ;;  %v9425_v47 = vld [vmem:[%s14037_s1 + $0x4ec] ss:$16 sps:$4 sm:$0xff]   ;;  %v9420_v48 = vld [vmem:[%s14037_s1 + $0x4e0] ss:$16 sps:$4 sm:$0xff]  }
  0x68   : > { %6580 = vmatprep.subr.bf16.mxu0 %v9338_v50  ;;  %7236 = vmatprep.subr.bf16.mxu1 %v9341_v51  ;;  %v9423_v50 = vld [vmem:[%s14037_s1 + $0x4e8] ss:$16 sps:$4 sm:$0xff]   ;;  %v9428_v51 = vld [vmem:[%s14037_s1 + $0x504] ss:$16 sps:$4 sm:$0xff]  }
  0x6b   : > { %6581 = vmatpush1.bf16.msra.mxu0 %v9336_v52  ;;  %7237 = vmatpush1.bf16.msra.mxu1 %v9339_v53  ;;  %v9431_v52 = vld [vmem:[%s14037_s1 + $0x50c] ss:$16 sps:$4 sm:$0xff]   ;;  %v9426_v53 = vld [vmem:[%s14037_s1 + $0x500] ss:$16 sps:$4 sm:$0xff]  }
  0x6c   : > { %6582 = vmatprep.subr.bf16.mxu0 %v9344_v54  ;;  %7238 = vmatprep.subr.bf16.mxu1 %v9347_v55  ;;  %v9429_v54 = vld [vmem:[%s14037_s1 + $0x508] ss:$16 sps:$4 sm:$0xff]   ;;  %v9434_v55 = vld [vmem:[%s14037_s1 + $0x524] ss:$16 sps:$4 sm:$0xff]  }
  0x6f   : > { %6583 = vmatpush1.bf16.msra.mxu0 %v9342_v56  ;;  %7239 = vmatpush1.bf16.msra.mxu1 %v9345_v57  ;;  %v9437_v56 = vld [vmem:[%s14037_s1 + $0x52c] ss:$16 sps:$4 sm:$0xff]   ;;  %v9432_v57 = vld [vmem:[%s14037_s1 + $0x520] ss:$16 sps:$4 sm:$0xff]  }
  0x70   : > { %6584 = vmatprep.subr.bf16.mxu0 %v9350_v58  ;;  %7240 = vmatprep.subr.bf16.mxu1 %v9353_v59  ;;  %v9435_v58 = vld [vmem:[%s14037_s1 + $0x528] ss:$16 sps:$4 sm:$0xff]   ;;  %v9440_v59 = vld [vmem:[%s14037_s1 + $0x544] ss:$16 sps:$4 sm:$0xff]  }
  0x73   : > { %6585 = vmatpush1.bf16.msra.mxu0 %v9348_v60  ;;  %7241 = vmatpush1.bf16.msra.mxu1 %v9351_v61  ;;  %v9443_v60 = vld [vmem:[%s14037_s1 + $0x54c] ss:$16 sps:$4 sm:$0xff]   ;;  %v9438_v61 = vld [vmem:[%s14037_s1 + $0x540] ss:$16 sps:$4 sm:$0xff]  }
  0x74   : > { %6586 = vmatprep.subr.bf16.mxu0 %v9356_v62  ;;  %7242 = vmatprep.subr.bf16.mxu1 %v9359_v63  ;;  %v9441_v62 = vld [vmem:[%s14037_s1 + $0x548] ss:$16 sps:$4 sm:$0xff]   ;;  %v9446_v63 = vld [vmem:[%s14037_s1 + $0x564] ss:$16 sps:$4 sm:$0xff]  }
  0x77   : > { %6587 = vmatpush1.bf16.msra.mxu0 %v9354_v0  ;;  %7243 = vmatpush1.bf16.msra.mxu1 %v9357_v1  ;;  %v9449_v0 = vld [vmem:[%s14037_s1 + $0x56c] ss:$16 sps:$4 sm:$0xff]   ;;  %v9444_v1 = vld [vmem:[%s14037_s1 + $0x560] ss:$16 sps:$4 sm:$0xff]  }
  0x78   : > { %6588 = vmatprep.subr.bf16.mxu0 %v9362_v2  ;;  %7244 = vmatprep.subr.bf16.mxu1 %v9365_v3  ;;  %v9447_v2 = vld [vmem:[%s14037_s1 + $0x568] ss:$16 sps:$4 sm:$0xff]   ;;  %v9452_v3 = vld [vmem:[%s14037_s1 + $0x584] ss:$16 sps:$4 sm:$0xff]  }
  0x7b   : > { %6589 = vmatpush1.bf16.msra.mxu0 %v9360_v4  ;;  %7245 = vmatpush1.bf16.msra.mxu1 %v9363_v5  ;;  %v9455_v4 = vld [vmem:[%s14037_s1 + $0x58c] ss:$16 sps:$4 sm:$0xff]   ;;  %v9450_v5 = vld [vmem:[%s14037_s1 + $0x580] ss:$16 sps:$4 sm:$0xff]  }
  0x7c   : > { %6590 = vmatprep.subr.bf16.mxu0 %v9368_v6  ;;  %7246 = vmatprep.subr.bf16.mxu1 %v9371_v7  ;;  %v9453_v6 = vld [vmem:[%s14037_s1 + $0x588] ss:$16 sps:$4 sm:$0xff]   ;;  %v9458_v7 = vld [vmem:[%s14037_s1 + $0x5a4] ss:$16 sps:$4 sm:$0xff]  }
  0x7f   : > { %6591 = vmatpush1.bf16.msra.mxu0 %v9366_v8  ;;  %7247 = vmatpush1.bf16.msra.mxu1 %v9369_v9  ;;  %v9461_v8 = vld [vmem:[%s14037_s1 + $0x5ac] ss:$16 sps:$4 sm:$0xff]   ;;  %v9456_v9 = vld [vmem:[%s14037_s1 + $0x5a0] ss:$16 sps:$4 sm:$0xff]  }
  0x80   : > { %6592 = vmatprep.subr.bf16.mxu0 %v9374_v10  ;;  %7248 = vmatprep.subr.bf16.mxu1 %v9377_v11  ;;  %v9459_v10 = vld [vmem:[%s14037_s1 + $0x5a8] ss:$16 sps:$4 sm:$0xff]   ;;  %v9464_v11 = vld [vmem:[%s14037_s1 + $0x5c4] ss:$16 sps:$4 sm:$0xff]  }
  0x83   : > { %6593 = vmatpush1.bf16.msra.mxu0 %v9372_v13  ;;  %7249 = vmatpush1.bf16.msra.mxu1 %v9375_v14  ;;  %v9467_v13 = vld [vmem:[%s14037_s1 + $0x5cc] ss:$16 sps:$4 sm:$0xff]   ;;  %v9462_v14 = vld [vmem:[%s14037_s1 + $0x5c0] ss:$16 sps:$4 sm:$0xff]  }
  0x84   : > { %6603 = vmatprep.subr.bf16.mxu0 %v9380_v15  ;;  %7259 = vmatprep.subr.bf16.mxu1 %v9383_v16  ;;  %v9465_v15 = vld [vmem:[%s14037_s1 + $0x5c8] ss:$16 sps:$4 sm:$0xff]   ;;  %v9470_v16 = vld [vmem:[%s14037_s1 + $0x5e4] ss:$16 sps:$4 sm:$0xff]  }
  0x86   : > { %6595 = vmatmul.mubr.bf16.vlgmr.msra.gmra.mrb[0].mxu0 %v10992_v12  ;;  %7251 = vmatmul.mubr.bf16.vlgmr.msra.gmra.mrb[0].mxu1 %v10992_v12  ;;  %v9395_v12 = vld [vmem:[%s14037_s1 + $0x44c] ss:$16 sps:$4 sm:$0xff]  }
  0x87   : > { %6604 = vmatpush1.bf16.msra.mxu0 %v9378_v17  ;;  %7260 = vmatpush1.bf16.msra.mxu1 %v9381_v18  ;;  %v9473_v17 = vld [vmem:[%s14037_s1 + $0x5ec] ss:$16 sps:$4 sm:$0xff]   ;;  %v1250_v18 = vcombine.high %v11195_v19, %v11195_v19 }
  0x88   : > { %6605 = vmatprep.subr.bf16.mxu0 %v9386_v20  ;;  %7261 = vmatprep.subr.bf16.mxu1 %v9389_v21  ;;  %v9468_v20 = vld [vmem:[%s14037_s1 + $0x5e0] ss:$16 sps:$4 sm:$0xff]   ;;  %v9471_v21 = vld [vmem:[%s14037_s1 + $0x5e8] ss:$16 sps:$4 sm:$0xff]   ;;  %v9479_v19 = vld [vmem:[%s14037_s1 + $0x60c] ss:$16 sps:$4 sm:$0xff]  }
  0x89   : > { %6635 = vmatprep.mubr.bf16.mxu0 %v1265_v23  ;;  %7291 = vmatprep.mubr.bf16.mxu1 %v1265_v23  ;;  %v9476_v23 = vld [vmem:[%s14037_s1 + $0x604] ss:$16 sps:$4 sm:$0xff]  }
  0x8b   : > { %6606 = vmatpush1.bf16.msra.mxu0 %v9384_v24  ;;  %7262 = vmatpush1.bf16.msra.mxu1 %v9387_v25  ;;  %v11394_v24 = vrot.slane %v1250_v18, %v10921_v49  ;;  %v9474_v25 = vld [vmem:[%s14037_s1 + $0x600] ss:$16 sps:$4 sm:$0xff]   ;;  %v9563_v18 = vld [vmem:[%s14037_s1 + $0x7cc] ss:$16 sps:$4 sm:$0xff]  }
  0x8c   : > { %6607 = vmatprep.subr.bf16.mxu0 %v9392_v26  ;;  %7263 = vmatprep.subr.bf16.mxu1 %v9395_v12  ;;  %v9477_v26 = vld [vmem:[%s14037_s1 + $0x608] ss:$16 sps:$4 sm:$0xff]   ;;  %v9482_v12 = vld [vmem:[%s14037_s1 + $0x624] ss:$16 sps:$4 sm:$0xff]  }
  0x8f   : > { %6608 = vmatpush1.bf16.msra.mxu0 %v9390_v27  ;;  %7264 = vmatpush1.bf16.msra.mxu1 %v9393_v28  ;;  %v9485_v27 = vld [vmem:[%s14037_s1 + $0x62c] ss:$16 sps:$4 sm:$0xff]   ;;  %v1266_v28 = vcombine.high %v11394_v24, %v11394_v24 }
  0x90   : > { %6609 = vmatprep.subr.bf16.mxu0 %v9398_v29  ;;  %7265 = vmatprep.subr.bf16.mxu1 %v9401_v30  ;;  %v9480_v29 = vld [vmem:[%s14037_s1 + $0x620] ss:$16 sps:$4 sm:$0xff]   ;;  %v9483_v30 = vld [vmem:[%s14037_s1 + $0x628] ss:$16 sps:$4 sm:$0xff]  }
  0x93   : > { %6610 = vmatpush1.bf16.msra.mxu0 %v9396_v31  ;;  %7266 = vmatpush1.bf16.msra.mxu1 %v9399_v32  ;;  %v9488_v31 = vld [vmem:[%s14037_s1 + $0x644] ss:$16 sps:$4 sm:$0xff]   ;;  %v9486_v32 = vld [vmem:[%s14037_s1 + $0x640] ss:$16 sps:$4 sm:$0xff]  }
  0x94   : > { %6611 = vmatprep.subr.bf16.mxu0 %v9404_v33  ;;  %7267 = vmatprep.subr.bf16.mxu1 %v9407_v34  ;;  %v9489_v33 = vld [vmem:[%s14037_s1 + $0x648] ss:$16 sps:$4 sm:$0xff]   ;;  %v9494_v34 = vld [vmem:[%s14037_s1 + $0x664] ss:$16 sps:$4 sm:$0xff]  }
  0x97   : > { %6612 = vmatpush1.bf16.msra.mxu0 %v9402_v35  ;;  %7268 = vmatpush1.bf16.msra.mxu1 %v9405_v36  ;;  %v9497_v35 = vld [vmem:[%s14037_s1 + $0x66c] ss:$16 sps:$4 sm:$0xff]   ;;  %v9492_v36 = vld [vmem:[%s14037_s1 + $0x660] ss:$16 sps:$4 sm:$0xff]  }
  0x98   : > { %6613 = vmatprep.subr.bf16.mxu0 %v9410_v37  ;;  %7269 = vmatprep.subr.bf16.mxu1 %v9413_v38  ;;  %v9495_v37 = vld [vmem:[%s14037_s1 + $0x668] ss:$16 sps:$4 sm:$0xff]   ;;  %v9500_v38 = vld [vmem:[%s14037_s1 + $0x684] ss:$16 sps:$4 sm:$0xff]  }
  0x9b   : > { %6614 = vmatpush1.bf16.msra.mxu0 %v9408_v39  ;;  %7270 = vmatpush1.bf16.msra.mxu1 %v9411_v40  ;;  %v9503_v39 = vld [vmem:[%s14037_s1 + $0x68c] ss:$16 sps:$4 sm:$0xff]   ;;  %v9498_v40 = vld [vmem:[%s14037_s1 + $0x680] ss:$16 sps:$4 sm:$0xff]  }
  0x9c   : > { %6615 = vmatprep.subr.bf16.mxu0 %v9416_v41  ;;  %7271 = vmatprep.subr.bf16.mxu1 %v9419_v43  ;;  %v9501_v41 = vld [vmem:[%s14037_s1 + $0x688] ss:$16 sps:$4 sm:$0xff]   ;;  %v9506_v43 = vld [vmem:[%s14037_s1 + $0x6a4] ss:$16 sps:$4 sm:$0xff]  }
  0x9f   : > { %6616 = vmatpush1.bf16.msra.mxu0 %v9414_v44  ;;  %7272 = vmatpush1.bf16.msra.mxu1 %v9417_v45  ;;  %v9509_v44 = vld [vmem:[%s14037_s1 + $0x6ac] ss:$16 sps:$4 sm:$0xff]   ;;  %v9504_v45 = vld [vmem:[%s14037_s1 + $0x6a0] ss:$16 sps:$4 sm:$0xff]  }
  0xa0   : > { %6617 = vmatprep.subr.bf16.mxu0 %v9422_v46  ;;  %7273 = vmatprep.subr.bf16.mxu1 %v9425_v47  ;;  %v9507_v46 = vld [vmem:[%s14037_s1 + $0x6a8] ss:$16 sps:$4 sm:$0xff]   ;;  %v9512_v47 = vld [vmem:[%s14037_s1 + $0x6c4] ss:$16 sps:$4 sm:$0xff]  }
  0xa3   : > { %6618 = vmatpush1.bf16.msra.mxu0 %v9420_v48  ;;  %7274 = vmatpush1.bf16.msra.mxu1 %v9423_v50  ;;  %v9515_v48 = vld [vmem:[%s14037_s1 + $0x6cc] ss:$16 sps:$4 sm:$0xff]   ;;  %v9510_v50 = vld [vmem:[%s14037_s1 + $0x6c0] ss:$16 sps:$4 sm:$0xff]  }
  0xa4   : > { %6619 = vmatprep.subr.bf16.mxu0 %v9428_v51  ;;  %7275 = vmatprep.subr.bf16.mxu1 %v9431_v52  ;;  %v9513_v51 = vld [vmem:[%s14037_s1 + $0x6c8] ss:$16 sps:$4 sm:$0xff]   ;;  %v9518_v52 = vld [vmem:[%s14037_s1 + $0x6e4] ss:$16 sps:$4 sm:$0xff]  }
  0xa7   : > { %6620 = vmatpush1.bf16.msra.mxu0 %v9426_v53  ;;  %7276 = vmatpush1.bf16.msra.mxu1 %v9429_v54  ;;  %v9521_v53 = vld [vmem:[%s14037_s1 + $0x6ec] ss:$16 sps:$4 sm:$0xff]   ;;  %v9516_v54 = vld [vmem:[%s14037_s1 + $0x6e0] ss:$16 sps:$4 sm:$0xff]  }
  0xa8   : > { %6621 = vmatprep.subr.bf16.mxu0 %v9434_v55  ;;  %7277 = vmatprep.subr.bf16.mxu1 %v9437_v56  ;;  %v9519_v55 = vld [vmem:[%s14037_s1 + $0x6e8] ss:$16 sps:$4 sm:$0xff]   ;;  %v9524_v56 = vld [vmem:[%s14037_s1 + $0x704] ss:$16 sps:$4 sm:$0xff]  }
  0xab   : > { %6622 = vmatpush1.bf16.msra.mxu0 %v9432_v57  ;;  %7278 = vmatpush1.bf16.msra.mxu1 %v9435_v58  ;;  %v9527_v57 = vld [vmem:[%s14037_s1 + $0x70c] ss:$16 sps:$4 sm:$0xff]   ;;  %v9522_v58 = vld [vmem:[%s14037_s1 + $0x700] ss:$16 sps:$4 sm:$0xff]  }
  0xac   : > { %6623 = vmatprep.subr.bf16.mxu0 %v9440_v59  ;;  %7279 = vmatprep.subr.bf16.mxu1 %v9443_v60  ;;  %v9525_v59 = vld [vmem:[%s14037_s1 + $0x708] ss:$16 sps:$4 sm:$0xff]   ;;  %v9530_v60 = vld [vmem:[%s14037_s1 + $0x724] ss:$16 sps:$4 sm:$0xff]  }
  0xaf   : > { %6624 = vmatpush1.bf16.msra.mxu0 %v9438_v61  ;;  %7280 = vmatpush1.bf16.msra.mxu1 %v9441_v62  ;;  %v9533_v61 = vld [vmem:[%s14037_s1 + $0x72c] ss:$16 sps:$4 sm:$0xff]   ;;  %v9528_v62 = vld [vmem:[%s14037_s1 + $0x720] ss:$16 sps:$4 sm:$0xff]  }
  0xb0   : > { %6625 = vmatprep.subr.bf16.mxu0 %v9446_v63  ;;  %7281 = vmatprep.subr.bf16.mxu1 %v9449_v0  ;;  %v9531_v63 = vld [vmem:[%s14037_s1 + $0x728] ss:$16 sps:$4 sm:$0xff]   ;;  %v9536_v0 = vld [vmem:[%s14037_s1 + $0x744] ss:$16 sps:$4 sm:$0xff]  }
  0xb3   : > { %6626 = vmatpush1.bf16.msra.mxu0 %v9444_v1  ;;  %7282 = vmatpush1.bf16.msra.mxu1 %v9447_v2  ;;  %v9539_v1 = vld [vmem:[%s14037_s1 + $0x74c] ss:$16 sps:$4 sm:$0xff]   ;;  %v9534_v2 = vld [vmem:[%s14037_s1 + $0x740] ss:$16 sps:$4 sm:$0xff]  }
  0xb4   : > { %6627 = vmatprep.subr.bf16.mxu0 %v9452_v3  ;;  %7283 = vmatprep.subr.bf16.mxu1 %v9455_v4  ;;  %v9537_v3 = vld [vmem:[%s14037_s1 + $0x748] ss:$16 sps:$4 sm:$0xff]   ;;  %v9542_v4 = vld [vmem:[%s14037_s1 + $0x764] ss:$16 sps:$4 sm:$0xff]  }
  0xb7   : > { %6628 = vmatpush1.bf16.msra.mxu0 %v9450_v5  ;;  %7284 = vmatpush1.bf16.msra.mxu1 %v9453_v6  ;;  %v9545_v5 = vld [vmem:[%s14037_s1 + $0x76c] ss:$16 sps:$4 sm:$0xff]   ;;  %v9540_v6 = vld [vmem:[%s14037_s1 + $0x760] ss:$16 sps:$4 sm:$0xff]  }
  0xb8   : > { %6629 = vmatprep.subr.bf16.mxu0 %v9458_v7  ;;  %7285 = vmatprep.subr.bf16.mxu1 %v9461_v8  ;;  %v9543_v7 = vld [vmem:[%s14037_s1 + $0x768] ss:$16 sps:$4 sm:$0xff]   ;;  %v9548_v8 = vld [vmem:[%s14037_s1 + $0x784] ss:$16 sps:$4 sm:$0xff]  }
  0xbb   : > { %6630 = vmatpush1.bf16.msra.mxu0 %v9456_v9  ;;  %7286 = vmatpush1.bf16.msra.mxu1 %v9459_v10  ;;  %v9551_v9 = vld [vmem:[%s14037_s1 + $0x78c] ss:$16 sps:$4 sm:$0xff]   ;;  %v9546_v10 = vld [vmem:[%s14037_s1 + $0x780] ss:$16 sps:$4 sm:$0xff]  }
  0xbc   : > { %6631 = vmatprep.subr.bf16.mxu0 %v9464_v11  ;;  %7287 = vmatprep.subr.bf16.mxu1 %v9467_v13  ;;  %v9549_v11 = vld [vmem:[%s14037_s1 + $0x788] ss:$16 sps:$4 sm:$0xff]   ;;  %v9554_v13 = vld [vmem:[%s14037_s1 + $0x7a4] ss:$16 sps:$4 sm:$0xff]  }
  0xbf   : > { %6632 = vmatpush1.bf16.msra.mxu0 %v9462_v14  ;;  %7288 = vmatpush1.bf16.msra.mxu1 %v9465_v15  ;;  %v9557_v14 = vld [vmem:[%s14037_s1 + $0x7ac] ss:$16 sps:$4 sm:$0xff]   ;;  %v9552_v15 = vld [vmem:[%s14037_s1 + $0x7a0] ss:$16 sps:$4 sm:$0xff]  }
  0xc0   : > { %6633 = vmatprep.subr.bf16.mxu0 %v9470_v16  ;;  %7289 = vmatprep.subr.bf16.mxu1 %v9473_v17  ;;  %v9555_v16 = vld [vmem:[%s14037_s1 + $0x7a8] ss:$16 sps:$4 sm:$0xff]   ;;  %v9560_v17 = vld [vmem:[%s14037_s1 + $0x7c4] ss:$16 sps:$4 sm:$0xff]  }
  0xc3   : > { %6634 = vmatpush1.bf16.msra.mxu0 %v9468_v20  ;;  %7290 = vmatpush1.bf16.msra.mxu1 %v9471_v21  ;;  %v9558_v20 = vld [vmem:[%s14037_s1 + $0x7c0] ss:$16 sps:$4 sm:$0xff]   ;;  %v9561_v21 = vld [vmem:[%s14037_s1 + $0x7c8] ss:$16 sps:$4 sm:$0xff]  }
  0xc4   : > { %6644 = vmatprep.subr.bf16.mxu0 %v9476_v23  ;;  %7300 = vmatprep.subr.bf16.mxu1 %v9479_v19  ;;  %v9566_v23 = vld [vmem:[%s14037_s1 + $0x7e4] ss:$16 sps:$4 sm:$0xff]   ;;  %v9569_v19 = vld [vmem:[%s14037_s1 + $0x7ec] ss:$16 sps:$4 sm:$0xff]  }
  0xc6   : > { %6636 = vmatmul.mubr.bf16.vlgmr.msra.gmra.mrb[0].mxu0 %v11205_v22  ;;  %7292 = vmatmul.mubr.bf16.vlgmr.msra.gmra.mrb[0].mxu1 %v11205_v22  ;;  %v9491_v22 = vld [vmem:[%s14037_s1 + $0x64c] ss:$16 sps:$4 sm:$0xff]  }
  0xc7   : > { %6645 = vmatpush1.bf16.msra.mxu0 %v9474_v25  ;;  %7301 = vmatpush1.bf16.msra.mxu1 %v9477_v26  ;;  %v9564_v25 = vld [vmem:[%s14037_s1 + $0x7e0] ss:$16 sps:$4 sm:$0xff]  }
  0xc8   : > { %6646 = vmatprep.subr.bf16.mxu0 %v9482_v12  ;;  %7302 = vmatprep.subr.bf16.mxu1 %v9485_v27  ;;  %v11584_v26 = vld [vmem:[%s10918_s30 + $0x10] sm:$0xff]  ;;  %v9567_v12 = vld [vmem:[%s14037_s1 + $0x7e8] ss:$16 sps:$4 sm:$0xff]  }
  0xc9   : > { %6676 = vmatprep.mubr.bf16.mxu0 %v1266_v28  ;;  %7332 = vmatprep.mubr.bf16.mxu1 %v1266_v28  ;;  %v9573_v27 = vld [vmem:[%s14037_s1 + $0x804] ss:$16 sps:$4 sm:$0xff]   ;;  %v9576_v28 = vld [vmem:[%s14037_s1 + $0x80c] ss:$16 sps:$4 sm:$0xff]  }
  0xcb   : > { %6647 = vmatpush1.bf16.msra.mxu0 %v9480_v29  ;;  %7303 = vmatpush1.bf16.msra.mxu1 %v9483_v30  ;;  %v11597_v29 = vrot.slane %v11584_v26, %v10921_v49  ;;  %v9571_v30 = vld [vmem:[%s14037_s1 + $0x800] ss:$16 sps:$4 sm:$0xff]  }
  0xcc   : > { %6648 = vmatprep.subr.bf16.mxu0 %v9488_v31  ;;  %7304 = vmatprep.subr.bf16.mxu1 %v9491_v22  ;;  %v9574_v31 = vld [vmem:[%s14037_s1 + $0x808] ss:$16 sps:$4 sm:$0xff]   ;;  %v9579_v22 = vld [vmem:[%s14037_s1 + $0x824] ss:$16 sps:$4 sm:$0xff]  }
  0xcf   : > { %6649 = vmatpush1.bf16.msra.mxu0 %v9486_v32  ;;  %7305 = vmatpush1.bf16.msra.mxu1 %v9489_v33  ;;  %v9582_v32 = vld [vmem:[%s14037_s1 + $0x82c] ss:$16 sps:$4 sm:$0xff]   ;;  %v1282_v33 = vcombine.high %v11597_v29, %v11597_v29 }
  0xd0   : > { %6650 = vmatprep.subr.bf16.mxu0 %v9494_v34  ;;  %7306 = vmatprep.subr.bf16.mxu1 %v9497_v35  ;;  %v9577_v34 = vld [vmem:[%s14037_s1 + $0x820] ss:$16 sps:$4 sm:$0xff]   ;;  %v9580_v35 = vld [vmem:[%s14037_s1 + $0x828] ss:$16 sps:$4 sm:$0xff]  }
  0xd3   : > { %6651 = vmatpush1.bf16.msra.mxu0 %v9492_v36  ;;  %7307 = vmatpush1.bf16.msra.mxu1 %v9495_v37  ;;  %v9585_v36 = vld [vmem:[%s14037_s1 + $0x844] ss:$16 sps:$4 sm:$0xff]   ;;  %v9583_v37 = vld [vmem:[%s14037_s1 + $0x840] ss:$16 sps:$4 sm:$0xff]  }
  0xd4   : > { %6652 = vmatprep.subr.bf16.mxu0 %v9500_v38  ;;  %7308 = vmatprep.subr.bf16.mxu1 %v9503_v39  ;;  %v9586_v38 = vld [vmem:[%s14037_s1 + $0x848] ss:$16 sps:$4 sm:$0xff]   ;;  %v9591_v39 = vld [vmem:[%s14037_s1 + $0x864] ss:$16 sps:$4 sm:$0xff]  }
  0xd7   : > { %6653 = vmatpush1.bf16.msra.mxu0 %v9498_v40  ;;  %7309 = vmatpush1.bf16.msra.mxu1 %v9501_v41  ;;  %v9594_v40 = vld [vmem:[%s14037_s1 + $0x86c] ss:$16 sps:$4 sm:$0xff]   ;;  %v9589_v41 = vld [vmem:[%s14037_s1 + $0x860] ss:$16 sps:$4 sm:$0xff]  }
  0xd8   : > { %6654 = vmatprep.subr.bf16.mxu0 %v9506_v43  ;;  %7310 = vmatprep.subr.bf16.mxu1 %v9509_v44  ;;  %v9592_v43 = vld [vmem:[%s14037_s1 + $0x868] ss:$16 sps:$4 sm:$0xff]   ;;  %v9597_v44 = vld [vmem:[%s14037_s1 + $0x884] ss:$16 sps:$4 sm:$0xff]  }
  0xdb   : > { %6655 = vmatpush1.bf16.msra.mxu0 %v9504_v45  ;;  %7311 = vmatpush1.bf16.msra.mxu1 %v9507_v46  ;;  %v9600_v45 = vld [vmem:[%s14037_s1 + $0x88c] ss:$16 sps:$4 sm:$0xff]   ;;  %v9595_v46 = vld [vmem:[%s14037_s1 + $0x880] ss:$16 sps:$4 sm:$0xff]  }
  0xdc   : > { %6656 = vmatprep.subr.bf16.mxu0 %v9512_v47  ;;  %7312 = vmatprep.subr.bf16.mxu1 %v9515_v48  ;;  %v9598_v47 = vld [vmem:[%s14037_s1 + $0x888] ss:$16 sps:$4 sm:$0xff]   ;;  %v9603_v48 = vld [vmem:[%s14037_s1 + $0x8a4] ss:$16 sps:$4 sm:$0xff]  }
  0xdf   : > { %6657 = vmatpush1.bf16.msra.mxu0 %v9510_v50  ;;  %7313 = vmatpush1.bf16.msra.mxu1 %v9513_v51  ;;  %v9606_v50 = vld [vmem:[%s14037_s1 + $0x8ac] ss:$16 sps:$4 sm:$0xff]   ;;  %v9601_v51 = vld [vmem:[%s14037_s1 + $0x8a0] ss:$16 sps:$4 sm:$0xff]  }
  0xe0   : > { %6658 = vmatprep.subr.bf16.mxu0 %v9518_v52  ;;  %7314 = vmatprep.subr.bf16.mxu1 %v9521_v53  ;;  %v9604_v52 = vld [vmem:[%s14037_s1 + $0x8a8] ss:$16 sps:$4 sm:$0xff]   ;;  %v9609_v53 = vld [vmem:[%s14037_s1 + $0x8c4] ss:$16 sps:$4 sm:$0xff]  }
  0xe3   : > { %6659 = vmatpush1.bf16.msra.mxu0 %v9516_v54  ;;  %7315 = vmatpush1.bf16.msra.mxu1 %v9519_v55  ;;  %v9612_v54 = vld [vmem:[%s14037_s1 + $0x8cc] ss:$16 sps:$4 sm:$0xff]   ;;  %v9607_v55 = vld [vmem:[%s14037_s1 + $0x8c0] ss:$16 sps:$4 sm:$0xff]  }
  0xe4   : > { %6660 = vmatprep.subr.bf16.mxu0 %v9524_v56  ;;  %7316 = vmatprep.subr.bf16.mxu1 %v9527_v57  ;;  %v9610_v56 = vld [vmem:[%s14037_s1 + $0x8c8] ss:$16 sps:$4 sm:$0xff]   ;;  %v9615_v57 = vld [vmem:[%s14037_s1 + $0x8e4] ss:$16 sps:$4 sm:$0xff]  }
  0xe7   : > { %6661 = vmatpush1.bf16.msra.mxu0 %v9522_v58  ;;  %7317 = vmatpush1.bf16.msra.mxu1 %v9525_v59  ;;  %v9618_v58 = vld [vmem:[%s14037_s1 + $0x8ec] ss:$16 sps:$4 sm:$0xff]   ;;  %v9613_v59 = vld [vmem:[%s14037_s1 + $0x8e0] ss:$16 sps:$4 sm:$0xff]  }
  0xe8   : > { %6662 = vmatprep.subr.bf16.mxu0 %v9530_v60  ;;  %7318 = vmatprep.subr.bf16.mxu1 %v9533_v61  ;;  %v9616_v60 = vld [vmem:[%s14037_s1 + $0x8e8] ss:$16 sps:$4 sm:$0xff]   ;;  %v9621_v61 = vld [vmem:[%s14037_s1 + $0x904] ss:$16 sps:$4 sm:$0xff]  }
  0xeb   : > { %6663 = vmatpush1.bf16.msra.mxu0 %v9528_v62  ;;  %7319 = vmatpush1.bf16.msra.mxu1 %v9531_v63  ;;  %v9624_v62 = vld [vmem:[%s14037_s1 + $0x90c] ss:$16 sps:$4 sm:$0xff]   ;;  %v9619_v63 = vld [vmem:[%s14037_s1 + $0x900] ss:$16 sps:$4 sm:$0xff]  }
  0xec   : > { %6664 = vmatprep.subr.bf16.mxu0 %v9536_v0  ;;  %7320 = vmatprep.subr.bf16.mxu1 %v9539_v1  ;;  %v9622_v0 = vld [vmem:[%s14037_s1 + $0x908] ss:$16 sps:$4 sm:$0xff]   ;;  %v9627_v1 = vld [vmem:[%s14037_s1 + $0x924] ss:$16 sps:$4 sm:$0xff]  }
  0xef   : > { %6665 = vmatpush1.bf16.msra.mxu0 %v9534_v2  ;;  %7321 = vmatpush1.bf16.msra.mxu1 %v9537_v3  ;;  %v9630_v2 = vld [vmem:[%s14037_s1 + $0x92c] ss:$16 sps:$4 sm:$0xff]   ;;  %v9625_v3 = vld [vmem:[%s14037_s1 + $0x920] ss:$16 sps:$4 sm:$0xff]  }
  0xf0   : > { %6666 = vmatprep.subr.bf16.mxu0 %v9542_v4  ;;  %7322 = vmatprep.subr.bf16.mxu1 %v9545_v5  ;;  %v9628_v4 = vld [vmem:[%s14037_s1 + $0x928] ss:$16 sps:$4 sm:$0xff]   ;;  %v9633_v5 = vld [vmem:[%s14037_s1 + $0x944] ss:$16 sps:$4 sm:$0xff]  }
  0xf3   : > { %6667 = vmatpush1.bf16.msra.mxu0 %v9540_v6  ;;  %7323 = vmatpush1.bf16.msra.mxu1 %v9543_v7  ;;  %v9636_v6 = vld [vmem:[%s14037_s1 + $0x94c] ss:$16 sps:$4 sm:$0xff]   ;;  %v9631_v7 = vld [vmem:[%s14037_s1 + $0x940] ss:$16 sps:$4 sm:$0xff]  }
  0xf4   : > { %6668 = vmatprep.subr.bf16.mxu0 %v9548_v8  ;;  %7324 = vmatprep.subr.bf16.mxu1 %v9551_v9  ;;  %v9634_v8 = vld [vmem:[%s14037_s1 + $0x948] ss:$16 sps:$4 sm:$0xff]   ;;  %v9639_v9 = vld [vmem:[%s14037_s1 + $0x964] ss:$16 sps:$4 sm:$0xff]  }
  0xf7   : > { %6669 = vmatpush1.bf16.msra.mxu0 %v9546_v10  ;;  %7325 = vmatpush1.bf16.msra.mxu1 %v9549_v11  ;;  %v9642_v10 = vld [vmem:[%s14037_s1 + $0x96c] ss:$16 sps:$4 sm:$0xff]   ;;  %v9637_v11 = vld [vmem:[%s14037_s1 + $0x960] ss:$16 sps:$4 sm:$0xff]  }
  0xf8   : > { %6670 = vmatprep.subr.bf16.mxu0 %v9554_v13  ;;  %7326 = vmatprep.subr.bf16.mxu1 %v9557_v14  ;;  %v9640_v13 = vld [vmem:[%s14037_s1 + $0x968] ss:$16 sps:$4 sm:$0xff]   ;;  %v9645_v14 = vld [vmem:[%s14037_s1 + $0x984] ss:$16 sps:$4 sm:$0xff]  }
  0xfb   : > { %6671 = vmatpush1.bf16.msra.mxu0 %v9552_v15  ;;  %7327 = vmatpush1.bf16.msra.mxu1 %v9555_v16  ;;  %v9648_v15 = vld [vmem:[%s14037_s1 + $0x98c] ss:$16 sps:$4 sm:$0xff]   ;;  %v9643_v16 = vld [vmem:[%s14037_s1 + $0x980] ss:$16 sps:$4 sm:$0xff]  }
  0xfc   : > { %6672 = vmatprep.subr.bf16.mxu0 %v9560_v17  ;;  %7328 = vmatprep.subr.bf16.mxu1 %v9563_v18  ;;  %v9646_v17 = vld [vmem:[%s14037_s1 + $0x988] ss:$16 sps:$4 sm:$0xff]   ;;  %v9651_v18 = vld [vmem:[%s14037_s1 + $0x9a4] ss:$16 sps:$4 sm:$0xff]  }
  0xff   : > { %6673 = vmatpush1.bf16.msra.mxu0 %v9558_v20  ;;  %7329 = vmatpush1.bf16.msra.mxu1 %v9561_v21  ;;  %v9654_v20 = vld [vmem:[%s14037_s1 + $0x9ac] ss:$16 sps:$4 sm:$0xff]   ;;  %v9649_v21 = vld [vmem:[%s14037_s1 + $0x9a0] ss:$16 sps:$4 sm:$0xff]  }
 0x100   : > { %6674 = vmatprep.subr.bf16.mxu0 %v9566_v23  ;;  %7330 = vmatprep.subr.bf16.mxu1 %v9569_v19  ;;  %v9652_v23 = vld [vmem:[%s14037_s1 + $0x9a8] ss:$16 sps:$4 sm:$0xff]   ;;  %v9657_v19 = vld [vmem:[%s14037_s1 + $0x9c4] ss:$16 sps:$4 sm:$0xff]  }
 0x103   : > { %6675 = vmatpush1.bf16.msra.mxu0 %v9564_v25  ;;  %7331 = vmatpush1.bf16.msra.mxu1 %v9567_v12  ;;  %v9660_v25 = vld [vmem:[%s14037_s1 + $0x9cc] ss:$16 sps:$4 sm:$0xff]   ;;  %v9655_v12 = vld [vmem:[%s14037_s1 + $0x9c0] ss:$16 sps:$4 sm:$0xff]  }
 0x104   : > { %6685 = vmatprep.subr.bf16.mxu0 %v9573_v27  ;;  %7341 = vmatprep.subr.bf16.mxu1 %v9576_v28  ;;  %v9658_v27 = vld [vmem:[%s14037_s1 + $0x9c8] ss:$16 sps:$4 sm:$0xff]   ;;  %v9663_v28 = vld [vmem:[%s14037_s1 + $0x9e4] ss:$16 sps:$4 sm:$0xff]  }
 0x106   : > { %6677 = vmatmul.mubr.bf16.vlgmr.msra.gmra.mrb[0].mxu0 %v11394_v24  ;;  %7333 = vmatmul.mubr.bf16.vlgmr.msra.gmra.mrb[0].mxu1 %v11394_v24  ;;  %v9588_v24 = vld [vmem:[%s14037_s1 + $0x84c] ss:$16 sps:$4 sm:$0xff]  }
 0x107   : > { %6686 = vmatpush1.bf16.msra.mxu0 %v9571_v30  ;;  %7342 = vmatpush1.bf16.msra.mxu1 %v9574_v31  ;;  %v9666_v30 = vld [vmem:[%s14037_s1 + $0x9ec] ss:$16 sps:$4 sm:$0xff]   ;;  %v1267_v31 = vcombine.high %v11584_v26, %v11584_v26 }
 0x108   : > { %6687 = vmatprep.subr.bf16.mxu0 %v9579_v22  ;;  %7343 = vmatprep.subr.bf16.mxu1 %v9582_v32  ;;  %v9661_v22 = vld [vmem:[%s14037_s1 + $0x9e0] ss:$16 sps:$4 sm:$0xff]   ;;  %v9664_v32 = vld [vmem:[%s14037_s1 + $0x9e8] ss:$16 sps:$4 sm:$0xff]   ;;  %v9672_v26 = vld [vmem:[%s14037_s1 + $0xa0c] ss:$16 sps:$4 sm:$0xff]  }
 0x109   : > { %6717 = vmatprep.mubr.bf16.mxu0 %v1282_v33  ;;  %7373 = vmatprep.mubr.bf16.mxu1 %v1282_v33  ;;  %v9669_v33 = vld [vmem:[%s14037_s1 + $0xa04] ss:$16 sps:$4 sm:$0xff]  }
 0x10b   : > { %6688 = vmatpush1.bf16.msra.mxu0 %v9577_v34  ;;  %7344 = vmatpush1.bf16.msra.mxu1 %v9580_v35  ;;  %v11798_v34 = vrot.slane %v1267_v31, %v10921_v49  ;;  %v9667_v35 = vld [vmem:[%s14037_s1 + $0xa00] ss:$16 sps:$4 sm:$0xff]   ;;  %v9756_v31 = vld [vmem:[%s14037_s1 + $0xbcc] ss:$16 sps:$4 sm:$0xff]  }
 0x10c   : > { %6689 = vmatprep.subr.bf16.mxu0 %v9585_v36  ;;  %7345 = vmatprep.subr.bf16.mxu1 %v9588_v24  ;;  %v9670_v36 = vld [vmem:[%s14037_s1 + $0xa08] ss:$16 sps:$4 sm:$0xff]   ;;  %v9675_v24 = vld [vmem:[%s14037_s1 + $0xa24] ss:$16 sps:$4 sm:$0xff]  }
 0x10f   : > { %6690 = vmatpush1.bf16.msra.mxu0 %v9583_v37  ;;  %7346 = vmatpush1.bf16.msra.mxu1 %v9586_v38  ;;  %v9678_v37 = vld [vmem:[%s14037_s1 + $0xa2c] ss:$16 sps:$4 sm:$0xff]   ;;  %v1283_v38 = vcombine.high %v11798_v34, %v11798_v34 }
 0x110   : > { %6691 = vmatprep.subr.bf16.mxu0 %v9591_v39  ;;  %7347 = vmatprep.subr.bf16.mxu1 %v9594_v40  ;;  %v9673_v39 = vld [vmem:[%s14037_s1 + $0xa20] ss:$16 sps:$4 sm:$0xff]   ;;  %v9676_v40 = vld [vmem:[%s14037_s1 + $0xa28] ss:$16 sps:$4 sm:$0xff]  }
 0x113   : > { %6692 = vmatpush1.bf16.msra.mxu0 %v9589_v41  ;;  %7348 = vmatpush1.bf16.msra.mxu1 %v9592_v43  ;;  %v9681_v41 = vld [vmem:[%s14037_s1 + $0xa44] ss:$16 sps:$4 sm:$0xff]   ;;  %v9679_v43 = vld [vmem:[%s14037_s1 + $0xa40] ss:$16 sps:$4 sm:$0xff]  }
 0x114   : > { %6693 = vmatprep.subr.bf16.mxu0 %v9597_v44  ;;  %7349 = vmatprep.subr.bf16.mxu1 %v9600_v45  ;;  %v9682_v44 = vld [vmem:[%s14037_s1 + $0xa48] ss:$16 sps:$4 sm:$0xff]   ;;  %v9687_v45 = vld [vmem:[%s14037_s1 + $0xa64] ss:$16 sps:$4 sm:$0xff]  }
 0x117   : > { %6694 = vmatpush1.bf16.msra.mxu0 %v9595_v46  ;;  %7350 = vmatpush1.bf16.msra.mxu1 %v9598_v47  ;;  %v9690_v46 = vld [vmem:[%s14037_s1 + $0xa6c] ss:$16 sps:$4 sm:$0xff]   ;;  %v9685_v47 = vld [vmem:[%s14037_s1 + $0xa60] ss:$16 sps:$4 sm:$0xff]  }
 0x118   : > { %6695 = vmatprep.subr.bf16.mxu0 %v9603_v48  ;;  %7351 = vmatprep.subr.bf16.mxu1 %v9606_v50  ;;  %v9688_v48 = vld [vmem:[%s14037_s1 + $0xa68] ss:$16 sps:$4 sm:$0xff]   ;;  %v9693_v50 = vld [vmem:[%s14037_s1 + $0xa84] ss:$16 sps:$4 sm:$0xff]  }
 0x11b   : > { %6696 = vmatpush1.bf16.msra.mxu0 %v9601_v51  ;;  %7352 = vmatpush1.bf16.msra.mxu1 %v9604_v52  ;;  %v9696_v51 = vld [vmem:[%s14037_s1 + $0xa8c] ss:$16 sps:$4 sm:$0xff]   ;;  %v9691_v52 = vld [vmem:[%s14037_s1 + $0xa80] ss:$16 sps:$4 sm:$0xff]  }
 0x11c   : > { %6697 = vmatprep.subr.bf16.mxu0 %v9609_v53  ;;  %7353 = vmatprep.subr.bf16.mxu1 %v9612_v54  ;;  %v9694_v53 = vld [vmem:[%s14037_s1 + $0xa88] ss:$16 sps:$4 sm:$0xff]   ;;  %v9699_v54 = vld [vmem:[%s14037_s1 + $0xaa4] ss:$16 sps:$4 sm:$0xff]  }
 0x11f   : > { %6698 = vmatpush1.bf16.msra.mxu0 %v9607_v55  ;;  %7354 = vmatpush1.bf16.msra.mxu1 %v9610_v56  ;;  %v9702_v55 = vld [vmem:[%s14037_s1 + $0xaac] ss:$16 sps:$4 sm:$0xff]   ;;  %v9697_v56 = vld [vmem:[%s14037_s1 + $0xaa0] ss:$16 sps:$4 sm:$0xff]  }
 0x120   : > { %6699 = vmatprep.subr.bf16.mxu0 %v9615_v57  ;;  %7355 = vmatprep.subr.bf16.mxu1 %v9618_v58  ;;  %v9700_v57 = vld [vmem:[%s14037_s1 + $0xaa8] ss:$16 sps:$4 sm:$0xff]   ;;  %v9705_v58 = vld [vmem:[%s14037_s1 + $0xac4] ss:$16 sps:$4 sm:$0xff]  }
 0x123   : > { %6700 = vmatpush1.bf16.msra.mxu0 %v9613_v59  ;;  %7356 = vmatpush1.bf16.msra.mxu1 %v9616_v60  ;;  %v9708_v59 = vld [vmem:[%s14037_s1 + $0xacc] ss:$16 sps:$4 sm:$0xff]   ;;  %v9703_v60 = vld [vmem:[%s14037_s1 + $0xac0] ss:$16 sps:$4 sm:$0xff]  }
 0x124   : > { %6701 = vmatprep.subr.bf16.mxu0 %v9621_v61  ;;  %7357 = vmatprep.subr.bf16.mxu1 %v9624_v62  ;;  %v9706_v61 = vld [vmem:[%s14037_s1 + $0xac8] ss:$16 sps:$4 sm:$0xff]   ;;  %v9711_v62 = vld [vmem:[%s14037_s1 + $0xae4] ss:$16 sps:$4 sm:$0xff]  }
 0x127   : > { %6702 = vmatpush1.bf16.msra.mxu0 %v9619_v63  ;;  %7358 = vmatpush1.bf16.msra.mxu1 %v9622_v0  ;;  %v9714_v63 = vld [vmem:[%s14037_s1 + $0xaec] ss:$16 sps:$4 sm:$0xff]   ;;  %v9709_v0 = vld [vmem:[%s14037_s1 + $0xae0] ss:$16 sps:$4 sm:$0xff]  }
 0x128   : > { %6703 = vmatprep.subr.bf16.mxu0 %v9627_v1  ;;  %7359 = vmatprep.subr.bf16.mxu1 %v9630_v2  ;;  %v9712_v1 = vld [vmem:[%s14037_s1 + $0xae8] ss:$16 sps:$4 sm:$0xff]   ;;  %v9717_v2 = vld [vmem:[%s14037_s1 + $0xb04] ss:$16 sps:$4 sm:$0xff]  }
 0x12b   : > { %6704 = vmatpush1.bf16.msra.mxu0 %v9625_v3  ;;  %7360 = vmatpush1.bf16.msra.mxu1 %v9628_v4  ;;  %v9720_v3 = vld [vmem:[%s14037_s1 + $0xb0c] ss:$16 sps:$4 sm:$0xff]   ;;  %v9715_v4 = vld [vmem:[%s14037_s1 + $0xb00] ss:$16 sps:$4 sm:$0xff]  }
 0x12c   : > { %6705 = vmatprep.subr.bf16.mxu0 %v9633_v5  ;;  %7361 = vmatprep.subr.bf16.mxu1 %v9636_v6  ;;  %v9718_v5 = vld [vmem:[%s14037_s1 + $0xb08] ss:$16 sps:$4 sm:$0xff]   ;;  %v9723_v6 = vld [vmem:[%s14037_s1 + $0xb24] ss:$16 sps:$4 sm:$0xff]  }
 0x12f   : > { %6706 = vmatpush1.bf16.msra.mxu0 %v9631_v7  ;;  %7362 = vmatpush1.bf16.msra.mxu1 %v9634_v8  ;;  %v9726_v7 = vld [vmem:[%s14037_s1 + $0xb2c] ss:$16 sps:$4 sm:$0xff]   ;;  %v9721_v8 = vld [vmem:[%s14037_s1 + $0xb20] ss:$16 sps:$4 sm:$0xff]  }
 0x130   : > { %6707 = vmatprep.subr.bf16.mxu0 %v9639_v9  ;;  %7363 = vmatprep.subr.bf16.mxu1 %v9642_v10  ;;  %v9724_v9 = vld [vmem:[%s14037_s1 + $0xb28] ss:$16 sps:$4 sm:$0xff]   ;;  %v9729_v10 = vld [vmem:[%s14037_s1 + $0xb44] ss:$16 sps:$4 sm:$0xff]  }
 0x133   : > { %6708 = vmatpush1.bf16.msra.mxu0 %v9637_v11  ;;  %7364 = vmatpush1.bf16.msra.mxu1 %v9640_v13  ;;  %v9732_v11 = vld [vmem:[%s14037_s1 + $0xb4c] ss:$16 sps:$4 sm:$0xff]   ;;  %v9727_v13 = vld [vmem:[%s14037_s1 + $0xb40] ss:$16 sps:$4 sm:$0xff]  }
 0x134   : > { %6709 = vmatprep.subr.bf16.mxu0 %v9645_v14  ;;  %7365 = vmatprep.subr.bf16.mxu1 %v9648_v15  ;;  %v9730_v14 = vld [vmem:[%s14037_s1 + $0xb48] ss:$16 sps:$4 sm:$0xff]   ;;  %v9735_v15 = vld [vmem:[%s14037_s1 + $0xb64] ss:$16 sps:$4 sm:$0xff]  }
 0x137   : > { %6710 = vmatpush1.bf16.msra.mxu0 %v9643_v16  ;;  %7366 = vmatpush1.bf16.msra.mxu1 %v9646_v17  ;;  %v9738_v16 = vld [vmem:[%s14037_s1 + $0xb6c] ss:$16 sps:$4 sm:$0xff]   ;;  %v9733_v17 = vld [vmem:[%s14037_s1 + $0xb60] ss:$16 sps:$4 sm:$0xff]  }
 0x138   : > { %6711 = vmatprep.subr.bf16.mxu0 %v9651_v18  ;;  %7367 = vmatprep.subr.bf16.mxu1 %v9654_v20  ;;  %v9736_v18 = vld [vmem:[%s14037_s1 + $0xb68] ss:$16 sps:$4 sm:$0xff]   ;;  %v9741_v20 = vld [vmem:[%s14037_s1 + $0xb84] ss:$16 sps:$4 sm:$0xff]  }
 0x13b   : > { %6712 = vmatpush1.bf16.msra.mxu0 %v9649_v21  ;;  %7368 = vmatpush1.bf16.msra.mxu1 %v9652_v23  ;;  %v9744_v21 = vld [vmem:[%s14037_s1 + $0xb8c] ss:$16 sps:$4 sm:$0xff]   ;;  %v9739_v23 = vld [vmem:[%s14037_s1 + $0xb80] ss:$16 sps:$4 sm:$0xff]  }
 0x13c   : > { %6713 = vmatprep.subr.bf16.mxu0 %v9657_v19  ;;  %7369 = vmatprep.subr.bf16.mxu1 %v9660_v25  ;;  %v9742_v19 = vld [vmem:[%s14037_s1 + $0xb88] ss:$16 sps:$4 sm:$0xff]   ;;  %v9747_v25 = vld [vmem:[%s14037_s1 + $0xba4] ss:$16 sps:$4 sm:$0xff]  }
 0x13f   : > { %6714 = vmatpush1.bf16.msra.mxu0 %v9655_v12  ;;  %7370 = vmatpush1.bf16.msra.mxu1 %v9658_v27  ;;  %v9750_v12 = vld [vmem:[%s14037_s1 + $0xbac] ss:$16 sps:$4 sm:$0xff]   ;;  %v9745_v27 = vld [vmem:[%s14037_s1 + $0xba0] ss:$16 sps:$4 sm:$0xff]  }
 0x140   : > { %6715 = vmatprep.subr.bf16.mxu0 %v9663_v28  ;;  %7371 = vmatprep.subr.bf16.mxu1 %v9666_v30  ;;  %v9748_v28 = vld [vmem:[%s14037_s1 + $0xba8] ss:$16 sps:$4 sm:$0xff]   ;;  %v9753_v30 = vld [vmem:[%s14037_s1 + $0xbc4] ss:$16 sps:$4 sm:$0xff]  }
 0x143   : > { %6716 = vmatpush1.bf16.msra.mxu0 %v9661_v22  ;;  %7372 = vmatpush1.bf16.msra.mxu1 %v9664_v32  ;;  %v9751_v22 = vld [vmem:[%s14037_s1 + $0xbc0] ss:$16 sps:$4 sm:$0xff]   ;;  %v9754_v32 = vld [vmem:[%s14037_s1 + $0xbc8] ss:$16 sps:$4 sm:$0xff]  }
 0x144   : > { %6726 = vmatprep.subr.bf16.mxu0 %v9669_v33  ;;  %7382 = vmatprep.subr.bf16.mxu1 %v9672_v26  ;;  %v9759_v33 = vld [vmem:[%s14037_s1 + $0xbe4] ss:$16 sps:$4 sm:$0xff]   ;;  %v9762_v26 = vld [vmem:[%s14037_s1 + $0xbec] ss:$16 sps:$4 sm:$0xff]  }
 0x146   : > { %6718 = vmatmul.mubr.bf16.vlgmr.msra.gmra.mrb[0].mxu0 %v11597_v29  ;;  %7374 = vmatmul.mubr.bf16.vlgmr.msra.gmra.mrb[0].mxu1 %v11597_v29  ;;  %v9684_v29 = vld [vmem:[%s14037_s1 + $0xa4c] ss:$16 sps:$4 sm:$0xff]  }
 0x147   : > { %6727 = vmatpush1.bf16.msra.mxu0 %v9667_v35  ;;  %7383 = vmatpush1.bf16.msra.mxu1 %v9670_v36  ;;  %v11985_v35 = vld [vmem:[%s10918_s30 + $0x18] sm:$0xff]  ;;  %v9757_v36 = vld [vmem:[%s14037_s1 + $0xbe0] ss:$16 sps:$4 sm:$0xff]  }
 0x148   : > { %6728 = vmatprep.subr.bf16.mxu0 %v9675_v24  ;;  %7384 = vmatprep.subr.bf16.mxu1 %v9678_v37  ;;  %v9760_v24 = vld [vmem:[%s14037_s1 + $0xbe8] ss:$16 sps:$4 sm:$0xff]   ;;  %v9766_v37 = vld [vmem:[%s14037_s1 + $0xc04] ss:$16 sps:$4 sm:$0xff]  }
 0x149   : > { %6758 = vmatprep.mubr.bf16.mxu0 %v1283_v38  ;;  %7414 = vmatprep.mubr.bf16.mxu1 %v1283_v38  ;;  %v9769_v38 = vld [vmem:[%s14037_s1 + $0xc0c] ss:$16 sps:$4 sm:$0xff]  }
 0x14b   : > { %6729 = vmatpush1.bf16.msra.mxu0 %v9673_v39  ;;  %7385 = vmatpush1.bf16.msra.mxu1 %v9676_v40  ;;  %v12001_v39 = vrot.slane %v11985_v35, %v10921_v49  ;;  %v9764_v40 = vld [vmem:[%s14037_s1 + $0xc00] ss:$16 sps:$4 sm:$0xff]  }
 0x14c   : > { %6730 = vmatprep.subr.bf16.mxu0 %v9681_v41  ;;  %7386 = vmatprep.subr.bf16.mxu1 %v9684_v29  ;;  %v9767_v41 = vld [vmem:[%s14037_s1 + $0xc08] ss:$16 sps:$4 sm:$0xff]   ;;  %v9772_v29 = vld [vmem:[%s14037_s1 + $0xc24] ss:$16 sps:$4 sm:$0xff]  }
 0x14f   : > { %6731 = vmatpush1.bf16.msra.mxu0 %v9679_v43  ;;  %7387 = vmatpush1.bf16.msra.mxu1 %v9682_v44  ;;  %v9775_v43 = vld [vmem:[%s14037_s1 + $0xc2c] ss:$16 sps:$4 sm:$0xff]   ;;  %v1299_v44 = vcombine.high %v12001_v39, %v12001_v39 }
 0x150   : > { %6732 = vmatprep.subr.bf16.mxu0 %v9687_v45  ;;  %7388 = vmatprep.subr.bf16.mxu1 %v9690_v46  ;;  %v9770_v45 = vld [vmem:[%s14037_s1 + $0xc20] ss:$16 sps:$4 sm:$0xff]   ;;  %v9773_v46 = vld [vmem:[%s14037_s1 + $0xc28] ss:$16 sps:$4 sm:$0xff]  }
 0x153   : > { %6733 = vmatpush1.bf16.msra.mxu0 %v9685_v47  ;;  %7389 = vmatpush1.bf16.msra.mxu1 %v9688_v48  ;;  %v9778_v47 = vld [vmem:[%s14037_s1 + $0xc44] ss:$16 sps:$4 sm:$0xff]   ;;  %v9776_v48 = vld [vmem:[%s14037_s1 + $0xc40] ss:$16 sps:$4 sm:$0xff]  }
 0x154   : > { %6734 = vmatprep.subr.bf16.mxu0 %v9693_v50  ;;  %7390 = vmatprep.subr.bf16.mxu1 %v9696_v51  ;;  %v9779_v50 = vld [vmem:[%s14037_s1 + $0xc48] ss:$16 sps:$4 sm:$0xff]   ;;  %v9784_v51 = vld [vmem:[%s14037_s1 + $0xc64] ss:$16 sps:$4 sm:$0xff]  }
 0x157   : > { %6735 = vmatpush1.bf16.msra.mxu0 %v9691_v52  ;;  %7391 = vmatpush1.bf16.msra.mxu1 %v9694_v53  ;;  %v9787_v52 = vld [vmem:[%s14037_s1 + $0xc6c] ss:$16 sps:$4 sm:$0xff]   ;;  %v9782_v53 = vld [vmem:[%s14037_s1 + $0xc60] ss:$16 sps:$4 sm:$0xff]  }
 0x158   : > { %6736 = vmatprep.subr.bf16.mxu0 %v9699_v54  ;;  %7392 = vmatprep.subr.bf16.mxu1 %v9702_v55  ;;  %v9785_v54 = vld [vmem:[%s14037_s1 + $0xc68] ss:$16 sps:$4 sm:$0xff]   ;;  %v9790_v55 = vld [vmem:[%s14037_s1 + $0xc84] ss:$16 sps:$4 sm:$0xff]  }
 0x15b   : > { %6737 = vmatpush1.bf16.msra.mxu0 %v9697_v56  ;;  %7393 = vmatpush1.bf16.msra.mxu1 %v9700_v57  ;;  %v9793_v56 = vld [vmem:[%s14037_s1 + $0xc8c] ss:$16 sps:$4 sm:$0xff]   ;;  %v9788_v57 = vld [vmem:[%s14037_s1 + $0xc80] ss:$16 sps:$4 sm:$0xff]  }
 0x15c   : > { %6738 = vmatprep.subr.bf16.mxu0 %v9705_v58  ;;  %7394 = vmatprep.subr.bf16.mxu1 %v9708_v59  ;;  %v9791_v58 = vld [vmem:[%s14037_s1 + $0xc88] ss:$16 sps:$4 sm:$0xff]   ;;  %v9796_v59 = vld [vmem:[%s14037_s1 + $0xca4] ss:$16 sps:$4 sm:$0xff]  }
 0x15f   : > { %6739 = vmatpush1.bf16.msra.mxu0 %v9703_v60  ;;  %7395 = vmatpush1.bf16.msra.mxu1 %v9706_v61  ;;  %v9799_v60 = vld [vmem:[%s14037_s1 + $0xcac] ss:$16 sps:$4 sm:$0xff]   ;;  %v9794_v61 = vld [vmem:[%s14037_s1 + $0xca0] ss:$16 sps:$4 sm:$0xff]  }
 0x160   : > { %6740 = vmatprep.subr.bf16.mxu0 %v9711_v62  ;;  %7396 = vmatprep.subr.bf16.mxu1 %v9714_v63  ;;  %v9797_v62 = vld [vmem:[%s14037_s1 + $0xca8] ss:$16 sps:$4 sm:$0xff]   ;;  %v9802_v63 = vld [vmem:[%s14037_s1 + $0xcc4] ss:$16 sps:$4 sm:$0xff]  }
 0x163   : > { %6741 = vmatpush1.bf16.msra.mxu0 %v9709_v0  ;;  %7397 = vmatpush1.bf16.msra.mxu1 %v9712_v1  ;;  %v9805_v0 = vld [vmem:[%s14037_s1 + $0xccc] ss:$16 sps:$4 sm:$0xff]   ;;  %v9800_v1 = vld [vmem:[%s14037_s1 + $0xcc0] ss:$16 sps:$4 sm:$0xff]  }
 0x164   : > { %6742 = vmatprep.subr.bf16.mxu0 %v9717_v2  ;;  %7398 = vmatprep.subr.bf16.mxu1 %v9720_v3  ;;  %v9803_v2 = vld [vmem:[%s14037_s1 + $0xcc8] ss:$16 sps:$4 sm:$0xff]   ;;  %v9808_v3 = vld [vmem:[%s14037_s1 + $0xce4] ss:$16 sps:$4 sm:$0xff]  }
 0x167   : > { %6743 = vmatpush1.bf16.msra.mxu0 %v9715_v4  ;;  %7399 = vmatpush1.bf16.msra.mxu1 %v9718_v5  ;;  %v9811_v4 = vld [vmem:[%s14037_s1 + $0xcec] ss:$16 sps:$4 sm:$0xff]   ;;  %v9806_v5 = vld [vmem:[%s14037_s1 + $0xce0] ss:$16 sps:$4 sm:$0xff]  }
 0x168   : > { %6744 = vmatprep.subr.bf16.mxu0 %v9723_v6  ;;  %7400 = vmatprep.subr.bf16.mxu1 %v9726_v7  ;;  %v9809_v6 = vld [vmem:[%s14037_s1 + $0xce8] ss:$16 sps:$4 sm:$0xff]   ;;  %v9814_v7 = vld [vmem:[%s14037_s1 + $0xd04] ss:$16 sps:$4 sm:$0xff]  }
 0x16b   : > { %6745 = vmatpush1.bf16.msra.mxu0 %v9721_v8  ;;  %7401 = vmatpush1.bf16.msra.mxu1 %v9724_v9  ;;  %v9817_v8 = vld [vmem:[%s14037_s1 + $0xd0c] ss:$16 sps:$4 sm:$0xff]   ;;  %v9812_v9 = vld [vmem:[%s14037_s1 + $0xd00] ss:$16 sps:$4 sm:$0xff]  }
 0x16c   : > { %6746 = vmatprep.subr.bf16.mxu0 %v9729_v10  ;;  %7402 = vmatprep.subr.bf16.mxu1 %v9732_v11  ;;  %v9815_v10 = vld [vmem:[%s14037_s1 + $0xd08] ss:$16 sps:$4 sm:$0xff]   ;;  %v9820_v11 = vld [vmem:[%s14037_s1 + $0xd24] ss:$16 sps:$4 sm:$0xff]  }
 0x16f   : > { %6747 = vmatpush1.bf16.msra.mxu0 %v9727_v13  ;;  %7403 = vmatpush1.bf16.msra.mxu1 %v9730_v14  ;;  %v9823_v13 = vld [vmem:[%s14037_s1 + $0xd2c] ss:$16 sps:$4 sm:$0xff]   ;;  %v9818_v14 = vld [vmem:[%s14037_s1 + $0xd20] ss:$16 sps:$4 sm:$0xff]  }
 0x170   : > { %6748 = vmatprep.subr.bf16.mxu0 %v9735_v15  ;;  %7404 = vmatprep.subr.bf16.mxu1 %v9738_v16  ;;  %v9821_v15 = vld [vmem:[%s14037_s1 + $0xd28] ss:$16 sps:$4 sm:$0xff]   ;;  %v9826_v16 = vld [vmem:[%s14037_s1 + $0xd44] ss:$16 sps:$4 sm:$0xff]  }
 0x173   : > { %6749 = vmatpush1.bf16.msra.mxu0 %v9733_v17  ;;  %7405 = vmatpush1.bf16.msra.mxu1 %v9736_v18  ;;  %v9829_v17 = vld [vmem:[%s14037_s1 + $0xd4c] ss:$16 sps:$4 sm:$0xff]   ;;  %v9824_v18 = vld [vmem:[%s14037_s1 + $0xd40] ss:$16 sps:$4 sm:$0xff]  }
 0x174   : > { %6750 = vmatprep.subr.bf16.mxu0 %v9741_v20  ;;  %7406 = vmatprep.subr.bf16.mxu1 %v9744_v21  ;;  %v9827_v20 = vld [vmem:[%s14037_s1 + $0xd48] ss:$16 sps:$4 sm:$0xff]   ;;  %v9832_v21 = vld [vmem:[%s14037_s1 + $0xd64] ss:$16 sps:$4 sm:$0xff]  }
 0x177   : > { %6751 = vmatpush1.bf16.msra.mxu0 %v9739_v23  ;;  %7407 = vmatpush1.bf16.msra.mxu1 %v9742_v19  ;;  %v9835_v23 = vld [vmem:[%s14037_s1 + $0xd6c] ss:$16 sps:$4 sm:$0xff]   ;;  %v9830_v19 = vld [vmem:[%s14037_s1 + $0xd60] ss:$16 sps:$4 sm:$0xff]  }
 0x178   : > { %6752 = vmatprep.subr.bf16.mxu0 %v9747_v25  ;;  %7408 = vmatprep.subr.bf16.mxu1 %v9750_v12  ;;  %v9833_v25 = vld [vmem:[%s14037_s1 + $0xd68] ss:$16 sps:$4 sm:$0xff]   ;;  %v9838_v12 = vld [vmem:[%s14037_s1 + $0xd84] ss:$16 sps:$4 sm:$0xff]  }
 0x17b   : > { %6753 = vmatpush1.bf16.msra.mxu0 %v9745_v27  ;;  %7409 = vmatpush1.bf16.msra.mxu1 %v9748_v28  ;;  %v9841_v27 = vld [vmem:[%s14037_s1 + $0xd8c] ss:$16 sps:$4 sm:$0xff]   ;;  %v9836_v28 = vld [vmem:[%s14037_s1 + $0xd80] ss:$16 sps:$4 sm:$0xff]  }
 0x17c   : > { %6754 = vmatprep.subr.bf16.mxu0 %v9753_v30  ;;  %7410 = vmatprep.subr.bf16.mxu1 %v9756_v31  ;;  %v9839_v30 = vld [vmem:[%s14037_s1 + $0xd88] ss:$16 sps:$4 sm:$0xff]   ;;  %v9844_v31 = vld [vmem:[%s14037_s1 + $0xda4] ss:$16 sps:$4 sm:$0xff]  }
 0x17f   : > { %6755 = vmatpush1.bf16.msra.mxu0 %v9751_v22  ;;  %7411 = vmatpush1.bf16.msra.mxu1 %v9754_v32  ;;  %v9847_v22 = vld [vmem:[%s14037_s1 + $0xdac] ss:$16 sps:$4 sm:$0xff]   ;;  %v9842_v32 = vld [vmem:[%s14037_s1 + $0xda0] ss:$16 sps:$4 sm:$0xff]  }
 0x180   : > { %6756 = vmatprep.subr.bf16.mxu0 %v9759_v33  ;;  %7412 = vmatprep.subr.bf16.mxu1 %v9762_v26  ;;  %v9845_v33 = vld [vmem:[%s14037_s1 + $0xda8] ss:$16 sps:$4 sm:$0xff]   ;;  %v9850_v26 = vld [vmem:[%s14037_s1 + $0xdc4] ss:$16 sps:$4 sm:$0xff]  }
 0x183   : > { %6757 = vmatpush1.bf16.msra.mxu0 %v9757_v36  ;;  %7413 = vmatpush1.bf16.msra.mxu1 %v9760_v24  ;;  %v9853_v36 = vld [vmem:[%s14037_s1 + $0xdcc] ss:$16 sps:$4 sm:$0xff]   ;;  %v9848_v24 = vld [vmem:[%s14037_s1 + $0xdc0] ss:$16 sps:$4 sm:$0xff]  }
 0x184   : > { %6767 = vmatprep.subr.bf16.mxu0 %v9766_v37  ;;  %7423 = vmatprep.subr.bf16.mxu1 %v9769_v38  ;;  %v9851_v37 = vld [vmem:[%s14037_s1 + $0xdc8] ss:$16 sps:$4 sm:$0xff]   ;;  %v9856_v38 = vld [vmem:[%s14037_s1 + $0xde4] ss:$16 sps:$4 sm:$0xff]  }
 0x186   : > { %6759 = vmatmul.mubr.bf16.vlgmr.msra.gmra.mrb[0].mxu0 %v11798_v34  ;;  %7415 = vmatmul.mubr.bf16.vlgmr.msra.gmra.mrb[0].mxu1 %v11798_v34  ;;  %v9781_v34 = vld [vmem:[%s14037_s1 + $0xc4c] ss:$16 sps:$4 sm:$0xff]  }
 0x187   : > { %6768 = vmatpush1.bf16.msra.mxu0 %v9764_v40  ;;  %7424 = vmatpush1.bf16.msra.mxu1 %v9767_v41  ;;  %v9859_v40 = vld [vmem:[%s14037_s1 + $0xdec] ss:$16 sps:$4 sm:$0xff]   ;;  %v1284_v41 = vcombine.high %v11985_v35, %v11985_v35 }
 0x188   : > { %6769 = vmatprep.subr.bf16.mxu0 %v9772_v29  ;;  %7425 = vmatprep.subr.bf16.mxu1 %v9775_v43  ;;  %v9854_v29 = vld [vmem:[%s14037_s1 + $0xde0] ss:$16 sps:$4 sm:$0xff]   ;;  %v9857_v43 = vld [vmem:[%s14037_s1 + $0xde8] ss:$16 sps:$4 sm:$0xff]   ;;  %v9865_v35 = vld [vmem:[%s14037_s1 + $0xe0c] ss:$16 sps:$4 sm:$0xff]  }
 0x189   : > { %6799 = vmatprep.mubr.bf16.mxu0 %v1299_v44  ;;  %7455 = vmatprep.mubr.bf16.mxu1 %v1299_v44  ;;  %v9862_v44 = vld [vmem:[%s14037_s1 + $0xe04] ss:$16 sps:$4 sm:$0xff]  }
 0x18b   : > { %6770 = vmatpush1.bf16.msra.mxu0 %v9770_v45  ;;  %7426 = vmatpush1.bf16.msra.mxu1 %v9773_v46  ;;  %v12202_v45 = vrot.slane %v1284_v41, %v10921_v49  ;;  %v9860_v46 = vld [vmem:[%s14037_s1 + $0xe00] ss:$16 sps:$4 sm:$0xff]   ;;  %v9949_v41 = vld [vmem:[%s14037_s1 + $0xfcc] ss:$16 sps:$4 sm:$0xff]  }
 0x18c   : > { %6771 = vmatprep.subr.bf16.mxu0 %v9778_v47  ;;  %7427 = vmatprep.subr.bf16.mxu1 %v9781_v34  ;;  %v9863_v47 = vld [vmem:[%s14037_s1 + $0xe08] ss:$16 sps:$4 sm:$0xff]   ;;  %v9868_v34 = vld [vmem:[%s14037_s1 + $0xe24] ss:$16 sps:$4 sm:$0xff]  }
 0x18f   : > { %6772 = vmatpush1.bf16.msra.mxu0 %v9776_v48  ;;  %7428 = vmatpush1.bf16.msra.mxu1 %v9779_v50  ;;  %v9871_v48 = vld [vmem:[%s14037_s1 + $0xe2c] ss:$16 sps:$4 sm:$0xff]   ;;  %v1300_v50 = vcombine.high %v12202_v45, %v12202_v45 }
 0x190   : > { %6773 = vmatprep.subr.bf16.mxu0 %v9784_v51  ;;  %7429 = vmatprep.subr.bf16.mxu1 %v9787_v52  ;;  %v9866_v51 = vld [vmem:[%s14037_s1 + $0xe20] ss:$16 sps:$4 sm:$0xff]   ;;  %v9869_v52 = vld [vmem:[%s14037_s1 + $0xe28] ss:$16 sps:$4 sm:$0xff]  }
 0x193   : > { %6774 = vmatpush1.bf16.msra.mxu0 %v9782_v53  ;;  %7430 = vmatpush1.bf16.msra.mxu1 %v9785_v54  ;;  %v9874_v53 = vld [vmem:[%s14037_s1 + $0xe44] ss:$16 sps:$4 sm:$0xff]   ;;  %v9872_v54 = vld [vmem:[%s14037_s1 + $0xe40] ss:$16 sps:$4 sm:$0xff]  }
 0x194   : > { %6775 = vmatprep.subr.bf16.mxu0 %v9790_v55  ;;  %7431 = vmatprep.subr.bf16.mxu1 %v9793_v56  ;;  %v9875_v55 = vld [vmem:[%s14037_s1 + $0xe48] ss:$16 sps:$4 sm:$0xff]   ;;  %v9880_v56 = vld [vmem:[%s14037_s1 + $0xe64] ss:$16 sps:$4 sm:$0xff]  }
 0x197   : > { %6776 = vmatpush1.bf16.msra.mxu0 %v9788_v57  ;;  %7432 = vmatpush1.bf16.msra.mxu1 %v9791_v58  ;;  %v9883_v57 = vld [vmem:[%s14037_s1 + $0xe6c] ss:$16 sps:$4 sm:$0xff]   ;;  %v9878_v58 = vld [vmem:[%s14037_s1 + $0xe60] ss:$16 sps:$4 sm:$0xff]  }
 0x198   : > { %6777 = vmatprep.subr.bf16.mxu0 %v9796_v59  ;;  %7433 = vmatprep.subr.bf16.mxu1 %v9799_v60  ;;  %v9881_v59 = vld [vmem:[%s14037_s1 + $0xe68] ss:$16 sps:$4 sm:$0xff]   ;;  %v9886_v60 = vld [vmem:[%s14037_s1 + $0xe84] ss:$16 sps:$4 sm:$0xff]  }
 0x19b   : > { %6778 = vmatpush1.bf16.msra.mxu0 %v9794_v61  ;;  %7434 = vmatpush1.bf16.msra.mxu1 %v9797_v62  ;;  %v9889_v61 = vld [vmem:[%s14037_s1 + $0xe8c] ss:$16 sps:$4 sm:$0xff]   ;;  %v9884_v62 = vld [vmem:[%s14037_s1 + $0xe80] ss:$16 sps:$4 sm:$0xff]  }
 0x19c   : > { %6779 = vmatprep.subr.bf16.mxu0 %v9802_v63  ;;  %7435 = vmatprep.subr.bf16.mxu1 %v9805_v0  ;;  %v9887_v63 = vld [vmem:[%s14037_s1 + $0xe88] ss:$16 sps:$4 sm:$0xff]   ;;  %v9892_v0 = vld [vmem:[%s14037_s1 + $0xea4] ss:$16 sps:$4 sm:$0xff]  }
 0x19f   : > { %6780 = vmatpush1.bf16.msra.mxu0 %v9800_v1  ;;  %7436 = vmatpush1.bf16.msra.mxu1 %v9803_v2  ;;  %v9895_v1 = vld [vmem:[%s14037_s1 + $0xeac] ss:$16 sps:$4 sm:$0xff]   ;;  %v9890_v2 = vld [vmem:[%s14037_s1 + $0xea0] ss:$16 sps:$4 sm:$0xff]  }
 0x1a0   : > { %6781 = vmatprep.subr.bf16.mxu0 %v9808_v3  ;;  %7437 = vmatprep.subr.bf16.mxu1 %v9811_v4  ;;  %v9893_v3 = vld [vmem:[%s14037_s1 + $0xea8] ss:$16 sps:$4 sm:$0xff]   ;;  %v9898_v4 = vld [vmem:[%s14037_s1 + $0xec4] ss:$16 sps:$4 sm:$0xff]  }
 0x1a3   : > { %6782 = vmatpush1.bf16.msra.mxu0 %v9806_v5  ;;  %7438 = vmatpush1.bf16.msra.mxu1 %v9809_v6  ;;  %v9901_v5 = vld [vmem:[%s14037_s1 + $0xecc] ss:$16 sps:$4 sm:$0xff]   ;;  %v9896_v6 = vld [vmem:[%s14037_s1 + $0xec0] ss:$16 sps:$4 sm:$0xff]  }
 0x1a4   : > { %6783 = vmatprep.subr.bf16.mxu0 %v9814_v7  ;;  %7439 = vmatprep.subr.bf16.mxu1 %v9817_v8  ;;  %v9899_v7 = vld [vmem:[%s14037_s1 + $0xec8] ss:$16 sps:$4 sm:$0xff]   ;;  %v9904_v8 = vld [vmem:[%s14037_s1 + $0xee4] ss:$16 sps:$4 sm:$0xff]  }
 0x1a7   : > { %6784 = vmatpush1.bf16.msra.mxu0 %v9812_v9  ;;  %7440 = vmatpush1.bf16.msra.mxu1 %v9815_v10  ;;  %v9907_v9 = vld [vmem:[%s14037_s1 + $0xeec] ss:$16 sps:$4 sm:$0xff]   ;;  %v9902_v10 = vld [vmem:[%s14037_s1 + $0xee0] ss:$16 sps:$4 sm:$0xff]  }
 0x1a8   : > { %6785 = vmatprep.subr.bf16.mxu0 %v9820_v11  ;;  %7441 = vmatprep.subr.bf16.mxu1 %v9823_v13  ;;  %v9905_v11 = vld [vmem:[%s14037_s1 + $0xee8] ss:$16 sps:$4 sm:$0xff]   ;;  %v9910_v13 = vld [vmem:[%s14037_s1 + $0xf04] ss:$16 sps:$4 sm:$0xff]  }
 0x1ab   : > { %6786 = vmatpush1.bf16.msra.mxu0 %v9818_v14  ;;  %7442 = vmatpush1.bf16.msra.mxu1 %v9821_v15  ;;  %v9913_v14 = vld [vmem:[%s14037_s1 + $0xf0c] ss:$16 sps:$4 sm:$0xff]   ;;  %v9908_v15 = vld [vmem:[%s14037_s1 + $0xf00] ss:$16 sps:$4 sm:$0xff]  }
 0x1ac   : > { %6787 = vmatprep.subr.bf16.mxu0 %v9826_v16  ;;  %7443 = vmatprep.subr.bf16.mxu1 %v9829_v17  ;;  %v9911_v16 = vld [vmem:[%s14037_s1 + $0xf08] ss:$16 sps:$4 sm:$0xff]   ;;  %v9916_v17 = vld [vmem:[%s14037_s1 + $0xf24] ss:$16 sps:$4 sm:$0xff]  }
 0x1af   : > { %6788 = vmatpush1.bf16.msra.mxu0 %v9824_v18  ;;  %7444 = vmatpush1.bf16.msra.mxu1 %v9827_v20  ;;  %v9919_v18 = vld [vmem:[%s14037_s1 + $0xf2c] ss:$16 sps:$4 sm:$0xff]   ;;  %v9914_v20 = vld [vmem:[%s14037_s1 + $0xf20] ss:$16 sps:$4 sm:$0xff]  }
 0x1b0   : > { %6789 = vmatprep.subr.bf16.mxu0 %v9832_v21  ;;  %7445 = vmatprep.subr.bf16.mxu1 %v9835_v23  ;;  %v9917_v21 = vld [vmem:[%s14037_s1 + $0xf28] ss:$16 sps:$4 sm:$0xff]   ;;  %v9922_v23 = vld [vmem:[%s14037_s1 + $0xf44] ss:$16 sps:$4 sm:$0xff]  }
 0x1b3   : > { %6790 = vmatpush1.bf16.msra.mxu0 %v9830_v19  ;;  %7446 = vmatpush1.bf16.msra.mxu1 %v9833_v25  ;;  %v9925_v19 = vld [vmem:[%s14037_s1 + $0xf4c] ss:$16 sps:$4 sm:$0xff]   ;;  %v9920_v25 = vld [vmem:[%s14037_s1 + $0xf40] ss:$16 sps:$4 sm:$0xff]  }
 0x1b4   : > { %6791 = vmatprep.subr.bf16.mxu0 %v9838_v12  ;;  %7447 = vmatprep.subr.bf16.mxu1 %v9841_v27  ;;  %v9923_v12 = vld [vmem:[%s14037_s1 + $0xf48] ss:$16 sps:$4 sm:$0xff]   ;;  %v9928_v27 = vld [vmem:[%s14037_s1 + $0xf64] ss:$16 sps:$4 sm:$0xff]  }
 0x1b7   : > { %6792 = vmatpush1.bf16.msra.mxu0 %v9836_v28  ;;  %7448 = vmatpush1.bf16.msra.mxu1 %v9839_v30  ;;  %v9931_v28 = vld [vmem:[%s14037_s1 + $0xf6c] ss:$16 sps:$4 sm:$0xff]   ;;  %v9926_v30 = vld [vmem:[%s14037_s1 + $0xf60] ss:$16 sps:$4 sm:$0xff]  }
 0x1b8   : > { %6793 = vmatprep.subr.bf16.mxu0 %v9844_v31  ;;  %7449 = vmatprep.subr.bf16.mxu1 %v9847_v22  ;;  %v9929_v31 = vld [vmem:[%s14037_s1 + $0xf68] ss:$16 sps:$4 sm:$0xff]   ;;  %v9934_v22 = vld [vmem:[%s14037_s1 + $0xf84] ss:$16 sps:$4 sm:$0xff]  }
 0x1bb   : > { %6794 = vmatpush1.bf16.msra.mxu0 %v9842_v32  ;;  %7450 = vmatpush1.bf16.msra.mxu1 %v9845_v33  ;;  %v9937_v32 = vld [vmem:[%s14037_s1 + $0xf8c] ss:$16 sps:$4 sm:$0xff]   ;;  %v9932_v33 = vld [vmem:[%s14037_s1 + $0xf80] ss:$16 sps:$4 sm:$0xff]  }
 0x1bc   : > { %6795 = vmatprep.subr.bf16.mxu0 %v9850_v26  ;;  %7451 = vmatprep.subr.bf16.mxu1 %v9853_v36  ;;  %v9935_v26 = vld [vmem:[%s14037_s1 + $0xf88] ss:$16 sps:$4 sm:$0xff]   ;;  %v9940_v36 = vld [vmem:[%s14037_s1 + $0xfa4] ss:$16 sps:$4 sm:$0xff]  }
 0x1bf   : > { %6796 = vmatpush1.bf16.msra.mxu0 %v9848_v24  ;;  %7452 = vmatpush1.bf16.msra.mxu1 %v9851_v37  ;;  %v9943_v24 = vld [vmem:[%s14037_s1 + $0xfac] ss:$16 sps:$4 sm:$0xff]   ;;  %v9938_v37 = vld [vmem:[%s14037_s1 + $0xfa0] ss:$16 sps:$4 sm:$0xff]  }
 0x1c0   : > { %6797 = vmatprep.subr.bf16.mxu0 %v9856_v38  ;;  %7453 = vmatprep.subr.bf16.mxu1 %v9859_v40  ;;  %v9941_v38 = vld [vmem:[%s14037_s1 + $0xfa8] ss:$16 sps:$4 sm:$0xff]   ;;  %v9946_v40 = vld [vmem:[%s14037_s1 + $0xfc4] ss:$16 sps:$4 sm:$0xff]  }
 0x1c3   : > { %6798 = vmatpush1.bf16.msra.mxu0 %v9854_v29  ;;  %7454 = vmatpush1.bf16.msra.mxu1 %v9857_v43  ;;  %v9944_v29 = vld [vmem:[%s14037_s1 + $0xfc0] ss:$16 sps:$4 sm:$0xff]   ;;  %v9947_v43 = vld [vmem:[%s14037_s1 + $0xfc8] ss:$16 sps:$4 sm:$0xff]  }
 0x1c4   : > { %6808 = vmatprep.subr.bf16.mxu0 %v9862_v44  ;;  %7464 = vmatprep.subr.bf16.mxu1 %v9865_v35  ;;  %v9952_v44 = vld [vmem:[%s14037_s1 + $0xfe4] ss:$16 sps:$4 sm:$0xff]   ;;  %v9955_v35 = vld [vmem:[%s14037_s1 + $0xfec] ss:$16 sps:$4 sm:$0xff]  }
 0x1c6   : > { %6800 = vmatmul.mubr.bf16.vlgmr.msra.gmra.mrb[0].mxu0 %v12001_v39  ;;  %7456 = vmatmul.mubr.bf16.vlgmr.msra.gmra.mrb[0].mxu1 %v12001_v39  ;;  %v9877_v39 = vld [vmem:[%s14037_s1 + $0xe4c] ss:$16 sps:$4 sm:$0xff]  }
 0x1c7   : > { %6809 = vmatpush1.bf16.msra.mxu0 %v9860_v46  ;;  %7465 = vmatpush1.bf16.msra.mxu1 %v9863_v47  ;;  %v12389_v46 = vld [vmem:[%s10918_s30 + $0x20] sm:$0xff] }
 0x1c8   : > { %6810 = vmatprep.subr.bf16.mxu0 %v9868_v34  ;;  %7466 = vmatprep.subr.bf16.mxu1 %v9871_v48  ;;  %v9950_v47 = vld [vmem:[%s14037_s1 + $0xfe0] ss:$16 sps:$4 sm:$0xff]   ;;  %v9953_v34 = vld [vmem:[%s14037_s1 + $0xfe8] ss:$16 sps:$4 sm:$0xff]   ;;  %v9959_v48 = vld [vmem:[%s14037_s1 + $0x1004] ss:$16 sps:$4 sm:$0xff]  }
 0x1c9   : > { %6840 = vmatprep.mubr.bf16.mxu0 %v1300_v50  ;;  %7496 = vmatprep.mubr.bf16.mxu1 %v1300_v50  ;;  %v9962_v50 = vld [vmem:[%s14037_s1 + $0x100c] ss:$16 sps:$4 sm:$0xff]  }
 0x1cb   : > { %6811 = vmatpush1.bf16.msra.mxu0 %v9866_v51  ;;  %7467 = vmatpush1.bf16.msra.mxu1 %v9869_v52  ;;  %v12405_v51 = vrot.slane %v12389_v46, %v10921_v49  ;;  %v9957_v52 = vld [vmem:[%s14037_s1 + $0x1000] ss:$16 sps:$4 sm:$0xff]  }
 0x1cc   : > { %6812 = vmatprep.subr.bf16.mxu0 %v9874_v53  ;;  %7468 = vmatprep.subr.bf16.mxu1 %v9877_v39  ;;  %v9960_v53 = vld [vmem:[%s14037_s1 + $0x1008] ss:$16 sps:$4 sm:$0xff]   ;;  %v9965_v39 = vld [vmem:[%s14037_s1 + $0x1024] ss:$16 sps:$4 sm:$0xff]  }
 0x1cf   : > { %6813 = vmatpush1.bf16.msra.mxu0 %v9872_v54  ;;  %7469 = vmatpush1.bf16.msra.mxu1 %v9875_v55  ;;  %v9968_v54 = vld [vmem:[%s14037_s1 + $0x102c] ss:$16 sps:$4 sm:$0xff]   ;;  %v1316_v55 = vcombine.high %v12405_v51, %v12405_v51 }
 0x1d0   : > { %6814 = vmatprep.subr.bf16.mxu0 %v9880_v56  ;;  %7470 = vmatprep.subr.bf16.mxu1 %v9883_v57  ;;  %v9963_v56 = vld [vmem:[%s14037_s1 + $0x1020] ss:$16 sps:$4 sm:$0xff]   ;;  %v9966_v57 = vld [vmem:[%s14037_s1 + $0x1028] ss:$16 sps:$4 sm:$0xff]  }
 0x1d3   : > { %6815 = vmatpush1.bf16.msra.mxu0 %v9878_v58  ;;  %7471 = vmatpush1.bf16.msra.mxu1 %v9881_v59  ;;  %v9971_v58 = vld [vmem:[%s14037_s1 + $0x1044] ss:$16 sps:$4 sm:$0xff]   ;;  %v9969_v59 = vld [vmem:[%s14037_s1 + $0x1040] ss:$16 sps:$4 sm:$0xff]  }
 0x1d4   : > { %6816 = vmatprep.subr.bf16.mxu0 %v9886_v60  ;;  %7472 = vmatprep.subr.bf16.mxu1 %v9889_v61  ;;  %v9972_v60 = vld [vmem:[%s14037_s1 + $0x1048] ss:$16 sps:$4 sm:$0xff]   ;;  %v9977_v61 = vld [vmem:[%s14037_s1 + $0x1064] ss:$16 sps:$4 sm:$0xff]  }
 0x1d7   : > { %6817 = vmatpush1.bf16.msra.mxu0 %v9884_v62  ;;  %7473 = vmatpush1.bf16.msra.mxu1 %v9887_v63  ;;  %v9980_v62 = vld [vmem:[%s14037_s1 + $0x106c] ss:$16 sps:$4 sm:$0xff]   ;;  %v9975_v63 = vld [vmem:[%s14037_s1 + $0x1060] ss:$16 sps:$4 sm:$0xff]  }
 0x1d8   : > { %6818 = vmatprep.subr.bf16.mxu0 %v9892_v0  ;;  %7474 = vmatprep.subr.bf16.mxu1 %v9895_v1  ;;  %v9978_v0 = vld [vmem:[%s14037_s1 + $0x1068] ss:$16 sps:$4 sm:$0xff]   ;;  %v9983_v1 = vld [vmem:[%s14037_s1 + $0x1084] ss:$16 sps:$4 sm:$0xff]  }
 0x1db   : > { %6819 = vmatpush1.bf16.msra.mxu0 %v9890_v2  ;;  %7475 = vmatpush1.bf16.msra.mxu1 %v9893_v3  ;;  %v9986_v2 = vld [vmem:[%s14037_s1 + $0x108c] ss:$16 sps:$4 sm:$0xff]   ;;  %v9981_v3 = vld [vmem:[%s14037_s1 + $0x1080] ss:$16 sps:$4 sm:$0xff]  }
 0x1dc   : > { %6820 = vmatprep.subr.bf16.mxu0 %v9898_v4  ;;  %7476 = vmatprep.subr.bf16.mxu1 %v9901_v5  ;;  %v9984_v4 = vld [vmem:[%s14037_s1 + $0x1088] ss:$16 sps:$4 sm:$0xff]   ;;  %v9989_v5 = vld [vmem:[%s14037_s1 + $0x10a4] ss:$16 sps:$4 sm:$0xff]  }
 0x1df   : > { %6821 = vmatpush1.bf16.msra.mxu0 %v9896_v6  ;;  %7477 = vmatpush1.bf16.msra.mxu1 %v9899_v7  ;;  %v9992_v6 = vld [vmem:[%s14037_s1 + $0x10ac] ss:$16 sps:$4 sm:$0xff]   ;;  %v9987_v7 = vld [vmem:[%s14037_s1 + $0x10a0] ss:$16 sps:$4 sm:$0xff]  }
 0x1e0   : > { %6822 = vmatprep.subr.bf16.mxu0 %v9904_v8  ;;  %7478 = vmatprep.subr.bf16.mxu1 %v9907_v9  ;;  %v9990_v8 = vld [vmem:[%s14037_s1 + $0x10a8] ss:$16 sps:$4 sm:$0xff]   ;;  %v9995_v9 = vld [vmem:[%s14037_s1 + $0x10c4] ss:$16 sps:$4 sm:$0xff]  }
 0x1e3   : > { %6823 = vmatpush1.bf16.msra.mxu0 %v9902_v10  ;;  %7479 = vmatpush1.bf16.msra.mxu1 %v9905_v11  ;;  %v9998_v10 = vld [vmem:[%s14037_s1 + $0x10cc] ss:$16 sps:$4 sm:$0xff]   ;;  %v9993_v11 = vld [vmem:[%s14037_s1 + $0x10c0] ss:$16 sps:$4 sm:$0xff]  }
 0x1e4   : > { %6824 = vmatprep.subr.bf16.mxu0 %v9910_v13  ;;  %7480 = vmatprep.subr.bf16.mxu1 %v9913_v14  ;;  %v9996_v13 = vld [vmem:[%s14037_s1 + $0x10c8] ss:$16 sps:$4 sm:$0xff]   ;;  %v10001_v14 = vld [vmem:[%s14037_s1 + $0x10e4] ss:$16 sps:$4 sm:$0xff]  }
 0x1e7   : > { %6825 = vmatpush1.bf16.msra.mxu0 %v9908_v15  ;;  %7481 = vmatpush1.bf16.msra.mxu1 %v9911_v16  ;;  %v10004_v15 = vld [vmem:[%s14037_s1 + $0x10ec] ss:$16 sps:$4 sm:$0xff]   ;;  %v9999_v16 = vld [vmem:[%s14037_s1 + $0x10e0] ss:$16 sps:$4 sm:$0xff]  }
 0x1e8   : > { %6826 = vmatprep.subr.bf16.mxu0 %v9916_v17  ;;  %7482 = vmatprep.subr.bf16.mxu1 %v9919_v18  ;;  %v10002_v17 = vld [vmem:[%s14037_s1 + $0x10e8] ss:$16 sps:$4 sm:$0xff]   ;;  %v10007_v18 = vld [vmem:[%s14037_s1 + $0x1104] ss:$16 sps:$4 sm:$0xff]  }
 0x1eb   : > { %6827 = vmatpush1.bf16.msra.mxu0 %v9914_v20  ;;  %7483 = vmatpush1.bf16.msra.mxu1 %v9917_v21  ;;  %v10010_v20 = vld [vmem:[%s14037_s1 + $0x110c] ss:$16 sps:$4 sm:$0xff]   ;;  %v10005_v21 = vld [vmem:[%s14037_s1 + $0x1100] ss:$16 sps:$4 sm:$0xff]  }
 0x1ec   : > { %6828 = vmatprep.subr.bf16.mxu0 %v9922_v23  ;;  %7484 = vmatprep.subr.bf16.mxu1 %v9925_v19  ;;  %v10008_v23 = vld [vmem:[%s14037_s1 + $0x1108] ss:$16 sps:$4 sm:$0xff]   ;;  %v10013_v19 = vld [vmem:[%s14037_s1 + $0x1124] ss:$16 sps:$4 sm:$0xff]  }
 0x1ef   : > { %6829 = vmatpush1.bf16.msra.mxu0 %v9920_v25  ;;  %7485 = vmatpush1.bf16.msra.mxu1 %v9923_v12  ;;  %v10016_v25 = vld [vmem:[%s14037_s1 + $0x112c] ss:$16 sps:$4 sm:$0xff]   ;;  %v10011_v12 = vld [vmem:[%s14037_s1 + $0x1120] ss:$16 sps:$4 sm:$0xff]  }
 0x1f0   : > { %6830 = vmatprep.subr.bf16.mxu0 %v9928_v27  ;;  %7486 = vmatprep.subr.bf16.mxu1 %v9931_v28  ;;  %v10014_v27 = vld [vmem:[%s14037_s1 + $0x1128] ss:$16 sps:$4 sm:$0xff]   ;;  %v10019_v28 = vld [vmem:[%s14037_s1 + $0x1144] ss:$16 sps:$4 sm:$0xff]  }
 0x1f3   : > { %6831 = vmatpush1.bf16.msra.mxu0 %v9926_v30  ;;  %7487 = vmatpush1.bf16.msra.mxu1 %v9929_v31  ;;  %v10022_v30 = vld [vmem:[%s14037_s1 + $0x114c] ss:$16 sps:$4 sm:$0xff]   ;;  %v10017_v31 = vld [vmem:[%s14037_s1 + $0x1140] ss:$16 sps:$4 sm:$0xff]  }
 0x1f4   : > { %6832 = vmatprep.subr.bf16.mxu0 %v9934_v22  ;;  %7488 = vmatprep.subr.bf16.mxu1 %v9937_v32  ;;  %v10020_v22 = vld [vmem:[%s14037_s1 + $0x1148] ss:$16 sps:$4 sm:$0xff]   ;;  %v10025_v32 = vld [vmem:[%s14037_s1 + $0x1164] ss:$16 sps:$4 sm:$0xff]  }
 0x1f7   : > { %6833 = vmatpush1.bf16.msra.mxu0 %v9932_v33  ;;  %7489 = vmatpush1.bf16.msra.mxu1 %v9935_v26  ;;  %v10028_v33 = vld [vmem:[%s14037_s1 + $0x116c] ss:$16 sps:$4 sm:$0xff]   ;;  %v10023_v26 = vld [vmem:[%s14037_s1 + $0x1160] ss:$16 sps:$4 sm:$0xff]  }
 0x1f8   : > { %6834 = vmatprep.subr.bf16.mxu0 %v9940_v36  ;;  %7490 = vmatprep.subr.bf16.mxu1 %v9943_v24  ;;  %v10026_v36 = vld [vmem:[%s14037_s1 + $0x1168] ss:$16 sps:$4 sm:$0xff]   ;;  %v10031_v24 = vld [vmem:[%s14037_s1 + $0x1184] ss:$16 sps:$4 sm:$0xff]  }
 0x1fb   : > { %6835 = vmatpush1.bf16.msra.mxu0 %v9938_v37  ;;  %7491 = vmatpush1.bf16.msra.mxu1 %v9941_v38  ;;  %v10034_v37 = vld [vmem:[%s14037_s1 + $0x118c] ss:$16 sps:$4 sm:$0xff]   ;;  %v10029_v38 = vld [vmem:[%s14037_s1 + $0x1180] ss:$16 sps:$4 sm:$0xff]  }
 0x1fc   : > { %6836 = vmatprep.subr.bf16.mxu0 %v9946_v40  ;;  %7492 = vmatprep.subr.bf16.mxu1 %v9949_v41  ;;  %v10032_v40 = vld [vmem:[%s14037_s1 + $0x1188] ss:$16 sps:$4 sm:$0xff]   ;;  %v10037_v41 = vld [vmem:[%s14037_s1 + $0x11a4] ss:$16 sps:$4 sm:$0xff]  }
 0x1ff   : > { %6837 = vmatpush1.bf16.msra.mxu0 %v9944_v29  ;;  %7493 = vmatpush1.bf16.msra.mxu1 %v9947_v43  ;;  %v10040_v29 = vld [vmem:[%s14037_s1 + $0x11ac] ss:$16 sps:$4 sm:$0xff]   ;;  %v10035_v43 = vld [vmem:[%s14037_s1 + $0x11a0] ss:$16 sps:$4 sm:$0xff]  }
 0x200   : > { %6838 = vmatprep.subr.bf16.mxu0 %v9952_v44  ;;  %7494 = vmatprep.subr.bf16.mxu1 %v9955_v35  ;;  %v10038_v44 = vld [vmem:[%s14037_s1 + $0x11a8] ss:$16 sps:$4 sm:$0xff]   ;;  %v10043_v35 = vld [vmem:[%s14037_s1 + $0x11c4] ss:$16 sps:$4 sm:$0xff]  }
 0x203   : > { %6839 = vmatpush1.bf16.msra.mxu0 %v9950_v47  ;;  %7495 = vmatpush1.bf16.msra.mxu1 %v9953_v34  ;;  %v10046_v47 = vld [vmem:[%s14037_s1 + $0x11cc] ss:$16 sps:$4 sm:$0xff]   ;;  %v10041_v34 = vld [vmem:[%s14037_s1 + $0x11c0] ss:$16 sps:$4 sm:$0xff]  }
 0x204   : > { %6849 = vmatprep.subr.bf16.mxu0 %v9959_v48  ;;  %7505 = vmatprep.subr.bf16.mxu1 %v9962_v50  ;;  %v10044_v48 = vld [vmem:[%s14037_s1 + $0x11c8] ss:$16 sps:$4 sm:$0xff]   ;;  %v10049_v50 = vld [vmem:[%s14037_s1 + $0x11e4] ss:$16 sps:$4 sm:$0xff]  }
 0x206   : > { %6841 = vmatmul.mubr.bf16.vlgmr.msra.gmra.mrb[0].mxu0 %v12202_v45  ;;  %7497 = vmatmul.mubr.bf16.vlgmr.msra.gmra.mrb[0].mxu1 %v12202_v45  ;;  %v9974_v45 = vld [vmem:[%s14037_s1 + $0x104c] ss:$16 sps:$4 sm:$0xff]  }
 0x207   : > { %6850 = vmatpush1.bf16.msra.mxu0 %v9957_v52  ;;  %7506 = vmatpush1.bf16.msra.mxu1 %v9960_v53  ;;  %v10052_v52 = vld [vmem:[%s14037_s1 + $0x11ec] ss:$16 sps:$4 sm:$0xff]   ;;  %v1301_v53 = vcombine.high %v12389_v46, %v12389_v46 }
 0x208   : > { %6851 = vmatprep.subr.bf16.mxu0 %v9965_v39  ;;  %7507 = vmatprep.subr.bf16.mxu1 %v9968_v54  ;;  %v10047_v39 = vld [vmem:[%s14037_s1 + $0x11e0] ss:$16 sps:$4 sm:$0xff]   ;;  %v10050_v54 = vld [vmem:[%s14037_s1 + $0x11e8] ss:$16 sps:$4 sm:$0xff]   ;;  %v10058_v46 = vld [vmem:[%s14037_s1 + $0x120c] ss:$16 sps:$4 sm:$0xff]  }
 0x209   : > { %6881 = vmatprep.mubr.bf16.mxu0 %v1316_v55  ;;  %7537 = vmatprep.mubr.bf16.mxu1 %v1316_v55  ;;  %v10055_v55 = vld [vmem:[%s14037_s1 + $0x1204] ss:$16 sps:$4 sm:$0xff]  }
 0x20b   : > { %6852 = vmatpush1.bf16.msra.mxu0 %v9963_v56  ;;  %7508 = vmatpush1.bf16.msra.mxu1 %v9966_v57  ;;  %v12606_v56 = vrot.slane %v1301_v53, %v10921_v49  ;;  %v10053_v57 = vld [vmem:[%s14037_s1 + $0x1200] ss:$16 sps:$4 sm:$0xff]   ;;  %v10142_v53 = vld [vmem:[%s14037_s1 + $0x13cc] ss:$16 sps:$4 sm:$0xff]  }
 0x20c   : > { %6853 = vmatprep.subr.bf16.mxu0 %v9971_v58  ;;  %7509 = vmatprep.subr.bf16.mxu1 %v9974_v45  ;;  %v10056_v58 = vld [vmem:[%s14037_s1 + $0x1208] ss:$16 sps:$4 sm:$0xff]   ;;  %v10061_v45 = vld [vmem:[%s14037_s1 + $0x1224] ss:$16 sps:$4 sm:$0xff]  }
 0x20f   : > { %6854 = vmatpush1.bf16.msra.mxu0 %v9969_v59  ;;  %7510 = vmatpush1.bf16.msra.mxu1 %v9972_v60  ;;  %v10064_v59 = vld [vmem:[%s14037_s1 + $0x122c] ss:$16 sps:$4 sm:$0xff]   ;;  %v1317_v60 = vcombine.high %v12606_v56, %v12606_v56 }
 0x210   : > { %6855 = vmatprep.subr.bf16.mxu0 %v9977_v61  ;;  %7511 = vmatprep.subr.bf16.mxu1 %v9980_v62  ;;  %v10059_v61 = vld [vmem:[%s14037_s1 + $0x1220] ss:$16 sps:$4 sm:$0xff]   ;;  %v10062_v62 = vld [vmem:[%s14037_s1 + $0x1228] ss:$16 sps:$4 sm:$0xff]  }
 0x213   : > { %6856 = vmatpush1.bf16.msra.mxu0 %v9975_v63  ;;  %7512 = vmatpush1.bf16.msra.mxu1 %v9978_v0  ;;  %v10067_v63 = vld [vmem:[%s14037_s1 + $0x1244] ss:$16 sps:$4 sm:$0xff]   ;;  %v10065_v0 = vld [vmem:[%s14037_s1 + $0x1240] ss:$16 sps:$4 sm:$0xff]  }
 0x214   : > { %6857 = vmatprep.subr.bf16.mxu0 %v9983_v1  ;;  %7513 = vmatprep.subr.bf16.mxu1 %v9986_v2  ;;  %v10068_v1 = vld [vmem:[%s14037_s1 + $0x1248] ss:$16 sps:$4 sm:$0xff]   ;;  %v10073_v2 = vld [vmem:[%s14037_s1 + $0x1264] ss:$16 sps:$4 sm:$0xff]  }
 0x217   : > { %6858 = vmatpush1.bf16.msra.mxu0 %v9981_v3  ;;  %7514 = vmatpush1.bf16.msra.mxu1 %v9984_v4  ;;  %v10076_v3 = vld [vmem:[%s14037_s1 + $0x126c] ss:$16 sps:$4 sm:$0xff]   ;;  %v10071_v4 = vld [vmem:[%s14037_s1 + $0x1260] ss:$16 sps:$4 sm:$0xff]  }
 0x218   : > { %6859 = vmatprep.subr.bf16.mxu0 %v9989_v5  ;;  %7515 = vmatprep.subr.bf16.mxu1 %v9992_v6  ;;  %v10074_v5 = vld [vmem:[%s14037_s1 + $0x1268] ss:$16 sps:$4 sm:$0xff]   ;;  %v10079_v6 = vld [vmem:[%s14037_s1 + $0x1284] ss:$16 sps:$4 sm:$0xff]  }
 0x21b   : > { %6860 = vmatpush1.bf16.msra.mxu0 %v9987_v7  ;;  %7516 = vmatpush1.bf16.msra.mxu1 %v9990_v8  ;;  %v10082_v7 = vld [vmem:[%s14037_s1 + $0x128c] ss:$16 sps:$4 sm:$0xff]   ;;  %v10077_v8 = vld [vmem:[%s14037_s1 + $0x1280] ss:$16 sps:$4 sm:$0xff]  }
 0x21c   : > { %6861 = vmatprep.subr.bf16.mxu0 %v9995_v9  ;;  %7517 = vmatprep.subr.bf16.mxu1 %v9998_v10  ;;  %v10080_v9 = vld [vmem:[%s14037_s1 + $0x1288] ss:$16 sps:$4 sm:$0xff]   ;;  %v10085_v10 = vld [vmem:[%s14037_s1 + $0x12a4] ss:$16 sps:$4 sm:$0xff]  }
 0x21f   : > { %6862 = vmatpush1.bf16.msra.mxu0 %v9993_v11  ;;  %7518 = vmatpush1.bf16.msra.mxu1 %v9996_v13  ;;  %v10088_v11 = vld [vmem:[%s14037_s1 + $0x12ac] ss:$16 sps:$4 sm:$0xff]   ;;  %v10083_v13 = vld [vmem:[%s14037_s1 + $0x12a0] ss:$16 sps:$4 sm:$0xff]  }
 0x220   : > { %6863 = vmatprep.subr.bf16.mxu0 %v10001_v14  ;;  %7519 = vmatprep.subr.bf16.mxu1 %v10004_v15  ;;  %v10086_v14 = vld [vmem:[%s14037_s1 + $0x12a8] ss:$16 sps:$4 sm:$0xff]   ;;  %v10091_v15 = vld [vmem:[%s14037_s1 + $0x12c4] ss:$16 sps:$4 sm:$0xff]  }
 0x223   : > { %6864 = vmatpush1.bf16.msra.mxu0 %v9999_v16  ;;  %7520 = vmatpush1.bf16.msra.mxu1 %v10002_v17  ;;  %v10094_v16 = vld [vmem:[%s14037_s1 + $0x12cc] ss:$16 sps:$4 sm:$0xff]   ;;  %v10089_v17 = vld [vmem:[%s14037_s1 + $0x12c0] ss:$16 sps:$4 sm:$0xff]  }
 0x224   : > { %6865 = vmatprep.subr.bf16.mxu0 %v10007_v18  ;;  %7521 = vmatprep.subr.bf16.mxu1 %v10010_v20  ;;  %v10092_v18 = vld [vmem:[%s14037_s1 + $0x12c8] ss:$16 sps:$4 sm:$0xff]   ;;  %v10097_v20 = vld [vmem:[%s14037_s1 + $0x12e4] ss:$16 sps:$4 sm:$0xff]  }
 0x227   : > { %6866 = vmatpush1.bf16.msra.mxu0 %v10005_v21  ;;  %7522 = vmatpush1.bf16.msra.mxu1 %v10008_v23  ;;  %v10100_v21 = vld [vmem:[%s14037_s1 + $0x12ec] ss:$16 sps:$4 sm:$0xff]   ;;  %v10095_v23 = vld [vmem:[%s14037_s1 + $0x12e0] ss:$16 sps:$4 sm:$0xff]  }
 0x228   : > { %6867 = vmatprep.subr.bf16.mxu0 %v10013_v19  ;;  %7523 = vmatprep.subr.bf16.mxu1 %v10016_v25  ;;  %v10098_v19 = vld [vmem:[%s14037_s1 + $0x12e8] ss:$16 sps:$4 sm:$0xff]   ;;  %v10103_v25 = vld [vmem:[%s14037_s1 + $0x1304] ss:$16 sps:$4 sm:$0xff]  }
 0x22b   : > { %6868 = vmatpush1.bf16.msra.mxu0 %v10011_v12  ;;  %7524 = vmatpush1.bf16.msra.mxu1 %v10014_v27  ;;  %v10106_v12 = vld [vmem:[%s14037_s1 + $0x130c] ss:$16 sps:$4 sm:$0xff]   ;;  %v10101_v27 = vld [vmem:[%s14037_s1 + $0x1300] ss:$16 sps:$4 sm:$0xff]  }
 0x22c   : > { %6869 = vmatprep.subr.bf16.mxu0 %v10019_v28  ;;  %7525 = vmatprep.subr.bf16.mxu1 %v10022_v30  ;;  %v10104_v28 = vld [vmem:[%s14037_s1 + $0x1308] ss:$16 sps:$4 sm:$0xff]   ;;  %v10109_v30 = vld [vmem:[%s14037_s1 + $0x1324] ss:$16 sps:$4 sm:$0xff]  }
 0x22f   : > { %6870 = vmatpush1.bf16.msra.mxu0 %v10017_v31  ;;  %7526 = vmatpush1.bf16.msra.mxu1 %v10020_v22  ;;  %v10112_v31 = vld [vmem:[%s14037_s1 + $0x132c] ss:$16 sps:$4 sm:$0xff]   ;;  %v10107_v22 = vld [vmem:[%s14037_s1 + $0x1320] ss:$16 sps:$4 sm:$0xff]  }
 0x230   : > { %6871 = vmatprep.subr.bf16.mxu0 %v10025_v32  ;;  %7527 = vmatprep.subr.bf16.mxu1 %v10028_v33  ;;  %v10110_v32 = vld [vmem:[%s14037_s1 + $0x1328] ss:$16 sps:$4 sm:$0xff]   ;;  %v10115_v33 = vld [vmem:[%s14037_s1 + $0x1344] ss:$16 sps:$4 sm:$0xff]  }
 0x233   : > { %6872 = vmatpush1.bf16.msra.mxu0 %v10023_v26  ;;  %7528 = vmatpush1.bf16.msra.mxu1 %v10026_v36  ;;  %v10118_v26 = vld [vmem:[%s14037_s1 + $0x134c] ss:$16 sps:$4 sm:$0xff]   ;;  %v10113_v36 = vld [vmem:[%s14037_s1 + $0x1340] ss:$16 sps:$4 sm:$0xff]  }
 0x234   : > { %6873 = vmatprep.subr.bf16.mxu0 %v10031_v24  ;;  %7529 = vmatprep.subr.bf16.mxu1 %v10034_v37  ;;  %v10116_v24 = vld [vmem:[%s14037_s1 + $0x1348] ss:$16 sps:$4 sm:$0xff]   ;;  %v10121_v37 = vld [vmem:[%s14037_s1 + $0x1364] ss:$16 sps:$4 sm:$0xff]  }
 0x237   : > { %6874 = vmatpush1.bf16.msra.mxu0 %v10029_v38  ;;  %7530 = vmatpush1.bf16.msra.mxu1 %v10032_v40  ;;  %v10124_v38 = vld [vmem:[%s14037_s1 + $0x136c] ss:$16 sps:$4 sm:$0xff]   ;;  %v10119_v40 = vld [vmem:[%s14037_s1 + $0x1360] ss:$16 sps:$4 sm:$0xff]  }
 0x238   : > { %6875 = vmatprep.subr.bf16.mxu0 %v10037_v41  ;;  %7531 = vmatprep.subr.bf16.mxu1 %v10040_v29  ;;  %v10122_v41 = vld [vmem:[%s14037_s1 + $0x1368] ss:$16 sps:$4 sm:$0xff]   ;;  %v10127_v29 = vld [vmem:[%s14037_s1 + $0x1384] ss:$16 sps:$4 sm:$0xff]  }
 0x23b   : > { %6876 = vmatpush1.bf16.msra.mxu0 %v10035_v43  ;;  %7532 = vmatpush1.bf16.msra.mxu1 %v10038_v44  ;;  %v10130_v43 = vld [vmem:[%s14037_s1 + $0x138c] ss:$16 sps:$4 sm:$0xff]   ;;  %v10125_v44 = vld [vmem:[%s14037_s1 + $0x1380] ss:$16 sps:$4 sm:$0xff]  }
 0x23c   : > { %6877 = vmatprep.subr.bf16.mxu0 %v10043_v35  ;;  %7533 = vmatprep.subr.bf16.mxu1 %v10046_v47  ;;  %v10128_v35 = vld [vmem:[%s14037_s1 + $0x1388] ss:$16 sps:$4 sm:$0xff]   ;;  %v10133_v47 = vld [vmem:[%s14037_s1 + $0x13a4] ss:$16 sps:$4 sm:$0xff]  }
 0x23f   : > { %6878 = vmatpush1.bf16.msra.mxu0 %v10041_v34  ;;  %7534 = vmatpush1.bf16.msra.mxu1 %v10044_v48  ;;  %v10136_v34 = vld [vmem:[%s14037_s1 + $0x13ac] ss:$16 sps:$4 sm:$0xff]   ;;  %v10131_v48 = vld [vmem:[%s14037_s1 + $0x13a0] ss:$16 sps:$4 sm:$0xff]  }
 0x240   : > { %6879 = vmatprep.subr.bf16.mxu0 %v10049_v50  ;;  %7535 = vmatprep.subr.bf16.mxu1 %v10052_v52  ;;  %v10134_v50 = vld [vmem:[%s14037_s1 + $0x13a8] ss:$16 sps:$4 sm:$0xff]   ;;  %v10139_v52 = vld [vmem:[%s14037_s1 + $0x13c4] ss:$16 sps:$4 sm:$0xff]  }
 0x243   : > { %6880 = vmatpush1.bf16.msra.mxu0 %v10047_v39  ;;  %7536 = vmatpush1.bf16.msra.mxu1 %v10050_v54  ;;  %v10137_v39 = vld [vmem:[%s14037_s1 + $0x13c0] ss:$16 sps:$4 sm:$0xff]   ;;  %v10140_v54 = vld [vmem:[%s14037_s1 + $0x13c8] ss:$16 sps:$4 sm:$0xff]  }
 0x244   : > { %6890 = vmatprep.subr.bf16.mxu0 %v10055_v55  ;;  %7546 = vmatprep.subr.bf16.mxu1 %v10058_v46  ;;  %v10145_v55 = vld [vmem:[%s14037_s1 + $0x13e4] ss:$16 sps:$4 sm:$0xff]   ;;  %v10148_v46 = vld [vmem:[%s14037_s1 + $0x13ec] ss:$16 sps:$4 sm:$0xff]  }
 0x246   : > { %6882 = vmatmul.mubr.bf16.vlgmr.msra.gmra.mrb[0].mxu0 %v12405_v51  ;;  %7538 = vmatmul.mubr.bf16.vlgmr.msra.gmra.mrb[0].mxu1 %v12405_v51  ;;  %v10070_v51 = vld [vmem:[%s14037_s1 + $0x124c] ss:$16 sps:$4 sm:$0xff]  }
 0x247   : > { %6891 = vmatpush1.bf16.msra.mxu0 %v10053_v57  ;;  %7547 = vmatpush1.bf16.msra.mxu1 %v10056_v58  ;;  %v12793_v57 = vld [vmem:[%s10918_s30 + $0x28] sm:$0xff]  ;;  %v10143_v58 = vld [vmem:[%s14037_s1 + $0x13e0] ss:$16 sps:$4 sm:$0xff]  }
 0x248   : > { %6892 = vmatprep.subr.bf16.mxu0 %v10061_v45  ;;  %7548 = vmatprep.subr.bf16.mxu1 %v10064_v59  ;;  %v10146_v45 = vld [vmem:[%s14037_s1 + $0x13e8] ss:$16 sps:$4 sm:$0xff]   ;;  %v10152_v59 = vld [vmem:[%s14037_s1 + $0x1404] ss:$16 sps:$4 sm:$0xff]  }
 0x249   : > { %6922 = vmatprep.mubr.bf16.mxu0 %v1317_v60  ;;  %7578 = vmatprep.mubr.bf16.mxu1 %v1317_v60  ;;  %v10155_v60 = vld [vmem:[%s14037_s1 + $0x140c] ss:$16 sps:$4 sm:$0xff]  }
 0x24b   : > { %6893 = vmatpush1.bf16.msra.mxu0 %v10059_v61  ;;  %7549 = vmatpush1.bf16.msra.mxu1 %v10062_v62  ;;  %v12809_v61 = vrot.slane %v12793_v57, %v10921_v49  ;;  %v10150_v62 = vld [vmem:[%s14037_s1 + $0x1400] ss:$16 sps:$4 sm:$0xff]  }
 0x24c   : > { %6894 = vmatprep.subr.bf16.mxu0 %v10067_v63  ;;  %7550 = vmatprep.subr.bf16.mxu1 %v10070_v51  ;;  %v10153_v63 = vld [vmem:[%s14037_s1 + $0x1408] ss:$16 sps:$4 sm:$0xff]   ;;  %v10158_v51 = vld [vmem:[%s14037_s1 + $0x1424] ss:$16 sps:$4 sm:$0xff]  }
 0x24f   : > { %6895 = vmatpush1.bf16.msra.mxu0 %v10065_v0  ;;  %7551 = vmatpush1.bf16.msra.mxu1 %v10068_v1  ;;  %v10161_v0 = vld [vmem:[%s14037_s1 + $0x142c] ss:$16 sps:$4 sm:$0xff]   ;;  %v1333_v1 = vcombine.high %v12809_v61, %v12809_v61 }
 0x250   : > { %6896 = vmatprep.subr.bf16.mxu0 %v10073_v2  ;;  %7552 = vmatprep.subr.bf16.mxu1 %v10076_v3  ;;  %v10156_v2 = vld [vmem:[%s14037_s1 + $0x1420] ss:$16 sps:$4 sm:$0xff]   ;;  %v10159_v3 = vld [vmem:[%s14037_s1 + $0x1428] ss:$16 sps:$4 sm:$0xff]  }
 0x253   : > { %6897 = vmatpush1.bf16.msra.mxu0 %v10071_v4  ;;  %7553 = vmatpush1.bf16.msra.mxu1 %v10074_v5  ;;  %v10164_v4 = vld [vmem:[%s14037_s1 + $0x1444] ss:$16 sps:$4 sm:$0xff]   ;;  %v10162_v5 = vld [vmem:[%s14037_s1 + $0x1440] ss:$16 sps:$4 sm:$0xff]  }
 0x254   : > { %6898 = vmatprep.subr.bf16.mxu0 %v10079_v6  ;;  %7554 = vmatprep.subr.bf16.mxu1 %v10082_v7  ;;  %v10165_v6 = vld [vmem:[%s14037_s1 + $0x1448] ss:$16 sps:$4 sm:$0xff]   ;;  %v10170_v7 = vld [vmem:[%s14037_s1 + $0x1464] ss:$16 sps:$4 sm:$0xff]  }
 0x257   : > { %6899 = vmatpush1.bf16.msra.mxu0 %v10077_v8  ;;  %7555 = vmatpush1.bf16.msra.mxu1 %v10080_v9  ;;  %v10173_v8 = vld [vmem:[%s14037_s1 + $0x146c] ss:$16 sps:$4 sm:$0xff]   ;;  %v10168_v9 = vld [vmem:[%s14037_s1 + $0x1460] ss:$16 sps:$4 sm:$0xff]  }
 0x258   : > { %6900 = vmatprep.subr.bf16.mxu0 %v10085_v10  ;;  %7556 = vmatprep.subr.bf16.mxu1 %v10088_v11  ;;  %v10171_v10 = vld [vmem:[%s14037_s1 + $0x1468] ss:$16 sps:$4 sm:$0xff]   ;;  %v10176_v11 = vld [vmem:[%s14037_s1 + $0x1484] ss:$16 sps:$4 sm:$0xff]  }
 0x25b   : > { %6901 = vmatpush1.bf16.msra.mxu0 %v10083_v13  ;;  %7557 = vmatpush1.bf16.msra.mxu1 %v10086_v14  ;;  %v10179_v13 = vld [vmem:[%s14037_s1 + $0x148c] ss:$16 sps:$4 sm:$0xff]   ;;  %v10174_v14 = vld [vmem:[%s14037_s1 + $0x1480] ss:$16 sps:$4 sm:$0xff]  }
 0x25c   : > { %6902 = vmatprep.subr.bf16.mxu0 %v10091_v15  ;;  %7558 = vmatprep.subr.bf16.mxu1 %v10094_v16  ;;  %v10177_v15 = vld [vmem:[%s14037_s1 + $0x1488] ss:$16 sps:$4 sm:$0xff]   ;;  %v10182_v16 = vld [vmem:[%s14037_s1 + $0x14a4] ss:$16 sps:$4 sm:$0xff]  }
 0x25f   : > { %6903 = vmatpush1.bf16.msra.mxu0 %v10089_v17  ;;  %7559 = vmatpush1.bf16.msra.mxu1 %v10092_v18  ;;  %v10185_v17 = vld [vmem:[%s14037_s1 + $0x14ac] ss:$16 sps:$4 sm:$0xff]   ;;  %v10180_v18 = vld [vmem:[%s14037_s1 + $0x14a0] ss:$16 sps:$4 sm:$0xff]  }
 0x260   : > { %6904 = vmatprep.subr.bf16.mxu0 %v10097_v20  ;;  %7560 = vmatprep.subr.bf16.mxu1 %v10100_v21  ;;  %v10183_v20 = vld [vmem:[%s14037_s1 + $0x14a8] ss:$16 sps:$4 sm:$0xff]   ;;  %v10188_v21 = vld [vmem:[%s14037_s1 + $0x14c4] ss:$16 sps:$4 sm:$0xff]  }
 0x263   : > { %6905 = vmatpush1.bf16.msra.mxu0 %v10095_v23  ;;  %7561 = vmatpush1.bf16.msra.mxu1 %v10098_v19  ;;  %v10191_v23 = vld [vmem:[%s14037_s1 + $0x14cc] ss:$16 sps:$4 sm:$0xff]   ;;  %v10186_v19 = vld [vmem:[%s14037_s1 + $0x14c0] ss:$16 sps:$4 sm:$0xff]  }
 0x264   : > { %6906 = vmatprep.subr.bf16.mxu0 %v10103_v25  ;;  %7562 = vmatprep.subr.bf16.mxu1 %v10106_v12  ;;  %v10189_v25 = vld [vmem:[%s14037_s1 + $0x14c8] ss:$16 sps:$4 sm:$0xff]   ;;  %v10194_v12 = vld [vmem:[%s14037_s1 + $0x14e4] ss:$16 sps:$4 sm:$0xff]  }
 0x267   : > { %6907 = vmatpush1.bf16.msra.mxu0 %v10101_v27  ;;  %7563 = vmatpush1.bf16.msra.mxu1 %v10104_v28  ;;  %v10197_v27 = vld [vmem:[%s14037_s1 + $0x14ec] ss:$16 sps:$4 sm:$0xff]   ;;  %v10192_v28 = vld [vmem:[%s14037_s1 + $0x14e0] ss:$16 sps:$4 sm:$0xff]  }
 0x268   : > { %6908 = vmatprep.subr.bf16.mxu0 %v10109_v30  ;;  %7564 = vmatprep.subr.bf16.mxu1 %v10112_v31  ;;  %v10195_v30 = vld [vmem:[%s14037_s1 + $0x14e8] ss:$16 sps:$4 sm:$0xff]   ;;  %v10200_v31 = vld [vmem:[%s14037_s1 + $0x1504] ss:$16 sps:$4 sm:$0xff]  }
 0x26b   : > { %6909 = vmatpush1.bf16.msra.mxu0 %v10107_v22  ;;  %7565 = vmatpush1.bf16.msra.mxu1 %v10110_v32  ;;  %v10203_v22 = vld [vmem:[%s14037_s1 + $0x150c] ss:$16 sps:$4 sm:$0xff]   ;;  %v10198_v32 = vld [vmem:[%s14037_s1 + $0x1500] ss:$16 sps:$4 sm:$0xff]  }
 0x26c   : > { %6910 = vmatprep.subr.bf16.mxu0 %v10115_v33  ;;  %7566 = vmatprep.subr.bf16.mxu1 %v10118_v26  ;;  %v10201_v33 = vld [vmem:[%s14037_s1 + $0x1508] ss:$16 sps:$4 sm:$0xff]   ;;  %v10206_v26 = vld [vmem:[%s14037_s1 + $0x1524] ss:$16 sps:$4 sm:$0xff]  }
 0x26f   : > { %6911 = vmatpush1.bf16.msra.mxu0 %v10113_v36  ;;  %7567 = vmatpush1.bf16.msra.mxu1 %v10116_v24  ;;  %v10209_v36 = vld [vmem:[%s14037_s1 + $0x152c] ss:$16 sps:$4 sm:$0xff]   ;;  %v10204_v24 = vld [vmem:[%s14037_s1 + $0x1520] ss:$16 sps:$4 sm:$0xff]  }
 0x270   : > { %6912 = vmatprep.subr.bf16.mxu0 %v10121_v37  ;;  %7568 = vmatprep.subr.bf16.mxu1 %v10124_v38  ;;  %v10207_v37 = vld [vmem:[%s14037_s1 + $0x1528] ss:$16 sps:$4 sm:$0xff]   ;;  %v10212_v38 = vld [vmem:[%s14037_s1 + $0x1544] ss:$16 sps:$4 sm:$0xff]  }
 0x273   : > { %6913 = vmatpush1.bf16.msra.mxu0 %v10119_v40  ;;  %7569 = vmatpush1.bf16.msra.mxu1 %v10122_v41  ;;  %v10215_v40 = vld [vmem:[%s14037_s1 + $0x154c] ss:$16 sps:$4 sm:$0xff]   ;;  %v10210_v41 = vld [vmem:[%s14037_s1 + $0x1540] ss:$16 sps:$4 sm:$0xff]  }
 0x274   : > { %6914 = vmatprep.subr.bf16.mxu0 %v10127_v29  ;;  %7570 = vmatprep.subr.bf16.mxu1 %v10130_v43  ;;  %v10213_v29 = vld [vmem:[%s14037_s1 + $0x1548] ss:$16 sps:$4 sm:$0xff]   ;;  %v10218_v43 = vld [vmem:[%s14037_s1 + $0x1564] ss:$16 sps:$4 sm:$0xff]  }
 0x277   : > { %6915 = vmatpush1.bf16.msra.mxu0 %v10125_v44  ;;  %7571 = vmatpush1.bf16.msra.mxu1 %v10128_v35  ;;  %v10221_v44 = vld [vmem:[%s14037_s1 + $0x156c] ss:$16 sps:$4 sm:$0xff]   ;;  %v10216_v35 = vld [vmem:[%s14037_s1 + $0x1560] ss:$16 sps:$4 sm:$0xff]  }
 0x278   : > { %6916 = vmatprep.subr.bf16.mxu0 %v10133_v47  ;;  %7572 = vmatprep.subr.bf16.mxu1 %v10136_v34  ;;  %v10219_v47 = vld [vmem:[%s14037_s1 + $0x1568] ss:$16 sps:$4 sm:$0xff]   ;;  %v10224_v34 = vld [vmem:[%s14037_s1 + $0x1584] ss:$16 sps:$4 sm:$0xff]  }
 0x27b   : > { %6917 = vmatpush1.bf16.msra.mxu0 %v10131_v48  ;;  %7573 = vmatpush1.bf16.msra.mxu1 %v10134_v50  ;;  %v10227_v48 = vld [vmem:[%s14037_s1 + $0x158c] ss:$16 sps:$4 sm:$0xff]   ;;  %v10222_v50 = vld [vmem:[%s14037_s1 + $0x1580] ss:$16 sps:$4 sm:$0xff]  }
 0x27c   : > { %6918 = vmatprep.subr.bf16.mxu0 %v10139_v52  ;;  %7574 = vmatprep.subr.bf16.mxu1 %v10142_v53  ;;  %v10225_v52 = vld [vmem:[%s14037_s1 + $0x1588] ss:$16 sps:$4 sm:$0xff]   ;;  %v10230_v53 = vld [vmem:[%s14037_s1 + $0x15a4] ss:$16 sps:$4 sm:$0xff]  }
 0x27f   : > { %6919 = vmatpush1.bf16.msra.mxu0 %v10137_v39  ;;  %7575 = vmatpush1.bf16.msra.mxu1 %v10140_v54  ;;  %v10233_v39 = vld [vmem:[%s14037_s1 + $0x15ac] ss:$16 sps:$4 sm:$0xff]   ;;  %v10228_v54 = vld [vmem:[%s14037_s1 + $0x15a0] ss:$16 sps:$4 sm:$0xff]  }
 0x280   : > { %6920 = vmatprep.subr.bf16.mxu0 %v10145_v55  ;;  %7576 = vmatprep.subr.bf16.mxu1 %v10148_v46  ;;  %v10231_v55 = vld [vmem:[%s14037_s1 + $0x15a8] ss:$16 sps:$4 sm:$0xff]   ;;  %v10236_v46 = vld [vmem:[%s14037_s1 + $0x15c4] ss:$16 sps:$4 sm:$0xff]  }
 0x283   : > { %6921 = vmatpush1.bf16.msra.mxu0 %v10143_v58  ;;  %7577 = vmatpush1.bf16.msra.mxu1 %v10146_v45  ;;  %v10239_v58 = vld [vmem:[%s14037_s1 + $0x15cc] ss:$16 sps:$4 sm:$0xff]   ;;  %v10234_v45 = vld [vmem:[%s14037_s1 + $0x15c0] ss:$16 sps:$4 sm:$0xff]  }
 0x284   : > { %6931 = vmatprep.subr.bf16.mxu0 %v10152_v59  ;;  %7587 = vmatprep.subr.bf16.mxu1 %v10155_v60  ;;  %v10237_v59 = vld [vmem:[%s14037_s1 + $0x15c8] ss:$16 sps:$4 sm:$0xff]   ;;  %v10242_v60 = vld [vmem:[%s14037_s1 + $0x15e4] ss:$16 sps:$4 sm:$0xff]  }
 0x286   : > { %6923 = vmatmul.mubr.bf16.vlgmr.msra.gmra.mrb[0].mxu0 %v12606_v56  ;;  %7579 = vmatmul.mubr.bf16.vlgmr.msra.gmra.mrb[0].mxu1 %v12606_v56  ;;  %v10167_v56 = vld [vmem:[%s14037_s1 + $0x144c] ss:$16 sps:$4 sm:$0xff]  }
 0x287   : > { %6932 = vmatpush1.bf16.msra.mxu0 %v10150_v62  ;;  %7588 = vmatpush1.bf16.msra.mxu1 %v10153_v63  ;;  %v10245_v62 = vld [vmem:[%s14037_s1 + $0x15ec] ss:$16 sps:$4 sm:$0xff]   ;;  %v1318_v63 = vcombine.high %v12793_v57, %v12793_v57 }
 0x288   : > { %6933 = vmatprep.subr.bf16.mxu0 %v10158_v51  ;;  %7589 = vmatprep.subr.bf16.mxu1 %v10161_v0  ;;  %v10240_v51 = vld [vmem:[%s14037_s1 + $0x15e0] ss:$16 sps:$4 sm:$0xff]   ;;  %v10243_v0 = vld [vmem:[%s14037_s1 + $0x15e8] ss:$16 sps:$4 sm:$0xff]   ;;  %v10251_v57 = vld [vmem:[%s14037_s1 + $0x160c] ss:$16 sps:$4 sm:$0xff]  }
 0x289   : > { %6963 = vmatprep.mubr.bf16.mxu0 %v1333_v1  ;;  %7619 = vmatprep.mubr.bf16.mxu1 %v1333_v1  ;;  %v10248_v1 = vld [vmem:[%s14037_s1 + $0x1604] ss:$16 sps:$4 sm:$0xff]  }
 0x28b   : > { %6934 = vmatpush1.bf16.msra.mxu0 %v10156_v2  ;;  %7590 = vmatpush1.bf16.msra.mxu1 %v10159_v3  ;;  %v13010_v2 = vrot.slane %v1318_v63, %v10921_v49  ;;  %v10246_v3 = vld [vmem:[%s14037_s1 + $0x1600] ss:$16 sps:$4 sm:$0xff]   ;;  %v10335_v63 = vld [vmem:[%s14037_s1 + $0x17cc] ss:$16 sps:$4 sm:$0xff]  }
 0x28c   : > { %6935 = vmatprep.subr.bf16.mxu0 %v10164_v4  ;;  %7591 = vmatprep.subr.bf16.mxu1 %v10167_v56  ;;  %v10249_v4 = vld [vmem:[%s14037_s1 + $0x1608] ss:$16 sps:$4 sm:$0xff]   ;;  %v10254_v56 = vld [vmem:[%s14037_s1 + $0x1624] ss:$16 sps:$4 sm:$0xff]  }
 0x28f   : > { %6936 = vmatpush1.bf16.msra.mxu0 %v10162_v5  ;;  %7592 = vmatpush1.bf16.msra.mxu1 %v10165_v6  ;;  %v10257_v5 = vld [vmem:[%s14037_s1 + $0x162c] ss:$16 sps:$4 sm:$0xff]   ;;  %v1334_v6 = vcombine.high %v13010_v2, %v13010_v2 }
 0x290   : > { %6937 = vmatprep.subr.bf16.mxu0 %v10170_v7  ;;  %7593 = vmatprep.subr.bf16.mxu1 %v10173_v8  ;;  %v10252_v7 = vld [vmem:[%s14037_s1 + $0x1620] ss:$16 sps:$4 sm:$0xff]   ;;  %v10255_v8 = vld [vmem:[%s14037_s1 + $0x1628] ss:$16 sps:$4 sm:$0xff]  }
 0x293   : > { %6938 = vmatpush1.bf16.msra.mxu0 %v10168_v9  ;;  %7594 = vmatpush1.bf16.msra.mxu1 %v10171_v10  ;;  %v10260_v9 = vld [vmem:[%s14037_s1 + $0x1644] ss:$16 sps:$4 sm:$0xff]   ;;  %v10258_v10 = vld [vmem:[%s14037_s1 + $0x1640] ss:$16 sps:$4 sm:$0xff]  }
 0x294   : > { %6939 = vmatprep.subr.bf16.mxu0 %v10176_v11  ;;  %7595 = vmatprep.subr.bf16.mxu1 %v10179_v13  ;;  %v10261_v11 = vld [vmem:[%s14037_s1 + $0x1648] ss:$16 sps:$4 sm:$0xff]   ;;  %v10266_v13 = vld [vmem:[%s14037_s1 + $0x1664] ss:$16 sps:$4 sm:$0xff]  }
 0x297   : > { %6940 = vmatpush1.bf16.msra.mxu0 %v10174_v14  ;;  %7596 = vmatpush1.bf16.msra.mxu1 %v10177_v15  ;;  %v10269_v14 = vld [vmem:[%s14037_s1 + $0x166c] ss:$16 sps:$4 sm:$0xff]   ;;  %v10264_v15 = vld [vmem:[%s14037_s1 + $0x1660] ss:$16 sps:$4 sm:$0xff]  }
 0x298   : > { %6941 = vmatprep.subr.bf16.mxu0 %v10182_v16  ;;  %7597 = vmatprep.subr.bf16.mxu1 %v10185_v17  ;;  %v10267_v16 = vld [vmem:[%s14037_s1 + $0x1668] ss:$16 sps:$4 sm:$0xff]   ;;  %v10272_v17 = vld [vmem:[%s14037_s1 + $0x1684] ss:$16 sps:$4 sm:$0xff]  }
 0x29b   : > { %6942 = vmatpush1.bf16.msra.mxu0 %v10180_v18  ;;  %7598 = vmatpush1.bf16.msra.mxu1 %v10183_v20  ;;  %v10275_v18 = vld [vmem:[%s14037_s1 + $0x168c] ss:$16 sps:$4 sm:$0xff]   ;;  %v10270_v20 = vld [vmem:[%s14037_s1 + $0x1680] ss:$16 sps:$4 sm:$0xff]  }
 0x29c   : > { %6943 = vmatprep.subr.bf16.mxu0 %v10188_v21  ;;  %7599 = vmatprep.subr.bf16.mxu1 %v10191_v23  ;;  %v10273_v21 = vld [vmem:[%s14037_s1 + $0x1688] ss:$16 sps:$4 sm:$0xff]   ;;  %v10278_v23 = vld [vmem:[%s14037_s1 + $0x16a4] ss:$16 sps:$4 sm:$0xff]  }
 0x29f   : > { %6944 = vmatpush1.bf16.msra.mxu0 %v10186_v19  ;;  %7600 = vmatpush1.bf16.msra.mxu1 %v10189_v25  ;;  %v10281_v19 = vld [vmem:[%s14037_s1 + $0x16ac] ss:$16 sps:$4 sm:$0xff]   ;;  %v10276_v25 = vld [vmem:[%s14037_s1 + $0x16a0] ss:$16 sps:$4 sm:$0xff]  }
 0x2a0   : > { %6945 = vmatprep.subr.bf16.mxu0 %v10194_v12  ;;  %7601 = vmatprep.subr.bf16.mxu1 %v10197_v27  ;;  %v10279_v12 = vld [vmem:[%s14037_s1 + $0x16a8] ss:$16 sps:$4 sm:$0xff]   ;;  %v10284_v27 = vld [vmem:[%s14037_s1 + $0x16c4] ss:$16 sps:$4 sm:$0xff]  }
 0x2a3   : > { %6946 = vmatpush1.bf16.msra.mxu0 %v10192_v28  ;;  %7602 = vmatpush1.bf16.msra.mxu1 %v10195_v30  ;;  %v10287_v28 = vld [vmem:[%s14037_s1 + $0x16cc] ss:$16 sps:$4 sm:$0xff]   ;;  %v10282_v30 = vld [vmem:[%s14037_s1 + $0x16c0] ss:$16 sps:$4 sm:$0xff]  }
 0x2a4   : > { %6947 = vmatprep.subr.bf16.mxu0 %v10200_v31  ;;  %7603 = vmatprep.subr.bf16.mxu1 %v10203_v22  ;;  %v10285_v31 = vld [vmem:[%s14037_s1 + $0x16c8] ss:$16 sps:$4 sm:$0xff]   ;;  %v10290_v22 = vld [vmem:[%s14037_s1 + $0x16e4] ss:$16 sps:$4 sm:$0xff]  }
 0x2a7   : > { %6948 = vmatpush1.bf16.msra.mxu0 %v10198_v32  ;;  %7604 = vmatpush1.bf16.msra.mxu1 %v10201_v33  ;;  %v10293_v32 = vld [vmem:[%s14037_s1 + $0x16ec] ss:$16 sps:$4 sm:$0xff]   ;;  %v10288_v33 = vld [vmem:[%s14037_s1 + $0x16e0] ss:$16 sps:$4 sm:$0xff]  }
 0x2a8   : > { %6949 = vmatprep.subr.bf16.mxu0 %v10206_v26  ;;  %7605 = vmatprep.subr.bf16.mxu1 %v10209_v36  ;;  %v10291_v26 = vld [vmem:[%s14037_s1 + $0x16e8] ss:$16 sps:$4 sm:$0xff]   ;;  %v10296_v36 = vld [vmem:[%s14037_s1 + $0x1704] ss:$16 sps:$4 sm:$0xff]  }
 0x2ab   : > { %6950 = vmatpush1.bf16.msra.mxu0 %v10204_v24  ;;  %7606 = vmatpush1.bf16.msra.mxu1 %v10207_v37  ;;  %v10299_v24 = vld [vmem:[%s14037_s1 + $0x170c] ss:$16 sps:$4 sm:$0xff]   ;;  %v10294_v37 = vld [vmem:[%s14037_s1 + $0x1700] ss:$16 sps:$4 sm:$0xff]  }
 0x2ac   : > { %6951 = vmatprep.subr.bf16.mxu0 %v10212_v38  ;;  %7607 = vmatprep.subr.bf16.mxu1 %v10215_v40  ;;  %v10297_v38 = vld [vmem:[%s14037_s1 + $0x1708] ss:$16 sps:$4 sm:$0xff]   ;;  %v10302_v40 = vld [vmem:[%s14037_s1 + $0x1724] ss:$16 sps:$4 sm:$0xff]  }
 0x2af   : > { %6952 = vmatpush1.bf16.msra.mxu0 %v10210_v41  ;;  %7608 = vmatpush1.bf16.msra.mxu1 %v10213_v29  ;;  %v10305_v41 = vld [vmem:[%s14037_s1 + $0x172c] ss:$16 sps:$4 sm:$0xff]   ;;  %v10300_v29 = vld [vmem:[%s14037_s1 + $0x1720] ss:$16 sps:$4 sm:$0xff]  }
 0x2b0   : > { %6953 = vmatprep.subr.bf16.mxu0 %v10218_v43  ;;  %7609 = vmatprep.subr.bf16.mxu1 %v10221_v44  ;;  %v10303_v43 = vld [vmem:[%s14037_s1 + $0x1728] ss:$16 sps:$4 sm:$0xff]   ;;  %v10308_v44 = vld [vmem:[%s14037_s1 + $0x1744] ss:$16 sps:$4 sm:$0xff]  }
 0x2b3   : > { %6954 = vmatpush1.bf16.msra.mxu0 %v10216_v35  ;;  %7610 = vmatpush1.bf16.msra.mxu1 %v10219_v47  ;;  %v10311_v35 = vld [vmem:[%s14037_s1 + $0x174c] ss:$16 sps:$4 sm:$0xff]   ;;  %v10306_v47 = vld [vmem:[%s14037_s1 + $0x1740] ss:$16 sps:$4 sm:$0xff]  }
 0x2b4   : > { %6955 = vmatprep.subr.bf16.mxu0 %v10224_v34  ;;  %7611 = vmatprep.subr.bf16.mxu1 %v10227_v48  ;;  %v10309_v34 = vld [vmem:[%s14037_s1 + $0x1748] ss:$16 sps:$4 sm:$0xff]   ;;  %v10314_v48 = vld [vmem:[%s14037_s1 + $0x1764] ss:$16 sps:$4 sm:$0xff]  }
 0x2b7   : > { %6956 = vmatpush1.bf16.msra.mxu0 %v10222_v50  ;;  %7612 = vmatpush1.bf16.msra.mxu1 %v10225_v52  ;;  %v10317_v50 = vld [vmem:[%s14037_s1 + $0x176c] ss:$16 sps:$4 sm:$0xff]   ;;  %v10312_v52 = vld [vmem:[%s14037_s1 + $0x1760] ss:$16 sps:$4 sm:$0xff]  }
 0x2b8   : > { %6957 = vmatprep.subr.bf16.mxu0 %v10230_v53  ;;  %7613 = vmatprep.subr.bf16.mxu1 %v10233_v39  ;;  %v10315_v53 = vld [vmem:[%s14037_s1 + $0x1768] ss:$16 sps:$4 sm:$0xff]   ;;  %v10320_v39 = vld [vmem:[%s14037_s1 + $0x1784] ss:$16 sps:$4 sm:$0xff]  }
 0x2bb   : > { %6958 = vmatpush1.bf16.msra.mxu0 %v10228_v54  ;;  %7614 = vmatpush1.bf16.msra.mxu1 %v10231_v55  ;;  %v10323_v54 = vld [vmem:[%s14037_s1 + $0x178c] ss:$16 sps:$4 sm:$0xff]   ;;  %v10318_v55 = vld [vmem:[%s14037_s1 + $0x1780] ss:$16 sps:$4 sm:$0xff]  }
 0x2bc   : > { %6959 = vmatprep.subr.bf16.mxu0 %v10236_v46  ;;  %7615 = vmatprep.subr.bf16.mxu1 %v10239_v58  ;;  %v10321_v46 = vld [vmem:[%s14037_s1 + $0x1788] ss:$16 sps:$4 sm:$0xff]   ;;  %v10326_v58 = vld [vmem:[%s14037_s1 + $0x17a4] ss:$16 sps:$4 sm:$0xff]  }
 0x2bf   : > { %6960 = vmatpush1.bf16.msra.mxu0 %v10234_v45  ;;  %7616 = vmatpush1.bf16.msra.mxu1 %v10237_v59  ;;  %v10329_v45 = vld [vmem:[%s14037_s1 + $0x17ac] ss:$16 sps:$4 sm:$0xff]   ;;  %v10324_v59 = vld [vmem:[%s14037_s1 + $0x17a0] ss:$16 sps:$4 sm:$0xff]  }
 0x2c0   : > { %6961 = vmatprep.subr.bf16.mxu0 %v10242_v60  ;;  %7617 = vmatprep.subr.bf16.mxu1 %v10245_v62  ;;  %v10327_v60 = vld [vmem:[%s14037_s1 + $0x17a8] ss:$16 sps:$4 sm:$0xff]   ;;  %v10332_v62 = vld [vmem:[%s14037_s1 + $0x17c4] ss:$16 sps:$4 sm:$0xff]  }
 0x2c3   : > { %6962 = vmatpush1.bf16.msra.mxu0 %v10240_v51  ;;  %7618 = vmatpush1.bf16.msra.mxu1 %v10243_v0  ;;  %v10330_v51 = vld [vmem:[%s14037_s1 + $0x17c0] ss:$16 sps:$4 sm:$0xff]   ;;  %v10333_v0 = vld [vmem:[%s14037_s1 + $0x17c8] ss:$16 sps:$4 sm:$0xff]  }
 0x2c4   : > { %6972 = vmatprep.subr.bf16.mxu0 %v10248_v1  ;;  %7628 = vmatprep.subr.bf16.mxu1 %v10251_v57  ;;  %v10338_v1 = vld [vmem:[%s14037_s1 + $0x17e4] ss:$16 sps:$4 sm:$0xff]   ;;  %v10341_v57 = vld [vmem:[%s14037_s1 + $0x17ec] ss:$16 sps:$4 sm:$0xff]  }
 0x2c6   : > { %6964 = vmatmul.mubr.bf16.vlgmr.msra.gmra.mrb[0].mxu0 %v12809_v61  ;;  %7620 = vmatmul.mubr.bf16.vlgmr.msra.gmra.mrb[0].mxu1 %v12809_v61  ;;  %v10263_v61 = vld [vmem:[%s14037_s1 + $0x164c] ss:$16 sps:$4 sm:$0xff]  }
 0x2c7   : > { %6973 = vmatpush1.bf16.msra.mxu0 %v10246_v3  ;;  %7629 = vmatpush1.bf16.msra.mxu1 %v10249_v4  ;;  %v13197_v3 = vld [vmem:[%s10918_s30 + $0x30] sm:$0xff] }
 0x2c8   : > { %6974 = vmatprep.subr.bf16.mxu0 %v10254_v56  ;;  %7630 = vmatprep.subr.bf16.mxu1 %v10257_v5  ;;  %v10336_v4 = vld [vmem:[%s14037_s1 + $0x17e0] ss:$16 sps:$4 sm:$0xff]   ;;  %v10339_v56 = vld [vmem:[%s14037_s1 + $0x17e8] ss:$16 sps:$4 sm:$0xff]   ;;  %v10345_v5 = vld [vmem:[%s14037_s1 + $0x1804] ss:$16 sps:$4 sm:$0xff]  }
 0x2c9   : > { %7004 = vmatprep.mubr.bf16.mxu0 %v1334_v6  ;;  %7660 = vmatprep.mubr.bf16.mxu1 %v1334_v6  ;;  %v10348_v6 = vld [vmem:[%s14037_s1 + $0x180c] ss:$16 sps:$4 sm:$0xff]  }
 0x2cb   : > { %6975 = vmatpush1.bf16.msra.mxu0 %v10252_v7  ;;  %7631 = vmatpush1.bf16.msra.mxu1 %v10255_v8  ;;  %v13213_v7 = vrot.slane %v13197_v3, %v10921_v49  ;;  %v10343_v8 = vld [vmem:[%s14037_s1 + $0x1800] ss:$16 sps:$4 sm:$0xff]  }
 0x2cc   : > { %6976 = vmatprep.subr.bf16.mxu0 %v10260_v9  ;;  %7632 = vmatprep.subr.bf16.mxu1 %v10263_v61  ;;  %v10346_v9 = vld [vmem:[%s14037_s1 + $0x1808] ss:$16 sps:$4 sm:$0xff]   ;;  %v10351_v61 = vld [vmem:[%s14037_s1 + $0x1824] ss:$16 sps:$4 sm:$0xff]  }
 0x2cf   : > { %6977 = vmatpush1.bf16.msra.mxu0 %v10258_v10  ;;  %7633 = vmatpush1.bf16.msra.mxu1 %v10261_v11  ;;  %v10354_v10 = vld [vmem:[%s14037_s1 + $0x182c] ss:$16 sps:$4 sm:$0xff]   ;;  %v1350_v11 = vcombine.high %v13213_v7, %v13213_v7 }
 0x2d0   : > { %6978 = vmatprep.subr.bf16.mxu0 %v10266_v13  ;;  %7634 = vmatprep.subr.bf16.mxu1 %v10269_v14  ;;  %v10349_v13 = vld [vmem:[%s14037_s1 + $0x1820] ss:$16 sps:$4 sm:$0xff]   ;;  %v10352_v14 = vld [vmem:[%s14037_s1 + $0x1828] ss:$16 sps:$4 sm:$0xff]  }
 0x2d3   : > { %6979 = vmatpush1.bf16.msra.mxu0 %v10264_v15  ;;  %7635 = vmatpush1.bf16.msra.mxu1 %v10267_v16  ;;  %v10357_v15 = vld [vmem:[%s14037_s1 + $0x1844] ss:$16 sps:$4 sm:$0xff]   ;;  %v10355_v16 = vld [vmem:[%s14037_s1 + $0x1840] ss:$16 sps:$4 sm:$0xff]  }
 0x2d4   : > { %6980 = vmatprep.subr.bf16.mxu0 %v10272_v17  ;;  %7636 = vmatprep.subr.bf16.mxu1 %v10275_v18  ;;  %v10358_v17 = vld [vmem:[%s14037_s1 + $0x1848] ss:$16 sps:$4 sm:$0xff]   ;;  %v10363_v18 = vld [vmem:[%s14037_s1 + $0x1864] ss:$16 sps:$4 sm:$0xff]  }
 0x2d7   : > { %6981 = vmatpush1.bf16.msra.mxu0 %v10270_v20  ;;  %7637 = vmatpush1.bf16.msra.mxu1 %v10273_v21  ;;  %v10366_v20 = vld [vmem:[%s14037_s1 + $0x186c] ss:$16 sps:$4 sm:$0xff]   ;;  %v10361_v21 = vld [vmem:[%s14037_s1 + $0x1860] ss:$16 sps:$4 sm:$0xff]  }
 0x2d8   : > { %6982 = vmatprep.subr.bf16.mxu0 %v10278_v23  ;;  %7638 = vmatprep.subr.bf16.mxu1 %v10281_v19  ;;  %v10364_v23 = vld [vmem:[%s14037_s1 + $0x1868] ss:$16 sps:$4 sm:$0xff]   ;;  %v10369_v19 = vld [vmem:[%s14037_s1 + $0x1884] ss:$16 sps:$4 sm:$0xff]  }
 0x2db   : > { %6983 = vmatpush1.bf16.msra.mxu0 %v10276_v25  ;;  %7639 = vmatpush1.bf16.msra.mxu1 %v10279_v12  ;;  %v10372_v25 = vld [vmem:[%s14037_s1 + $0x188c] ss:$16 sps:$4 sm:$0xff]   ;;  %v10367_v12 = vld [vmem:[%s14037_s1 + $0x1880] ss:$16 sps:$4 sm:$0xff]  }
 0x2dc   : > { %6984 = vmatprep.subr.bf16.mxu0 %v10284_v27  ;;  %7640 = vmatprep.subr.bf16.mxu1 %v10287_v28  ;;  %v10370_v27 = vld [vmem:[%s14037_s1 + $0x1888] ss:$16 sps:$4 sm:$0xff]   ;;  %v10375_v28 = vld [vmem:[%s14037_s1 + $0x18a4] ss:$16 sps:$4 sm:$0xff]  }
 0x2df   : > { %6985 = vmatpush1.bf16.msra.mxu0 %v10282_v30  ;;  %7641 = vmatpush1.bf16.msra.mxu1 %v10285_v31  ;;  %v10378_v30 = vld [vmem:[%s14037_s1 + $0x18ac] ss:$16 sps:$4 sm:$0xff]   ;;  %v10373_v31 = vld [vmem:[%s14037_s1 + $0x18a0] ss:$16 sps:$4 sm:$0xff]  }
 0x2e0   : > { %6986 = vmatprep.subr.bf16.mxu0 %v10290_v22  ;;  %7642 = vmatprep.subr.bf16.mxu1 %v10293_v32  ;;  %v10376_v22 = vld [vmem:[%s14037_s1 + $0x18a8] ss:$16 sps:$4 sm:$0xff]   ;;  %v10381_v32 = vld [vmem:[%s14037_s1 + $0x18c4] ss:$16 sps:$4 sm:$0xff]  }
 0x2e3   : > { %6987 = vmatpush1.bf16.msra.mxu0 %v10288_v33  ;;  %7643 = vmatpush1.bf16.msra.mxu1 %v10291_v26  ;;  %v10384_v33 = vld [vmem:[%s14037_s1 + $0x18cc] ss:$16 sps:$4 sm:$0xff]   ;;  %v10379_v26 = vld [vmem:[%s14037_s1 + $0x18c0] ss:$16 sps:$4 sm:$0xff]  }
 0x2e4   : > { %6988 = vmatprep.subr.bf16.mxu0 %v10296_v36  ;;  %7644 = vmatprep.subr.bf16.mxu1 %v10299_v24  ;;  %v10382_v36 = vld [vmem:[%s14037_s1 + $0x18c8] ss:$16 sps:$4 sm:$0xff]   ;;  %v10387_v24 = vld [vmem:[%s14037_s1 + $0x18e4] ss:$16 sps:$4 sm:$0xff]  }
 0x2e7   : > { %6989 = vmatpush1.bf16.msra.mxu0 %v10294_v37  ;;  %7645 = vmatpush1.bf16.msra.mxu1 %v10297_v38  ;;  %v10390_v37 = vld [vmem:[%s14037_s1 + $0x18ec] ss:$16 sps:$4 sm:$0xff]   ;;  %v10385_v38 = vld [vmem:[%s14037_s1 + $0x18e0] ss:$16 sps:$4 sm:$0xff]  }
 0x2e8   : > { %6990 = vmatprep.subr.bf16.mxu0 %v10302_v40  ;;  %7646 = vmatprep.subr.bf16.mxu1 %v10305_v41  ;;  %v10388_v40 = vld [vmem:[%s14037_s1 + $0x18e8] ss:$16 sps:$4 sm:$0xff]   ;;  %v10393_v41 = vld [vmem:[%s14037_s1 + $0x1904] ss:$16 sps:$4 sm:$0xff]  }
 0x2eb   : > { %6991 = vmatpush1.bf16.msra.mxu0 %v10300_v29  ;;  %7647 = vmatpush1.bf16.msra.mxu1 %v10303_v43  ;;  %v10396_v29 = vld [vmem:[%s14037_s1 + $0x190c] ss:$16 sps:$4 sm:$0xff]   ;;  %v10391_v43 = vld [vmem:[%s14037_s1 + $0x1900] ss:$16 sps:$4 sm:$0xff]  }
 0x2ec   : > { %6992 = vmatprep.subr.bf16.mxu0 %v10308_v44  ;;  %7648 = vmatprep.subr.bf16.mxu1 %v10311_v35  ;;  %v10394_v44 = vld [vmem:[%s14037_s1 + $0x1908] ss:$16 sps:$4 sm:$0xff]   ;;  %v10399_v35 = vld [vmem:[%s14037_s1 + $0x1924] ss:$16 sps:$4 sm:$0xff]  }
 0x2ef   : > { %6993 = vmatpush1.bf16.msra.mxu0 %v10306_v47  ;;  %7649 = vmatpush1.bf16.msra.mxu1 %v10309_v34  ;;  %v10402_v47 = vld [vmem:[%s14037_s1 + $0x192c] ss:$16 sps:$4 sm:$0xff]   ;;  %v10397_v34 = vld [vmem:[%s14037_s1 + $0x1920] ss:$16 sps:$4 sm:$0xff]  }
 0x2f0   : > { %6994 = vmatprep.subr.bf16.mxu0 %v10314_v48  ;;  %7650 = vmatprep.subr.bf16.mxu1 %v10317_v50  ;;  %v10400_v48 = vld [vmem:[%s14037_s1 + $0x1928] ss:$16 sps:$4 sm:$0xff]   ;;  %v10405_v50 = vld [vmem:[%s14037_s1 + $0x1944] ss:$16 sps:$4 sm:$0xff]  }
 0x2f3   : > { %6995 = vmatpush1.bf16.msra.mxu0 %v10312_v52  ;;  %7651 = vmatpush1.bf16.msra.mxu1 %v10315_v53  ;;  %v10408_v52 = vld [vmem:[%s14037_s1 + $0x194c] ss:$16 sps:$4 sm:$0xff]   ;;  %v10403_v53 = vld [vmem:[%s14037_s1 + $0x1940] ss:$16 sps:$4 sm:$0xff]  }
 0x2f4   : > { %6996 = vmatprep.subr.bf16.mxu0 %v10320_v39  ;;  %7652 = vmatprep.subr.bf16.mxu1 %v10323_v54  ;;  %v10406_v39 = vld [vmem:[%s14037_s1 + $0x1948] ss:$16 sps:$4 sm:$0xff]   ;;  %v10411_v54 = vld [vmem:[%s14037_s1 + $0x1964] ss:$16 sps:$4 sm:$0xff]  }
 0x2f7   : > { %6997 = vmatpush1.bf16.msra.mxu0 %v10318_v55  ;;  %7653 = vmatpush1.bf16.msra.mxu1 %v10321_v46  ;;  %v10414_v55 = vld [vmem:[%s14037_s1 + $0x196c] ss:$16 sps:$4 sm:$0xff]   ;;  %v10409_v46 = vld [vmem:[%s14037_s1 + $0x1960] ss:$16 sps:$4 sm:$0xff]  }
 0x2f8   : > { %6998 = vmatprep.subr.bf16.mxu0 %v10326_v58  ;;  %7654 = vmatprep.subr.bf16.mxu1 %v10329_v45  ;;  %v10412_v58 = vld [vmem:[%s14037_s1 + $0x1968] ss:$16 sps:$4 sm:$0xff]   ;;  %v10417_v45 = vld [vmem:[%s14037_s1 + $0x1984] ss:$16 sps:$4 sm:$0xff]  }
 0x2fb   : > { %6999 = vmatpush1.bf16.msra.mxu0 %v10324_v59  ;;  %7655 = vmatpush1.bf16.msra.mxu1 %v10327_v60  ;;  %v10420_v59 = vld [vmem:[%s14037_s1 + $0x198c] ss:$16 sps:$4 sm:$0xff]   ;;  %v10415_v60 = vld [vmem:[%s14037_s1 + $0x1980] ss:$16 sps:$4 sm:$0xff]  }
 0x2fc   : > { %7000 = vmatprep.subr.bf16.mxu0 %v10332_v62  ;;  %7656 = vmatprep.subr.bf16.mxu1 %v10335_v63  ;;  %v10418_v62 = vld [vmem:[%s14037_s1 + $0x1988] ss:$16 sps:$4 sm:$0xff]   ;;  %v10423_v63 = vld [vmem:[%s14037_s1 + $0x19a4] ss:$16 sps:$4 sm:$0xff]  }
 0x2ff   : > { %7001 = vmatpush1.bf16.msra.mxu0 %v10330_v51  ;;  %7657 = vmatpush1.bf16.msra.mxu1 %v10333_v0  ;;  %v10426_v51 = vld [vmem:[%s14037_s1 + $0x19ac] ss:$16 sps:$4 sm:$0xff]   ;;  %v10421_v0 = vld [vmem:[%s14037_s1 + $0x19a0] ss:$16 sps:$4 sm:$0xff]  }
 0x300   : > { %7002 = vmatprep.subr.bf16.mxu0 %v10338_v1  ;;  %7658 = vmatprep.subr.bf16.mxu1 %v10341_v57  ;;  %v10424_v1 = vld [vmem:[%s14037_s1 + $0x19a8] ss:$16 sps:$4 sm:$0xff]   ;;  %v10429_v57 = vld [vmem:[%s14037_s1 + $0x19c4] ss:$16 sps:$4 sm:$0xff]  }
 0x303   : > { %7003 = vmatpush1.bf16.msra.mxu0 %v10336_v4  ;;  %7659 = vmatpush1.bf16.msra.mxu1 %v10339_v56  ;;  %v10432_v4 = vld [vmem:[%s14037_s1 + $0x19cc] ss:$16 sps:$4 sm:$0xff]   ;;  %v10427_v56 = vld [vmem:[%s14037_s1 + $0x19c0] ss:$16 sps:$4 sm:$0xff]  }
 0x304   : > { %7013 = vmatprep.subr.bf16.mxu0 %v10345_v5  ;;  %7669 = vmatprep.subr.bf16.mxu1 %v10348_v6  ;;  %v10430_v5 = vld [vmem:[%s14037_s1 + $0x19c8] ss:$16 sps:$4 sm:$0xff]   ;;  %v10435_v6 = vld [vmem:[%s14037_s1 + $0x19e4] ss:$16 sps:$4 sm:$0xff]  }
 0x306   : > { %7005 = vmatmul.mubr.bf16.vlgmr.msra.gmra.mrb[0].mxu0 %v13010_v2  ;;  %7661 = vmatmul.mubr.bf16.vlgmr.msra.gmra.mrb[0].mxu1 %v13010_v2  ;;  %v10360_v2 = vld [vmem:[%s14037_s1 + $0x184c] ss:$16 sps:$4 sm:$0xff]  }
 0x307   : > { %7014 = vmatpush1.bf16.msra.mxu0 %v10343_v8  ;;  %7670 = vmatpush1.bf16.msra.mxu1 %v10346_v9  ;;  %v10438_v8 = vld [vmem:[%s14037_s1 + $0x19ec] ss:$16 sps:$4 sm:$0xff]   ;;  %v1335_v9 = vcombine.high %v13197_v3, %v13197_v3 }
 0x308   : > { %7015 = vmatprep.subr.bf16.mxu0 %v10351_v61  ;;  %7671 = vmatprep.subr.bf16.mxu1 %v10354_v10  ;;  %v10433_v61 = vld [vmem:[%s14037_s1 + $0x19e0] ss:$16 sps:$4 sm:$0xff]   ;;  %v10436_v10 = vld [vmem:[%s14037_s1 + $0x19e8] ss:$16 sps:$4 sm:$0xff]   ;;  %v10444_v3 = vld [vmem:[%s14037_s1 + $0x1a0c] ss:$16 sps:$4 sm:$0xff]  }
 0x309   : > { %7045 = vmatprep.mubr.bf16.mxu0 %v1350_v11  ;;  %7701 = vmatprep.mubr.bf16.mxu1 %v1350_v11  ;;  %v10441_v11 = vld [vmem:[%s14037_s1 + $0x1a04] ss:$16 sps:$4 sm:$0xff]  }
 0x30b   : > { %7016 = vmatpush1.bf16.msra.mxu0 %v10349_v13  ;;  %7672 = vmatpush1.bf16.msra.mxu1 %v10352_v14  ;;  %v13414_v13 = vrot.slane %v1335_v9, %v10921_v49  ;;  %v10439_v14 = vld [vmem:[%s14037_s1 + $0x1a00] ss:$16 sps:$4 sm:$0xff]   ;;  %v10528_v9 = vld [vmem:[%s14037_s1 + $0x1bcc] ss:$16 sps:$4 sm:$0xff]  }
 0x30c   : > { %7017 = vmatprep.subr.bf16.mxu0 %v10357_v15  ;;  %7673 = vmatprep.subr.bf16.mxu1 %v10360_v2  ;;  %v10442_v15 = vld [vmem:[%s14037_s1 + $0x1a08] ss:$16 sps:$4 sm:$0xff]   ;;  %v10447_v2 = vld [vmem:[%s14037_s1 + $0x1a24] ss:$16 sps:$4 sm:$0xff]  }
 0x30f   : > { %7018 = vmatpush1.bf16.msra.mxu0 %v10355_v16  ;;  %7674 = vmatpush1.bf16.msra.mxu1 %v10358_v17  ;;  %v10450_v16 = vld [vmem:[%s14037_s1 + $0x1a2c] ss:$16 sps:$4 sm:$0xff]   ;;  %v1351_v17 = vcombine.high %v13414_v13, %v13414_v13 }
 0x310   : > { %7019 = vmatprep.subr.bf16.mxu0 %v10363_v18  ;;  %7675 = vmatprep.subr.bf16.mxu1 %v10366_v20  ;;  %v10445_v18 = vld [vmem:[%s14037_s1 + $0x1a20] ss:$16 sps:$4 sm:$0xff]   ;;  %v10448_v20 = vld [vmem:[%s14037_s1 + $0x1a28] ss:$16 sps:$4 sm:$0xff]  }
 0x313   : > { %7020 = vmatpush1.bf16.msra.mxu0 %v10361_v21  ;;  %7676 = vmatpush1.bf16.msra.mxu1 %v10364_v23  ;;  %v10453_v21 = vld [vmem:[%s14037_s1 + $0x1a44] ss:$16 sps:$4 sm:$0xff]   ;;  %v10451_v23 = vld [vmem:[%s14037_s1 + $0x1a40] ss:$16 sps:$4 sm:$0xff]  }
 0x314   : > { %7021 = vmatprep.subr.bf16.mxu0 %v10369_v19  ;;  %7677 = vmatprep.subr.bf16.mxu1 %v10372_v25  ;;  %v10454_v19 = vld [vmem:[%s14037_s1 + $0x1a48] ss:$16 sps:$4 sm:$0xff]   ;;  %v10459_v25 = vld [vmem:[%s14037_s1 + $0x1a64] ss:$16 sps:$4 sm:$0xff]  }
 0x317   : > { %7022 = vmatpush1.bf16.msra.mxu0 %v10367_v12  ;;  %7678 = vmatpush1.bf16.msra.mxu1 %v10370_v27  ;;  %v10462_v12 = vld [vmem:[%s14037_s1 + $0x1a6c] ss:$16 sps:$4 sm:$0xff]   ;;  %v10457_v27 = vld [vmem:[%s14037_s1 + $0x1a60] ss:$16 sps:$4 sm:$0xff]  }
 0x318   : > { %7023 = vmatprep.subr.bf16.mxu0 %v10375_v28  ;;  %7679 = vmatprep.subr.bf16.mxu1 %v10378_v30  ;;  %v10460_v28 = vld [vmem:[%s14037_s1 + $0x1a68] ss:$16 sps:$4 sm:$0xff]   ;;  %v10465_v30 = vld [vmem:[%s14037_s1 + $0x1a84] ss:$16 sps:$4 sm:$0xff]  }
 0x31b   : > { %7024 = vmatpush1.bf16.msra.mxu0 %v10373_v31  ;;  %7680 = vmatpush1.bf16.msra.mxu1 %v10376_v22  ;;  %v10468_v31 = vld [vmem:[%s14037_s1 + $0x1a8c] ss:$16 sps:$4 sm:$0xff]   ;;  %v10463_v22 = vld [vmem:[%s14037_s1 + $0x1a80] ss:$16 sps:$4 sm:$0xff]  }
 0x31c   : > { %7025 = vmatprep.subr.bf16.mxu0 %v10381_v32  ;;  %7681 = vmatprep.subr.bf16.mxu1 %v10384_v33  ;;  %v10466_v32 = vld [vmem:[%s14037_s1 + $0x1a88] ss:$16 sps:$4 sm:$0xff]   ;;  %v10471_v33 = vld [vmem:[%s14037_s1 + $0x1aa4] ss:$16 sps:$4 sm:$0xff]  }
 0x31f   : > { %7026 = vmatpush1.bf16.msra.mxu0 %v10379_v26  ;;  %7682 = vmatpush1.bf16.msra.mxu1 %v10382_v36  ;;  %v10474_v26 = vld [vmem:[%s14037_s1 + $0x1aac] ss:$16 sps:$4 sm:$0xff]   ;;  %v10469_v36 = vld [vmem:[%s14037_s1 + $0x1aa0] ss:$16 sps:$4 sm:$0xff]  }
 0x320   : > { %7027 = vmatprep.subr.bf16.mxu0 %v10387_v24  ;;  %7683 = vmatprep.subr.bf16.mxu1 %v10390_v37  ;;  %v10472_v24 = vld [vmem:[%s14037_s1 + $0x1aa8] ss:$16 sps:$4 sm:$0xff]   ;;  %v10477_v37 = vld [vmem:[%s14037_s1 + $0x1ac4] ss:$16 sps:$4 sm:$0xff]  }
 0x323   : > { %7028 = vmatpush1.bf16.msra.mxu0 %v10385_v38  ;;  %7684 = vmatpush1.bf16.msra.mxu1 %v10388_v40  ;;  %v10480_v38 = vld [vmem:[%s14037_s1 + $0x1acc] ss:$16 sps:$4 sm:$0xff]   ;;  %v10475_v40 = vld [vmem:[%s14037_s1 + $0x1ac0] ss:$16 sps:$4 sm:$0xff]  }
 0x324   : > { %7029 = vmatprep.subr.bf16.mxu0 %v10393_v41  ;;  %7685 = vmatprep.subr.bf16.mxu1 %v10396_v29  ;;  %v10478_v41 = vld [vmem:[%s14037_s1 + $0x1ac8] ss:$16 sps:$4 sm:$0xff]   ;;  %v10483_v29 = vld [vmem:[%s14037_s1 + $0x1ae4] ss:$16 sps:$4 sm:$0xff]  }
 0x327   : > { %7030 = vmatpush1.bf16.msra.mxu0 %v10391_v43  ;;  %7686 = vmatpush1.bf16.msra.mxu1 %v10394_v44  ;;  %v10486_v43 = vld [vmem:[%s14037_s1 + $0x1aec] ss:$16 sps:$4 sm:$0xff]   ;;  %v10481_v44 = vld [vmem:[%s14037_s1 + $0x1ae0] ss:$16 sps:$4 sm:$0xff]  }
 0x328   : > { %7031 = vmatprep.subr.bf16.mxu0 %v10399_v35  ;;  %7687 = vmatprep.subr.bf16.mxu1 %v10402_v47  ;;  %v10484_v35 = vld [vmem:[%s14037_s1 + $0x1ae8] ss:$16 sps:$4 sm:$0xff]   ;;  %v10489_v47 = vld [vmem:[%s14037_s1 + $0x1b04] ss:$16 sps:$4 sm:$0xff]  }
 0x32b   : > { %7032 = vmatpush1.bf16.msra.mxu0 %v10397_v34  ;;  %7688 = vmatpush1.bf16.msra.mxu1 %v10400_v48  ;;  %v10492_v34 = vld [vmem:[%s14037_s1 + $0x1b0c] ss:$16 sps:$4 sm:$0xff]   ;;  %v10487_v48 = vld [vmem:[%s14037_s1 + $0x1b00] ss:$16 sps:$4 sm:$0xff]  }
 0x32c   : > { %7033 = vmatprep.subr.bf16.mxu0 %v10405_v50  ;;  %7689 = vmatprep.subr.bf16.mxu1 %v10408_v52  ;;  %v10490_v50 = vld [vmem:[%s14037_s1 + $0x1b08] ss:$16 sps:$4 sm:$0xff]   ;;  %v10495_v52 = vld [vmem:[%s14037_s1 + $0x1b24] ss:$16 sps:$4 sm:$0xff]  }
 0x32f   : > { %7034 = vmatpush1.bf16.msra.mxu0 %v10403_v53  ;;  %7690 = vmatpush1.bf16.msra.mxu1 %v10406_v39  ;;  %v10498_v53 = vld [vmem:[%s14037_s1 + $0x1b2c] ss:$16 sps:$4 sm:$0xff]   ;;  %v10493_v39 = vld [vmem:[%s14037_s1 + $0x1b20] ss:$16 sps:$4 sm:$0xff]  }
 0x330   : > { %7035 = vmatprep.subr.bf16.mxu0 %v10411_v54  ;;  %7691 = vmatprep.subr.bf16.mxu1 %v10414_v55  ;;  %v10496_v54 = vld [vmem:[%s14037_s1 + $0x1b28] ss:$16 sps:$4 sm:$0xff]   ;;  %v10501_v55 = vld [vmem:[%s14037_s1 + $0x1b44] ss:$16 sps:$4 sm:$0xff]  }
 0x333   : > { %7036 = vmatpush1.bf16.msra.mxu0 %v10409_v46  ;;  %7692 = vmatpush1.bf16.msra.mxu1 %v10412_v58  ;;  %v10504_v46 = vld [vmem:[%s14037_s1 + $0x1b4c] ss:$16 sps:$4 sm:$0xff]   ;;  %v10499_v58 = vld [vmem:[%s14037_s1 + $0x1b40] ss:$16 sps:$4 sm:$0xff]  }
 0x334   : > { %7037 = vmatprep.subr.bf16.mxu0 %v10417_v45  ;;  %7693 = vmatprep.subr.bf16.mxu1 %v10420_v59  ;;  %v10502_v45 = vld [vmem:[%s14037_s1 + $0x1b48] ss:$16 sps:$4 sm:$0xff]   ;;  %v10507_v59 = vld [vmem:[%s14037_s1 + $0x1b64] ss:$16 sps:$4 sm:$0xff]  }
 0x337   : > { %7038 = vmatpush1.bf16.msra.mxu0 %v10415_v60  ;;  %7694 = vmatpush1.bf16.msra.mxu1 %v10418_v62  ;;  %v10510_v60 = vld [vmem:[%s14037_s1 + $0x1b6c] ss:$16 sps:$4 sm:$0xff]   ;;  %v10505_v62 = vld [vmem:[%s14037_s1 + $0x1b60] ss:$16 sps:$4 sm:$0xff]  }
 0x338   : > { %7039 = vmatprep.subr.bf16.mxu0 %v10423_v63  ;;  %7695 = vmatprep.subr.bf16.mxu1 %v10426_v51  ;;  %v10508_v63 = vld [vmem:[%s14037_s1 + $0x1b68] ss:$16 sps:$4 sm:$0xff]   ;;  %v10513_v51 = vld [vmem:[%s14037_s1 + $0x1b84] ss:$16 sps:$4 sm:$0xff]  }
 0x33b   : > { %7040 = vmatpush1.bf16.msra.mxu0 %v10421_v0  ;;  %7696 = vmatpush1.bf16.msra.mxu1 %v10424_v1  ;;  %v10516_v0 = vld [vmem:[%s14037_s1 + $0x1b8c] ss:$16 sps:$4 sm:$0xff]   ;;  %v10511_v1 = vld [vmem:[%s14037_s1 + $0x1b80] ss:$16 sps:$4 sm:$0xff]  }
 0x33c   : > { %7041 = vmatprep.subr.bf16.mxu0 %v10429_v57  ;;  %7697 = vmatprep.subr.bf16.mxu1 %v10432_v4  ;;  %v10514_v57 = vld [vmem:[%s14037_s1 + $0x1b88] ss:$16 sps:$4 sm:$0xff]   ;;  %v10519_v4 = vld [vmem:[%s14037_s1 + $0x1ba4] ss:$16 sps:$4 sm:$0xff]  }
 0x33f   : > { %7042 = vmatpush1.bf16.msra.mxu0 %v10427_v56  ;;  %7698 = vmatpush1.bf16.msra.mxu1 %v10430_v5  ;;  %v10522_v56 = vld [vmem:[%s14037_s1 + $0x1bac] ss:$16 sps:$4 sm:$0xff]   ;;  %v10517_v5 = vld [vmem:[%s14037_s1 + $0x1ba0] ss:$16 sps:$4 sm:$0xff]  }
 0x340   : > { %7043 = vmatprep.subr.bf16.mxu0 %v10435_v6  ;;  %7699 = vmatprep.subr.bf16.mxu1 %v10438_v8  ;;  %v10520_v6 = vld [vmem:[%s14037_s1 + $0x1ba8] ss:$16 sps:$4 sm:$0xff]   ;;  %v10525_v8 = vld [vmem:[%s14037_s1 + $0x1bc4] ss:$16 sps:$4 sm:$0xff]  }
 0x343   : > { %7044 = vmatpush1.bf16.msra.mxu0 %v10433_v61  ;;  %7700 = vmatpush1.bf16.msra.mxu1 %v10436_v10  ;;  %v10523_v61 = vld [vmem:[%s14037_s1 + $0x1bc0] ss:$16 sps:$4 sm:$0xff]   ;;  %v10526_v10 = vld [vmem:[%s14037_s1 + $0x1bc8] ss:$16 sps:$4 sm:$0xff]  }
 0x344   : > { %7054 = vmatprep.subr.bf16.mxu0 %v10441_v11  ;;  %7710 = vmatprep.subr.bf16.mxu1 %v10444_v3  ;;  %v10531_v11 = vld [vmem:[%s14037_s1 + $0x1be4] ss:$16 sps:$4 sm:$0xff]   ;;  %v10534_v3 = vld [vmem:[%s14037_s1 + $0x1bec] ss:$16 sps:$4 sm:$0xff]  }
 0x346   : > { %7046 = vmatmul.mubr.bf16.vlgmr.msra.gmra.mrb[0].mxu0 %v13213_v7  ;;  %7702 = vmatmul.mubr.bf16.vlgmr.msra.gmra.mrb[0].mxu1 %v13213_v7  ;;  %v10456_v7 = vld [vmem:[%s14037_s1 + $0x1a4c] ss:$16 sps:$4 sm:$0xff]  }
 0x347   : > { %7055 = vmatpush1.bf16.msra.mxu0 %v10439_v14  ;;  %7711 = vmatpush1.bf16.msra.mxu1 %v10442_v15  ;;  %v13601_v14 = vld [vmem:[%s10918_s30 + $0x38] sm:$0xff]  ;;  %v10529_v15 = vld [vmem:[%s14037_s1 + $0x1be0] ss:$16 sps:$4 sm:$0xff]  }
 0x348   : > { %7056 = vmatprep.subr.bf16.mxu0 %v10447_v2  ;;  %7712 = vmatprep.subr.bf16.mxu1 %v10450_v16  ;;  %v10532_v2 = vld [vmem:[%s14037_s1 + $0x1be8] ss:$16 sps:$4 sm:$0xff]   ;;  %v10538_v16 = vld [vmem:[%s14037_s1 + $0x1c04] ss:$16 sps:$4 sm:$0xff]  }
 0x349   : > { %7086 = vmatprep.mubr.bf16.mxu0 %v1351_v17  ;;  %7742 = vmatprep.mubr.bf16.mxu1 %v1351_v17  ;;  %v10541_v17 = vld [vmem:[%s14037_s1 + $0x1c0c] ss:$16 sps:$4 sm:$0xff]  }
 0x34b   : > { %7057 = vmatpush1.bf16.msra.mxu0 %v10445_v18  ;;  %7713 = vmatpush1.bf16.msra.mxu1 %v10448_v20  ;;  %v13617_v18 = vrot.slane %v13601_v14, %v10921_v49  ;;  %v10536_v20 = vld [vmem:[%s14037_s1 + $0x1c00] ss:$16 sps:$4 sm:$0xff]  }
 0x34c   : > { %7058 = vmatprep.subr.bf16.mxu0 %v10453_v21  ;;  %7714 = vmatprep.subr.bf16.mxu1 %v10456_v7  ;;  %v10539_v21 = vld [vmem:[%s14037_s1 + $0x1c08] ss:$16 sps:$4 sm:$0xff]   ;;  %v10544_v7 = vld [vmem:[%s14037_s1 + $0x1c24] ss:$16 sps:$4 sm:$0xff]  }
 0x34f   : > { %7059 = vmatpush1.bf16.msra.mxu0 %v10451_v23  ;;  %7715 = vmatpush1.bf16.msra.mxu1 %v10454_v19  ;;  %v10547_v23 = vld [vmem:[%s14037_s1 + $0x1c2c] ss:$16 sps:$4 sm:$0xff]   ;;  %v1367_v19 = vcombine.high %v13617_v18, %v13617_v18 }
 0x350   : > { %7060 = vmatprep.subr.bf16.mxu0 %v10459_v25  ;;  %7716 = vmatprep.subr.bf16.mxu1 %v10462_v12  ;;  %v10542_v25 = vld [vmem:[%s14037_s1 + $0x1c20] ss:$16 sps:$4 sm:$0xff]   ;;  %v10545_v12 = vld [vmem:[%s14037_s1 + $0x1c28] ss:$16 sps:$4 sm:$0xff]  }
 0x353   : > { %7061 = vmatpush1.bf16.msra.mxu0 %v10457_v27  ;;  %7717 = vmatpush1.bf16.msra.mxu1 %v10460_v28  ;;  %v10550_v27 = vld [vmem:[%s14037_s1 + $0x1c44] ss:$16 sps:$4 sm:$0xff]   ;;  %v10548_v28 = vld [vmem:[%s14037_s1 + $0x1c40] ss:$16 sps:$4 sm:$0xff]  }
 0x354   : > { %7062 = vmatprep.subr.bf16.mxu0 %v10465_v30  ;;  %7718 = vmatprep.subr.bf16.mxu1 %v10468_v31  ;;  %v10551_v30 = vld [vmem:[%s14037_s1 + $0x1c48] ss:$16 sps:$4 sm:$0xff]   ;;  %v10556_v31 = vld [vmem:[%s14037_s1 + $0x1c64] ss:$16 sps:$4 sm:$0xff]  }
 0x357   : > { %7063 = vmatpush1.bf16.msra.mxu0 %v10463_v22  ;;  %7719 = vmatpush1.bf16.msra.mxu1 %v10466_v32  ;;  %v10559_v22 = vld [vmem:[%s14037_s1 + $0x1c6c] ss:$16 sps:$4 sm:$0xff]   ;;  %v10554_v32 = vld [vmem:[%s14037_s1 + $0x1c60] ss:$16 sps:$4 sm:$0xff]  }
 0x358   : > { %7064 = vmatprep.subr.bf16.mxu0 %v10471_v33  ;;  %7720 = vmatprep.subr.bf16.mxu1 %v10474_v26  ;;  %v10557_v33 = vld [vmem:[%s14037_s1 + $0x1c68] ss:$16 sps:$4 sm:$0xff]   ;;  %v10562_v26 = vld [vmem:[%s14037_s1 + $0x1c84] ss:$16 sps:$4 sm:$0xff]  }
 0x35b   : > { %7065 = vmatpush1.bf16.msra.mxu0 %v10469_v36  ;;  %7721 = vmatpush1.bf16.msra.mxu1 %v10472_v24  ;;  %v10565_v36 = vld [vmem:[%s14037_s1 + $0x1c8c] ss:$16 sps:$4 sm:$0xff]   ;;  %v10560_v24 = vld [vmem:[%s14037_s1 + $0x1c80] ss:$16 sps:$4 sm:$0xff]  }
 0x35c   : > { %7066 = vmatprep.subr.bf16.mxu0 %v10477_v37  ;;  %7722 = vmatprep.subr.bf16.mxu1 %v10480_v38  ;;  %v10563_v37 = vld [vmem:[%s14037_s1 + $0x1c88] ss:$16 sps:$4 sm:$0xff]   ;;  %v10568_v38 = vld [vmem:[%s14037_s1 + $0x1ca4] ss:$16 sps:$4 sm:$0xff]  }
 0x35f   : > { %7067 = vmatpush1.bf16.msra.mxu0 %v10475_v40  ;;  %7723 = vmatpush1.bf16.msra.mxu1 %v10478_v41  ;;  %v10571_v40 = vld [vmem:[%s14037_s1 + $0x1cac] ss:$16 sps:$4 sm:$0xff]   ;;  %v10566_v41 = vld [vmem:[%s14037_s1 + $0x1ca0] ss:$16 sps:$4 sm:$0xff]  }
 0x360   : > { %7068 = vmatprep.subr.bf16.mxu0 %v10483_v29  ;;  %7724 = vmatprep.subr.bf16.mxu1 %v10486_v43  ;;  %v10569_v29 = vld [vmem:[%s14037_s1 + $0x1ca8] ss:$16 sps:$4 sm:$0xff]   ;;  %v10574_v43 = vld [vmem:[%s14037_s1 + $0x1cc4] ss:$16 sps:$4 sm:$0xff]  }
 0x363   : > { %7069 = vmatpush1.bf16.msra.mxu0 %v10481_v44  ;;  %7725 = vmatpush1.bf16.msra.mxu1 %v10484_v35  ;;  %v10577_v44 = vld [vmem:[%s14037_s1 + $0x1ccc] ss:$16 sps:$4 sm:$0xff]   ;;  %v10572_v35 = vld [vmem:[%s14037_s1 + $0x1cc0] ss:$16 sps:$4 sm:$0xff]  }
 0x364   : > { %7070 = vmatprep.subr.bf16.mxu0 %v10489_v47  ;;  %7726 = vmatprep.subr.bf16.mxu1 %v10492_v34  ;;  %v10575_v47 = vld [vmem:[%s14037_s1 + $0x1cc8] ss:$16 sps:$4 sm:$0xff]   ;;  %v10580_v34 = vld [vmem:[%s14037_s1 + $0x1ce4] ss:$16 sps:$4 sm:$0xff]  }
 0x367   : > { %7071 = vmatpush1.bf16.msra.mxu0 %v10487_v48  ;;  %7727 = vmatpush1.bf16.msra.mxu1 %v10490_v50  ;;  %v10583_v48 = vld [vmem:[%s14037_s1 + $0x1cec] ss:$16 sps:$4 sm:$0xff]   ;;  %v10578_v50 = vld [vmem:[%s14037_s1 + $0x1ce0] ss:$16 sps:$4 sm:$0xff]  }
 0x368   : > { %7072 = vmatprep.subr.bf16.mxu0 %v10495_v52  ;;  %7728 = vmatprep.subr.bf16.mxu1 %v10498_v53  ;;  %v10581_v52 = vld [vmem:[%s14037_s1 + $0x1ce8] ss:$16 sps:$4 sm:$0xff]   ;;  %v10586_v53 = vld [vmem:[%s14037_s1 + $0x1d04] ss:$16 sps:$4 sm:$0xff]  }
 0x36b   : > { %7073 = vmatpush1.bf16.msra.mxu0 %v10493_v39  ;;  %7729 = vmatpush1.bf16.msra.mxu1 %v10496_v54  ;;  %v10589_v39 = vld [vmem:[%s14037_s1 + $0x1d0c] ss:$16 sps:$4 sm:$0xff]   ;;  %v10584_v54 = vld [vmem:[%s14037_s1 + $0x1d00] ss:$16 sps:$4 sm:$0xff]  }
 0x36c   : > { %7074 = vmatprep.subr.bf16.mxu0 %v10501_v55  ;;  %7730 = vmatprep.subr.bf16.mxu1 %v10504_v46  ;;  %v10587_v55 = vld [vmem:[%s14037_s1 + $0x1d08] ss:$16 sps:$4 sm:$0xff]   ;;  %v10592_v46 = vld [vmem:[%s14037_s1 + $0x1d24] ss:$16 sps:$4 sm:$0xff]  }
 0x36f   : > { %7075 = vmatpush1.bf16.msra.mxu0 %v10499_v58  ;;  %7731 = vmatpush1.bf16.msra.mxu1 %v10502_v45  ;;  %v10595_v58 = vld [vmem:[%s14037_s1 + $0x1d2c] ss:$16 sps:$4 sm:$0xff]   ;;  %v10590_v45 = vld [vmem:[%s14037_s1 + $0x1d20] ss:$16 sps:$4 sm:$0xff]  }
 0x370   : > { %7076 = vmatprep.subr.bf16.mxu0 %v10507_v59  ;;  %7732 = vmatprep.subr.bf16.mxu1 %v10510_v60  ;;  %v10593_v59 = vld [vmem:[%s14037_s1 + $0x1d28] ss:$16 sps:$4 sm:$0xff]   ;;  %v10598_v60 = vld [vmem:[%s14037_s1 + $0x1d44] ss:$16 sps:$4 sm:$0xff]  }
 0x373   : > { %7077 = vmatpush1.bf16.msra.mxu0 %v10505_v62  ;;  %7733 = vmatpush1.bf16.msra.mxu1 %v10508_v63  ;;  %v10601_v62 = vld [vmem:[%s14037_s1 + $0x1d4c] ss:$16 sps:$4 sm:$0xff]   ;;  %v10596_v63 = vld [vmem:[%s14037_s1 + $0x1d40] ss:$16 sps:$4 sm:$0xff]  }
 0x374   : > { %7078 = vmatprep.subr.bf16.mxu0 %v10513_v51  ;;  %7734 = vmatprep.subr.bf16.mxu1 %v10516_v0  ;;  %v10599_v51 = vld [vmem:[%s14037_s1 + $0x1d48] ss:$16 sps:$4 sm:$0xff]   ;;  %v10604_v0 = vld [vmem:[%s14037_s1 + $0x1d64] ss:$16 sps:$4 sm:$0xff]  }
 0x377   : > { %7079 = vmatpush1.bf16.msra.mxu0 %v10511_v1  ;;  %7735 = vmatpush1.bf16.msra.mxu1 %v10514_v57  ;;  %v10607_v1 = vld [vmem:[%s14037_s1 + $0x1d6c] ss:$16 sps:$4 sm:$0xff]   ;;  %v10602_v57 = vld [vmem:[%s14037_s1 + $0x1d60] ss:$16 sps:$4 sm:$0xff]  }
 0x378   : > { %7080 = vmatprep.subr.bf16.mxu0 %v10519_v4  ;;  %7736 = vmatprep.subr.bf16.mxu1 %v10522_v56  ;;  %v10605_v4 = vld [vmem:[%s14037_s1 + $0x1d68] ss:$16 sps:$4 sm:$0xff]   ;;  %v10610_v56 = vld [vmem:[%s14037_s1 + $0x1d84] ss:$16 sps:$4 sm:$0xff]  }
 0x37b   : > { %7081 = vmatpush1.bf16.msra.mxu0 %v10517_v5  ;;  %7737 = vmatpush1.bf16.msra.mxu1 %v10520_v6  ;;  %v10613_v5 = vld [vmem:[%s14037_s1 + $0x1d8c] ss:$16 sps:$4 sm:$0xff]   ;;  %v10608_v6 = vld [vmem:[%s14037_s1 + $0x1d80] ss:$16 sps:$4 sm:$0xff]  }
 0x37c   : > { %7082 = vmatprep.subr.bf16.mxu0 %v10525_v8  ;;  %7738 = vmatprep.subr.bf16.mxu1 %v10528_v9  ;;  %v10611_v8 = vld [vmem:[%s14037_s1 + $0x1d88] ss:$16 sps:$4 sm:$0xff]   ;;  %v10616_v9 = vld [vmem:[%s14037_s1 + $0x1da4] ss:$16 sps:$4 sm:$0xff]  }
 0x37f   : > { %7083 = vmatpush1.bf16.msra.mxu0 %v10523_v61  ;;  %7739 = vmatpush1.bf16.msra.mxu1 %v10526_v10  ;;  %v10619_v61 = vld [vmem:[%s14037_s1 + $0x1dac] ss:$16 sps:$4 sm:$0xff]   ;;  %v10614_v10 = vld [vmem:[%s14037_s1 + $0x1da0] ss:$16 sps:$4 sm:$0xff]  }
 0x380   : > { %7084 = vmatprep.subr.bf16.mxu0 %v10531_v11  ;;  %7740 = vmatprep.subr.bf16.mxu1 %v10534_v3  ;;  %v10617_v11 = vld [vmem:[%s14037_s1 + $0x1da8] ss:$16 sps:$4 sm:$0xff]   ;;  %v10622_v3 = vld [vmem:[%s14037_s1 + $0x1dc4] ss:$16 sps:$4 sm:$0xff]  }
 0x383   : > { %7085 = vmatpush1.bf16.msra.mxu0 %v10529_v15  ;;  %7741 = vmatpush1.bf16.msra.mxu1 %v10532_v2  ;;  %v10625_v15 = vld [vmem:[%s14037_s1 + $0x1dcc] ss:$16 sps:$4 sm:$0xff]   ;;  %v10620_v2 = vld [vmem:[%s14037_s1 + $0x1dc0] ss:$16 sps:$4 sm:$0xff]  }
 0x384   : > { %7095 = vmatprep.subr.bf16.mxu0 %v10538_v16  ;;  %7751 = vmatprep.subr.bf16.mxu1 %v10541_v17  ;;  %v10623_v16 = vld [vmem:[%s14037_s1 + $0x1dc8] ss:$16 sps:$4 sm:$0xff]   ;;  %v10628_v17 = vld [vmem:[%s14037_s1 + $0x1de4] ss:$16 sps:$4 sm:$0xff]  }
 0x386   : > { %7087 = vmatmul.mubr.bf16.vlgmr.msra.gmra.mrb[0].mxu0 %v13414_v13  ;;  %7743 = vmatmul.mubr.bf16.vlgmr.msra.gmra.mrb[0].mxu1 %v13414_v13  ;;  %v10553_v13 = vld [vmem:[%s14037_s1 + $0x1c4c] ss:$16 sps:$4 sm:$0xff]  }
 0x387   : > { %7096 = vmatpush1.bf16.msra.mxu0 %v10536_v20  ;;  %7752 = vmatpush1.bf16.msra.mxu1 %v10539_v21  ;;  %v10631_v20 = vld [vmem:[%s14037_s1 + $0x1dec] ss:$16 sps:$4 sm:$0xff]   ;;  %v1352_v21 = vcombine.high %v13601_v14, %v13601_v14 }
 0x388   : > { %7097 = vmatprep.subr.bf16.mxu0 %v10544_v7  ;;  %7753 = vmatprep.subr.bf16.mxu1 %v10547_v23  ;;  %v10626_v7 = vld [vmem:[%s14037_s1 + $0x1de0] ss:$16 sps:$4 sm:$0xff]   ;;  %v10629_v23 = vld [vmem:[%s14037_s1 + $0x1de8] ss:$16 sps:$4 sm:$0xff]   ;;  %v10637_v14 = vld [vmem:[%s14037_s1 + $0x1e0c] ss:$16 sps:$4 sm:$0xff]  }
 0x389   : > { %7127 = vmatprep.mubr.bf16.mxu0 %v1367_v19  ;;  %7783 = vmatprep.mubr.bf16.mxu1 %v1367_v19  ;;  %v10634_v19 = vld [vmem:[%s14037_s1 + $0x1e04] ss:$16 sps:$4 sm:$0xff]  }
 0x38b   : > { %7098 = vmatpush1.bf16.msra.mxu0 %v10542_v25  ;;  %7754 = vmatpush1.bf16.msra.mxu1 %v10545_v12  ;;  %v13818_v25 = vrot.slane %v1352_v21, %v10921_v49  ;;  %v10632_v12 = vld [vmem:[%s14037_s1 + $0x1e00] ss:$16 sps:$4 sm:$0xff]   ;;  %v10721_v21 = vld [vmem:[%s14037_s1 + $0x1fcc] ss:$16 sps:$4 sm:$0xff]  }
 0x38c   : > { %7099 = vmatprep.subr.bf16.mxu0 %v10550_v27  ;;  %7755 = vmatprep.subr.bf16.mxu1 %v10553_v13  ;;  %v10635_v27 = vld [vmem:[%s14037_s1 + $0x1e08] ss:$16 sps:$4 sm:$0xff]   ;;  %v10640_v13 = vld [vmem:[%s14037_s1 + $0x1e24] ss:$16 sps:$4 sm:$0xff]  }
 0x38f   : > { %7100 = vmatpush1.bf16.msra.mxu0 %v10548_v28  ;;  %7756 = vmatpush1.bf16.msra.mxu1 %v10551_v30  ;;  %v10643_v28 = vld [vmem:[%s14037_s1 + $0x1e2c] ss:$16 sps:$4 sm:$0xff]   ;;  %v1368_v30 = vcombine.high %v13818_v25, %v13818_v25 }
 0x390   : > { %7101 = vmatprep.subr.bf16.mxu0 %v10556_v31  ;;  %7757 = vmatprep.subr.bf16.mxu1 %v10559_v22  ;;  %v10638_v31 = vld [vmem:[%s14037_s1 + $0x1e20] ss:$16 sps:$4 sm:$0xff]   ;;  %v10641_v22 = vld [vmem:[%s14037_s1 + $0x1e28] ss:$16 sps:$4 sm:$0xff]  }
 0x393   : > { %7102 = vmatpush1.bf16.msra.mxu0 %v10554_v32  ;;  %7758 = vmatpush1.bf16.msra.mxu1 %v10557_v33  ;;  %v10646_v32 = vld [vmem:[%s14037_s1 + $0x1e44] ss:$16 sps:$4 sm:$0xff]   ;;  %v10644_v33 = vld [vmem:[%s14037_s1 + $0x1e40] ss:$16 sps:$4 sm:$0xff]  }
 0x394   : > { %7103 = vmatprep.subr.bf16.mxu0 %v10562_v26  ;;  %7759 = vmatprep.subr.bf16.mxu1 %v10565_v36  ;;  %v10647_v26 = vld [vmem:[%s14037_s1 + $0x1e48] ss:$16 sps:$4 sm:$0xff]   ;;  %v10652_v36 = vld [vmem:[%s14037_s1 + $0x1e64] ss:$16 sps:$4 sm:$0xff]  }
 0x397   : > { %7104 = vmatpush1.bf16.msra.mxu0 %v10560_v24  ;;  %7760 = vmatpush1.bf16.msra.mxu1 %v10563_v37  ;;  %v10655_v24 = vld [vmem:[%s14037_s1 + $0x1e6c] ss:$16 sps:$4 sm:$0xff]   ;;  %v10650_v37 = vld [vmem:[%s14037_s1 + $0x1e60] ss:$16 sps:$4 sm:$0xff]  }
 0x398   : > { %7105 = vmatprep.subr.bf16.mxu0 %v10568_v38  ;;  %7761 = vmatprep.subr.bf16.mxu1 %v10571_v40  ;;  %v10653_v38 = vld [vmem:[%s14037_s1 + $0x1e68] ss:$16 sps:$4 sm:$0xff]   ;;  %v10658_v40 = vld [vmem:[%s14037_s1 + $0x1e84] ss:$16 sps:$4 sm:$0xff]  }
 0x39b   : > { %7106 = vmatpush1.bf16.msra.mxu0 %v10566_v41  ;;  %7762 = vmatpush1.bf16.msra.mxu1 %v10569_v29  ;;  %v10661_v41 = vld [vmem:[%s14037_s1 + $0x1e8c] ss:$16 sps:$4 sm:$0xff]   ;;  %v10656_v29 = vld [vmem:[%s14037_s1 + $0x1e80] ss:$16 sps:$4 sm:$0xff]  }
 0x39c   : > { %7107 = vmatprep.subr.bf16.mxu0 %v10574_v43  ;;  %7763 = vmatprep.subr.bf16.mxu1 %v10577_v44  ;;  %v10659_v43 = vld [vmem:[%s14037_s1 + $0x1e88] ss:$16 sps:$4 sm:$0xff]   ;;  %v10664_v44 = vld [vmem:[%s14037_s1 + $0x1ea4] ss:$16 sps:$4 sm:$0xff]  }
 0x39f   : > { %7108 = vmatpush1.bf16.msra.mxu0 %v10572_v35  ;;  %7764 = vmatpush1.bf16.msra.mxu1 %v10575_v47  ;;  %v10667_v35 = vld [vmem:[%s14037_s1 + $0x1eac] ss:$16 sps:$4 sm:$0xff]   ;;  %v10662_v47 = vld [vmem:[%s14037_s1 + $0x1ea0] ss:$16 sps:$4 sm:$0xff]  }
 0x3a0   : > { %7109 = vmatprep.subr.bf16.mxu0 %v10580_v34  ;;  %7765 = vmatprep.subr.bf16.mxu1 %v10583_v48  ;;  %v10665_v34 = vld [vmem:[%s14037_s1 + $0x1ea8] ss:$16 sps:$4 sm:$0xff]   ;;  %v10670_v48 = vld [vmem:[%s14037_s1 + $0x1ec4] ss:$16 sps:$4 sm:$0xff]  }
 0x3a3   : > { %7110 = vmatpush1.bf16.msra.mxu0 %v10578_v50  ;;  %7766 = vmatpush1.bf16.msra.mxu1 %v10581_v52  ;;  %v10673_v50 = vld [vmem:[%s14037_s1 + $0x1ecc] ss:$16 sps:$4 sm:$0xff]   ;;  %v10668_v52 = vld [vmem:[%s14037_s1 + $0x1ec0] ss:$16 sps:$4 sm:$0xff]  }
 0x3a4   : > { %7111 = vmatprep.subr.bf16.mxu0 %v10586_v53  ;;  %7767 = vmatprep.subr.bf16.mxu1 %v10589_v39  ;;  %v10671_v53 = vld [vmem:[%s14037_s1 + $0x1ec8] ss:$16 sps:$4 sm:$0xff]   ;;  %v10676_v39 = vld [vmem:[%s14037_s1 + $0x1ee4] ss:$16 sps:$4 sm:$0xff]  }
 0x3a7   : > { %7112 = vmatpush1.bf16.msra.mxu0 %v10584_v54  ;;  %7768 = vmatpush1.bf16.msra.mxu1 %v10587_v55  ;;  %v10679_v54 = vld [vmem:[%s14037_s1 + $0x1eec] ss:$16 sps:$4 sm:$0xff]   ;;  %v10674_v55 = vld [vmem:[%s14037_s1 + $0x1ee0] ss:$16 sps:$4 sm:$0xff]  }
 0x3a8   : > { %7113 = vmatprep.subr.bf16.mxu0 %v10592_v46  ;;  %7769 = vmatprep.subr.bf16.mxu1 %v10595_v58  ;;  %v10677_v46 = vld [vmem:[%s14037_s1 + $0x1ee8] ss:$16 sps:$4 sm:$0xff]   ;;  %v10682_v58 = vld [vmem:[%s14037_s1 + $0x1f04] ss:$16 sps:$4 sm:$0xff]  }
 0x3ab   : > { %7114 = vmatpush1.bf16.msra.mxu0 %v10590_v45  ;;  %7770 = vmatpush1.bf16.msra.mxu1 %v10593_v59  ;;  %v10685_v45 = vld [vmem:[%s14037_s1 + $0x1f0c] ss:$16 sps:$4 sm:$0xff]   ;;  %v10680_v59 = vld [vmem:[%s14037_s1 + $0x1f00] ss:$16 sps:$4 sm:$0xff]  }
 0x3ac   : > { %7115 = vmatprep.subr.bf16.mxu0 %v10598_v60  ;;  %7771 = vmatprep.subr.bf16.mxu1 %v10601_v62  ;;  %v10683_v60 = vld [vmem:[%s14037_s1 + $0x1f08] ss:$16 sps:$4 sm:$0xff]   ;;  %v10688_v62 = vld [vmem:[%s14037_s1 + $0x1f24] ss:$16 sps:$4 sm:$0xff]  }
 0x3af   : > { %7116 = vmatpush1.bf16.msra.mxu0 %v10596_v63  ;;  %7772 = vmatpush1.bf16.msra.mxu1 %v10599_v51  ;;  %v10691_v63 = vld [vmem:[%s14037_s1 + $0x1f2c] ss:$16 sps:$4 sm:$0xff]   ;;  %v10686_v51 = vld [vmem:[%s14037_s1 + $0x1f20] ss:$16 sps:$4 sm:$0xff]  }
 0x3b0   : > { %7117 = vmatprep.subr.bf16.mxu0 %v10604_v0  ;;  %7773 = vmatprep.subr.bf16.mxu1 %v10607_v1  ;;  %v10689_v0 = vld [vmem:[%s14037_s1 + $0x1f28] ss:$16 sps:$4 sm:$0xff]   ;;  %v10694_v1 = vld [vmem:[%s14037_s1 + $0x1f44] ss:$16 sps:$4 sm:$0xff]  }
 0x3b3   : > { %7118 = vmatpush1.bf16.msra.mxu0 %v10602_v57  ;;  %7774 = vmatpush1.bf16.msra.mxu1 %v10605_v4  ;;  %v10697_v57 = vld [vmem:[%s14037_s1 + $0x1f4c] ss:$16 sps:$4 sm:$0xff]   ;;  %v10692_v4 = vld [vmem:[%s14037_s1 + $0x1f40] ss:$16 sps:$4 sm:$0xff]  }
 0x3b4   : > { %7119 = vmatprep.subr.bf16.mxu0 %v10610_v56  ;;  %7775 = vmatprep.subr.bf16.mxu1 %v10613_v5  ;;  %v10695_v56 = vld [vmem:[%s14037_s1 + $0x1f48] ss:$16 sps:$4 sm:$0xff]   ;;  %v10700_v5 = vld [vmem:[%s14037_s1 + $0x1f64] ss:$16 sps:$4 sm:$0xff]  }
 0x3b7   : > { %7120 = vmatpush1.bf16.msra.mxu0 %v10608_v6  ;;  %7776 = vmatpush1.bf16.msra.mxu1 %v10611_v8  ;;  %v10703_v6 = vld [vmem:[%s14037_s1 + $0x1f6c] ss:$16 sps:$4 sm:$0xff]   ;;  %v10698_v8 = vld [vmem:[%s14037_s1 + $0x1f60] ss:$16 sps:$4 sm:$0xff]  }
 0x3b8   : > { %7121 = vmatprep.subr.bf16.mxu0 %v10616_v9  ;;  %7777 = vmatprep.subr.bf16.mxu1 %v10619_v61  ;;  %v10701_v9 = vld [vmem:[%s14037_s1 + $0x1f68] ss:$16 sps:$4 sm:$0xff]   ;;  %v10706_v61 = vld [vmem:[%s14037_s1 + $0x1f84] ss:$16 sps:$4 sm:$0xff]  }
 0x3bb   : > { %7122 = vmatpush1.bf16.msra.mxu0 %v10614_v10  ;;  %7778 = vmatpush1.bf16.msra.mxu1 %v10617_v11  ;;  %v10709_v10 = vld [vmem:[%s14037_s1 + $0x1f8c] ss:$16 sps:$4 sm:$0xff]   ;;  %v10704_v11 = vld [vmem:[%s14037_s1 + $0x1f80] ss:$16 sps:$4 sm:$0xff]  }
 0x3bc   : > { %7123 = vmatprep.subr.bf16.mxu0 %v10622_v3  ;;  %7779 = vmatprep.subr.bf16.mxu1 %v10625_v15  ;;  %v10707_v3 = vld [vmem:[%s14037_s1 + $0x1f88] ss:$16 sps:$4 sm:$0xff]   ;;  %v10712_v15 = vld [vmem:[%s14037_s1 + $0x1fa4] ss:$16 sps:$4 sm:$0xff]  }
 0x3bf   : > { %7124 = vmatpush1.bf16.msra.mxu0 %v10620_v2  ;;  %7780 = vmatpush1.bf16.msra.mxu1 %v10623_v16  ;;  %v10715_v2 = vld [vmem:[%s14037_s1 + $0x1fac] ss:$16 sps:$4 sm:$0xff]   ;;  %v10710_v16 = vld [vmem:[%s14037_s1 + $0x1fa0] ss:$16 sps:$4 sm:$0xff]  }
 0x3c0   : > { %7125 = vmatprep.subr.bf16.mxu0 %v10628_v17  ;;  %7781 = vmatprep.subr.bf16.mxu1 %v10631_v20  ;;  %v10713_v17 = vld [vmem:[%s14037_s1 + $0x1fa8] ss:$16 sps:$4 sm:$0xff]   ;;  %v10718_v20 = vld [vmem:[%s14037_s1 + $0x1fc4] ss:$16 sps:$4 sm:$0xff]  }
 0x3c3   : > { %7126 = vmatpush1.bf16.msra.mxu0 %v10626_v7  ;;  %7782 = vmatpush1.bf16.msra.mxu1 %v10629_v23  ;;  %v10716_v7 = vld [vmem:[%s14037_s1 + $0x1fc0] ss:$16 sps:$4 sm:$0xff]   ;;  %v10719_v23 = vld [vmem:[%s14037_s1 + $0x1fc8] ss:$16 sps:$4 sm:$0xff]  }
 0x3c4   : > { %7136 = vmatprep.subr.bf16.mxu0 %v10634_v19  ;;  %7792 = vmatprep.subr.bf16.mxu1 %v10637_v14  ;;  %v10724_v19 = vld [vmem:[%s14037_s1 + $0x1fe4] ss:$16 sps:$4 sm:$0xff]   ;;  %v10727_v14 = vld [vmem:[%s14037_s1 + $0x1fec] ss:$16 sps:$4 sm:$0xff]  }
 0x3c6   : > { %7128 = vmatmul.mubr.bf16.vlgmr.msra.gmra.mrb[0].mxu0 %v13617_v18  ;;  %7784 = vmatmul.mubr.bf16.vlgmr.msra.gmra.mrb[0].mxu1 %v13617_v18  ;;  %v10649_v18 = vld [vmem:[%s14037_s1 + $0x1e4c] ss:$16 sps:$4 sm:$0xff]  }
 0x3c7   : > { %7137 = vmatpush1.bf16.msra.mxu0 %v10632_v12  ;;  %7793 = vmatpush1.bf16.msra.mxu1 %v10635_v27  ;;  %v10722_v12 = vld [vmem:[%s14037_s1 + $0x1fe0] ss:$16 sps:$4 sm:$0xff]   ;;  %v10725_v27 = vld [vmem:[%s14037_s1 + $0x1fe8] ss:$16 sps:$4 sm:$0xff]  }
 0x3c8   : > { %7138 = vmatprep.subr.bf16.mxu0 %v10640_v13  ;;  %7794 = vmatprep.subr.bf16.mxu1 %v10643_v28  ;;  %v1207_v13 = vsub.s32 0, %v10897_v42  ;;  %v1215_v28 = vsub.s32 2, %v10897_v42 }
 0x3c9   : > { %7168 = vmatprep.mubr.bf16.mxu0 %v1368_v30  ;;  %7824 = vmatprep.mubr.bf16.mxu1 %v1368_v30  ;;  %v1203_v30 = vld [vmem:[%s14038_s2] sm:$0xf] }
 0x3cb   : > { %7139 = vmatpush1.bf16.msra.mxu0 %v10638_v31  ;;  %7795 = vmatpush1.bf16.msra.mxu1 %v10641_v22  ;;  %v1211_v31 = vsub.s32 1, %v10897_v42  ;;  %v1219_v22 = vsub.s32 3, %v10897_v42 }
 0x3cc   : > { %7140 = vmatprep.subr.bf16.mxu0 %v10646_v32  ;;  %7796 = vmatprep.subr.bf16.mxu1 %v10649_v18  ;;  %v1208_v32 = vrot.slane %v1203_v30, %v1207_v13  ;;  %v1216_v18 = vrot.slane %v1203_v30, %v1215_v28 }
 0x3cf   : > { %7141 = vmatpush1.bf16.msra.mxu0 %v10644_v33  ;;  %7797 = vmatpush1.bf16.msra.mxu1 %v10647_v26  ;;  %v1212_v33 = vrot.slane %v1203_v30, %v1211_v31  ;;  %v1220_v26 = vrot.slane %v1203_v30, %v1219_v22 }
 0x3d0   : > { %7142 = vmatprep.subr.bf16.mxu0 %v10652_v36  ;;  %7798 = vmatprep.subr.bf16.mxu1 %v10655_v24 }
 0x3d3   : > { %7143 = vmatpush1.bf16.msra.mxu0 %v10650_v37  ;;  %7799 = vmatpush1.bf16.msra.mxu1 %v10653_v38 }
 0x3d4   : > { %7144 = vmatprep.subr.bf16.mxu0 %v10658_v40  ;;  %7800 = vmatprep.subr.bf16.mxu1 %v10661_v41 }
 0x3d7   : > { %7145 = vmatpush1.bf16.msra.mxu0 %v10656_v29  ;;  %7801 = vmatpush1.bf16.msra.mxu1 %v10659_v43 }
 0x3d8   : > { %7146 = vmatprep.subr.bf16.mxu0 %v10664_v44  ;;  %7802 = vmatprep.subr.bf16.mxu1 %v10667_v35 }
 0x3db   : > { %7147 = vmatpush1.bf16.msra.mxu0 %v10662_v47  ;;  %7803 = vmatpush1.bf16.msra.mxu1 %v10665_v34 }
 0x3dc   : > { %7148 = vmatprep.subr.bf16.mxu0 %v10670_v48  ;;  %7804 = vmatprep.subr.bf16.mxu1 %v10673_v50 }
 0x3df   : > { %7149 = vmatpush1.bf16.msra.mxu0 %v10668_v52  ;;  %7805 = vmatpush1.bf16.msra.mxu1 %v10671_v53 }
 0x3e0   : > { %7150 = vmatprep.subr.bf16.mxu0 %v10676_v39  ;;  %7806 = vmatprep.subr.bf16.mxu1 %v10679_v54 }
 0x3e3   : > { %7151 = vmatpush1.bf16.msra.mxu0 %v10674_v55  ;;  %7807 = vmatpush1.bf16.msra.mxu1 %v10677_v46 }
 0x3e4   : > { %7152 = vmatprep.subr.bf16.mxu0 %v10682_v58  ;;  %7808 = vmatprep.subr.bf16.mxu1 %v10685_v45 }
 0x3e7   : > { %7153 = vmatpush1.bf16.msra.mxu0 %v10680_v59  ;;  %7809 = vmatpush1.bf16.msra.mxu1 %v10683_v60 }
 0x3e8   : > { %7154 = vmatprep.subr.bf16.mxu0 %v10688_v62  ;;  %7810 = vmatprep.subr.bf16.mxu1 %v10691_v63 }
 0x3eb   : > { %7155 = vmatpush1.bf16.msra.mxu0 %v10686_v51  ;;  %7811 = vmatpush1.bf16.msra.mxu1 %v10689_v0 }
 0x3ec   : > { %7156 = vmatprep.subr.bf16.mxu0 %v10694_v1  ;;  %7812 = vmatprep.subr.bf16.mxu1 %v10697_v57 }
 0x3ef   : > { %7157 = vmatpush1.bf16.msra.mxu0 %v10692_v4  ;;  %7813 = vmatpush1.bf16.msra.mxu1 %v10695_v56 }
 0x3f0   : > { %7158 = vmatprep.subr.bf16.mxu0 %v10700_v5  ;;  %7814 = vmatprep.subr.bf16.mxu1 %v10703_v6 }
 0x3f3   : > { %7159 = vmatpush1.bf16.msra.mxu0 %v10698_v8  ;;  %7815 = vmatpush1.bf16.msra.mxu1 %v10701_v9 }
 0x3f4   : > { %7160 = vmatprep.subr.bf16.mxu0 %v10706_v61  ;;  %7816 = vmatprep.subr.bf16.mxu1 %v10709_v10 }
 0x3f7   : > { %7161 = vmatpush1.bf16.msra.mxu0 %v10704_v11  ;;  %7817 = vmatpush1.bf16.msra.mxu1 %v10707_v3 }
 0x3f8   : > { %7162 = vmatprep.subr.bf16.mxu0 %v10712_v15  ;;  %7818 = vmatprep.subr.bf16.mxu1 %v10715_v2 }
 0x3fb   : > { %7163 = vmatpush1.bf16.msra.mxu0 %v10710_v16  ;;  %7819 = vmatpush1.bf16.msra.mxu1 %v10713_v17 }
 0x3fc   : > { %7164 = vmatprep.subr.bf16.mxu0 %v10718_v20  ;;  %7820 = vmatprep.subr.bf16.mxu1 %v10721_v21 }
 0x3ff   : > { %7165 = vmatpush1.bf16.msra.mxu0 %v10716_v7  ;;  %7821 = vmatpush1.bf16.msra.mxu1 %v10719_v23 }
 0x400   : > { %7166 = vmatprep.subr.bf16.mxu0 %v10724_v19  ;;  %7822 = vmatprep.subr.bf16.mxu1 %v10727_v14 }
 0x403   : > { %7167 = vmatpush1.bf16.msra.mxu0 %v10722_v12  ;;  %7823 = vmatpush1.bf16.msra.mxu1 %v10725_v27 }
 0x406   : > { %7169 = vmatmul.mubr.bf16.vlgmr.msra.gmra.mrb[0].mxu0 %v13818_v25  ;;  %7825 = vmatmul.mubr.bf16.vlgmr.msra.gmra.mrb[0].mxu1 %v13818_v25 }
 0x4d9   : > { %v7170_v36 = vpop.f32.mrb[0].mxu0  ;;  %v7826_v24 = vpop.f32.mrb[0].mxu1 }
 0x4da   : > { %v9052_v25 = vadd.f32 %v7170_v36, %v1208_v32  ;;  %v9054_v37 = vadd.f32 %v7826_v24, %v1216_v18  ;;  %v7172_v38 = vpop.f32.mrb[1].mxu0  ;;  %v7828_v40 = vpop.f32.mrb[1].mxu1 }
 0x4db   : > { %v9053_v41 = vadd.f32 %v7172_v38, %v1212_v33  ;;  %v9055_v29 = vadd.f32 %v7828_v40, %v1220_v26  ;;  %v7174_v43 = vpop.f32.mrb[2].mxu0  ;;  %v7830_v44 = vpop.f32.mrb[2].mxu1 }
 0x4dc   : > { %v7834_v35 = vsel %vm7833_vm0, %v9052_v25, 0.0  ;;  %v7848_v47 = vsel %vm7833_vm0, %v9054_v37, 0.0  ;;  %v7175_v42 = vpop.f32.mrb[3].mxu0  ;;  %v7831_v34 = vpop.f32.mrb[3].mxu1 }
 0x4dd   : > { %v7835_v48 = vrot.slane %v7834_v35, 4  ;;  %v7849_v50 = vrot.slane %v7848_v47, 4  ;;  %v7841_v52 = vsel %vm7833_vm0, %v9053_v41, 0.0  ;;  %v7855_v53 = vsel %vm7833_vm0, %v9055_v29, 0.0 }
 0x4de   : > { %v7842_v39 = vrot.slane %v7841_v52, 4  ;;  %v7856_v54 = vrot.slane %v7855_v53, 4 }
 0x4df   : > { %v7836_v55 = vadd.f32 %v7835_v48, %v7834_v35  ;;  %v7850_v46 = vadd.f32 %v7849_v50, %v7848_v47 }
 0x4e0   : > { %v7843_v58 = vadd.f32 %v7842_v39, %v7841_v52  ;;  %v7857_v45 = vadd.f32 %v7856_v54, %v7855_v53 }
 0x4e1   : > { %v7837_v59 = vrot.slane %v7836_v55, 2  ;;  %v7851_v60 = vrot.slane %v7850_v46, 2 }
 0x4e2   : > { %v7844_v62 = vrot.slane %v7843_v58, 2  ;;  %v7858_v63 = vrot.slane %v7857_v45, 2 }
 0x4e3   : > { %v7838_v51 = vadd.f32 %v7837_v59, %v7836_v55  ;;  %v7852_v0 = vadd.f32 %v7851_v60, %v7850_v46 }
 0x4e4   : > { %v7845_v1 = vadd.f32 %v7844_v62, %v7843_v58  ;;  %v7859_v57 = vadd.f32 %v7858_v63, %v7857_v45 }
 0x4e5   : > { %v7839_v4 = vrot.slane %v7838_v51, 1  ;;  %v7853_v56 = vrot.slane %v7852_v0, 1 }
 0x4e6   : > { %v7846_v5 = vrot.slane %v7845_v1, 1  ;;  %v7860_v6 = vrot.slane %v7859_v57, 1 }
 0x4e7   : > { %v7840_v8 = vadd.f32 %v7839_v4, %v7838_v51  ;;  %v7854_v9 = vadd.f32 %v7853_v56, %v7852_v0 }
 0x4e8   : > { %v7847_v61 = vadd.f32 %v7846_v5, %v7845_v1  ;;  %v7861_v10 = vadd.f32 %v7860_v6, %v7859_v57 }
 0x4e9   : > { %v7863_v11 = vmul.f32 0.25, %v7840_v8  ;;  %v7865_v3 = vmul.f32 0.25, %v7854_v9 }
 0x4ea   : > { %v7864_v15 = vmul.f32 0.25, %v7847_v61  ;;  %v7866_v2 = vmul.f32 0.25, %v7861_v10 }
 0x4eb   : > { %v7867_v16 = vsub.f32 %v9052_v25, %v7863_v11  ;;  %v7869_v17 = vsub.f32 %v9054_v37, %v7865_v3 }
 0x4ec   : > { %v7868_v20 = vsub.f32 %v9053_v41, %v7864_v15  ;;  %v7870_v21 = vsub.f32 %v9055_v29, %v7866_v2 }
 0x4ed   : > { %v7871_v7 = vmul.f32 %v7867_v16, %v7867_v16  ;;  %v7873_v23 = vmul.f32 %v7869_v17, %v7869_v17 }
 0x4ee   : > { %v7872_v19 = vmul.f32 %v7868_v20, %v7868_v20  ;;  %v7874_v14 = vmul.f32 %v7870_v21, %v7870_v21 }
 0x4ef   : > { %v7875_v12 = vsel %vm7833_vm0, %v7871_v7, 0.0  ;;  %v7889_v27 = vsel %vm7833_vm0, %v7873_v23, 0.0 }
 0x4f0   : > { %v7876_v13 = vrot.slane %v7875_v12, 4  ;;  %v7890_v28 = vrot.slane %v7889_v27, 4  ;;  %v7882_v30 = vsel %vm7833_vm0, %v7872_v19, 0.0  ;;  %v7896_v31 = vsel %vm7833_vm0, %v7874_v14, 0.0 }
 0x4f1   : > { %v7883_v22 = vrot.slane %v7882_v30, 4  ;;  %v7897_v32 = vrot.slane %v7896_v31, 4 }
 0x4f2   : > { %v7877_v18 = vadd.f32 %v7876_v13, %v7875_v12  ;;  %v7891_v33 = vadd.f32 %v7890_v28, %v7889_v27 }
 0x4f3   : > { %v7884_v26 = vadd.f32 %v7883_v22, %v7882_v30  ;;  %v7898_v36 = vadd.f32 %v7897_v32, %v7896_v31 }
 0x4f4   : > { %v7878_v24 = vrot.slane %v7877_v18, 2  ;;  %v7892_v25 = vrot.slane %v7891_v33, 2 }
 0x4f5   : > { %v7885_v37 = vrot.slane %v7884_v26, 2  ;;  %v7899_v38 = vrot.slane %v7898_v36, 2 }
 0x4f6   : > { %v7879_v40 = vadd.f32 %v7878_v24, %v7877_v18  ;;  %v7893_v41 = vadd.f32 %v7892_v25, %v7891_v33 }
 0x4f7   : > { %v7886_v29 = vadd.f32 %v7885_v37, %v7884_v26  ;;  %v7900_v43 = vadd.f32 %v7899_v38, %v7898_v36 }
 0x4f8   : > { %v7880_v44 = vrot.slane %v7879_v40, 1  ;;  %v7894_v35 = vrot.slane %v7893_v41, 1 }
 0x4f9   : > { %v7887_v47 = vrot.slane %v7886_v29, 1  ;;  %v7901_v42 = vrot.slane %v7900_v43, 1 }
 0x4fa   : > { %v7881_v34 = vadd.f32 %v7880_v44, %v7879_v40  ;;  %v7895_v48 = vadd.f32 %v7894_v35, %v7893_v41 }
 0x4fb   : > { %v7888_v50 = vadd.f32 %v7887_v47, %v7886_v29  ;;  %v7902_v52 = vadd.f32 %v7901_v42, %v7900_v43 }
 0x4fc   : > { %v7903_v53 = vmul.f32 0.25, %v7881_v34  ;;  %v7905_v39 = vmul.f32 0.25, %v7895_v48 }
 0x4fd   : > { %v7904_v54 = vmul.f32 0.25, %v7888_v50  ;;  %v7906_v55 = vmul.f32 0.25, %v7902_v52 }
 0x4fe   : > { %v7907_v46 = vadd.f32 1e-05, %v7903_v53  ;;  %v7909_v58 = vadd.f32 1e-05, %v7905_v39 }
 0x4ff   : > { %v7908_v45 = vadd.f32 1e-05, %v7904_v54  ;;  %v7910_v59 = vadd.f32 1e-05, %v7906_v55 }
 0x500   : > { %10729 = vrsqrt.f32 %v7907_v46 }
 0x501   : > { %10731 = vrsqrt.f32 %v7909_v58 }
 0x502   : > { %10733 = vrsqrt.f32 %v7908_v45 }
 0x503   : > { %10735 = vrsqrt.f32 %v7910_v59 }
 0x50a   : > { %v10730_v60 = vpop.eup %10729 }
 0x50b   : > { %v10732_v62 = vpop.eup %10731  ;;  %v7915_v63 = vmul.f32 %v10730_v60, %v7867_v16 }
 0x50c   : > { %v10734_v51 = vpop.eup %10733  ;;  %v7917_v0 = vmul.f32 %v10732_v62, %v7869_v17 }
 0x50d   : > { %v10736_v1 = vpop.eup %10735  ;;  %vm7919_vm1 = vcmp.ge.f32.partialorder %v7915_v63, 0.0  ;;  %v7923_v57 = vmul.f32 0.2, %v7915_v63  ;;  %v7916_v4 = vmul.f32 %v10734_v51, %v7868_v20 }
 0x50e   : > { %vm7921_vm2 = vcmp.ge.f32.partialorder %v7917_v0, 0.0  ;;  %v7925_v56 = vmul.f32 0.2, %v7917_v0  ;;  %v7918_v5 = vmul.f32 %v10736_v1, %v7870_v21 }
 0x50f   : > { %v7927_v6 = vsel %vm7919_vm1, %v7915_v63, %v7923_v57  ;;  %vm7920_vm3 = vcmp.ge.f32.partialorder %v7916_v4, 0.0  ;;  %v7924_v8 = vmul.f32 0.2, %v7916_v4 }
 0x510   : > { %v7929_v9 = vsel %vm7921_vm2, %v7917_v0, %v7925_v56  ;;  %vm7922_vm4 = vcmp.ge.f32.partialorder %v7918_v5, 0.0  ;;  %v7926_v61 = vmul.f32 0.2, %v7918_v5 }
 0x511   : > { %v7928_v10 = vsel %vm7920_vm3, %v7916_v4, %v7924_v8 }
 0x512   : > { %v9046_v11 = vpack.c.bf16 %v7928_v10, %v7927_v6  ;;  %v7930_v3 = vsel %vm7922_vm4, %v7918_v5, %v7926_v61 }
 0x513   : > { %v9047_v15 = vpack.c.bf16 %v7930_v3, %v7929_v9 }
 0x514   : > { %v7947_v2 = vrot.slane %v9046_v11, %v10921_v49 }
 0x515   : > { %v7954_v16 = vrot.slane %v9047_v15, %v10921_v49 }
 0x517   : > { %v7955_v17 = vcombine.low %v7947_v2, %v7954_v16 }
 0x519   : > { %7957 = vst [vmem:[%s170_s16] sm:$0xff] %v7955_v17 }
 0x51a PF: > { %s13_s12 = sadd.s32 1, %s10743_s12  }
 0x51b   : > { %p10_p4 = scmp.ge.s32.totalorder %s13_s12, 4  }
 0x51d   :  { %12 = sbr.rel (!%p10_p4) target bundleno = 1 (0x1), region = 62 }

// kernel: discriminator_forward.9
= control target key start
LH: loop header
LB: loop body
LE: loop exit
PB: predicated region body
PF: predicated region fallthrough
CT: control target
= control target key end

     0   :  { %v147_v0 = vlaneseq  ;;  %vm858_vm0 = vcmask 7168   ;;  %s1563_s1 = inlined_call_operand.vmem [shape: bf16[1,8192], index: 1, kind: input, shape index: {}]   ;;  %s1564_s0 = inlined_call_operand.vmem [shape: bf16[8,8192], index: 0, kind: input, shape index: {}]   ;;  %s1565_s2 = inlined_call_operand.vmem [shape: f32[8,1], index: 2, kind: output, shape index: {}]  }
   0x1   :  { %v112_v1 = vld [vmem:[%s1563_s1 + $0x28] sm:$0xff]  ;;  %v113_v2 = vld [vmem:[%s1563_s1 + $0x30] sm:$0xff]  ;;  %v114_v4 = vld [vmem:[%s1563_s1 + $0x38] sm:$0xff] }
   0x2   :  { %v148_v3 = vshrl.u32 %v147_v0, 7  ;;  %v893_v5 = vunpack.c.l.bf16 %v112_v1  ;;  %v895_v6 = vunpack.c.h.bf16 %v112_v1  ;;  %v897_v7 = vunpack.c.l.bf16 %v113_v2  ;;  %v948_v31 = vld [vmem:[%s1564_s0] sm:$0xff]  ;;  %v953_v32 = vld [vmem:[%s1564_s0 + $0x8] sm:$0xff]  ;;  %v966_v37 = vld [vmem:[%s1564_s0 + $0x10] sm:$0xff] }
   0x3   :  { %v907_v12 = vunpack.c.h.bf16 %v113_v2  ;;  %v909_v13 = vunpack.c.l.bf16 %v114_v4  ;;  %v911_v14 = vunpack.c.h.bf16 %v114_v4  ;;  %1583 = vst [vmem:[#allocation6_spill] sm:$0xff] %v966_v37  ;;  %v971_v38 = vld [vmem:[%s1564_s0 + $0x88] sm:$0xff]  ;;  %v111_v39 = vld [vmem:[%s1563_s1 + $0x20] sm:$0xff]  ;;  %v987_v44 = vld [vmem:[%s1564_s0 + $0x90] sm:$0xff] }
   0x4   :  { %v899_v8 = vsub.s32 0, %v148_v3  ;;  %v901_v9 = vsub.s32 2, %v148_v3  ;;  %v903_v10 = vsub.s32 4, %v148_v3  ;;  %v905_v11 = vsub.s32 6, %v148_v3  ;;  %v992_v45 = vld [vmem:[%s1564_s0 + $0x98] sm:$0xff]  ;;  %v107_v53 = vld [vmem:[%s1563_s1] sm:$0xff] }
   0x5   :  { %v1004_v54 = vunpack.c.l.bf16 %v111_v39  ;;  %v1009_v55 = vld [vmem:[%s1564_s0 + $0xa0] sm:$0xff]  ;;  %v1014_v56 = vld [vmem:[%s1564_s0 + $0xa8] sm:$0xff]  ;;  %v1019_v60 = vunpack.c.h.bf16 %v111_v39  ;;  %v1024_v61 = vld [vmem:[%s1564_s0 + $0xb0] sm:$0xff]  ;;  %v1038_v3 = vunpack.c.l.bf16 %v107_v53  ;;  %v1054_v47 = vunpack.c.h.bf16 %v107_v53 }
   0x6   :  { %1579 = vst [vmem:[#allocation2_spill] sm:$0xff] %v899_v8  ;;  %1580 = vst [vmem:[#allocation3_spill] sm:$0xff] %v901_v9  ;;  %v310_v15 = vrot.slane %v893_v5, %v899_v8  ;;  %v314_v16 = vrot.slane %v893_v5, %v901_v9  ;;  %v318_v17 = vrot.slane %v893_v5, %v903_v10  ;;  %v1029_v62 = vld [vmem:[%s1564_s0 + $0xb8] sm:$0xff]  ;;  %v41_v49 = vld [vmem:[%s1564_s0 + $0xf0] sm:$0xff] }
   0x7   :  { %1581 = vst [vmem:[#allocation4_spill] sm:$0xff] %v903_v10  ;;  %1582 = vst [vmem:[#allocation5_spill] sm:$0xff] %v905_v11  ;;  %v322_v18 = vrot.slane %v893_v5, %v905_v11  ;;  %v326_v19 = vrot.slane %v895_v6, %v899_v8  ;;  %v330_v20 = vrot.slane %v895_v6, %v901_v9 }
   0x8   :  { %v334_v21 = vrot.slane %v895_v6, %v903_v10  ;;  %v338_v22 = vrot.slane %v895_v6, %v905_v11  ;;  %v342_v23 = vrot.slane %v897_v7, %v899_v8  ;;  %v346_v24 = vrot.slane %v897_v7, %v901_v9  ;;  %1584 = vst [vmem:[#allocation7_spill] sm:$0xff] %v1004_v54 }
   0x9   :  { %v350_v25 = vrot.slane %v897_v7, %v903_v10  ;;  %v354_v26 = vrot.slane %v897_v7, %v905_v11  ;;  %v358_v27 = vrot.slane %v907_v12, %v899_v8  ;;  %v362_v28 = vrot.slane %v907_v12, %v901_v9 }
   0xa   :  { %v366_v29 = vrot.slane %v907_v12, %v903_v10  ;;  %v370_v30 = vrot.slane %v907_v12, %v905_v11  ;;  %v374_v33 = vrot.slane %v909_v13, %v899_v8  ;;  %v378_v34 = vrot.slane %v909_v13, %v901_v9 }
   0xb   :  { %v382_v35 = vrot.slane %v909_v13, %v903_v10  ;;  %v386_v36 = vrot.slane %v909_v13, %v905_v11  ;;  %v390_v40 = vrot.slane %v911_v14, %v899_v8  ;;  %v394_v41 = vrot.slane %v911_v14, %v901_v9 }
   0xc   :  { %v398_v42 = vrot.slane %v911_v14, %v903_v10  ;;  %v402_v43 = vrot.slane %v911_v14, %v905_v11  ;;  %v282_v0 = vrot.slane %v1004_v54, %v901_v9  ;;  %v286_v1 = vrot.slane %v1004_v54, %v903_v10  ;;  %v40_v14 = vld [vmem:[%s1564_s0 + $0xe8] sm:$0xff] }
   0xd   :  { %v290_v2 = vrot.slane %v1004_v54, %v905_v11  ;;  %v298_v4 = vrot.slane %v1019_v60, %v901_v9  ;;  %v302_v39 = vrot.slane %v1019_v60, %v903_v10  ;;  %v306_v51 = vrot.slane %v1019_v60, %v905_v11 }
   0xe   :  { %v1057_v46 = vrot.slane %v282_v0, %v899_v8  ;;  %v1060_v50 = vrot.slane %v286_v1, %v899_v8  ;;  %v150_v58 = vrot.slane %v1038_v3, %v899_v8  ;;  %v1080_v0 = vrot.slane %v310_v15, %v899_v8 }
   0xf   :  { %v1063_v63 = vrot.slane %v290_v2, %v899_v8  ;;  %v1068_v57 = vrot.slane %v298_v4, %v899_v8  ;;  %v1071_v52 = vrot.slane %v302_v39, %v899_v8  ;;  %v1074_v53 = vrot.slane %v306_v51, %v899_v8 }
  0x10   :  { %1585 = vst [vmem:[#allocation8_spill] sm:$0xff] %v1057_v46  ;;  %v1086_v1 = vrot.slane %v314_v16, %v899_v8  ;;  %v1092_v2 = vrot.slane %v318_v17, %v899_v8  ;;  %v1098_v51 = vrot.slane %v322_v18, %v899_v8  ;;  %v1104_v15 = vrot.slane %v326_v19, %v899_v8 }
  0x11   :  { %v1110_v16 = vrot.slane %v330_v20, %v899_v8  ;;  %v1116_v17 = vrot.slane %v334_v21, %v899_v8  ;;  %v1122_v5 = vrot.slane %v338_v22, %v899_v8  ;;  %v1128_v18 = vrot.slane %v342_v23, %v899_v8  ;;  %v1151_v21 = vld [vmem:[%s1564_s0 + $0xc0] sm:$0xff] }
  0x12   :  { %v1134_v19 = vrot.slane %v346_v24, %v899_v8  ;;  %v1140_v20 = vrot.slane %v350_v25, %v899_v8  ;;  %v1146_v6 = vrot.slane %v354_v26, %v899_v8  ;;  %v1157_v22 = vrot.slane %v358_v27, %v899_v8  ;;  %v1180_v25 = vld [vmem:[%s1564_s0 + $0xc8] sm:$0xff] }
  0x13   :  { %v1163_v23 = vrot.slane %v362_v28, %v899_v8  ;;  %v1169_v7 = vrot.slane %v366_v29, %v899_v8  ;;  %v1175_v24 = vrot.slane %v370_v30, %v899_v8  ;;  %v1186_v26 = vrot.slane %v374_v33, %v899_v8  ;;  %v1209_v29 = vld [vmem:[%s1564_s0 + $0xd0] sm:$0xff]  ;;  %v1214_v30 = vld [vmem:[%s1564_s0 + $0xd8] sm:$0xff] }
  0x14   :  { %1586 = vst [vmem:[#allocation9_spill] sm:$0xff] %v1157_v22  ;;  %v1192_v27 = vrot.slane %v378_v34, %v899_v8  ;;  %v1198_v12 = vrot.slane %v382_v35, %v899_v8  ;;  %v1204_v28 = vrot.slane %v386_v36, %v899_v8  ;;  %v1220_v33 = vrot.slane %v390_v40, %v899_v8  ;;  %v1243_v36 = vld [vmem:[%s1564_s0 + $0xe0] sm:$0xff] }
  0x15   :  { %1587 = vst [vmem:[#allocation10_spill] sm:$0xff] %v1163_v23  ;;  %1588 = vst [vmem:[#allocation11_spill] sm:$0xff] %v1169_v7  ;;  %v1226_v13 = vrot.slane %v394_v41, %v899_v8  ;;  %v1232_v34 = vrot.slane %v398_v42, %v899_v8  ;;  %v1238_v35 = vrot.slane %v402_v43, %v899_v8  ;;  %v90_v40 = vunpack.c.h.bf16 %v1029_v62 }
  0x16   :  { %1589 = vst [vmem:[#allocation12_spill] sm:$0xff] %v1175_v24  ;;  %1590 = vst [vmem:[#allocation13_spill] sm:$0xff] %v1186_v26  ;;  %v91_v41 = vunpack.c.l.bf16 %v1151_v21  ;;  %v154_v4 = vrot.slane %v1038_v3, %v901_v9  ;;  %v158_v42 = vrot.slane %v1038_v3, %v903_v10  ;;  %v92_v43 = vunpack.c.h.bf16 %v1151_v21  ;;  %v42_v21 = vld [vmem:[%s1564_s0 + $0xf8] sm:$0xff] }
  0x17   :  { %1591 = vst [vmem:[#allocation14_spill] sm:$0xff] %v1192_v27  ;;  %1592 = vst [vmem:[#allocation15_spill] sm:$0xff] %v1198_v12  ;;  %v93_v39 = vunpack.c.l.bf16 %v1180_v25  ;;  %v94_v48 = vunpack.c.h.bf16 %v1180_v25  ;;  %v294_v59 = vrot.slane %v1019_v60, %v899_v8  ;;  %v95_v46 = vunpack.c.l.bf16 %v1209_v29  ;;  %v1273_v60 = vld [vmem:[%s1563_s1 + $0x8] sm:$0xff] }
  0x18   :  { %1593 = vst [vmem:[#allocation16_spill] sm:$0xff] %v1204_v28  ;;  %1594 = vst [vmem:[#allocation17_spill] sm:$0xff] %v1220_v33  ;;  %v96_v54 = vunpack.c.h.bf16 %v1209_v29  ;;  %v97_v37 = vunpack.c.l.bf16 %v1214_v30  ;;  %v99_v25 = vunpack.c.l.bf16 %v1243_v36  ;;  %v166_v29 = vrot.slane %v1054_v47, %v899_v8 }
  0x19   :  { %1595 = vst [vmem:[#allocation18_spill] sm:$0xff] %v1226_v13  ;;  %1596 = vst [vmem:[#allocation19_spill] sm:$0xff] %v1232_v34  ;;  %v162_v34 = vrot.slane %v1038_v3, %v905_v11  ;;  %v470_v13 = vrot.slane %v150_v58, %v899_v8  ;;  %v101_v33 = vunpack.c.l.bf16 %v40_v14  ;;  %v474_v28 = vrot.slane %v154_v4, %v899_v8 }
  0x1a   :  { %1597 = vst [vmem:[#allocation20_spill] sm:$0xff] %v1238_v35  ;;  %v98_v35 = vunpack.c.h.bf16 %v1214_v30  ;;  %1598 = vst [vmem:[#allocation21_spill] sm:$0xff] %v1273_v60  ;;  %v100_v30 = vunpack.c.h.bf16 %v1243_v36  ;;  %v478_v12 = vrot.slane %v158_v42, %v899_v8  ;;  %v102_v27 = vunpack.c.h.bf16 %v40_v14 }
  0x1b   :  { %v103_v26 = vunpack.c.l.bf16 %v41_v49  ;;  %v104_v24 = vunpack.c.h.bf16 %v41_v49  ;;  %v614_v7 = vrot.slane %v294_v59, %v899_v8  ;;  %v105_v23 = vunpack.c.l.bf16 %v42_v21 }
  0x1c   :  { %v106_v22 = vunpack.c.h.bf16 %v42_v21  ;;  %v1285_v3 = vunpack.c.l.bf16 %v1273_v60  ;;  %v170_v58 = vrot.slane %v1054_v47, %v901_v9  ;;  %v174_v36 = vrot.slane %v1054_v47, %v903_v10 }
  0x1d   :  { %v482_v4 = vrot.slane %v162_v34, %v899_v8  ;;  %v486_v42 = vrot.slane %v166_v29, %v899_v8  ;;  %v1600_v14 = vunpack.c.l.bf16 %v948_v31  ;;  %v1601_v59 = vunpack.c.h.bf16 %v948_v31 }
  0x1e   :  { %1599 = vst [vmem:[#allocation22_spill] sm:$0xff] %v1285_v3  ;;  %v1602_v21 = vunpack.c.l.bf16 %v953_v32  ;;  %v1603_v3 = vunpack.c.l.bf16 %v971_v38  ;;  %v1604_v10 = vunpack.c.h.bf16 %v971_v38  ;;  %v1605_v29 = vunpack.c.l.bf16 %v987_v44 }
  0x1f   :  { %v723_v49 = vmul.f32 %v470_v13, %v1600_v14  ;;  %v724_v11 = vmul.f32 %v474_v28, %v1601_v59  ;;  %v1606_v31 = vunpack.c.h.bf16 %v987_v44  ;;  %v1610_v44 = vunpack.c.h.bf16 %v1009_v55 }
  0x20   :  { %v725_v60 = vmul.f32 %v478_v12, %v1602_v21  ;;  %v1302_v9 = vmul.f32 %v1060_v50, %v1603_v3  ;;  %v1307_v34 = vmul.f32 %v1063_v63, %v1604_v10  ;;  %v1311_v8 = vmul.f32 %v614_v7, %v1605_v29 }
  0x21   :  { %v1316_v28 = vmul.f32 %v1068_v57, %v1606_v31  ;;  %v1607_v12 = vunpack.c.l.bf16 %v992_v45  ;;  %v1608_v50 = vunpack.c.h.bf16 %v992_v45  ;;  %v1609_v10 = vunpack.c.l.bf16 %v1009_v55 }
  0x22   :  { %v1336_v57 = vmul.f32 %v1086_v1, %v1610_v44  ;;  %v1611_v7 = vunpack.c.l.bf16 %v1014_v56  ;;  %v1612_v45 = vunpack.c.h.bf16 %v1014_v56  ;;  %v1613_v3 = vunpack.c.l.bf16 %v1024_v61 }
  0x23   :  { %v1321_v13 = vmul.f32 %v1071_v52, %v1607_v12  ;;  %v1326_v38 = vmul.f32 %v1074_v53, %v1608_v50  ;;  %v1331_v63 = vmul.f32 %v1080_v0, %v1609_v10  ;;  %v1614_v55 = vunpack.c.h.bf16 %v1024_v61  ;;  %v1626_v50 = vld [vmem:[#allocation19_spill] sm:$0xff] }
  0x24   :  { %v1341_v52 = vmul.f32 %v1092_v2, %v1611_v7  ;;  %v1346_v53 = vmul.f32 %v1098_v51, %v1612_v45  ;;  %v1351_v0 = vmul.f32 %v1104_v15, %v1613_v3  ;;  %v1615_v14 = vunpack.c.l.bf16 %v1029_v62 }
  0x25   :  { %v1356_v1 = vmul.f32 %v1110_v16, %v1614_v55  ;;  %v1364_v56 = vmul.f32 %v1122_v5, %v90_v40  ;;  %v1367_v51 = vmul.f32 %v1128_v18, %v91_v41  ;;  %v1370_v59 = vmul.f32 %v1134_v19, %v92_v43  ;;  %v1616_v16 = vld [vmem:[#allocation9_spill] sm:$0xff]  ;;  %v1618_v5 = vld [vmem:[#allocation11_spill] sm:$0xff]  ;;  %v1619_v18 = vld [vmem:[#allocation12_spill] sm:$0xff] }
  0x26   :  { %v1361_v2 = vmul.f32 %v1116_v17, %v1615_v14  ;;  %v1373_v15 = vmul.f32 %v1140_v20, %v93_v39  ;;  %v1376_v61 = vmul.f32 %v1146_v6, %v94_v48  ;;  %v1379_v62 = vmul.f32 %v1616_v16, %v95_v46  ;;  %v1617_v17 = vld [vmem:[#allocation10_spill] sm:$0xff]  ;;  %v14_v19 = vld [vmem:[%s1564_s0 + $0x18] sm:$0xff]  ;;  %v1622_v46 = vld [vmem:[#allocation15_spill] sm:$0xff] }
  0x27   :  { %v1382_v21 = vmul.f32 %v1617_v17, %v96_v54  ;;  %v1385_v40 = vmul.f32 %v1618_v5, %v97_v37  ;;  %v1388_v41 = vmul.f32 %v1619_v18, %v98_v35  ;;  %v1620_v20 = vld [vmem:[#allocation13_spill] sm:$0xff]  ;;  %v1621_v48 = vld [vmem:[#allocation14_spill] sm:$0xff]  ;;  %v1400_v39 = vmul.f32 %v1622_v46, %v101_v33  ;;  %v1623_v54 = vld [vmem:[#allocation16_spill] sm:$0xff] }
  0x28   :  { %v1394_v43 = vmul.f32 %v1620_v20, %v99_v25  ;;  %v1397_v6 = vmul.f32 %v1621_v48, %v100_v30  ;;  %v1403_v29 = vmul.f32 %v1623_v54, %v102_v27  ;;  %v1624_v37 = vld [vmem:[#allocation17_spill] sm:$0xff]  ;;  %v1625_v35 = vld [vmem:[#allocation18_spill] sm:$0xff]  ;;  %v1412_v10 = vmul.f32 %v1626_v50, %v105_v23  ;;  %v1627_v25 = vld [vmem:[#allocation20_spill] sm:$0xff] }
  0x29   :  { %v1406_v31 = vmul.f32 %v1624_v37, %v103_v26  ;;  %v1409_v12 = vmul.f32 %v1625_v35, %v104_v24  ;;  %v1415_v44 = vmul.f32 %v1627_v25, %v106_v22  ;;  %v1628_v30 = vld [vmem:[#allocation5_spill] sm:$0xff]  ;;  %v1629_v33 = vld [vmem:[#allocation2_spill] sm:$0xff]  ;;  %v1630_v27 = vunpack.c.h.bf16 %v953_v32  ;;  %v1637_v37 = vld [vmem:[#allocation4_spill] sm:$0xff] }
  0x2a   :  { %v178_v7 = vrot.slane %v1054_v47, %v1628_v30  ;;  %v490_v45 = vrot.slane %v170_v58, %v1629_v33  ;;  %v787_v55 = vadd.f32 %v724_v11, %v723_v49  ;;  %v49_v26 = vunpack.c.l.bf16 %v14_v19  ;;  %v15_v24 = vld [vmem:[%s1564_s0 + $0x20] sm:$0xff]  ;;  %v1634_v58 = vld [vmem:[#allocation3_spill] sm:$0xff]  ;;  %v1636_v46 = vld [vmem:[#allocation21_spill] sm:$0xff] }
  0x2b   :  { %v726_v3 = vmul.f32 %v482_v4, %v1630_v27  ;;  %v1631_v23 = vld [vmem:[#allocation22_spill] sm:$0xff]  ;;  %v494_v22 = vrot.slane %v174_v36, %v1629_v33  ;;  %v50_v18 = vunpack.c.h.bf16 %v14_v19  ;;  %v51_v48 = vunpack.c.l.bf16 %v15_v24  ;;  %v16_v36 = vld [vmem:[%s1564_s0 + $0x28] sm:$0xff] }
  0x2c   :  { %v182_v14 = vrot.slane %v1631_v23, %v1629_v33  ;;  %v1632_v16 = vld [vmem:[#allocation6_spill] sm:$0xff]  ;;  %v788_v47 = vadd.f32 %v787_v55, %v725_v60  ;;  %v186_v32 = vrot.slane %v1631_v23, %v1634_v58  ;;  %v498_v11 = vrot.slane %v178_v7, %v1629_v33  ;;  %v17_v55 = vld [vmem:[%s1564_s0 + $0x30] sm:$0xff] }
  0x2d   :  { %v1633_v17 = vunpack.c.l.bf16 %v1632_v16  ;;  %v1635_v4 = vunpack.c.h.bf16 %v1632_v16  ;;  %v118_v54 = vunpack.c.h.bf16 %v1636_v46  ;;  %v190_v60 = vrot.slane %v1631_v23, %v1637_v37  ;;  %v109_v16 = vld [vmem:[%s1563_s1 + $0x10] sm:$0xff] }
  0x2e   :  { %v789_v20 = vadd.f32 %v788_v47, %v726_v3  ;;  %v729_v19 = vmul.f32 %v494_v22, %v49_v26  ;;  %v52_v50 = vunpack.c.h.bf16 %v15_v24  ;;  %v194_v25 = vrot.slane %v1631_v23, %v1628_v30 }
  0x2f   :  { %v727_v5 = vmul.f32 %v486_v42, %v1633_v17  ;;  %v728_v49 = vmul.f32 %v490_v45, %v1635_v4  ;;  %v502_v42 = vrot.slane %v182_v14, %v1629_v33  ;;  %v506_v7 = vrot.slane %v186_v32, %v1629_v33  ;;  %v18_v4 = vld [vmem:[%s1564_s0 + $0x38] sm:$0xff] }
  0x30   :  { %v730_v45 = vmul.f32 %v498_v11, %v50_v18  ;;  %v53_v3 = vunpack.c.l.bf16 %v16_v36  ;;  %v198_v26 = vrot.slane %v118_v54, %v1629_v33  ;;  %v510_v24 = vrot.slane %v190_v60, %v1629_v33 }
  0x31   :  { %v790_v35 = vadd.f32 %v789_v20, %v727_v5  ;;  %v731_v14 = vmul.f32 %v502_v42, %v51_v48  ;;  %v54_v23 = vunpack.c.h.bf16 %v16_v36  ;;  %v202_v17 = vrot.slane %v118_v54, %v1634_v58 }
  0x32   :  { %v514_v5 = vrot.slane %v194_v25, %v1629_v33  ;;  %v732_v47 = vmul.f32 %v506_v7, %v52_v50  ;;  %v55_v32 = vunpack.c.l.bf16 %v17_v55  ;;  %v119_v11 = vunpack.c.l.bf16 %v109_v16  ;;  %v19_v25 = vld [vmem:[%s1564_s0 + $0x40] sm:$0xff] }
  0x33   :  { %v791_v27 = vadd.f32 %v790_v35, %v728_v49  ;;  %v206_v49 = vrot.slane %v118_v54, %v1637_v37  ;;  %v518_v20 = vrot.slane %v198_v26, %v1629_v33  ;;  %v733_v46 = vmul.f32 %v510_v24, %v53_v3 }
  0x34   :  { %v56_v60 = vunpack.c.h.bf16 %v17_v55  ;;  %v210_v36 = vrot.slane %v118_v54, %v1628_v30  ;;  %v522_v42 = vrot.slane %v202_v17, %v1629_v33  ;;  %v57_v50 = vunpack.c.l.bf16 %v18_v4  ;;  %v20_v17 = vld [vmem:[%s1564_s0 + $0x48] sm:$0xff] }
  0x35   :  { %v792_v22 = vadd.f32 %v791_v27, %v729_v19  ;;  %v734_v19 = vmul.f32 %v514_v5, %v54_v23  ;;  %v214_v7 = vrot.slane %v119_v11, %v1629_v33  ;;  %v735_v27 = vmul.f32 %v518_v20, %v55_v32 }
  0x36   :  { %v58_v3 = vunpack.c.h.bf16 %v18_v4  ;;  %v218_v55 = vrot.slane %v119_v11, %v1634_v58  ;;  %v530_v54 = vrot.slane %v210_v36, %v1629_v33  ;;  %v736_v24 = vmul.f32 %v522_v42, %v56_v60  ;;  %v110_v36 = vld [vmem:[%s1563_s1 + $0x18] sm:$0xff] }
  0x37   :  { %v793_v18 = vadd.f32 %v792_v22, %v730_v45  ;;  %v526_v45 = vrot.slane %v206_v49, %v1629_v33  ;;  %v59_v22 = vunpack.c.l.bf16 %v19_v25  ;;  %v120_v23 = vunpack.c.h.bf16 %v109_v16  ;;  %v21_v16 = vld [vmem:[%s1564_s0 + $0x50] sm:$0xff] }
  0x38   :  { %v222_v5 = vrot.slane %v119_v11, %v1637_v37  ;;  %v60_v49 = vunpack.c.h.bf16 %v19_v25  ;;  %v226_v4 = vrot.slane %v119_v11, %v1628_v30  ;;  %v538_v20 = vrot.slane %v218_v55, %v1629_v33  ;;  %v22_v55 = vld [vmem:[%s1564_s0 + $0x58] sm:$0xff] }
  0x39   :  { %v794_v48 = vadd.f32 %v793_v18, %v731_v14  ;;  %v737_v18 = vmul.f32 %v526_v45, %v57_v50  ;;  %v61_v60 = vunpack.c.l.bf16 %v20_v17  ;;  %v230_v42 = vrot.slane %v120_v23, %v1629_v33 }
  0x3a   :  { %v62_v11 = vunpack.c.h.bf16 %v20_v17  ;;  %v234_v25 = vrot.slane %v120_v23, %v1634_v58  ;;  %v740_v45 = vmul.f32 %v538_v20, %v60_v49  ;;  %v242_v17 = vrot.slane %v120_v23, %v1628_v30 }
  0x3b   :  { %v795_v35 = vadd.f32 %v794_v48, %v732_v47  ;;  %v534_v47 = vrot.slane %v214_v7, %v1629_v33  ;;  %v546_v7 = vrot.slane %v226_v4, %v1629_v33  ;;  %v65_v49 = vunpack.c.l.bf16 %v22_v55  ;;  %v23_v4 = vld [vmem:[%s1564_s0 + $0x60] sm:$0xff] }
  0x3d   :  { %v796_v26 = vadd.f32 %v795_v35, %v733_v46  ;;  %v738_v46 = vmul.f32 %v530_v54, %v58_v3  ;;  %v739_v35 = vmul.f32 %v534_v47, %v59_v22  ;;  %v121_v3 = vunpack.c.l.bf16 %v110_v36 }
  0x3e   :  { %v238_v54 = vrot.slane %v120_v23, %v1637_v37  ;;  %v554_v47 = vrot.slane %v234_v25, %v1629_v33  ;;  %v562_v23 = vrot.slane %v242_v17, %v1629_v33  ;;  %v24_v25 = vld [vmem:[%s1564_s0 + $0x68] sm:$0xff] }
  0x3f   :  { %v797_v14 = vadd.f32 %v796_v26, %v734_v19  ;;  %v542_v19 = vrot.slane %v222_v5, %v1629_v33  ;;  %v63_v26 = vunpack.c.l.bf16 %v21_v16  ;;  %v64_v5 = vunpack.c.h.bf16 %v21_v16 }
  0x40   :  { %v246_v20 = vrot.slane %v121_v3, %v1629_v33  ;;  %v250_v16 = vrot.slane %v121_v3, %v1634_v58 }
  0x41   :  { %v798_v32 = vadd.f32 %v797_v14, %v735_v27  ;;  %v741_v14 = vmul.f32 %v542_v19, %v61_v60  ;;  %v66_v60 = vunpack.c.h.bf16 %v22_v55  ;;  %v744_v19 = vmul.f32 %v554_v47, %v64_v5 }
  0x42   :  { %v258_v55 = vrot.slane %v121_v3, %v1628_v30  ;;  %v69_v5 = vunpack.c.l.bf16 %v24_v25 }
  0x43   :  { %v799_v48 = vadd.f32 %v798_v32, %v736_v24  ;;  %v550_v24 = vrot.slane %v230_v42, %v1629_v33 }
  0x45   :  { %v800_v50 = vadd.f32 %v799_v48, %v737_v18  ;;  %v742_v18 = vmul.f32 %v546_v7, %v62_v11  ;;  %v743_v48 = vmul.f32 %v550_v24, %v63_v26  ;;  %v122_v11 = vunpack.c.h.bf16 %v110_v36  ;;  %v25_v36 = vld [vmem:[%s1564_s0 + $0x70] sm:$0xff] }
  0x46   :  { %v254_v7 = vrot.slane %v121_v3, %v1637_v37  ;;  %v570_v24 = vrot.slane %v250_v16, %v1629_v33  ;;  %v578_v3 = vrot.slane %v258_v55, %v1629_v33 }
  0x47   :  { %v801_v27 = vadd.f32 %v800_v50, %v738_v46  ;;  %v558_v46 = vrot.slane %v238_v54, %v1629_v33  ;;  %v67_v50 = vunpack.c.l.bf16 %v23_v4  ;;  %v68_v54 = vunpack.c.h.bf16 %v23_v4 }
  0x48   :  { %v262_v17 = vrot.slane %v122_v11, %v1629_v33  ;;  %v574_v47 = vrot.slane %v254_v7, %v1629_v33  ;;  %v266_v4 = vrot.slane %v122_v11, %v1634_v58 }
  0x49   :  { %v802_v22 = vadd.f32 %v801_v27, %v739_v35  ;;  %v745_v27 = vmul.f32 %v558_v46, %v65_v49  ;;  %v70_v49 = vunpack.c.h.bf16 %v24_v25 }
  0x4a   :  { %v582_v16 = vrot.slane %v262_v17, %v1629_v33  ;;  %v586_v58 = vrot.slane %v266_v4, %v1629_v33 }
  0x4b   :  { %v803_v32 = vadd.f32 %v802_v22, %v740_v45  ;;  %v566_v45 = vrot.slane %v246_v20, %v1629_v33  ;;  %v748_v20 = vmul.f32 %v570_v24, %v68_v54  ;;  %v750_v25 = vmul.f32 %v578_v3, %v70_v49 }
  0x4d   :  { %v804_v42 = vadd.f32 %v803_v32, %v741_v14  ;;  %v746_v14 = vmul.f32 %v562_v23, %v66_v60  ;;  %v270_v60 = vrot.slane %v122_v11, %v1637_v37  ;;  %v749_v23 = vmul.f32 %v574_v47, %v69_v5  ;;  %v27_v37 = vld [vmem:[%s1564_s0 + $0x80] sm:$0xff] }
  0x4e   :  { %v75_v5 = vunpack.c.l.bf16 %v27_v37 }
  0x4f   :  { %v805_v35 = vadd.f32 %v804_v42, %v742_v18  ;;  %v747_v18 = vmul.f32 %v566_v45, %v67_v50  ;;  %v26_v42 = vld [vmem:[%s1564_s0 + $0x78] sm:$0xff]  ;;  %v274_v50 = vrot.slane %v122_v11, %v1628_v30  ;;  %v590_v54 = vrot.slane %v270_v60, %v1629_v33 }
  0x50   :  { %v73_v45 = vunpack.c.l.bf16 %v26_v42 }
  0x51   :  { %v806_v26 = vadd.f32 %v805_v35, %v743_v48  ;;  %v71_v48 = vunpack.c.l.bf16 %v25_v36  ;;  %v72_v35 = vunpack.c.h.bf16 %v25_v36 }
  0x52   :  { %v753_v17 = vmul.f32 %v590_v54, %v73_v45 }
  0x53   :  { %v807_v22 = vadd.f32 %v806_v26, %v744_v19  ;;  %v751_v55 = vmul.f32 %v582_v16, %v71_v48  ;;  %v752_v30 = vmul.f32 %v586_v58, %v72_v35 }
  0x55   :  { %v808_v32 = vadd.f32 %v807_v22, %v745_v27  ;;  %v1638_v27 = vld [vmem:[#allocation7_spill] sm:$0xff]  ;;  %v594_v22 = vrot.slane %v274_v50, %v1629_v33 }
  0x56   :  { %v278_v26 = vrot.slane %v1638_v27, %v1629_v33 }
  0x57   :  { %v809_v46 = vadd.f32 %v808_v32, %v746_v14  ;;  %v74_v14 = vunpack.c.h.bf16 %v26_v42 }
  0x58   :  { %v598_v36 = vrot.slane %v278_v26, %v1629_v33 }
  0x59   :  { %v810_v19 = vadd.f32 %v809_v46, %v747_v18  ;;  %v76_v18 = vunpack.c.h.bf16 %v27_v37  ;;  %v754_v32 = vmul.f32 %v594_v22, %v74_v14 }
  0x5a   :  { %v755_v4 = vmul.f32 %v598_v36, %v75_v5 }
  0x5b   :  { %v811_v7 = vadd.f32 %v810_v19, %v748_v20  ;;  %v1639_v20 = vld [vmem:[#allocation8_spill] sm:$0xff] }
  0x5c   :  { %v756_v46 = vmul.f32 %v1639_v20, %v76_v18 }
  0x5d   :  { %v812_v24 = vadd.f32 %v811_v7, %v749_v23 }
  0x5f   :  { %v813_v11 = vadd.f32 %v812_v24, %v750_v25 }
  0x61   :  { %v814_v47 = vadd.f32 %v813_v11, %v751_v55 }
  0x63   :  { %v815_v49 = vadd.f32 %v814_v47, %v752_v30 }
  0x65   :  { %v816_v3 = vadd.f32 %v815_v49, %v753_v17 }
  0x67   :  { %v817_v48 = vadd.f32 %v816_v3, %v754_v32 }
  0x69   :  { %v818_v60 = vadd.f32 %v817_v48, %v755_v4 }
  0x6b   :  { %v819_v16 = vadd.f32 %v818_v60, %v756_v46 }
  0x6d   :  { %v820_v42 = vadd.f32 %v819_v16, %v1302_v9 }
  0x6f   :  { %v821_v23 = vadd.f32 %v820_v42, %v1307_v34 }
  0x71   :  { %v822_v19 = vadd.f32 %v821_v23, %v1311_v8 }
  0x73   :  { %v823_v33 = vadd.f32 %v822_v19, %v1316_v28 }
  0x75   :  { %v824_v35 = vadd.f32 %v823_v33, %v1321_v13 }
  0x77   :  { %v825_v50 = vadd.f32 %v824_v35, %v1326_v38 }
  0x79   :  { %v826_v58 = vadd.f32 %v825_v50, %v1331_v63 }
  0x7b   :  { %v827_v25 = vadd.f32 %v826_v58, %v1336_v57 }
  0x7d   :  { %v828_v7 = vadd.f32 %v827_v25, %v1341_v52 }
  0x7f   :  { %v829_v45 = vadd.f32 %v828_v7, %v1346_v53 }
  0x81   :  { %v830_v9 = vadd.f32 %v829_v45, %v1351_v0 }
  0x83   :  { %v831_v34 = vadd.f32 %v830_v9, %v1356_v1 }
  0x85   :  { %v832_v8 = vadd.f32 %v831_v34, %v1361_v2 }
  0x87   :  { %v833_v28 = vadd.f32 %v832_v8, %v1364_v56 }
  0x89   :  { %v834_v13 = vadd.f32 %v833_v28, %v1367_v51 }
  0x8b   :  { %v835_v38 = vadd.f32 %v834_v13, %v1370_v59 }
  0x8d   :  { %v836_v63 = vadd.f32 %v835_v38, %v1373_v15 }
  0x8f   :  { %v837_v57 = vadd.f32 %v836_v63, %v1376_v61 }
  0x91   :  { %v838_v52 = vadd.f32 %v837_v57, %v1379_v62 }
  0x93   :  { %v839_v53 = vadd.f32 %v838_v52, %v1382_v21 }
  0x95   :  { %v840_v0 = vadd.f32 %v839_v53, %v1385_v40 }
  0x97   :  { %v841_v1 = vadd.f32 %v840_v0, %v1388_v41 }
  0x99   :  { %v842_v2 = vadd.f32 %v841_v1, %v1394_v43 }
  0x9b   :  { %v843_v56 = vadd.f32 %v842_v2, %v1397_v6 }
  0x9d   :  { %v844_v51 = vadd.f32 %v843_v56, %v1400_v39 }
  0x9f   :  { %v845_v59 = vadd.f32 %v844_v51, %v1403_v29 }
  0xa1   :  { %v846_v15 = vadd.f32 %v845_v59, %v1406_v31 }
  0xa3   :  { %v847_v61 = vadd.f32 %v846_v15, %v1409_v12 }
  0xa5   :  { %v848_v62 = vadd.f32 %v847_v61, %v1412_v10 }
  0xa7   :  { %v849_v21 = vadd.f32 %v848_v62, %v1415_v44 }
  0xa9   :  { %850 = vadd.xlane.f32.xlu0 %v849_v21 }
 0x136   :  { %v851_v40 = vpop.xlane.xlu0 %850 }
 0x137   :  { %v864_v27 = vmul.f32 -1.442695, %v851_v40 }
 0x139   :  { %865 = vpow2.f32 %v864_v27 }
 0x143   :  { %v866_v41 = vpop.eup %865 }
 0x144   :  { %v855_v43 = vadd.f32 1.0, %v866_v41 }
 0x146   :  { %867 = vrcp.f32 %v855_v43 }
 0x150   :  { %v868_v6 = vpop.eup %867 }
 0x151   :  { %859 = vst.msk [vmem:[%s1565_s2] sm:$0xff] %vm858_vm0, %v868_v6 }

</bundles_post_ra>
